<compile_context>
chip_gen: v7x
topology: tpu7x:2x2x1
jax: 0.10.0
libtpu: 0.0.40
codegen_flags: <defaults>
</compile_context>

<pallas_src>
import jax
import jax.numpy as jnp
from jax.experimental import pallas as pl
from jax.experimental.pallas import tpu as pltpu


def _round_up(x, m):
    return ((x + m - 1) // m) * m


def cas_kernel(xcol_ref, w1_ref, b1_ref, w2_ref, out_ref, feat_ref):
    # xcol_ref: (tile_m, K_pad)   bf16  im2col rows (B*T flattened into M)
    # w1_ref  : (K_pad, Cout)     bf16  conv1 weight, tap-major, K zero-padded
    # b1_ref  : (1, Cout)         f32   conv1 bias
    # w2_ref  : (Cout, NC_pad)    bf16  1x1 classifier weight, lane-padded to 128
    # out_ref : (tile_m, NC_pad)  f32   logits (lane-dense)
    # feat_ref: (tile_m, Cout)    bf16  ReLU features (dominant HBM writeback)

    # k=3 conv (pad=1) as a single im2col matmul; f32 accumulation on the MXU.
    acc = jnp.dot(xcol_ref[...], w1_ref[...], preferred_element_type=jnp.float32)
    acc = acc + b1_ref[...]                       # (1, Cout) broadcast over rows

    feat = jnp.maximum(acc, 0.0)                  # ReLU
    feat_ref[...] = feat.astype(feat_ref.dtype)

    # 1x1 conv (no bias); dropout is identity at inference.
    # Lane-dense (tile_m, 128) store; real classes are the first NC columns.
    out_ref[...] = jnp.dot(
        feat.astype(w2_ref.dtype), w2_ref[...],
        preferred_element_type=jnp.float32,
    ).astype(out_ref.dtype)


def cas_module_forward(x, w1, b1, w2, *, tile_m=1024,
                       compute_dtype=jnp.bfloat16,
                       feat_dtype=jnp.bfloat16):
    """x: (B, T, Cin) f32. w1: (2048, Cin, 3) torch layout. b1: (2048,).
    w2: (NC, 2048, 1) torch layout.
    Returns (out (B,T,NC) f32, features (B,T,2048) feat_dtype).
    Set feat_dtype=jnp.float32 for exact-PyTorch feature dtype (costs ~2x HBM
    traffic, since the feature writeback dominates the kernel)."""
    B, T, Cin = x.shape
    Cout = w1.shape[0]
    NC = w2.shape[0]
    M = B * T

    # ---- glue (plain XLA ops outside the kernel) ----
    # im2col for kernel_size=3, padding=1: for output position t the 3 taps are
    # xpad[t+0], xpad[t+1], xpad[t+2], concatenated along channels (tap-major).
    xpad = jnp.pad(x, ((0, 0), (1, 1), (0, 0)))                  # (B, T+2, Cin)
    xcol = jnp.concatenate(
        [xpad[:, 0:T, :], xpad[:, 1:T + 1, :], xpad[:, 2:T + 2, :]], axis=-1
    ).reshape(M, 3 * Cin)                                        # (B*T, 3*Cin)

    K = 3 * Cin
    K_pad = _round_up(K, 128)                    # unmasked K lanes on the MXU

    # tile_m: multiple of 256 (bf16 sublane packing + full MXU M fill); keep
    # >=2 grid steps when possible so the "parallel" axis splits across v7x's
    # two TensorCores.
    tile_m = max(256, min(tile_m, _round_up(pl.cdiv(M, 2), 256)))
    M_pad = _round_up(M, tile_m)
    grid_m = M_pad // tile_m

    xcol = jnp.pad(xcol, ((0, M_pad - M), (0, K_pad - K)))

    # Weights: torch Conv1d layouts -> matmul form.
    # w1 (Cout, Cin, 3) -> (3, Cin, Cout) -> (3*Cin, Cout), matching xcol
    # tap-major column order; K zero-padded to K_pad.
    w1_flat = jnp.transpose(w1, (2, 1, 0)).reshape(K, Cout)
    w1_flat = jnp.pad(w1_flat, ((0, K_pad - K), (0, 0)))
    b1_row = b1.reshape(1, Cout).astype(jnp.float32)
    # w2 (NC, Cout, 1) -> (Cout, NC), zero-padded to a lane-dense 128 columns.
    NC_pad = _round_up(NC, 128)
    w2_mat = jnp.transpose(w2[:, :, 0], (1, 0))
    w2_mat = jnp.pad(w2_mat, ((0, 0), (0, NC_pad - NC)))

    # bf16 operands, f32 accumulation inside the kernel.
    xcol = xcol.astype(compute_dtype)
    w1_flat = w1_flat.astype(compute_dtype)
    w2_mat = w2_mat.astype(compute_dtype)

    out_pad, feat_pad = pl.pallas_call(
        cas_kernel,
        out_shape=(
            jax.ShapeDtypeStruct((M_pad, NC_pad), jnp.float32),
            jax.ShapeDtypeStruct((M_pad, Cout), feat_dtype),
        ),
        grid_spec=pltpu.PrefetchScalarGridSpec(
            num_scalar_prefetch=0,
            grid=(grid_m,),
            in_specs=[
                pl.BlockSpec((tile_m, K_pad), lambda i: (i, 0)),
                pl.BlockSpec((K_pad, Cout), lambda i: (0, 0)),
                pl.BlockSpec((1, Cout), lambda i: (0, 0)),
                pl.BlockSpec((Cout, NC_pad), lambda i: (0, 0)),
            ],
            out_specs=[
                pl.BlockSpec((tile_m, NC_pad), lambda i: (i, 0)),
                pl.BlockSpec((tile_m, Cout), lambda i: (i, 0)),
            ],
        ),
        compiler_params=pltpu.CompilerParams(
            dimension_semantics=("parallel",),
        ),
    )(xcol, w1_flat, b1_row, w2_mat)

    # Padded rows of out_pad/feat_pad contain ReLU(b1)-derived garbage; the
    # [:M] slice below is what makes the result correct -- never consume the
    # padded buffers directly.
    out = out_pad[:M, :NC].reshape(B, T, NC).astype(x.dtype)
    feat = feat_pad[:M, :].reshape(B, T, Cout)
    return out, feat


def reference_forward(x, w1, b1, w2):
    """Pure-jnp f32 reference (true module math, no Pallas, no bf16)."""
    B, T, Cin = x.shape
    xpad = jnp.pad(x, ((0, 0), (1, 1), (0, 0)))
    w1_taps = jnp.transpose(w1, (2, 1, 0))                       # (3, Cin, Cout)
    acc = b1[None, None, :]
    for k in range(3):
        acc = acc + jnp.einsum("btc,cd->btd", xpad[:, k:k + T, :], w1_taps[k])
    feat = jnp.maximum(acc, 0.0)
    out = jnp.einsum("btd,dn->btn", feat, jnp.transpose(w2[:, :, 0], (1, 0)))
    return out, feat


if __name__ == "__main__":
    # Small shapes consistent with the module: len_feature=32, num_classes=4
    B, T, LEN_FEATURE, NUM_CLASSES, COUT = 2, 8, 32, 4, 2048

    key = jax.random.PRNGKey(0)
    kx, kw1, kb1, kw2 = jax.random.split(key, 4)

    x = jax.random.normal(kx, (B, T, LEN_FEATURE), dtype=jnp.float32)
    # Deterministic synthetic parameters (torch Conv1d weight layouts).
    w1 = 0.05 * jax.random.normal(kw1, (COUT, LEN_FEATURE, 3), dtype=jnp.float32)
    b1 = 0.01 * jax.random.normal(kb1, (COUT,), dtype=jnp.float32)
    w2 = 0.05 * jax.random.normal(kw2, (NUM_CLASSES, COUT, 1), dtype=jnp.float32)

    out, feat = cas_module_forward(x, w1, b1, w2)
    out = jax.block_until_ready(out)
    feat = jax.block_until_ready(feat)

    out_ref, feat_ref = reference_forward(x, w1, b1, w2)
    assert out.shape == (B, T, NUM_CLASSES)
    assert feat.shape == (B, T, COUT)
    # Kernel uses bf16 MXU operands with f32 accumulation, and stores features
    # in bf16 by default; compare against the full-f32 reference at
    # bf16-appropriate tolerances.
    assert jnp.allclose(feat.astype(jnp.float32), feat_ref, rtol=5e-2, atol=5e-2)
    assert jnp.allclose(out, out_ref, rtol=5e-2, atol=5e-2)

    print("KERNEL_OK")
</pallas_src>

<mosaic_0001>
module attributes {stable_mosaic.version = 11 : i64} {
  func.func @cas_kernel(%arg0: i32, %arg1: memref<256x128xbf16, #tpu.memory_space<vmem>>, %arg2: memref<128x2048xbf16, #tpu.memory_space<vmem>>, %arg3: memref<1x2048xf32, #tpu.memory_space<vmem>>, %arg4: memref<2048x128xbf16, #tpu.memory_space<vmem>>, %arg5: memref<256x128xf32, #tpu.memory_space<vmem>>, %arg6: memref<256x2048xbf16, #tpu.memory_space<vmem>>) attributes {dimension_semantics = [#tpu.dimension_semantics<parallel>], iteration_bounds = array<i64: 1>, scalar_prefetch = 0 : i64, scratch_operands = 0 : i64, tpu.core_type = #tpu.core_type<tc>, window_params = [{transform_indices = @transform_0, window_bounds = array<i64: 256, 128>}, {pipeline_mode = #tpu.pipeline_mode<synchronous>, transform_indices = @transform_1, window_bounds = array<i64: 128, 2048>}, {pipeline_mode = #tpu.pipeline_mode<synchronous>, transform_indices = @transform_2, window_bounds = array<i64: 1, 2048>}, {pipeline_mode = #tpu.pipeline_mode<synchronous>, transform_indices = @transform_3, window_bounds = array<i64: 2048, 128>}, {transform_indices = @transform_4, window_bounds = array<i64: 256, 128>}, {transform_indices = @transform_5, window_bounds = array<i64: 256, 2048>}]} {
    %c0 = arith.constant 0 : index
    %c0_0 = arith.constant 0 : index
    %0 = vector.load %arg1[%c0, %c0_0] : memref<256x128xbf16, #tpu.memory_space<vmem>>, vector<256x128xbf16>
    %c0_1 = arith.constant 0 : index
    %c0_2 = arith.constant 0 : index
    %1 = vector.load %arg2[%c0_1, %c0_2] : memref<128x2048xbf16, #tpu.memory_space<vmem>>, vector<128x2048xbf16>
    %cst = arith.constant dense<0.000000e+00> : vector<256x2048xf32>
    %2 = tpu.matmul %0, %1, %cst {dimension_numbers = #tpu.dot_dimension_numbers<[1], [0], [0], [1], [0, 0, 1, 1], [], []>} : vector<256x128xbf16>, vector<128x2048xbf16>, vector<256x2048xf32> -> vector<256x2048xf32>
    %c0_3 = arith.constant 0 : index
    %c0_4 = arith.constant 0 : index
    %3 = vector.load %arg3[%c0_3, %c0_4] : memref<1x2048xf32, #tpu.memory_space<vmem>>, vector<1x2048xf32>
    %4 = vector.broadcast %3 : vector<1x2048xf32> to vector<256x2048xf32>
    %5 = arith.addf %2, %4 : vector<256x2048xf32>
    %cst_5 = arith.constant 0.000000e+00 : f32
    %6 = vector.broadcast %cst_5 : f32 to vector<256x2048xf32>
    %7 = arith.maximumf %5, %6 : vector<256x2048xf32>
    %8 = arith.truncf %7 : vector<256x2048xf32> to vector<256x2048xbf16>
    %c0_6 = arith.constant 0 : index
    %c0_7 = arith.constant 0 : index
    %9 = vector.load %arg6[%c0_6, %c0_7] : memref<256x2048xbf16, #tpu.memory_space<vmem>>, vector<256x2048xbf16>
    tpu.vector_store %arg6[%c0_6, %c0_7], %8 {strides = array<i32>} : memref<256x2048xbf16, #tpu.memory_space<vmem>>, vector<256x2048xbf16>,
    %10 = arith.truncf %7 : vector<256x2048xf32> to vector<256x2048xbf16>
    %c0_8 = arith.constant 0 : index
    %c0_9 = arith.constant 0 : index
    %11 = vector.load %arg4[%c0_8, %c0_9] : memref<2048x128xbf16, #tpu.memory_space<vmem>>, vector<2048x128xbf16>
    %cst_10 = arith.constant dense<0.000000e+00> : vector<256x128xf32>
    %12 = tpu.matmul %10, %11, %cst_10 {dimension_numbers = #tpu.dot_dimension_numbers<[1], [0], [0], [1], [0, 0, 1, 1], [], []>} : vector<256x2048xbf16>, vector<2048x128xbf16>, vector<256x128xf32> -> vector<256x128xf32>
    %c0_11 = arith.constant 0 : index
    %c0_12 = arith.constant 0 : index
    %13 = vector.load %arg5[%c0_11, %c0_12] : memref<256x128xf32, #tpu.memory_space<vmem>>, vector<256x128xf32>
    tpu.vector_store %arg5[%c0_11, %c0_12], %12 {strides = array<i32>} : memref<256x128xf32, #tpu.memory_space<vmem>>, vector<256x128xf32>,
    return
  }
  func.func @transform_0(%arg0: i32) -> (i32, i32) {
    %c0_i32 = arith.constant 0 : i32
    %c0_i32_0 = arith.constant 0 : i32
    return %arg0, %c0_i32 : i32, i32
  }
  func.func @transform_1(%arg0: i32) -> (i32, i32) {
    %c0_i32 = arith.constant 0 : i32
    %c0_i32_0 = arith.constant 0 : i32
    %c0_i32_1 = arith.constant 0 : i32
    return %c0_i32, %c0_i32_0 : i32, i32
  }
  func.func @transform_2(%arg0: i32) -> (i32, i32) {
    %c0_i32 = arith.constant 0 : i32
    %c0_i32_0 = arith.constant 0 : i32
    %c0_i32_1 = arith.constant 0 : i32
    return %c0_i32, %c0_i32_0 : i32, i32
  }
  func.func @transform_3(%arg0: i32) -> (i32, i32) {
    %c0_i32 = arith.constant 0 : i32
    %c0_i32_0 = arith.constant 0 : i32
    %c0_i32_1 = arith.constant 0 : i32
    return %c0_i32, %c0_i32_0 : i32, i32
  }
  func.func @transform_4(%arg0: i32) -> (i32, i32) {
    %c0_i32 = arith.constant 0 : i32
    %c0_i32_0 = arith.constant 0 : i32
    return %arg0, %c0_i32 : i32, i32
  }
  func.func @transform_5(%arg0: i32) -> (i32, i32) {
    %c0_i32 = arith.constant 0 : i32
    %c0_i32_0 = arith.constant 0 : i32
    return %arg0, %c0_i32 : i32, i32
  }
}

</mosaic_0001>

<bundles_post_ra>
// kernel: tpu_custom_call.1
= control target key start
LH: loop header
LB: loop body
LE: loop exit
PB: predicated region body
PF: predicated region fallthrough
CT: control target
= control target key end

     0   :  { %11 = vsyncpa [#allocation3], 0  ;;  %s11463_s0 = inlined_call_operand.hbm [shape: bf16[256,128], index: 0, kind: input, shape index: {}]   ;;  %s11464_s1 = inlined_call_operand.hbm [shape: bf16[128,2048], index: 1, kind: input, shape index: {}]   ;;  %s11465_s2 = inlined_call_operand.hbm [shape: f32[1,2048], index: 2, kind: input, shape index: {}]   ;;  %s11466_s3 = inlined_call_operand.hbm [shape: bf16[2048,128], index: 3, kind: input, shape index: {}]   ;;  %s11467_s4 = inlined_call_operand.hbm [shape: f32[256,128], index: 4, kind: output, shape index: {0}]   ;;  %s11468_s5 = inlined_call_operand.hbm [shape: bf16[256,2048], index: 5, kind: output, shape index: {1}]  }
   0x1   :  { %12 = vsyncpa [#allocation6], 0 }
   0x2   :  { %13 = vsyncpa [#allocation9], 0 }
   0x3   :  { %14 = vsyncpa [#allocation4], 0 }
   0x4   :  { %15 = vsyncpa [#allocation12], 0  ;;  %s9294_s18 = smov [#allocation5]   ;;  %s9152_s22 = scalar_lea.hbm %s11464_s1, 16384 }
   0x5   :  { %s33_s19 = sshll.u32 %s9294_s18, 4  ;;  %p9153_p0 = scmp.ne.s32.totalorder %s11464_s1, %s9152_s22  ;;  %s34_s19 = int_to_ptr.vmem [resolvable:$true] %s33_s19 }
   0x6   :  { %p9156_p1 = scmp.lt.u32.totalorder %s9152_s22, %s11464_s1 }
   0x8   :  { %p9158_p2 = pnand %p9156_p1, %p9153_p0 }
   0xa   :  { %9161 = shalt.err (!%p9158_p2)
}
   0xb   :  { %s9162_s27 = scalar_lea.vmem %s34_s19, 16384  ;;  %p9167_p4 = scmp.lt.s32.totalorder %s34_s19, %s34_s19 }
   0xc   :  { %p9163_p3 = scmp.ne.s32.totalorder %s34_s19, %s9162_s27  ;;  %p9168_p5 = scmp.lt.s32.totalorder %s9162_s27, %s9162_s27 }
   0xe   :  { %p9169_p6 = por %p9168_p5, %p9167_p4 }
  0x10   :  { %p9170_p7 = pnand %p9169_p6, %p9163_p3 }
  0x12   :  { %9173 = shalt.err (!%p9170_p7)
}
  0x13   :  { %s9295_s28 = smov 1024   ;;  %s9296_s29 = smov 64  }
  0x14   :  { %39 = dma.hbm_to_vmem [thread:$0]  %s11464_s1, 16384, %s34_s19, [#allocation6], %s9295_s28, %s9295_s28, %s9296_s29  }
  0x15   :  { %s9297_s7 = smov [#allocation2]   ;;  %s9174_s11 = scalar_lea.hbm %s11463_s0, 2048 }
  0x16   :  { %s21_s8 = sshll.u32 %s9297_s7, 4  ;;  %p9175_p8 = scmp.ne.s32.totalorder %s11463_s0, %s9174_s11  ;;  %s22_s8 = int_to_ptr.vmem [resolvable:$true] %s21_s8 }
  0x17   :  { %p9178_p9 = scmp.lt.u32.totalorder %s9174_s11, %s11463_s0 }
  0x19   :  { %p9180_p10 = pnand %p9178_p9, %p9175_p8 }
  0x1b   :  { %9183 = shalt.err (!%p9180_p10)
}
  0x1c   :  { %s9184_s16 = scalar_lea.vmem %s22_s8, 2048  ;;  %p9189_p12 = scmp.lt.s32.totalorder %s22_s8, %s22_s8 }
  0x1d   :  { %p9185_p11 = scmp.ne.s32.totalorder %s22_s8, %s9184_s16  ;;  %p9190_p13 = scmp.lt.s32.totalorder %s9184_s16, %s9184_s16 }
  0x1f   :  { %p9191_p0 = por %p9190_p13, %p9189_p12 }
  0x21   :  { %p9192_p1 = pnand %p9191_p0, %p9185_p11 }
  0x23   :  { %9195 = shalt.err (!%p9192_p1)
}
  0x24   :  { %s9298_s1 = smov 4   ;;  %s9299_s19 = smov [#allocation7]  }
  0x25   :  { %27 = dma.hbm_to_vmem [thread:$0]  %s11463_s0, 2048, %s22_s8, [#allocation3], %s9296_s29, %s9296_s29, %s9298_s1  }
  0x26   :  { %s46_s20 = sshll.u32 %s9299_s19, 4  ;;  %s9300_s21 = smov [#allocation8]   ;;  %s47_s20 = int_to_ptr.vmem [resolvable:$true] %s46_s20 }
  0x27   :  { %s55_s22 = sshll.u32 %s9300_s21, 4  ;;  %s9196_s25 = scalar_lea.hbm %s11465_s2, 256  ;;  %s56_s22 = int_to_ptr.vmem [resolvable:$true] %s55_s22 }
  0x28   :  { %p9197_p2 = scmp.ne.s32.totalorder %s11465_s2, %s9196_s25  ;;  %p9200_p3 = scmp.lt.u32.totalorder %s9196_s25, %s11465_s2 }
  0x2a   :  { %p9202_p4 = pnand %p9200_p3, %p9197_p2 }
  0x2c   :  { %9205 = shalt.err (!%p9202_p4)
}
  0x2d   :  { %s9206_s0 = scalar_lea.vmem %s47_s20, 256  ;;  %p9211_p6 = scmp.lt.s32.totalorder %s47_s20, %s47_s20 }
  0x2e   :  { %p9207_p5 = scmp.ne.s32.totalorder %s47_s20, %s9206_s0  ;;  %p9212_p7 = scmp.lt.s32.totalorder %s9206_s0, %s9206_s0 }
  0x30   :  { %p9213_p8 = por %p9212_p7, %p9211_p6 }
  0x32   :  { %p9214_p9 = pnand %p9213_p8, %p9207_p5 }
  0x34   :  { %9217 = shalt.err (!%p9214_p9)
}
  0x35   :  { %49 = dma.hbm_to_vmem [thread:$0]  %s11465_s2, 256, %s47_s20, [#allocation6]  }
  0x36   :  { %s9218_s11 = scalar_lea.hbm %s11466_s3, 16384 }
  0x37   :  { %p9219_p10 = scmp.ne.s32.totalorder %s11466_s3, %s9218_s11  ;;  %p9222_p11 = scmp.lt.u32.totalorder %s9218_s11, %s11466_s3 }
  0x39   :  { %p9224_p12 = pnand %p9222_p11, %p9219_p10 }
  0x3b   :  { %9227 = shalt.err (!%p9224_p12)
}
  0x3c   :  { %s9228_s16 = scalar_lea.vmem %s56_s22, 16384  ;;  %p9233_p0 = scmp.lt.s32.totalorder %s56_s22, %s56_s22 }
  0x3d   :  { %p9229_p13 = scmp.ne.s32.totalorder %s56_s22, %s9228_s16  ;;  %p9234_p1 = scmp.lt.s32.totalorder %s9228_s16, %s9228_s16 }
  0x3f   :  { %p9235_p2 = por %p9234_p1, %p9233_p0 }
  0x41   :  { %p9236_p3 = pnand %p9235_p2, %p9229_p13 }
  0x43   :  { %9239 = shalt.err (!%p9236_p3)
}
  0x44   :  { %61 = dma.hbm_to_vmem [thread:$0]  %s11466_s3, 16384, %s56_s22, [#allocation9], %s9296_s29, %s9296_s29, %s9298_s1  }
  0x45   :  { %9284 = dma.done.wait [#allocation3], 2048  }
  0x46   :  { %9285 = vsyncadd [#allocation3], 4294965248 }
  0x47   :  { %9286 = dma.done.wait [#allocation6], 16640  }
  0x48   :  { %9287 = vsyncadd [#allocation6], 4294950656 }
  0x49   :  { %9288 = dma.done.wait [#allocation9], 16384  }
  0x4a   :  { %9289 = vsyncadd [#allocation9], 4294950912  ;;  %v11473_v0 = vmov 0   ;;  %v107_v1 = vld [vmem:[#allocation5] sm:$0xff]  ;;  %v108_v3 = vld [vmem:[#allocation5 + $0x8] sm:$0xff]  ;;  %s9302_s3 = smov [#allocation11]  }
  0x4b   :  { %1087 = vmatprep.mubr.bf16.mxu0 %v11473_v0  ;;  %1280 = vmatprep.mubr.bf16.mxu1 %v11473_v0  ;;  %v115_v2 = vld [vmem:[#allocation5 + $0x40] sm:$0xff]  ;;  %v116_v5 = vld [vmem:[#allocation5 + $0x48] sm:$0xff]  ;;  %v109_v62 = vld [vmem:[#allocation5 + $0x10] sm:$0xff]  ;;  %s7264_s1 = sshll.u32 %s9302_s3, 4  ;;  %s7265_s1 = int_to_ptr.vmem [resolvable:$true] %s7264_s1 }
  0x4c   :  { %v7299_v4 = vcombine.high %v107_v1, %v115_v2  ;;  %v7298_v6 = vcombine.low %v107_v1, %v115_v2  ;;  %v123_v7 = vld [vmem:[#allocation5 + $0x80] sm:$0xff]  ;;  %v7301_v9 = vcombine.high %v108_v3, %v116_v5  ;;  %v7300_v10 = vcombine.low %v108_v3, %v116_v5  ;;  %v124_v12 = vld [vmem:[#allocation5 + $0x88] sm:$0xff]  ;;  %v117_v63 = vld [vmem:[#allocation5 + $0x50] sm:$0xff]  ;;  %s9240_s18 = scalar_lea.vmem %s7265_s1, 32768  ;;  %p9245_p5 = scmp.lt.s32.totalorder %s7265_s1, %s7265_s1 }
  0x4d   :  { %v131_v8 = vld [vmem:[#allocation5 + $0xc0] sm:$0xff]  ;;  %v132_v13 = vld [vmem:[#allocation5 + $0xc8] sm:$0xff]  ;;  %v110_v2 = vld [vmem:[#allocation5 + $0x18] sm:$0xff]  ;;  %p9241_p4 = scmp.ne.s32.totalorder %s7265_s1, %s9240_s18  ;;  %p9246_p6 = scmp.lt.s32.totalorder %s9240_s18, %s9240_s18 }
  0x4e   :  { %v7315_v11 = vcombine.high %v123_v7, %v131_v8  ;;  %v139_v14 = vld [vmem:[#allocation5 + $0x100] sm:$0xff]  ;;  %1055 = vmatprep.subr.bf16.mxu0 %v7299_v4  ;;  %v7317_v15 = vcombine.high %v124_v12, %v132_v13  ;;  %v140_v17 = vld [vmem:[#allocation5 + $0x108] sm:$0xff]  ;;  %1248 = vmatprep.subr.bf16.mxu1 %v7301_v9  ;;  %v7314_v19 = vcombine.low %v123_v7, %v131_v8  ;;  %v118_v3 = vld [vmem:[#allocation5 + $0x58] sm:$0xff] }
  0x4f   :  { %v147_v16 = vld [vmem:[#allocation5 + $0x140] sm:$0xff]  ;;  %v148_v18 = vld [vmem:[#allocation5 + $0x148] sm:$0xff]  ;;  %1056 = vmatpush1.bf16.msra.mxu0 %v7298_v6  ;;  %1249 = vmatpush1.bf16.msra.mxu1 %v7300_v10  ;;  %v7316_v20 = vcombine.low %v124_v12, %v132_v13  ;;  %v7303_v6 = vcombine.high %v109_v62, %v117_v63  ;;  %v7305_v8 = vcombine.high %v110_v2, %v118_v3  ;;  %v125_v9 = vld [vmem:[#allocation5 + $0x90] sm:$0xff]  ;;  %p9247_p7 = por %p9246_p6, %p9245_p5 }
  0x50   :  { %1057 = vmatprep.subr.bf16.mxu0 %v7315_v11  ;;  %v7331_v21 = vcombine.high %v139_v14, %v147_v16  ;;  %1250 = vmatprep.subr.bf16.mxu1 %v7317_v15  ;;  %v7333_v22 = vcombine.high %v140_v17, %v148_v18  ;;  %v155_v23 = vld [vmem:[#allocation5 + $0x180] sm:$0xff]  ;;  %v156_v25 = vld [vmem:[#allocation5 + $0x188] sm:$0xff]  ;;  %v7330_v27 = vcombine.low %v139_v14, %v147_v16  ;;  %v133_v10 = vld [vmem:[#allocation5 + $0xd0] sm:$0xff] }
  0x51   :  { %v163_v24 = vld [vmem:[#allocation5 + $0x1c0] sm:$0xff]  ;;  %v164_v26 = vld [vmem:[#allocation5 + $0x1c8] sm:$0xff]  ;;  %v7332_v28 = vcombine.low %v140_v17, %v148_v18  ;;  %v7302_v11 = vcombine.low %v109_v62, %v117_v63  ;;  %v126_v12 = vld [vmem:[#allocation5 + $0x98] sm:$0xff]  ;;  %v7304_v14 = vcombine.low %v110_v2, %v118_v3  ;;  %v7319_v16 = vcombine.high %v125_v9, %v133_v10  ;;  %p9248_p8 = pnand %p9247_p7, %p9241_p4 }
  0x52   :  { %v7347_v29 = vcombine.high %v155_v23, %v163_v24  ;;  %v7349_v30 = vcombine.high %v156_v25, %v164_v26  ;;  %v171_v31 = vld [vmem:[#allocation5 + $0x200] sm:$0xff]  ;;  %v172_v33 = vld [vmem:[#allocation5 + $0x208] sm:$0xff]  ;;  %v7346_v35 = vcombine.low %v155_v23, %v163_v24  ;;  %v7348_v36 = vcombine.low %v156_v25, %v164_v26  ;;  %v134_v13 = vld [vmem:[#allocation5 + $0xd8] sm:$0xff] }
  0x53   :  { %1058 = vmatpush1.bf16.msra.mxu0 %v7314_v19  ;;  %1251 = vmatpush1.bf16.msra.mxu1 %v7316_v20  ;;  %v179_v32 = vld [vmem:[#allocation5 + $0x240] sm:$0xff]  ;;  %v180_v34 = vld [vmem:[#allocation5 + $0x248] sm:$0xff]  ;;  %v141_v15 = vld [vmem:[#allocation5 + $0x110] sm:$0xff]  ;;  %v7321_v18 = vcombine.high %v126_v12, %v134_v13  ;;  %v7320_v23 = vcombine.low %v126_v12, %v134_v13 }
  0x54   :  { %1059 = vmatprep.subr.bf16.mxu0 %v7331_v21  ;;  %1252 = vmatprep.subr.bf16.mxu1 %v7333_v22  ;;  %v7363_v37 = vcombine.high %v171_v31, %v179_v32  ;;  %v187_v38 = vld [vmem:[#allocation5 + $0x280] sm:$0xff]  ;;  %v7365_v39 = vcombine.high %v172_v33, %v180_v34  ;;  %v188_v41 = vld [vmem:[#allocation5 + $0x288] sm:$0xff]  ;;  %v7362_v43 = vcombine.low %v171_v31, %v179_v32  ;;  %v149_v17 = vld [vmem:[#allocation5 + $0x150] sm:$0xff] }
  0x55   :  { %v195_v40 = vld [vmem:[#allocation5 + $0x2c0] sm:$0xff]  ;;  %v196_v42 = vld [vmem:[#allocation5 + $0x2c8] sm:$0xff]  ;;  %v7364_v44 = vcombine.low %v172_v33, %v180_v34  ;;  %v142_v19 = vld [vmem:[#allocation5 + $0x118] sm:$0xff]  ;;  %v7318_v21 = vcombine.low %v125_v9, %v133_v10  ;;  %v7335_v24 = vcombine.high %v141_v15, %v149_v17 }
  0x56   :  { %v7379_v45 = vcombine.high %v187_v38, %v195_v40  ;;  %v7381_v46 = vcombine.high %v188_v41, %v196_v42  ;;  %v203_v47 = vld [vmem:[#allocation5 + $0x300] sm:$0xff]  ;;  %v204_v49 = vld [vmem:[#allocation5 + $0x308] sm:$0xff]  ;;  %v7378_v51 = vcombine.low %v187_v38, %v195_v40  ;;  %v7380_v52 = vcombine.low %v188_v41, %v196_v42  ;;  %v150_v20 = vld [vmem:[#allocation5 + $0x158] sm:$0xff] }
  0x57   :  { %1060 = vmatpush1.bf16.msra.mxu0 %v7330_v27  ;;  %1253 = vmatpush1.bf16.msra.mxu1 %v7332_v28  ;;  %v211_v48 = vld [vmem:[#allocation5 + $0x340] sm:$0xff]  ;;  %v212_v50 = vld [vmem:[#allocation5 + $0x348] sm:$0xff]  ;;  %v157_v25 = vld [vmem:[#allocation5 + $0x190] sm:$0xff] }
  0x58   :  { %1061 = vmatprep.subr.bf16.mxu0 %v7347_v29  ;;  %1254 = vmatprep.subr.bf16.mxu1 %v7349_v30  ;;  %v7395_v53 = vcombine.high %v203_v47, %v211_v48  ;;  %v7397_v54 = vcombine.high %v204_v49, %v212_v50  ;;  %v219_v55 = vld [vmem:[#allocation5 + $0x380] sm:$0xff]  ;;  %v220_v57 = vld [vmem:[#allocation5 + $0x388] sm:$0xff]  ;;  %v7394_v59 = vcombine.low %v203_v47, %v211_v48  ;;  %v165_v26 = vld [vmem:[#allocation5 + $0x1d0] sm:$0xff] }
  0x59   :  { %v227_v56 = vld [vmem:[#allocation5 + $0x3c0] sm:$0xff]  ;;  %v228_v58 = vld [vmem:[#allocation5 + $0x3c8] sm:$0xff]  ;;  %v7396_v60 = vcombine.low %v204_v49, %v212_v50  ;;  %v7337_v29 = vcombine.high %v142_v19, %v150_v20  ;;  %v158_v30 = vld [vmem:[#allocation5 + $0x198] sm:$0xff]  ;;  %v7351_v40 = vcombine.high %v157_v25, %v165_v26 }
  0x5a   :  { %v7411_v61 = vcombine.high %v219_v55, %v227_v56  ;;  %v7413_v1 = vcombine.high %v220_v57, %v228_v58  ;;  %v7410_v4 = vcombine.low %v219_v55, %v227_v56  ;;  %v7412_v5 = vcombine.low %v220_v57, %v228_v58  ;;  %v9395_v7 = vld [vmem:[#allocation2] sm:$0xff]   ;;  %v9400_v22 = vld [vmem:[#allocation2 + $0x8] sm:$0xff]   ;;  %v166_v31 = vld [vmem:[#allocation5 + $0x1d8] sm:$0xff] }
  0x5b   :  { %1062 = vmatpush1.bf16.msra.mxu0 %v7346_v35  ;;  %1255 = vmatpush1.bf16.msra.mxu1 %v7348_v36  ;;  %v9402_v27 = vld [vmem:[#allocation5 + $0x20] sm:$0xff]  ;;  %v9409_v33 = vld [vmem:[#allocation5 + $0x28] sm:$0xff]  ;;  %v7334_v36 = vcombine.low %v141_v15, %v149_v17  ;;  %v181_v38 = vld [vmem:[#allocation5 + $0x250] sm:$0xff]  ;;  %v7352_v48 = vcombine.low %v158_v30, %v166_v31 }
  0x5c   :  { %1063 = vmatprep.subr.bf16.mxu0 %v7363_v37  ;;  %1256 = vmatprep.subr.bf16.mxu1 %v7365_v39  ;;  %v9404_v28 = vld [vmem:[#allocation5 + $0x60] sm:$0xff]  ;;  %v9411_v34 = vld [vmem:[#allocation5 + $0x68] sm:$0xff]  ;;  %v173_v37 = vld [vmem:[#allocation5 + $0x210] sm:$0xff]  ;;  %v7336_v39 = vcombine.low %v142_v19, %v150_v20 }
  0x5d   :  { %v7306_v32 = vcombine.low %v9402_v27, %v9404_v28  ;;  %v7308_v35 = vcombine.low %v9409_v33, %v9411_v34  ;;  %v174_v41 = vld [vmem:[#allocation5 + $0x218] sm:$0xff]  ;;  %v197_v47 = vld [vmem:[#allocation5 + $0x2d0] sm:$0xff]  ;;  %v7367_v49 = vcombine.high %v173_v37, %v181_v38  ;;  %v9431_v12 = vld [vmem:[#allocation2 + $0x20] sm:$0xff]   ;;  %v7307_v15 = vcombine.high %v9402_v27, %v9404_v28 }
  0x5e   :  { %v182_v42 = vld [vmem:[#allocation5 + $0x258] sm:$0xff]  ;;  %v213_v55 = vld [vmem:[#allocation5 + $0x350] sm:$0xff]  ;;  %v9441_v17 = vld [vmem:[#allocation2 + $0x28] sm:$0xff]  }
  0x5f   :  { %1064 = vmatpush1.bf16.msra.mxu0 %v7362_v43  ;;  %1257 = vmatpush1.bf16.msra.mxu1 %v7364_v44  ;;  %v7353_v43 = vcombine.high %v158_v30, %v166_v31  ;;  %v9419_v44 = vld [vmem:[#allocation2 + $0x10] sm:$0xff]   ;;  %v190_v50 = vld [vmem:[#allocation5 + $0x298] sm:$0xff]  ;;  %v7368_v56 = vcombine.low %v174_v41, %v182_v42  ;;  %v9459_v20 = vld [vmem:[#allocation2 + $0x40] sm:$0xff]  }
  0x60   :  { %1065 = vmatprep.subr.bf16.mxu0 %v7379_v45  ;;  %1258 = vmatprep.subr.bf16.mxu1 %v7381_v46  ;;  %v7350_v45 = vcombine.low %v157_v25, %v165_v26  ;;  %v189_v46 = vld [vmem:[#allocation5 + $0x290] sm:$0xff]  ;;  %v9453_v19 = vld [vmem:[#allocation2 + $0x38] sm:$0xff]   ;;  %v9483_v25 = vld [vmem:[#allocation2 + $0x60] sm:$0xff]  }
  0x61   :  { %v7383_v57 = vcombine.high %v189_v46, %v197_v47  ;;  %v7382_v62 = vcombine.low %v189_v46, %v197_v47  ;;  %v221_v63 = vld [vmem:[#allocation5 + $0x390] sm:$0xff]  ;;  %v9489_v26 = vld [vmem:[#allocation2 + $0x68] sm:$0xff]   ;;  %v9501_v30 = vld [vmem:[#allocation2 + $0x78] sm:$0xff]  }
  0x62   :  { %v127_v31 = vld [vmem:[#allocation5 + $0xa0] sm:$0xff]  ;;  %v168_v27 = vld [vmem:[#allocation5 + $0x1e8] sm:$0xff] }
  0x63   :  { %1066 = vmatpush1.bf16.msra.mxu0 %v7378_v51  ;;  %1259 = vmatpush1.bf16.msra.mxu1 %v7380_v52  ;;  %v198_v51 = vld [vmem:[#allocation5 + $0x2d8] sm:$0xff]  ;;  %v7369_v52 = vcombine.high %v174_v41, %v182_v42  ;;  %v151_v41 = vld [vmem:[#allocation5 + $0x160] sm:$0xff] }
  0x64   :  { %1067 = vmatprep.subr.bf16.mxu0 %v7395_v53  ;;  %1260 = vmatprep.subr.bf16.mxu1 %v7397_v54  ;;  %v7366_v53 = vcombine.low %v173_v37, %v181_v38  ;;  %v205_v54 = vld [vmem:[#allocation5 + $0x310] sm:$0xff]  ;;  %v7385_v58 = vcombine.high %v190_v50, %v198_v51  ;;  %v7384_v2 = vcombine.low %v190_v50, %v198_v51  ;;  %v128_v37 = vld [vmem:[#allocation5 + $0xa8] sm:$0xff]  ;;  %v159_v50 = vld [vmem:[#allocation5 + $0x1a0] sm:$0xff] }
  0x65   :  { %v7399_v3 = vcombine.high %v205_v54, %v213_v55  ;;  %v136_v38 = vld [vmem:[#allocation5 + $0xe8] sm:$0xff] }
  0x66   :  { %v7325_v42 = vcombine.high %v128_v37, %v136_v38  ;;  %v7324_v47 = vcombine.low %v128_v37, %v136_v38  ;;  %v160_v51 = vld [vmem:[#allocation5 + $0x1a8] sm:$0xff]  ;;  %v223_v38 = vld [vmem:[#allocation5 + $0x3a0] sm:$0xff] }
  0x67   :  { %1068 = vmatpush1.bf16.msra.mxu0 %v7394_v59  ;;  %1261 = vmatpush1.bf16.msra.mxu1 %v7396_v60  ;;  %v206_v59 = vld [vmem:[#allocation5 + $0x318] sm:$0xff] }
  0x68   :  { %1069 = vmatprep.subr.bf16.mxu0 %v7411_v61  ;;  %1262 = vmatprep.subr.bf16.mxu1 %v7413_v1  ;;  %v214_v60 = vld [vmem:[#allocation5 + $0x358] sm:$0xff]  ;;  %v229_v1 = vld [vmem:[#allocation5 + $0x3d0] sm:$0xff] }
  0x69   :  { %v9425_v61 = vld [vmem:[#allocation2 + $0x18] sm:$0xff]   ;;  %v7400_v9 = vcombine.low %v206_v59, %v214_v60  ;;  %v7415_v10 = vcombine.high %v221_v63, %v229_v1  ;;  %v7414_v13 = vcombine.low %v221_v63, %v229_v1  ;;  %v7356_v63 = vcombine.low %v160_v51, %v168_v27 }
  0x6b   :  { %1070 = vmatpush1.bf16.msra.mxu0 %v7410_v4  ;;  %1263 = vmatpush1.bf16.msra.mxu1 %v7412_v5  ;;  %v222_v4 = vld [vmem:[#allocation5 + $0x398] sm:$0xff] }
  0x6c   :  { %1441 = vmatprep.subr.bf16.mxu0 %v7303_v6  ;;  %1634 = vmatprep.subr.bf16.mxu1 %v7305_v8  ;;  %v230_v5 = vld [vmem:[#allocation5 + $0x3d8] sm:$0xff]  ;;  %v7401_v6 = vcombine.high %v206_v59, %v214_v60  ;;  %v7398_v8 = vcombine.low %v205_v54, %v213_v55  ;;  %v7357_v55 = vcombine.high %v160_v51, %v168_v27  ;;  %v176_v59 = vld [vmem:[#allocation5 + $0x228] sm:$0xff] }
  0x6d   :  { %v9525_v54 = vld [vmem:[#allocation5 + $0x78] sm:$0xff]  ;;  %v184_v60 = vld [vmem:[#allocation5 + $0x268] sm:$0xff] }
  0x6e   :  { %1088 = vmatmul.mubr.bf16.vlgmr.msra.gmra.mrb[0].mxu0 %v9395_v7  ;;  %1281 = vmatmul.mubr.bf16.vlgmr.msra.gmra.mrb[0].mxu1 %v9395_v7 }
  0x6f   :  { %1442 = vmatpush1.bf16.msra.mxu0 %v7302_v11  ;;  %1635 = vmatpush1.bf16.msra.mxu1 %v7304_v14  ;;  %v7417_v11 = vcombine.high %v222_v4, %v230_v5  ;;  %v7416_v14 = vcombine.low %v222_v4, %v230_v5  ;;  %v199_v4 = vld [vmem:[#allocation5 + $0x2e0] sm:$0xff]  ;;  %v192_v5 = vld [vmem:[#allocation5 + $0x2a8] sm:$0xff] }
  0x70   :  { %1097 = vmatprep.mubr.bf16.mxu0 %v11473_v0  ;;  %1290 = vmatprep.mubr.bf16.mxu1 %v11473_v0 }
  0x71   :  { %1443 = vmatprep.subr.bf16.mxu0 %v7319_v16  ;;  %1636 = vmatprep.subr.bf16.mxu1 %v7321_v18  ;;  %v7309_v16 = vcombine.high %v9409_v33, %v9411_v34  ;;  %v9447_v18 = vld [vmem:[#allocation2 + $0x30] sm:$0xff]   ;;  %v9521_v34 = vld [vmem:[#allocation5 + $0x38] sm:$0xff] }
  0x72   :  { %v9519_v33 = vld [vmem:[#allocation5 + $0x70] sm:$0xff] }
  0x73   :  { %1444 = vmatpush1.bf16.msra.mxu0 %v7318_v21  ;;  %1637 = vmatpush1.bf16.msra.mxu1 %v7320_v23  ;;  %v9465_v21 = vld [vmem:[#allocation2 + $0x48] sm:$0xff]   ;;  %v9471_v23 = vld [vmem:[#allocation2 + $0x50] sm:$0xff]  }
  0x74   :  { %1445 = vmatprep.subr.bf16.mxu0 %v7335_v24  ;;  %1638 = vmatprep.subr.bf16.mxu1 %v7337_v29  ;;  %v9477_v24 = vld [vmem:[#allocation2 + $0x58] sm:$0xff]   ;;  %v9495_v29 = vld [vmem:[#allocation2 + $0x70] sm:$0xff]  }
  0x76   :  { %1098 = vmatmul.mubr.bf16.gmra.mrb[4].mxu0 %v9400_v22  ;;  %1291 = vmatmul.mubr.bf16.gmra.mrb[4].mxu1 %v9400_v22 }
  0x77   :  { %1107 = vmatprep.mubr.bf16.mxu0 %v11473_v0  ;;  %1300 = vmatprep.mubr.bf16.mxu1 %v11473_v0 }
  0x78   :  { %1446 = vmatpush1.bf16.msra.mxu0 %v7334_v36  ;;  %1639 = vmatpush1.bf16.msra.mxu1 %v7336_v39  ;;  %v135_v36 = vld [vmem:[#allocation5 + $0xe0] sm:$0xff] }
  0x79   :  { %1447 = vmatprep.subr.bf16.mxu0 %v7351_v40  ;;  %1640 = vmatprep.subr.bf16.mxu1 %v7353_v43  ;;  %v7323_v39 = vcombine.high %v127_v31, %v135_v36  ;;  %v143_v40 = vld [vmem:[#allocation5 + $0x120] sm:$0xff]  ;;  %v144_v43 = vld [vmem:[#allocation5 + $0x128] sm:$0xff]  ;;  %v7322_v46 = vcombine.low %v127_v31, %v135_v36 }
  0x7a   :  { %v7338_v28 = vcombine.low %v143_v40, %v151_v41 }
  0x7c   :  { %1448 = vmatpush1.bf16.msra.mxu0 %v7350_v45  ;;  %1641 = vmatpush1.bf16.msra.mxu1 %v7352_v48  ;;  %v152_v45 = vld [vmem:[#allocation5 + $0x168] sm:$0xff]  ;;  %v7339_v48 = vcombine.high %v143_v40, %v151_v41 }
  0x7d   :  { %1449 = vmatprep.subr.bf16.mxu0 %v7367_v49  ;;  %1642 = vmatprep.subr.bf16.mxu1 %v7369_v52  ;;  %v7341_v49 = vcombine.high %v144_v43, %v152_v45  ;;  %v224_v40 = vld [vmem:[#allocation5 + $0x3a8] sm:$0xff] }
  0x7e   :  { %1108 = vmatmul.mubr.bf16.gmra.mrb[8].mxu0 %v9419_v44  ;;  %1301 = vmatmul.mubr.bf16.gmra.mrb[8].mxu1 %v9419_v44  ;;  %v232_v41 = vld [vmem:[#allocation5 + $0x3e8] sm:$0xff] }
  0x7f   :  { %1117 = vmatprep.mubr.bf16.mxu0 %v11473_v0  ;;  %1310 = vmatprep.mubr.bf16.mxu1 %v11473_v0 }
  0x80   :  { %1450 = vmatpush1.bf16.msra.mxu0 %v7366_v53  ;;  %1643 = vmatpush1.bf16.msra.mxu1 %v7368_v56  ;;  %v175_v56 = vld [vmem:[#allocation5 + $0x220] sm:$0xff] }
  0x81   :  { %1451 = vmatprep.subr.bf16.mxu0 %v7383_v57  ;;  %1644 = vmatprep.subr.bf16.mxu1 %v7385_v58  ;;  %v183_v57 = vld [vmem:[#allocation5 + $0x260] sm:$0xff]  ;;  %v7312_v58 = vcombine.low %v9521_v34, %v9525_v54 }
  0x82   :  { %v7371_v1 = vcombine.high %v175_v56, %v183_v57 }
  0x84   :  { %1452 = vmatpush1.bf16.msra.mxu0 %v7382_v62  ;;  %1645 = vmatpush1.bf16.msra.mxu1 %v7384_v2  ;;  %v7373_v2 = vcombine.high %v176_v59, %v184_v60 }
  0x85   :  { %1453 = vmatprep.subr.bf16.mxu0 %v7399_v3  ;;  %1646 = vmatprep.subr.bf16.mxu1 %v7401_v6  ;;  %v191_v3 = vld [vmem:[#allocation5 + $0x2a0] sm:$0xff]  ;;  %v200_v6 = vld [vmem:[#allocation5 + $0x2e8] sm:$0xff] }
  0x86   :  { %1118 = vmatmul.mubr.bf16.gmra.mrb[12].mxu0 %v9425_v61  ;;  %1311 = vmatmul.mubr.bf16.gmra.mrb[12].mxu1 %v9425_v61  ;;  %v7388_v31 = vcombine.low %v192_v5, %v200_v6 }
  0x87   :  { %1127 = vmatprep.mubr.bf16.mxu0 %v11473_v0  ;;  %1320 = vmatprep.mubr.bf16.mxu1 %v11473_v0 }
  0x88   :  { %1454 = vmatpush1.bf16.msra.mxu0 %v7398_v8  ;;  %1647 = vmatpush1.bf16.msra.mxu1 %v7400_v9  ;;  %v7372_v8 = vcombine.low %v176_v59, %v184_v60  ;;  %v7387_v9 = vcombine.high %v191_v3, %v199_v4 }
  0x89   :  { %1455 = vmatprep.subr.bf16.mxu0 %v7415_v10  ;;  %1648 = vmatprep.subr.bf16.mxu1 %v7417_v11  ;;  %v7389_v10 = vcombine.high %v192_v5, %v200_v6  ;;  %v207_v11 = vld [vmem:[#allocation5 + $0x320] sm:$0xff] }
  0x8c   :  { %1456 = vmatpush1.bf16.msra.mxu0 %v7414_v13  ;;  %1649 = vmatpush1.bf16.msra.mxu1 %v7416_v14  ;;  %v215_v13 = vld [vmem:[#allocation5 + $0x360] sm:$0xff]  ;;  %v208_v14 = vld [vmem:[#allocation5 + $0x328] sm:$0xff] }
  0x8d   :  { %1827 = vmatprep.subr.bf16.mxu0 %v7307_v15  ;;  %2020 = vmatprep.subr.bf16.mxu1 %v7309_v16  ;;  %v216_v15 = vld [vmem:[#allocation5 + $0x368] sm:$0xff]  ;;  %v7386_v16 = vcombine.low %v191_v3, %v199_v4  ;;  %v7403_v36 = vcombine.high %v207_v11, %v215_v13 }
  0x8e   :  { %1128 = vmatmul.mubr.bf16.gmra.mrb[16].mxu0 %v9431_v12  ;;  %1321 = vmatmul.mubr.bf16.gmra.mrb[16].mxu1 %v9431_v12  ;;  %v7405_v37 = vcombine.high %v208_v14, %v216_v15 }
  0x8f   :  { %1137 = vmatprep.mubr.bf16.mxu0 %v11473_v0  ;;  %1330 = vmatprep.mubr.bf16.mxu1 %v11473_v0 }
  0x96   :  { %1138 = vmatmul.mubr.bf16.gmra.mrb[20].mxu0 %v9441_v17  ;;  %1331 = vmatmul.mubr.bf16.gmra.mrb[20].mxu1 %v9441_v17 }
  0x97   :  { %1147 = vmatprep.mubr.bf16.mxu0 %v11473_v0  ;;  %1340 = vmatprep.mubr.bf16.mxu1 %v11473_v0 }
  0x9e   :  { %1148 = vmatmul.mubr.bf16.gmra.mrb[24].mxu0 %v9447_v18  ;;  %1341 = vmatmul.mubr.bf16.gmra.mrb[24].mxu1 %v9447_v18 }
  0x9f   :  { %1157 = vmatprep.mubr.bf16.mxu0 %v11473_v0  ;;  %1350 = vmatprep.mubr.bf16.mxu1 %v11473_v0 }
  0xa6   :  { %1158 = vmatmul.mubr.bf16.gmra.mrb[28].mxu0 %v9453_v19  ;;  %1351 = vmatmul.mubr.bf16.gmra.mrb[28].mxu1 %v9453_v19 }
  0xa7   :  { %1167 = vmatprep.mubr.bf16.mxu0 %v11473_v0  ;;  %1360 = vmatprep.mubr.bf16.mxu1 %v11473_v0 }
  0xae   :  { %1168 = vmatmul.mubr.bf16.gmra.mrb[32].mxu0 %v9459_v20  ;;  %1361 = vmatmul.mubr.bf16.gmra.mrb[32].mxu1 %v9459_v20 }
  0xaf   :  { %1177 = vmatprep.mubr.bf16.mxu0 %v11473_v0  ;;  %1370 = vmatprep.mubr.bf16.mxu1 %v11473_v0 }
  0xb6   :  { %1178 = vmatmul.mubr.bf16.gmra.mrb[36].mxu0 %v9465_v21  ;;  %1371 = vmatmul.mubr.bf16.gmra.mrb[36].mxu1 %v9465_v21 }
  0xb7   :  { %1187 = vmatprep.mubr.bf16.mxu0 %v11473_v0  ;;  %1380 = vmatprep.mubr.bf16.mxu1 %v11473_v0 }
  0xbe   :  { %1188 = vmatmul.mubr.bf16.gmra.mrb[40].mxu0 %v9471_v23  ;;  %1381 = vmatmul.mubr.bf16.gmra.mrb[40].mxu1 %v9471_v23 }
  0xbf   :  { %1197 = vmatprep.mubr.bf16.mxu0 %v11473_v0  ;;  %1390 = vmatprep.mubr.bf16.mxu1 %v11473_v0 }
  0xc6   :  { %1198 = vmatmul.mubr.bf16.gmra.mrb[44].mxu0 %v9477_v24  ;;  %1391 = vmatmul.mubr.bf16.gmra.mrb[44].mxu1 %v9477_v24 }
  0xc7   :  { %1207 = vmatprep.mubr.bf16.mxu0 %v11473_v0  ;;  %1400 = vmatprep.mubr.bf16.mxu1 %v11473_v0 }
  0xce   :  { %1208 = vmatmul.mubr.bf16.gmra.mrb[48].mxu0 %v9483_v25  ;;  %1401 = vmatmul.mubr.bf16.gmra.mrb[48].mxu1 %v9483_v25 }
  0xcf   :  { %1217 = vmatprep.mubr.bf16.mxu0 %v11473_v0  ;;  %1410 = vmatprep.mubr.bf16.mxu1 %v11473_v0 }
  0xd6   :  { %1218 = vmatmul.mubr.bf16.gmra.mrb[52].mxu0 %v9489_v26  ;;  %1411 = vmatmul.mubr.bf16.gmra.mrb[52].mxu1 %v9489_v26 }
  0xd7   :  { %1227 = vmatprep.mubr.bf16.mxu0 %v11473_v0  ;;  %1420 = vmatprep.mubr.bf16.mxu1 %v11473_v0 }
  0xde   :  { %1228 = vmatmul.mubr.bf16.gmra.mrb[56].mxu0 %v9495_v29  ;;  %1421 = vmatmul.mubr.bf16.gmra.mrb[56].mxu1 %v9495_v29 }
  0xdf   :  { %1237 = vmatprep.mubr.bf16.mxu0 %v11473_v0  ;;  %1430 = vmatprep.mubr.bf16.mxu1 %v11473_v0 }
  0xe6   :  { %1238 = vmatmul.mubr.bf16.gmra.mrb[60].mxu0 %v9501_v30  ;;  %1431 = vmatmul.mubr.bf16.gmra.mrb[60].mxu1 %v9501_v30 }
  0xe7   :  { %1473 = vmatprep.mubr.bf16.mxu0 %v11473_v0  ;;  %1666 = vmatprep.mubr.bf16.mxu1 %v11473_v0 }
  0xee   :  { %1474 = vmatmul.mubr.bf16.vlgmr.msra.gmra.mrb[64].mxu0 %v9395_v7  ;;  %1667 = vmatmul.mubr.bf16.vlgmr.msra.gmra.mrb[64].mxu1 %v9395_v7  ;;  %v167_v7 = vld [vmem:[#allocation5 + $0x1e0] sm:$0xff] }
  0xef   :  { %1828 = vmatpush1.bf16.msra.mxu0 %v7306_v32  ;;  %2021 = vmatpush1.bf16.msra.mxu1 %v7308_v35  ;;  %v9517_v32 = vld [vmem:[#allocation5 + $0x30] sm:$0xff]  ;;  %v7340_v35 = vcombine.low %v144_v43, %v152_v45  ;;  %v7355_v52 = vcombine.high %v159_v50, %v167_v7  ;;  %v7354_v62 = vcombine.low %v159_v50, %v167_v7 }
  0xf0   :  { %1483 = vmatprep.mubr.bf16.mxu0 %v11473_v0  ;;  %1676 = vmatprep.mubr.bf16.mxu1 %v11473_v0  ;;  %v7310_v53 = vcombine.low %v9517_v32, %v9519_v33  ;;  %v7421_v45 = vcombine.high %v224_v40, %v232_v41 }
  0xf1   :  { %1829 = vmatprep.subr.bf16.mxu0 %v7323_v39  ;;  %2022 = vmatprep.subr.bf16.mxu1 %v7325_v42  ;;  %v231_v39 = vld [vmem:[#allocation5 + $0x3e0] sm:$0xff]  ;;  %v7404_v42 = vcombine.low %v208_v14, %v216_v15 }
  0xf2   :  { %v7419_v43 = vcombine.high %v223_v38, %v231_v39 }
  0xf3   :  { %1830 = vmatpush1.bf16.msra.mxu0 %v7322_v46  ;;  %2023 = vmatpush1.bf16.msra.mxu1 %v7324_v47  ;;  %v7418_v46 = vcombine.low %v223_v38, %v231_v39  ;;  %v7420_v47 = vcombine.low %v224_v40, %v232_v41 }
  0xf4   :  { %1831 = vmatprep.subr.bf16.mxu0 %v7339_v48  ;;  %2024 = vmatprep.subr.bf16.mxu1 %v7341_v49  ;;  %v7311_v48 = vcombine.high %v9517_v32, %v9519_v33  ;;  %v7313_v49 = vcombine.high %v9521_v34, %v9525_v54  ;;  %v9744_v32 = vld [vmem:[#allocation5 + $0x1f0] sm:$0xff]  ;;  %v9751_v34 = vld [vmem:[#allocation5 + $0x1f8] sm:$0xff] }
  0xf6   :  { %1484 = vmatmul.mubr.bf16.gmra.mrb[68].mxu0 %v9400_v22  ;;  %1677 = vmatmul.mubr.bf16.gmra.mrb[68].mxu1 %v9400_v22  ;;  %v7370_v22 = vcombine.low %v175_v56, %v183_v57 }
  0xf7   :  { %1493 = vmatprep.mubr.bf16.mxu0 %v11473_v0  ;;  %1686 = vmatprep.mubr.bf16.mxu1 %v11473_v0 }
  0xf8   :  { %1832 = vmatpush1.bf16.msra.mxu0 %v7338_v28  ;;  %2025 = vmatpush1.bf16.msra.mxu1 %v7340_v35 }
  0xf9   :  { %1833 = vmatprep.subr.bf16.mxu0 %v7355_v52  ;;  %2026 = vmatprep.subr.bf16.mxu1 %v7357_v55 }
  0xfc   :  { %1834 = vmatpush1.bf16.msra.mxu0 %v7354_v62  ;;  %2027 = vmatpush1.bf16.msra.mxu1 %v7356_v63 }
  0xfd   :  { %1835 = vmatprep.subr.bf16.mxu0 %v7371_v1  ;;  %2028 = vmatprep.subr.bf16.mxu1 %v7373_v2 }
  0xfe   :  { %1494 = vmatmul.mubr.bf16.gmra.mrb[72].mxu0 %v9419_v44  ;;  %1687 = vmatmul.mubr.bf16.gmra.mrb[72].mxu1 %v9419_v44  ;;  %v7402_v44 = vcombine.low %v207_v11, %v215_v13 }
  0xff   :  { %1503 = vmatprep.mubr.bf16.mxu0 %v11473_v0  ;;  %1696 = vmatprep.mubr.bf16.mxu1 %v11473_v0 }
 0x100   :  { %1836 = vmatpush1.bf16.msra.mxu0 %v7370_v22  ;;  %2029 = vmatpush1.bf16.msra.mxu1 %v7372_v8 }
 0x101   :  { %1837 = vmatprep.subr.bf16.mxu0 %v7387_v9  ;;  %2030 = vmatprep.subr.bf16.mxu1 %v7389_v10 }
 0x104   :  { %1838 = vmatpush1.bf16.msra.mxu0 %v7386_v16  ;;  %2031 = vmatpush1.bf16.msra.mxu1 %v7388_v31 }
 0x105   :  { %1839 = vmatprep.subr.bf16.mxu0 %v7403_v36  ;;  %2032 = vmatprep.subr.bf16.mxu1 %v7405_v37 }
 0x106   :  { %1504 = vmatmul.mubr.bf16.gmra.mrb[76].mxu0 %v9425_v61  ;;  %1697 = vmatmul.mubr.bf16.gmra.mrb[76].mxu1 %v9425_v61  ;;  %v239_v61 = vlaneseq }
 0x107   :  { %1513 = vmatprep.mubr.bf16.mxu0 %v11473_v0  ;;  %1706 = vmatprep.mubr.bf16.mxu1 %v11473_v0 }
 0x108   :  { %1840 = vmatpush1.bf16.msra.mxu0 %v7402_v44  ;;  %2033 = vmatpush1.bf16.msra.mxu1 %v7404_v42 }
 0x109   :  { %1841 = vmatprep.subr.bf16.mxu0 %v7419_v43  ;;  %2034 = vmatprep.subr.bf16.mxu1 %v7421_v45 }
 0x10c   :  { %1842 = vmatpush1.bf16.msra.mxu0 %v7418_v46  ;;  %2035 = vmatpush1.bf16.msra.mxu1 %v7420_v47 }
 0x10d   :  { %2213 = vmatprep.subr.bf16.mxu0 %v7311_v48  ;;  %2406 = vmatprep.subr.bf16.mxu1 %v7313_v49 }
 0x10e   :  { %1514 = vmatmul.mubr.bf16.gmra.mrb[80].mxu0 %v9431_v12  ;;  %1707 = vmatmul.mubr.bf16.gmra.mrb[80].mxu1 %v9431_v12  ;;  %v9566_v12 = vshrl.u32 %v239_v61, 7 }
 0x10f   :  { %1523 = vmatprep.mubr.bf16.mxu0 %v11473_v0  ;;  %1716 = vmatprep.mubr.bf16.mxu1 %v11473_v0 }
 0x110   :  { %v11469_v50 = vsub.s32 3, %v9566_v12 }
 0x116   :  { %1524 = vmatmul.mubr.bf16.gmra.mrb[84].mxu0 %v9441_v17  ;;  %1717 = vmatmul.mubr.bf16.gmra.mrb[84].mxu1 %v9441_v17  ;;  %v11472_v17 = vsub.s32 0, %v9566_v12 }
 0x117   :  { %1533 = vmatprep.mubr.bf16.mxu0 %v11473_v0  ;;  %1726 = vmatprep.mubr.bf16.mxu1 %v11473_v0 }
 0x11e   :  { %1534 = vmatmul.mubr.bf16.gmra.mrb[88].mxu0 %v9447_v18  ;;  %1727 = vmatmul.mubr.bf16.gmra.mrb[88].mxu1 %v9447_v18  ;;  %v235_v18 = vld [vmem:[#allocation7] sm:$0xff] }
 0x11f   :  { %1543 = vmatprep.mubr.bf16.mxu0 %v11473_v0  ;;  %1736 = vmatprep.mubr.bf16.mxu1 %v11473_v0  ;;  %v9578_v7 = vrot.slane %v235_v18, %v11472_v17  ;;  %v9592_v27 = vrot.slane %v235_v18, %v11469_v50 }
 0x126   :  { %1544 = vmatmul.mubr.bf16.gmra.mrb[92].mxu0 %v9453_v19  ;;  %1737 = vmatmul.mubr.bf16.gmra.mrb[92].mxu1 %v9453_v19  ;;  %v11470_v19 = vsub.s32 2, %v9566_v12 }
 0x127   :  { %1553 = vmatprep.mubr.bf16.mxu0 %v11473_v0  ;;  %1746 = vmatprep.mubr.bf16.mxu1 %v11473_v0 }
 0x12e   :  { %1554 = vmatmul.mubr.bf16.gmra.mrb[96].mxu0 %v9459_v20  ;;  %1747 = vmatmul.mubr.bf16.gmra.mrb[96].mxu1 %v9459_v20  ;;  %v11471_v20 = vsub.s32 1, %v9566_v12 }
 0x12f   :  { %1563 = vmatprep.mubr.bf16.mxu0 %v11473_v0  ;;  %1756 = vmatprep.mubr.bf16.mxu1 %v11473_v0 }
 0x130   :  { %v9587_v51 = vrot.slane %v235_v18, %v11471_v20 }
 0x136   :  { %1564 = vmatmul.mubr.bf16.gmra.mrb[100].mxu0 %v9465_v21  ;;  %1757 = vmatmul.mubr.bf16.gmra.mrb[100].mxu1 %v9465_v21  ;;  %v9583_v21 = vrot.slane %v235_v18, %v11470_v19 }
 0x137   :  { %1573 = vmatprep.mubr.bf16.mxu0 %v11473_v0  ;;  %1766 = vmatprep.mubr.bf16.mxu1 %v11473_v0 }
 0x13e   :  { %1574 = vmatmul.mubr.bf16.gmra.mrb[104].mxu0 %v9471_v23  ;;  %1767 = vmatmul.mubr.bf16.gmra.mrb[104].mxu1 %v9471_v23 }
 0x13f   :  { %1583 = vmatprep.mubr.bf16.mxu0 %v11473_v0  ;;  %1776 = vmatprep.mubr.bf16.mxu1 %v11473_v0 }
 0x141   :  { %v1089_v28 = vpop.f32.mrb[0].mxu0  ;;  %v1282_v23 = vpop.f32.mrb[0].mxu1 }
 0x142   :  { %v1090_v35 = vadd.f32 %v1089_v28, %v9578_v7  ;;  %v1091_v52 = vpop.f32.mrb[1].mxu0  ;;  %v1283_v55 = vadd.f32 %v1282_v23, %v9583_v21  ;;  %v1284_v57 = vpop.f32.mrb[1].mxu1 }
 0x143   :  { %v1092_v56 = vadd.f32 %v1091_v52, %v9587_v51  ;;  %v1093_v59 = vpop.f32.mrb[2].mxu0  ;;  %v1285_v62 = vadd.f32 %v1284_v57, %v9592_v27  ;;  %v1286_v1 = vpop.f32.mrb[2].mxu1 }
 0x144   :  { %v2599_v60 = vmax.f32 %v1090_v35, 0.0  ;;  %v1094_v63 = vadd.f32 %v1093_v59, %v9578_v7  ;;  %v1095_v2 = vpop.f32.mrb[3].mxu0  ;;  %v2601_v3 = vmax.f32 %v1283_v55, 0.0  ;;  %v1287_v5 = vadd.f32 %v1286_v1, %v9583_v21  ;;  %v1288_v22 = vpop.f32.mrb[3].mxu1 }
 0x145   :  { %v2600_v4 = vmax.f32 %v1092_v56, 0.0  ;;  %v1096_v6 = vadd.f32 %v1095_v2, %v9587_v51  ;;  %v2602_v8 = vmax.f32 %v1285_v62, 0.0  ;;  %v1289_v10 = vadd.f32 %v1288_v22, %v9592_v27 }
 0x146   :  { %v2615_v9 = vmax.f32 %v1094_v63, 0.0  ;;  %1584 = vmatmul.mubr.bf16.gmra.mrb[108].mxu0 %v9477_v24  ;;  %v2617_v13 = vmax.f32 %v1287_v5, 0.0  ;;  %1777 = vmatmul.mubr.bf16.gmra.mrb[108].mxu1 %v9477_v24 }
 0x147   :  { %v7810_v11 = vpack.c.bf16 %v2600_v4, %v2599_v60  ;;  %v2616_v14 = vmax.f32 %v1096_v6, 0.0  ;;  %1593 = vmatprep.mubr.bf16.mxu0 %v11473_v0  ;;  %v7811_v15 = vpack.c.bf16 %v2602_v8, %v2601_v3  ;;  %v2618_v31 = vmax.f32 %v1289_v10, 0.0  ;;  %1786 = vmatprep.mubr.bf16.mxu1 %v11473_v0 }
 0x148   :  { %v9606_v16 = vpack.c.bf16 %v2615_v9, %v2599_v60  ;;  %v9609_v36 = vpack.c.bf16 %v2617_v13, %v2601_v3 }
 0x149   :  { %4647 = vst [vmem:[#allocation11] sm:$0xff] %v7810_v11  ;;  %v7818_v37 = vpack.c.bf16 %v2616_v14, %v2615_v9  ;;  %v1099_v38 = vpop.f32.mrb[4].mxu0  ;;  %v9611_v39 = vpack.c.bf16 %v2616_v14, %v2600_v4  ;;  %4648 = vst [vmem:[#allocation11 + $0x8] sm:$0xff] %v7811_v15  ;;  %v7819_v40 = vpack.c.bf16 %v2618_v31, %v2617_v13  ;;  %v1292_v24 = vpop.f32.mrb[4].mxu1 }
 0x14a   :  { %v1100_v41 = vadd.f32 %v1099_v38, %v9578_v7  ;;  %v1101_v44 = vpop.f32.mrb[5].mxu0  ;;  %v9614_v42 = vpack.c.bf16 %v2618_v31, %v2602_v8  ;;  %v1293_v43 = vadd.f32 %v1292_v24, %v9583_v21  ;;  %v1294_v46 = vpop.f32.mrb[5].mxu1 }
 0x14b   :  { %4655 = vst [vmem:[#allocation11 + $0x40] sm:$0xff] %v7818_v37  ;;  %v1102_v45 = vadd.f32 %v1101_v44, %v9587_v51  ;;  %v1103_v47 = vpop.f32.mrb[6].mxu0  ;;  %4656 = vst [vmem:[#allocation11 + $0x48] sm:$0xff] %v7819_v40  ;;  %v1295_v49 = vadd.f32 %v1294_v46, %v9592_v27  ;;  %v1296_v18 = vpop.f32.mrb[6].mxu1 }
 0x14c   :  { %v2631_v48 = vmax.f32 %v1100_v41, 0.0  ;;  %v1104_v61 = vadd.f32 %v1103_v47, %v9578_v7  ;;  %v1105_v28 = vpop.f32.mrb[7].mxu0  ;;  %v2633_v35 = vmax.f32 %v1293_v43, 0.0  ;;  %v1297_v52 = vadd.f32 %v1296_v18, %v9583_v21  ;;  %v1298_v56 = vpop.f32.mrb[7].mxu1 }
 0x14d   :  { %v2632_v23 = vmax.f32 %v1102_v45, 0.0  ;;  %v1106_v55 = vadd.f32 %v1105_v28, %v9587_v51  ;;  %v2634_v57 = vmax.f32 %v1295_v49, 0.0  ;;  %v1299_v60 = vadd.f32 %v1298_v56, %v9592_v27 }
 0x14e   :  { %v2647_v59 = vmax.f32 %v1104_v61, 0.0  ;;  %1594 = vmatmul.mubr.bf16.gmra.mrb[112].mxu0 %v9483_v25  ;;  %v2649_v63 = vmax.f32 %v1297_v52, 0.0  ;;  %1787 = vmatmul.mubr.bf16.gmra.mrb[112].mxu1 %v9483_v25 }
 0x14f   :  { %v7826_v62 = vpack.c.bf16 %v2632_v23, %v2631_v48  ;;  %v2648_v1 = vmax.f32 %v1106_v55, 0.0  ;;  %1603 = vmatprep.mubr.bf16.mxu0 %v11473_v0  ;;  %v7827_v2 = vpack.c.bf16 %v2634_v57, %v2633_v35  ;;  %v2650_v4 = vmax.f32 %v1299_v60, 0.0  ;;  %1796 = vmatprep.mubr.bf16.mxu1 %v11473_v0 }
 0x150   :  { %v9626_v3 = vpack.c.bf16 %v2647_v59, %v2631_v48  ;;  %v9629_v5 = vpack.c.bf16 %v2649_v63, %v2633_v35 }
 0x151   :  { %4663 = vst [vmem:[#allocation11 + $0x80] sm:$0xff] %v7826_v62  ;;  %v7834_v6 = vpack.c.bf16 %v2648_v1, %v2647_v59  ;;  %v1109_v22 = vpop.f32.mrb[8].mxu0  ;;  %v9631_v8 = vpack.c.bf16 %v2648_v1, %v2632_v23  ;;  %4664 = vst [vmem:[#allocation11 + $0x88] sm:$0xff] %v7827_v2  ;;  %v7835_v9 = vpack.c.bf16 %v2650_v4, %v2649_v63  ;;  %v1302_v25 = vpop.f32.mrb[8].mxu1 }
 0x152   :  { %v1110_v10 = vadd.f32 %v1109_v22, %v9578_v7  ;;  %v1111_v11 = vpop.f32.mrb[9].mxu0  ;;  %v9634_v13 = vpack.c.bf16 %v2650_v4, %v2634_v57  ;;  %v1303_v14 = vadd.f32 %v1302_v25, %v9583_v21  ;;  %v1304_v31 = vpop.f32.mrb[9].mxu1 }
 0x153   :  { %4671 = vst [vmem:[#allocation11 + $0xc0] sm:$0xff] %v7834_v6  ;;  %v1112_v15 = vadd.f32 %v1111_v11, %v9587_v51  ;;  %v1113_v37 = vpop.f32.mrb[10].mxu0  ;;  %4672 = vst [vmem:[#allocation11 + $0xc8] sm:$0xff] %v7835_v9  ;;  %v1305_v40 = vadd.f32 %v1304_v31, %v9592_v27  ;;  %v1306_v24 = vpop.f32.mrb[10].mxu1 }
 0x154   :  { %v2663_v38 = vmax.f32 %v1110_v10, 0.0  ;;  %v1114_v41 = vadd.f32 %v1113_v37, %v9578_v7  ;;  %v1115_v44 = vpop.f32.mrb[11].mxu0  ;;  %v2665_v43 = vmax.f32 %v1303_v14, 0.0  ;;  %v1307_v46 = vadd.f32 %v1306_v24, %v9583_v21  ;;  %v1308_v48 = vpop.f32.mrb[11].mxu1 }
 0x155   :  { %v2664_v45 = vmax.f32 %v1112_v15, 0.0  ;;  %v1116_v47 = vadd.f32 %v1115_v44, %v9587_v51  ;;  %v2666_v49 = vmax.f32 %v1305_v40, 0.0  ;;  %v1309_v18 = vadd.f32 %v1308_v48, %v9592_v27 }
 0x156   :  { %v2679_v61 = vmax.f32 %v1114_v41, 0.0  ;;  %1604 = vmatmul.mubr.bf16.gmra.mrb[116].mxu0 %v9489_v26  ;;  %v2681_v35 = vmax.f32 %v1307_v46, 0.0  ;;  %1797 = vmatmul.mubr.bf16.gmra.mrb[116].mxu1 %v9489_v26 }
 0x157   :  { %v7842_v28 = vpack.c.bf16 %v2664_v45, %v2663_v38  ;;  %v2680_v23 = vmax.f32 %v1116_v47, 0.0  ;;  %1613 = vmatprep.mubr.bf16.mxu0 %v11473_v0  ;;  %v7843_v52 = vpack.c.bf16 %v2666_v49, %v2665_v43  ;;  %v2682_v56 = vmax.f32 %v1309_v18, 0.0  ;;  %1806 = vmatprep.mubr.bf16.mxu1 %v11473_v0 }
 0x158   :  { %v9646_v55 = vpack.c.bf16 %v2679_v61, %v2663_v38  ;;  %v9649_v57 = vpack.c.bf16 %v2681_v35, %v2665_v43 }
 0x159   :  { %4679 = vst [vmem:[#allocation11 + $0x100] sm:$0xff] %v7842_v28  ;;  %v7850_v59 = vpack.c.bf16 %v2680_v23, %v2679_v61  ;;  %v1119_v60 = vpop.f32.mrb[12].mxu0  ;;  %v9651_v62 = vpack.c.bf16 %v2680_v23, %v2664_v45  ;;  %4680 = vst [vmem:[#allocation11 + $0x108] sm:$0xff] %v7843_v52  ;;  %v7851_v63 = vpack.c.bf16 %v2682_v56, %v2681_v35  ;;  %v1312_v26 = vpop.f32.mrb[12].mxu1 }
 0x15a   :  { %v1120_v1 = vadd.f32 %v1119_v60, %v9578_v7  ;;  %v1121_v2 = vpop.f32.mrb[13].mxu0  ;;  %v9654_v4 = vpack.c.bf16 %v2682_v56, %v2666_v49  ;;  %v1313_v6 = vadd.f32 %v1312_v26, %v9583_v21  ;;  %v1314_v9 = vpop.f32.mrb[13].mxu1 }
 0x15b   :  { %4687 = vst [vmem:[#allocation11 + $0x140] sm:$0xff] %v7850_v59  ;;  %v1122_v22 = vadd.f32 %v1121_v2, %v9587_v51  ;;  %v1123_v10 = vpop.f32.mrb[14].mxu0  ;;  %4688 = vst [vmem:[#allocation11 + $0x148] sm:$0xff] %v7851_v63  ;;  %v1315_v11 = vadd.f32 %v1314_v9, %v9592_v27  ;;  %v1316_v15 = vpop.f32.mrb[14].mxu1 }
 0x15c   :  { %v2695_v25 = vmax.f32 %v1120_v1, 0.0  ;;  %v1124_v14 = vadd.f32 %v1123_v10, %v9578_v7  ;;  %v1125_v31 = vpop.f32.mrb[15].mxu0  ;;  %v2697_v37 = vmax.f32 %v1313_v6, 0.0  ;;  %v1317_v40 = vadd.f32 %v1316_v15, %v9583_v21  ;;  %v1318_v24 = vpop.f32.mrb[15].mxu1 }
 0x15d   :  { %v2696_v38 = vmax.f32 %v1122_v22, 0.0  ;;  %v1126_v41 = vadd.f32 %v1125_v31, %v9587_v51  ;;  %v2698_v44 = vmax.f32 %v1315_v11, 0.0  ;;  %v1319_v45 = vadd.f32 %v1318_v24, %v9592_v27 }
 0x15e   :  { %v2711_v43 = vmax.f32 %v1124_v14, 0.0  ;;  %1614 = vmatmul.mubr.bf16.gmra.mrb[120].mxu0 %v9495_v29  ;;  %v2713_v47 = vmax.f32 %v1317_v40, 0.0  ;;  %1807 = vmatmul.mubr.bf16.gmra.mrb[120].mxu1 %v9495_v29 }
 0x15f   :  { %v7858_v46 = vpack.c.bf16 %v2696_v38, %v2695_v25  ;;  %v2712_v48 = vmax.f32 %v1126_v41, 0.0  ;;  %1623 = vmatprep.mubr.bf16.mxu0 %v11473_v0  ;;  %v7859_v49 = vpack.c.bf16 %v2698_v44, %v2697_v37  ;;  %v2714_v18 = vmax.f32 %v1319_v45, 0.0  ;;  %1816 = vmatprep.mubr.bf16.mxu1 %v11473_v0 }
 0x160   :  { %v9666_v61 = vpack.c.bf16 %v2711_v43, %v2695_v25  ;;  %v9669_v28 = vpack.c.bf16 %v2713_v47, %v2697_v37 }
 0x161   :  { %4695 = vst [vmem:[#allocation11 + $0x180] sm:$0xff] %v7858_v46  ;;  %v7866_v35 = vpack.c.bf16 %v2712_v48, %v2711_v43  ;;  %v1129_v23 = vpop.f32.mrb[16].mxu0  ;;  %v9671_v52 = vpack.c.bf16 %v2712_v48, %v2696_v38  ;;  %4696 = vst [vmem:[#allocation11 + $0x188] sm:$0xff] %v7859_v49  ;;  %v7867_v56 = vpack.c.bf16 %v2714_v18, %v2713_v47  ;;  %v1322_v29 = vpop.f32.mrb[16].mxu1  ;;  %v9686_v46 = vld [vmem:[#allocation5 + $0xb0] sm:$0xff] }
 0x162   :  { %v1130_v59 = vadd.f32 %v1129_v23, %v9578_v7  ;;  %v1131_v60 = vpop.f32.mrb[17].mxu0  ;;  %v9674_v63 = vpack.c.bf16 %v2714_v18, %v2698_v44  ;;  %v1323_v1 = vadd.f32 %v1322_v29, %v9583_v21  ;;  %v1324_v2 = vpop.f32.mrb[17].mxu1  ;;  %v9688_v47 = vld [vmem:[#allocation5 + $0xf0] sm:$0xff]  ;;  %v9695_v23 = vld [vmem:[#allocation5 + $0xf8] sm:$0xff] }
 0x163   :  { %4703 = vst [vmem:[#allocation11 + $0x1c0] sm:$0xff] %v7866_v35  ;;  %v1132_v26 = vadd.f32 %v1131_v60, %v9587_v51  ;;  %v1133_v6 = vpop.f32.mrb[18].mxu0  ;;  %4704 = vst [vmem:[#allocation11 + $0x1c8] sm:$0xff] %v7867_v56  ;;  %v1325_v9 = vadd.f32 %v1324_v2, %v9592_v27  ;;  %v1326_v25 = vpop.f32.mrb[18].mxu1  ;;  %v9693_v35 = vld [vmem:[#allocation5 + $0xb8] sm:$0xff] }
 0x164   :  { %v2727_v22 = vmax.f32 %v1130_v59, 0.0  ;;  %v1134_v10 = vadd.f32 %v1133_v6, %v9578_v7  ;;  %v1135_v11 = vpop.f32.mrb[19].mxu0  ;;  %v2729_v14 = vmax.f32 %v1323_v1, 0.0  ;;  %v1327_v31 = vadd.f32 %v1326_v25, %v9583_v21  ;;  %v1328_v38 = vpop.f32.mrb[19].mxu1 }
 0x165   :  { %v2728_v15 = vmax.f32 %v1132_v26, 0.0  ;;  %v1136_v37 = vadd.f32 %v1135_v11, %v9587_v51  ;;  %v2730_v40 = vmax.f32 %v1325_v9, 0.0  ;;  %v1329_v24 = vadd.f32 %v1328_v38, %v9592_v27 }
 0x166   :  { %v2743_v41 = vmax.f32 %v1134_v10, 0.0  ;;  %1624 = vmatmul.mubr.bf16.gmra.mrb[124].mxu0 %v9501_v30  ;;  %v2745_v43 = vmax.f32 %v1327_v31, 0.0  ;;  %1817 = vmatmul.mubr.bf16.gmra.mrb[124].mxu1 %v9501_v30  ;;  %v7326_v6 = vcombine.low %v9686_v46, %v9688_v47  ;;  %v9712_v31 = vld [vmem:[#allocation5 + $0x130] sm:$0xff] }
 0x167   :  { %v7874_v44 = vpack.c.bf16 %v2728_v15, %v2727_v22  ;;  %v2744_v45 = vmax.f32 %v1136_v37, 0.0  ;;  %1859 = vmatprep.mubr.bf16.mxu0 %v11473_v0  ;;  %v7875_v48 = vpack.c.bf16 %v2730_v40, %v2729_v14  ;;  %v2746_v18 = vmax.f32 %v1329_v24, 0.0  ;;  %2052 = vmatprep.mubr.bf16.mxu1 %v11473_v0  ;;  %v9714_v37 = vld [vmem:[#allocation5 + $0x170] sm:$0xff] }
 0x168   :  { %v9690_v49 = vpack.c.bf16 %v2743_v41, %v2727_v22  ;;  %v9697_v56 = vpack.c.bf16 %v2745_v43, %v2729_v14  ;;  %v7327_v14 = vcombine.high %v9686_v46, %v9688_v47  ;;  %v7342_v50 = vcombine.low %v9712_v31, %v9714_v37  ;;  %v9776_v47 = vld [vmem:[#allocation5 + $0x230] sm:$0xff] }
 0x169   :  { %4711 = vst [vmem:[#allocation11 + $0x200] sm:$0xff] %v7874_v44  ;;  %v7882_v30 = vpack.c.bf16 %v2744_v45, %v2743_v41  ;;  %v1139_v59 = vpop.f32.mrb[20].mxu0  ;;  %v9699_v29 = vpack.c.bf16 %v2744_v45, %v2728_v15  ;;  %4712 = vst [vmem:[#allocation11 + $0x208] sm:$0xff] %v7875_v48  ;;  %v7883_v60 = vpack.c.bf16 %v2746_v18, %v2745_v43  ;;  %v1332_v26 = vpop.f32.mrb[20].mxu1 }
 0x16a   :  { %v1140_v1 = vadd.f32 %v1139_v59, %v9578_v7  ;;  %v1141_v2 = vpop.f32.mrb[21].mxu0  ;;  %v9704_v22 = vpack.c.bf16 %v2746_v18, %v2730_v40  ;;  %v1333_v9 = vadd.f32 %v1332_v26, %v9583_v21  ;;  %v1334_v25 = vpop.f32.mrb[21].mxu1  ;;  %v7328_v15 = vcombine.low %v9693_v35, %v9695_v23  ;;  %v9722_v26 = vld [vmem:[#allocation5 + $0x138] sm:$0xff] }
 0x16b   :  { %4719 = vst [vmem:[#allocation11 + $0x240] sm:$0xff] %v7882_v30  ;;  %v1142_v10 = vadd.f32 %v1141_v2, %v9587_v51  ;;  %v1143_v11 = vpop.f32.mrb[22].mxu0  ;;  %4720 = vst [vmem:[#allocation11 + $0x248] sm:$0xff] %v7883_v60  ;;  %v1335_v40 = vadd.f32 %v1334_v25, %v9592_v27  ;;  %v1336_v24 = vpop.f32.mrb[22].mxu1  ;;  %v7329_v43 = vcombine.high %v9693_v35, %v9695_v23  ;;  %v9724_v60 = vld [vmem:[#allocation5 + $0x178] sm:$0xff]  ;;  %v9119_v23 = vld [vmem:[#allocation2 + $0x8] sm:$0xff]  }
 0x16c   :  { %v2759_v38 = vmax.f32 %v1140_v1, 0.0  ;;  %v1144_v41 = vadd.f32 %v1143_v11, %v9578_v7  ;;  %v1145_v44 = vpop.f32.mrb[23].mxu0  ;;  %v2761_v45 = vmax.f32 %v1333_v9, 0.0  ;;  %v1337_v18 = vadd.f32 %v1336_v24, %v9583_v21  ;;  %v1338_v59 = vpop.f32.mrb[23].mxu1  ;;  %v9118_v11 = vld [vmem:[#allocation2] sm:$0xff]  }
 0x16d   :  { %v2760_v48 = vmax.f32 %v1142_v10, 0.0  ;;  %v1146_v30 = vadd.f32 %v1145_v44, %v9587_v51  ;;  %v2762_v1 = vmax.f32 %v1335_v40, 0.0  ;;  %v1339_v25 = vadd.f32 %v1338_v59, %v9592_v27  ;;  %v9749_v59 = vld [vmem:[#allocation5 + $0x1b8] sm:$0xff] }
 0x16e   :  { %v2775_v2 = vmax.f32 %v1144_v41, 0.0  ;;  %1860 = vmatmul.mubr.bf16.vlgmr.msra.gmra.mrb[128].mxu0 %v9118_v11  ;;  %v2777_v10 = vmax.f32 %v1337_v18, 0.0  ;;  %2053 = vmatmul.mubr.bf16.vlgmr.msra.gmra.mrb[128].mxu1 %v9118_v11  ;;  %v7343_v24 = vcombine.high %v9712_v31, %v9714_v37  ;;  %v7345_v18 = vcombine.high %v9722_v26, %v9724_v60 }
 0x16f   :  { %v7890_v9 = vpack.c.bf16 %v2760_v48, %v2759_v38  ;;  %v2776_v19 = vmax.f32 %v1146_v30, 0.0  ;;  %2214 = vmatpush1.bf16.msra.mxu0 %v7310_v53  ;;  %v7891_v40 = vpack.c.bf16 %v2762_v1, %v2761_v45  ;;  %v2778_v44 = vmax.f32 %v1339_v25, 0.0  ;;  %2407 = vmatpush1.bf16.msra.mxu1 %v7312_v58  ;;  %v9742_v30 = vld [vmem:[#allocation5 + $0x1b0] sm:$0xff] }
 0x170   :  { %v9734_v41 = vpack.c.bf16 %v2775_v2, %v2759_v38  ;;  %1869 = vmatprep.mubr.bf16.mxu0 %v11473_v0  ;;  %v9746_v33 = vpack.c.bf16 %v2777_v10, %v2761_v45  ;;  %2062 = vmatprep.mubr.bf16.mxu1 %v11473_v0  ;;  %v7344_v45 = vcombine.low %v9722_v26, %v9724_v60 }
 0x171   :  { %4727 = vst [vmem:[#allocation11 + $0x280] sm:$0xff] %v7890_v9  ;;  %v7898_v53 = vpack.c.bf16 %v2776_v19, %v2775_v2  ;;  %v1149_v38 = vpop.f32.mrb[24].mxu0  ;;  %2215 = vmatprep.subr.bf16.mxu0 %v7327_v14  ;;  %v9753_v54 = vpack.c.bf16 %v2776_v19, %v2760_v48  ;;  %4728 = vst [vmem:[#allocation11 + $0x288] sm:$0xff] %v7891_v40  ;;  %v7899_v58 = vpack.c.bf16 %v2778_v44, %v2777_v10  ;;  %v1342_v11 = vpop.f32.mrb[24].mxu1 }
 0x172   :  { %v1150_v25 = vadd.f32 %v1149_v38, %v9578_v7  ;;  %v1151_v20 = vpop.f32.mrb[25].mxu0  ;;  %2408 = vmatprep.subr.bf16.mxu1 %v7329_v43  ;;  %v9758_v2 = vpack.c.bf16 %v2778_v44, %v2762_v1  ;;  %v1343_v14 = vadd.f32 %v1342_v11, %v9583_v21  ;;  %v1344_v17 = vpop.f32.mrb[25].mxu1  ;;  %v7358_v48 = vcombine.low %v9742_v30, %v9744_v32 }
 0x173   :  { %4735 = vst [vmem:[#allocation11 + $0x2c0] sm:$0xff] %v7898_v53  ;;  %v1152_v9 = vadd.f32 %v1151_v20, %v9587_v51  ;;  %v1153_v19 = vpop.f32.mrb[26].mxu0  ;;  %2216 = vmatpush1.bf16.msra.mxu0 %v7326_v6  ;;  %v7359_v43 = vcombine.high %v9742_v30, %v9744_v32  ;;  %4736 = vst [vmem:[#allocation11 + $0x2c8] sm:$0xff] %v7899_v58  ;;  %v1345_v60 = vadd.f32 %v1344_v17, %v9592_v27  ;;  %v1346_v10 = vpop.f32.mrb[26].mxu1  ;;  %v9778_v6 = vld [vmem:[#allocation5 + $0x270] sm:$0xff] }
 0x174   :  { %v2791_v26 = vmax.f32 %v1150_v25, 0.0  ;;  %v1154_v1 = vadd.f32 %v1153_v19, %v9578_v7  ;;  %v1155_v20 = vpop.f32.mrb[27].mxu0  ;;  %2409 = vmatpush1.bf16.msra.mxu1 %v7328_v15  ;;  %2217 = vmatprep.subr.bf16.mxu0 %v7343_v24  ;;  %v2793_v40 = vmax.f32 %v1343_v14, 0.0  ;;  %v1347_v17 = vadd.f32 %v1346_v10, %v9583_v21  ;;  %v1348_v38 = vpop.f32.mrb[27].mxu1 }
 0x175   :  { %v2792_v44 = vmax.f32 %v1152_v9, 0.0  ;;  %v1156_v53 = vadd.f32 %v1155_v20, %v9587_v51  ;;  %2410 = vmatprep.subr.bf16.mxu1 %v7345_v18  ;;  %v2794_v58 = vmax.f32 %v1345_v60, 0.0  ;;  %v1349_v35 = vadd.f32 %v1348_v38, %v9592_v27  ;;  %v9788_v9 = vld [vmem:[#allocation5 + $0x238] sm:$0xff] }
 0x176   :  { %v2807_v25 = vmax.f32 %v1154_v1, 0.0  ;;  %1870 = vmatmul.mubr.bf16.gmra.mrb[132].mxu0 %v9119_v23  ;;  %v7361_v15 = vcombine.high %v9749_v59, %v9751_v34  ;;  %v2809_v11 = vmax.f32 %v1347_v17, 0.0  ;;  %2063 = vmatmul.mubr.bf16.gmra.mrb[132].mxu1 %v9119_v23  ;;  %v9790_v18 = vld [vmem:[#allocation5 + $0x278] sm:$0xff]  ;;  %v7375_v20 = vcombine.high %v9776_v47, %v9778_v6  ;;  %v9800_v17 = vld [vmem:[#allocation5 + $0x2b0] sm:$0xff] }
 0x177   :  { %v7906_v24 = vpack.c.bf16 %v2792_v44, %v2791_v26  ;;  %v2808_v19 = vmax.f32 %v1156_v53, 0.0  ;;  %1879 = vmatprep.mubr.bf16.mxu0 %v11473_v0  ;;  %v7907_v60 = vpack.c.bf16 %v2794_v58, %v2793_v40  ;;  %v2810_v10 = vmax.f32 %v1349_v35, 0.0  ;;  %2072 = vmatprep.mubr.bf16.mxu1 %v11473_v0  ;;  %v9802_v53 = vld [vmem:[#allocation5 + $0x2f0] sm:$0xff] }
 0x178   :  { %v9792_v1 = vpack.c.bf16 %v2807_v25, %v2791_v26  ;;  %2218 = vmatpush1.bf16.msra.mxu0 %v7342_v50  ;;  %v9804_v38 = vpack.c.bf16 %v2809_v11, %v2793_v40  ;;  %2411 = vmatpush1.bf16.msra.mxu1 %v7344_v45  ;;  %v7377_v0 = vcombine.high %v9788_v9, %v9790_v18 }
 0x179   :  { %4743 = vst [vmem:[#allocation11 + $0x300] sm:$0xff] %v7906_v24  ;;  %v7914_v23 = vpack.c.bf16 %v2808_v19, %v2807_v25  ;;  %v1159_v26 = vpop.f32.mrb[28].mxu0  ;;  %2219 = vmatprep.subr.bf16.mxu0 %v7359_v43  ;;  %v9806_v35 = vpack.c.bf16 %v2808_v19, %v2792_v44  ;;  %4744 = vst [vmem:[#allocation11 + $0x308] sm:$0xff] %v7907_v60  ;;  %v7915_v14 = vpack.c.bf16 %v2810_v10, %v2809_v11  ;;  %v1352_v31 = vpop.f32.mrb[28].mxu1  ;;  %v9819_v11 = vld [vmem:[#allocation5 + $0x2b8] sm:$0xff] }
 0x17a   :  { %v1160_v50 = vadd.f32 %v1159_v26, %v9578_v7  ;;  %v1161_v37 = vpop.f32.mrb[29].mxu0  ;;  %2412 = vmatprep.subr.bf16.mxu1 %v7361_v15  ;;  %v9811_v46 = vpack.c.bf16 %v2810_v10, %v2794_v58  ;;  %v1353_v40 = vadd.f32 %v1352_v31, %v9583_v21  ;;  %v1354_v43 = vpop.f32.mrb[29].mxu1  ;;  %v7376_v25 = vcombine.low %v9788_v9, %v9790_v18  ;;  %v9821_v15 = vld [vmem:[#allocation5 + $0x2f8] sm:$0xff] }
 0x17b   :  { %4751 = vst [vmem:[#allocation11 + $0x340] sm:$0xff] %v7914_v23  ;;  %v1162_v45 = vadd.f32 %v1161_v37, %v9587_v51  ;;  %v1163_v44 = vpop.f32.mrb[30].mxu0  ;;  %4752 = vst [vmem:[#allocation11 + $0x348] sm:$0xff] %v7915_v14  ;;  %v1355_v19 = vadd.f32 %v1354_v43, %v9592_v27  ;;  %v1356_v10 = vpop.f32.mrb[30].mxu1  ;;  %v7391_v9 = vcombine.high %v9800_v17, %v9802_v53  ;;  %v9835_v43 = vld [vmem:[#allocation5 + $0x330] sm:$0xff] }
 0x17c   :  { %v2823_v58 = vmax.f32 %v1160_v50, 0.0  ;;  %v1164_v60 = vadd.f32 %v1163_v44, %v9578_v7  ;;  %v1165_v23 = vpop.f32.mrb[31].mxu0  ;;  %2220 = vmatpush1.bf16.msra.mxu0 %v7358_v48  ;;  %v2825_v18 = vmax.f32 %v1353_v40, 0.0  ;;  %v1357_v31 = vadd.f32 %v1356_v10, %v9583_v21  ;;  %v1358_v50 = vpop.f32.mrb[31].mxu1  ;;  %v9837_v44 = vld [vmem:[#allocation5 + $0x370] sm:$0xff] }
 0x17d   :  { %v2824_v26 = vmax.f32 %v1162_v45, 0.0  ;;  %v1166_v14 = vadd.f32 %v1165_v23, %v9587_v51  ;;  %v11475_v37 = vcombine.low %v9749_v59, %v9751_v34  ;;  %2221 = vmatprep.subr.bf16.mxu0 %v7375_v20  ;;  %v2826_v30 = vmax.f32 %v1355_v19, 0.0  ;;  %v9120_v40 = vld [vmem:[#allocation2 + $0x10] sm:$0xff]   ;;  %v9845_v20 = vld [vmem:[#allocation5 + $0x338] sm:$0xff] }
 0x17e   :  { %v2839_v32 = vmax.f32 %v1164_v60, 0.0  ;;  %v1359_v48 = vadd.f32 %v1358_v50, %v9592_v27  ;;  %1880 = vmatmul.mubr.bf16.gmra.mrb[136].mxu0 %v9120_v40  ;;  %v7393_v45 = vcombine.high %v9819_v11, %v9821_v15  ;;  %v2841_v23 = vmax.f32 %v1357_v31, 0.0  ;;  %2073 = vmatmul.mubr.bf16.gmra.mrb[136].mxu1 %v9120_v40  ;;  %v9847_v19 = vld [vmem:[#allocation5 + $0x378] sm:$0xff]  ;;  %v9859_v40 = vld [vmem:[#allocation5 + $0x3b0] sm:$0xff] }
 0x17f   :  { %2413 = vmatpush1.bf16.msra.mxu1 %v11475_v37  ;;  %v7922_v10 = vpack.c.bf16 %v2824_v26, %v2823_v58  ;;  %v2840_v24 = vmax.f32 %v1166_v14, 0.0  ;;  %v11476_v59 = vmov 0   ;;  %v7392_v34 = vcombine.low %v9819_v11, %v9821_v15 }
 0x180   :  { %2414 = vmatprep.subr.bf16.mxu1 %v7377_v0  ;;  %1889 = vmatprep.mubr.bf16.mxu0 %v11476_v59  ;;  %v7923_v60 = vpack.c.bf16 %v2826_v30, %v2825_v18  ;;  %v9849_v50 = vpack.c.bf16 %v2839_v32, %v2823_v58  ;;  %v2842_v0 = vmax.f32 %v1359_v48, 0.0  ;;  %v11478_v31 = vcombine.low %v9776_v47, %v9778_v6  ;;  %v9861_v58 = vld [vmem:[#allocation5 + $0x3f0] sm:$0xff] }
 0x181   :  { %2082 = vmatprep.mubr.bf16.mxu1 %v11476_v59  ;;  %v7407_v14 = vcombine.high %v9835_v43, %v9837_v44  ;;  %4759 = vst [vmem:[#allocation11 + $0x380] sm:$0xff] %v7922_v10  ;;  %v9857_v37 = vpack.c.bf16 %v2841_v23, %v2825_v18  ;;  %v7930_v11 = vpack.c.bf16 %v2840_v24, %v2839_v32  ;;  %v1169_v15 = vpop.f32.mrb[32].mxu0  ;;  %v1362_v6 = vpop.f32.mrb[32].mxu1 }
 0x182   :  { %11477 = vst [vmem:[#allocation18_spill] sm:$0xff] %v9849_v50  ;;  %2222 = vmatpush1.bf16.msra.mxu0 %v11478_v31  ;;  %v9863_v48 = vpack.c.bf16 %v2840_v24, %v2824_v26  ;;  %4760 = vst [vmem:[#allocation11 + $0x388] sm:$0xff] %v7923_v60  ;;  %v7931_v50 = vpack.c.bf16 %v2842_v0, %v2841_v23  ;;  %v1170_v47 = vadd.f32 %v1169_v15, %v9578_v7  ;;  %v1171_v31 = vpop.f32.mrb[33].mxu0  ;;  %v1364_v10 = vpop.f32.mrb[33].mxu1  ;;  %v9876_v60 = vld [vmem:[#allocation5 + $0x3b8] sm:$0xff] }
 0x183   :  { %11479 = vst [vmem:[#allocation19_spill] sm:$0xff] %v9857_v37  ;;  %2415 = vmatpush1.bf16.msra.mxu1 %v7376_v25  ;;  %2223 = vmatprep.subr.bf16.mxu0 %v7391_v9  ;;  %v7409_v18 = vcombine.high %v9845_v20, %v9847_v19  ;;  %v9868_v32 = vpack.c.bf16 %v2842_v0, %v2826_v30  ;;  %4767 = vst [vmem:[#allocation11 + $0x3c0] sm:$0xff] %v7930_v11  ;;  %v1173_v24 = vpop.f32.mrb[34].mxu0  ;;  %v1366_v15 = vpop.f32.mrb[34].mxu1 }
 0x184   :  { %2416 = vmatprep.subr.bf16.mxu1 %v7393_v45  ;;  %v1363_v25 = vadd.f32 %v1362_v6, %v9583_v21  ;;  %v1172_v9 = vadd.f32 %v1171_v31, %v9587_v51  ;;  %v7406_v26 = vcombine.low %v9835_v43, %v9837_v44  ;;  %v7408_v23 = vcombine.low %v9845_v20, %v9847_v19  ;;  %v9878_v45 = vld [vmem:[#allocation5 + $0x3f8] sm:$0xff]  ;;  %v1175_v6 = vpop.f32.mrb[35].mxu0 }
 0x185   :  { %11480 = vst [vmem:[#allocation20_spill] sm:$0xff] %v9868_v32  ;;  %4768 = vst [vmem:[#allocation11 + $0x3c8] sm:$0xff] %v7931_v50  ;;  %v2855_v30 = vmax.f32 %v1170_v47, 0.0  ;;  %v1365_v0 = vadd.f32 %v1364_v10, %v9592_v27  ;;  %v1174_v11 = vadd.f32 %v1173_v24, %v9578_v7  ;;  %v11481_v31 = vcombine.low %v9800_v17, %v9802_v53  ;;  %v1368_v47 = vpop.f32.mrb[35].mxu1  ;;  %v9121_v32 = vld [vmem:[#allocation2 + $0x18] sm:$0xff]  }
 0x186   :  { %v7423_v43 = vcombine.high %v9859_v40, %v9861_v58  ;;  %v2857_v44 = vmax.f32 %v1363_v25, 0.0  ;;  %v2856_v20 = vmax.f32 %v1172_v9, 0.0  ;;  %v1367_v19 = vadd.f32 %v1366_v15, %v9583_v21  ;;  %1890 = vmatmul.mubr.bf16.gmra.mrb[140].mxu0 %v9121_v32  ;;  %2083 = vmatmul.mubr.bf16.gmra.mrb[140].mxu1 %v9121_v32 }
 0x187   :  { %2224 = vmatpush1.bf16.msra.mxu0 %v11481_v31  ;;  %v1176_v50 = vadd.f32 %v1175_v6, %v9587_v51  ;;  %2417 = vmatpush1.bf16.msra.mxu1 %v7392_v34  ;;  %v2858_v10 = vmax.f32 %v1365_v0, 0.0  ;;  %v2871_v24 = vmax.f32 %v1174_v11, 0.0  ;;  %v1369_v37 = vadd.f32 %v1368_v47, %v9592_v27  ;;  %v8990_v31 = vld [vmem:[#allocation8 + $0x40] sm:$0xff]  }
 0x188   :  { %2225 = vmatprep.subr.bf16.mxu0 %v7407_v14  ;;  %2418 = vmatprep.subr.bf16.mxu1 %v7409_v18  ;;  %v7425_v17 = vcombine.high %v9876_v60, %v9878_v45  ;;  %v7938_v53 = vpack.c.bf16 %v2856_v20, %v2855_v30  ;;  %v2873_v25 = vmax.f32 %v1367_v19, 0.0  ;;  %v7422_v34 = vcombine.low %v9859_v40, %v9861_v58 }
 0x189   :  { %v2872_v9 = vmax.f32 %v1176_v50, 0.0  ;;  %1899 = vmatprep.mubr.bf16.mxu0 %v11476_v59  ;;  %v7939_v14 = vpack.c.bf16 %v2858_v10, %v2857_v44  ;;  %v9895_v0 = vpack.c.bf16 %v2871_v24, %v2855_v30  ;;  %v2874_v11 = vmax.f32 %v1369_v37, 0.0  ;;  %2092 = vmatprep.mubr.bf16.mxu1 %v11476_v59  ;;  %v1179_v32 = vpop.f32.mrb[36].mxu0  ;;  %v1372_v58 = vpop.f32.mrb[36].mxu1 }
 0x18a   :  { %v7424_v18 = vcombine.low %v9876_v60, %v9878_v45  ;;  %4775 = vst [vmem:[#allocation11 + $0x400] sm:$0xff] %v7938_v53  ;;  %v9900_v15 = vpack.c.bf16 %v2873_v25, %v2857_v44  ;;  %v1180_v37 = vadd.f32 %v1179_v32, %v9578_v7  ;;  %v1181_v30 = vpop.f32.mrb[37].mxu0  ;;  %v1373_v60 = vadd.f32 %v1372_v58, %v9583_v21 }
 0x18b   :  { %2226 = vmatpush1.bf16.msra.mxu0 %v7406_v26  ;;  %v7946_v6 = vpack.c.bf16 %v2872_v9, %v2871_v24  ;;  %2419 = vmatpush1.bf16.msra.mxu1 %v7408_v23  ;;  %v9902_v19 = vpack.c.bf16 %v2872_v9, %v2856_v20  ;;  %4776 = vst [vmem:[#allocation11 + $0x408] sm:$0xff] %v7939_v14  ;;  %v8992_v26 = vld [vmem:[#allocation8 + $0xc0] sm:$0xff]   ;;  %v1374_v23 = vpop.f32.mrb[37].mxu1 }
 0x18c   :  { %2227 = vmatprep.subr.bf16.mxu0 %v7423_v43  ;;  %v7947_v40 = vpack.c.bf16 %v2874_v11, %v2873_v25  ;;  %2420 = vmatprep.subr.bf16.mxu1 %v7425_v17  ;;  %v9905_v50 = vpack.c.bf16 %v2874_v11, %v2858_v10  ;;  %v1182_v45 = vadd.f32 %v1181_v30, %v9587_v51  ;;  %v1183_v43 = vpop.f32.mrb[38].mxu0  ;;  %v2887_v44 = vmax.f32 %v1180_v37, 0.0  ;;  %v1376_v24 = vpop.f32.mrb[38].mxu1 }
 0x18d   :  { %4783 = vst [vmem:[#allocation11 + $0x440] sm:$0xff] %v7946_v6  ;;  %v1375_v20 = vadd.f32 %v1374_v23, %v9592_v27  ;;  %v1184_v47 = vadd.f32 %v1183_v43, %v9578_v7  ;;  %v1185_v53 = vpop.f32.mrb[39].mxu0  ;;  %v2889_v17 = vmax.f32 %v1373_v60, 0.0  ;;  %v1377_v10 = vadd.f32 %v1376_v24, %v9583_v21  ;;  %v1378_v14 = vpop.f32.mrb[39].mxu1 }
 0x18e   :  { %4784 = vst [vmem:[#allocation11 + $0x448] sm:$0xff] %v7947_v40  ;;  %v2888_v25 = vmax.f32 %v1182_v45, 0.0  ;;  %v1186_v9 = vadd.f32 %v1185_v53, %v9587_v51  ;;  %v1379_v32 = vadd.f32 %v1378_v14, %v9592_v27  ;;  %v9122_v40 = vld [vmem:[#allocation2 + $0x20] sm:$0xff]  }
 0x18f   :  { %2228 = vmatpush1.bf16.msra.mxu0 %v7422_v34  ;;  %2421 = vmatpush1.bf16.msra.mxu1 %v7424_v18  ;;  %v2890_v11 = vmax.f32 %v1375_v20, 0.0  ;;  %v2903_v6 = vmax.f32 %v1184_v47, 0.0  ;;  %v2905_v58 = vmax.f32 %v1377_v10, 0.0 }
 0x190   :  { %8066 = vmatprep.subr.bf16.mxu0 %v8990_v31  ;;  %1900 = vmatmul.mubr.bf16.gmra.mrb[144].mxu0 %v9122_v40  ;;  %v7954_v37 = vpack.c.bf16 %v2888_v25, %v2887_v44  ;;  %v2904_v30 = vmax.f32 %v1186_v9, 0.0  ;;  %v2906_v45 = vmax.f32 %v1379_v32, 0.0 }
 0x191   :  { %8178 = vmatprep.subr.bf16.mxu1 %v8992_v26  ;;  %2093 = vmatmul.mubr.bf16.gmra.mrb[144].mxu1 %v9122_v40  ;;  %v7955_v34 = vpack.c.bf16 %v2890_v11, %v2889_v17  ;;  %v9915_v60 = vpack.c.bf16 %v2903_v6, %v2887_v44  ;;  %v9918_v18 = vpack.c.bf16 %v2905_v58, %v2889_v17  ;;  %v1189_v23 = vpop.f32.mrb[40].mxu0  ;;  %v1382_v47 = vpop.f32.mrb[40].mxu1 }
 0x192   :  { %1909 = vmatprep.mubr.bf16.mxu0 %v11476_v59  ;;  %2102 = vmatprep.mubr.bf16.mxu1 %v11476_v59  ;;  %4791 = vst [vmem:[#allocation11 + $0x480] sm:$0xff] %v7954_v37  ;;  %v7962_v31 = vpack.c.bf16 %v2904_v30, %v2903_v6  ;;  %v9920_v43 = vpack.c.bf16 %v2904_v30, %v2888_v25  ;;  %v1191_v24 = vpop.f32.mrb[41].mxu0  ;;  %v1384_v9 = vpop.f32.mrb[41].mxu1 }
 0x193   :  { %11482 = vst [vmem:[#allocation21_spill] sm:$0xff] %v9915_v60  ;;  %11483 = vst [vmem:[#allocation22_spill] sm:$0xff] %v9918_v18  ;;  %v7963_v26 = vpack.c.bf16 %v2906_v45, %v2905_v58  ;;  %v1190_v20 = vadd.f32 %v1189_v23, %v9578_v7  ;;  %v9923_v53 = vpack.c.bf16 %v2906_v45, %v2890_v11  ;;  %v1193_v17 = vpop.f32.mrb[42].mxu0  ;;  %v1386_v32 = vpop.f32.mrb[42].mxu1 }
 0x194   :  { %11484 = vst [vmem:[#allocation23_spill] sm:$0xff] %v9920_v43  ;;  %4792 = vst [vmem:[#allocation11 + $0x488] sm:$0xff] %v7955_v34  ;;  %v1383_v44 = vadd.f32 %v1382_v47, %v9583_v21  ;;  %v1192_v10 = vadd.f32 %v1191_v24, %v9587_v51  ;;  %v1385_v25 = vadd.f32 %v1384_v9, %v9592_v27  ;;  %v1195_v40 = vpop.f32.mrb[43].mxu0  ;;  %v1388_v34 = vpop.f32.mrb[43].mxu1  ;;  %v9123_v47 = vld [vmem:[#allocation2 + $0x28] sm:$0xff]  }
 0x195   :  { %11485 = vst [vmem:[#allocation24_spill] sm:$0xff] %v9923_v53  ;;  %4799 = vst [vmem:[#allocation11 + $0x4c0] sm:$0xff] %v7962_v31  ;;  %v2919_v14 = vmax.f32 %v1190_v20, 0.0  ;;  %v1194_v6 = vadd.f32 %v1193_v17, %v9578_v7  ;;  %v1387_v11 = vadd.f32 %v1386_v32, %v9583_v21  ;;  %v1196_v30 = vadd.f32 %v1195_v40, %v9587_v51 }
 0x196   :  { %4800 = vst [vmem:[#allocation11 + $0x4c8] sm:$0xff] %v7963_v26  ;;  %v2921_v37 = vmax.f32 %v1383_v44, 0.0  ;;  %v2920_v58 = vmax.f32 %v1192_v10, 0.0  ;;  %v2922_v45 = vmax.f32 %v1385_v25, 0.0  ;;  %v1389_v23 = vadd.f32 %v1388_v34, %v9592_v27 }
 0x197   :  { %v2935_v31 = vmax.f32 %v1194_v6, 0.0  ;;  %v2937_v20 = vmax.f32 %v1387_v11, 0.0  ;;  %v2936_v24 = vmax.f32 %v1196_v30, 0.0 }
 0x198   :  { %1910 = vmatmul.mubr.bf16.gmra.mrb[148].mxu0 %v9123_v47  ;;  %v7970_v26 = vpack.c.bf16 %v2920_v58, %v2919_v14  ;;  %v7971_v9 = vpack.c.bf16 %v2922_v45, %v2921_v37  ;;  %v2938_v10 = vmax.f32 %v1389_v23, 0.0 }
 0x199   :  { %2103 = vmatmul.mubr.bf16.gmra.mrb[148].mxu1 %v9123_v47  ;;  %1919 = vmatprep.mubr.bf16.mxu0 %v11476_v59  ;;  %v9933_v44 = vpack.c.bf16 %v2935_v31, %v2919_v14  ;;  %v9936_v17 = vpack.c.bf16 %v2937_v20, %v2921_v37  ;;  %v7978_v25 = vpack.c.bf16 %v2936_v24, %v2935_v31  ;;  %v1199_v6 = vpop.f32.mrb[44].mxu0  ;;  %v1392_v30 = vpop.f32.mrb[44].mxu1 }
 0x19a   :  { %2112 = vmatprep.mubr.bf16.mxu1 %v11476_v59  ;;  %4807 = vst [vmem:[#allocation11 + $0x500] sm:$0xff] %v7970_v26  ;;  %v9938_v32 = vpack.c.bf16 %v2936_v24, %v2920_v58  ;;  %4808 = vst [vmem:[#allocation11 + $0x508] sm:$0xff] %v7971_v9  ;;  %v7979_v40 = vpack.c.bf16 %v2938_v10, %v2937_v20  ;;  %v1200_v11 = vadd.f32 %v1199_v6, %v9578_v7  ;;  %v1201_v34 = vpop.f32.mrb[45].mxu0  ;;  %v1394_v26 = vpop.f32.mrb[45].mxu1 }
 0x19b   :  { %11486 = vst [vmem:[#allocation25_spill] sm:$0xff] %v9933_v44  ;;  %11487 = vst [vmem:[#allocation26_spill] sm:$0xff] %v9936_v17  ;;  %v9941_v47 = vpack.c.bf16 %v2938_v10, %v2922_v45  ;;  %v1393_v14 = vadd.f32 %v1392_v30, %v9583_v21  ;;  %v1202_v23 = vadd.f32 %v1201_v34, %v9587_v51  ;;  %v1203_v37 = vpop.f32.mrb[46].mxu0  ;;  %v1396_v20 = vpop.f32.mrb[46].mxu1 }
 0x19c   :  { %11488 = vst [vmem:[#allocation27_spill] sm:$0xff] %v9938_v32  ;;  %4815 = vst [vmem:[#allocation11 + $0x540] sm:$0xff] %v7978_v25  ;;  %v2951_v31 = vmax.f32 %v1200_v11, 0.0  ;;  %v1395_v58 = vadd.f32 %v1394_v26, %v9592_v27  ;;  %v1204_v24 = vadd.f32 %v1203_v37, %v9578_v7  ;;  %v1205_v9 = vpop.f32.mrb[47].mxu0  ;;  %v1397_v45 = vadd.f32 %v1396_v20, %v9583_v21  ;;  %v1398_v25 = vpop.f32.mrb[47].mxu1 }
 0x19d   :  { %11489 = vst [vmem:[#allocation28_spill] sm:$0xff] %v9941_v47  ;;  %4816 = vst [vmem:[#allocation11 + $0x548] sm:$0xff] %v7979_v40  ;;  %v2953_v6 = vmax.f32 %v1393_v14, 0.0  ;;  %v2952_v17 = vmax.f32 %v1202_v23, 0.0  ;;  %v1206_v10 = vadd.f32 %v1205_v9, %v9587_v51  ;;  %v1399_v34 = vadd.f32 %v1398_v25, %v9592_v27  ;;  %v9124_v47 = vld [vmem:[#allocation2 + $0x30] sm:$0xff]  }
 0x19e   :  { %v2954_v30 = vmax.f32 %v1395_v58, 0.0  ;;  %v2967_v44 = vmax.f32 %v1204_v24, 0.0  ;;  %v2969_v11 = vmax.f32 %v1397_v45, 0.0 }
 0x19f   :  { %v7986_v40 = vpack.c.bf16 %v2952_v17, %v2951_v31  ;;  %v2968_v26 = vmax.f32 %v1206_v10, 0.0  ;;  %v2970_v23 = vmax.f32 %v1399_v34, 0.0 }
 0x1a0   :  { %1920 = vmatmul.mubr.bf16.gmra.mrb[152].mxu0 %v9124_v47  ;;  %v7987_v37 = vpack.c.bf16 %v2954_v30, %v2953_v6  ;;  %v9951_v14 = vpack.c.bf16 %v2967_v44, %v2951_v31  ;;  %v9954_v20 = vpack.c.bf16 %v2969_v11, %v2953_v6 }
 0x1a1   :  { %2113 = vmatmul.mubr.bf16.gmra.mrb[152].mxu1 %v9124_v47  ;;  %1929 = vmatprep.mubr.bf16.mxu0 %v11476_v59  ;;  %4823 = vst [vmem:[#allocation11 + $0x580] sm:$0xff] %v7986_v40  ;;  %v7994_v58 = vpack.c.bf16 %v2968_v26, %v2967_v44  ;;  %v1209_v24 = vpop.f32.mrb[48].mxu0  ;;  %v9956_v9 = vpack.c.bf16 %v2968_v26, %v2952_v17  ;;  %v1402_v47 = vpop.f32.mrb[48].mxu1 }
 0x1a2   :  { %11490 = vst [vmem:[#allocation29_spill] sm:$0xff] %v9951_v14  ;;  %2122 = vmatprep.mubr.bf16.mxu1 %v11476_v59  ;;  %11491 = vst [vmem:[#allocation30_spill] sm:$0xff] %v9954_v20  ;;  %v7995_v25 = vpack.c.bf16 %v2970_v23, %v2969_v11  ;;  %v1210_v45 = vadd.f32 %v1209_v24, %v9578_v7  ;;  %v1211_v10 = vpop.f32.mrb[49].mxu0  ;;  %v9959_v32 = vpack.c.bf16 %v2970_v23, %v2954_v30  ;;  %v1404_v40 = vpop.f32.mrb[49].mxu1 }
 0x1a3   :  { %11492 = vst [vmem:[#allocation31_spill] sm:$0xff] %v9956_v9  ;;  %4824 = vst [vmem:[#allocation11 + $0x588] sm:$0xff] %v7987_v37  ;;  %v1403_v31 = vadd.f32 %v1402_v47, %v9583_v21  ;;  %v1212_v34 = vadd.f32 %v1211_v10, %v9587_v51  ;;  %v1213_v6 = vpop.f32.mrb[50].mxu0  ;;  %v1405_v17 = vadd.f32 %v1404_v40, %v9592_v27  ;;  %v1406_v11 = vpop.f32.mrb[50].mxu1 }
 0x1a4   :  { %11493 = vst [vmem:[#allocation32_spill] sm:$0xff] %v9959_v32  ;;  %4831 = vst [vmem:[#allocation11 + $0x5c0] sm:$0xff] %v7994_v58  ;;  %v2983_v44 = vmax.f32 %v1210_v45, 0.0  ;;  %v1214_v26 = vadd.f32 %v1213_v6, %v9578_v7  ;;  %v1215_v37 = vpop.f32.mrb[51].mxu0  ;;  %v1407_v30 = vadd.f32 %v1406_v11, %v9583_v21  ;;  %v1408_v58 = vpop.f32.mrb[51].mxu1  ;;  %v9125_v32 = vld [vmem:[#allocation2 + $0x38] sm:$0xff]  }
 0x1a5   :  { %4832 = vst [vmem:[#allocation11 + $0x5c8] sm:$0xff] %v7995_v25  ;;  %v2985_v24 = vmax.f32 %v1403_v31, 0.0  ;;  %v2984_v20 = vmax.f32 %v1212_v34, 0.0  ;;  %v1216_v23 = vadd.f32 %v1215_v37, %v9587_v51  ;;  %v2986_v47 = vmax.f32 %v1405_v17, 0.0 }
 0x1a6   :  { %v2999_v14 = vmax.f32 %v1214_v26, 0.0  ;;  %v1409_v10 = vadd.f32 %v1408_v58, %v9592_v27  ;;  %v3001_v45 = vmax.f32 %v1407_v30, 0.0 }
 0x1a7   :  { %v8002_v25 = vpack.c.bf16 %v2984_v20, %v2983_v44  ;;  %v3000_v40 = vmax.f32 %v1216_v23, 0.0  ;;  %v8003_v6 = vpack.c.bf16 %v2986_v47, %v2985_v24 }
 0x1a8   :  { %1930 = vmatmul.mubr.bf16.gmra.mrb[156].mxu0 %v9125_v32  ;;  %v9969_v31 = vpack.c.bf16 %v2999_v14, %v2983_v44  ;;  %v3002_v34 = vmax.f32 %v1409_v10, 0.0  ;;  %v9972_v11 = vpack.c.bf16 %v3001_v45, %v2985_v24 }
 0x1a9   :  { %2123 = vmatmul.mubr.bf16.gmra.mrb[156].mxu1 %v9125_v32  ;;  %1939 = vmatprep.mubr.bf16.mxu0 %v11476_v59  ;;  %4839 = vst [vmem:[#allocation11 + $0x600] sm:$0xff] %v8002_v25  ;;  %v8010_v17 = vpack.c.bf16 %v3000_v40, %v2999_v14  ;;  %v1219_v26 = vpop.f32.mrb[52].mxu0  ;;  %v9974_v37 = vpack.c.bf16 %v3000_v40, %v2984_v20  ;;  %4840 = vst [vmem:[#allocation11 + $0x608] sm:$0xff] %v8003_v6  ;;  %v1412_v32 = vpop.f32.mrb[52].mxu1 }
 0x1aa   :  { %11494 = vst [vmem:[#allocation33_spill] sm:$0xff] %v9969_v31  ;;  %2132 = vmatprep.mubr.bf16.mxu1 %v11476_v59  ;;  %11495 = vst [vmem:[#allocation34_spill] sm:$0xff] %v9972_v11  ;;  %v8011_v58 = vpack.c.bf16 %v3002_v34, %v3001_v45  ;;  %v1220_v30 = vadd.f32 %v1219_v26, %v9578_v7  ;;  %v1221_v23 = vpop.f32.mrb[53].mxu0  ;;  %v9977_v9 = vpack.c.bf16 %v3002_v34, %v2986_v47  ;;  %v1414_v25 = vpop.f32.mrb[53].mxu1 }
 0x1ab   :  { %11496 = vst [vmem:[#allocation35_spill] sm:$0xff] %v9974_v37  ;;  %4847 = vst [vmem:[#allocation11 + $0x640] sm:$0xff] %v8010_v17  ;;  %v1413_v44 = vadd.f32 %v1412_v32, %v9583_v21  ;;  %v1222_v10 = vadd.f32 %v1221_v23, %v9587_v51  ;;  %v1223_v24 = vpop.f32.mrb[54].mxu0  ;;  %v1415_v20 = vadd.f32 %v1414_v25, %v9592_v27  ;;  %v1416_v45 = vpop.f32.mrb[54].mxu1 }
 0x1ac   :  { %11497 = vst [vmem:[#allocation36_spill] sm:$0xff] %v9977_v9  ;;  %4848 = vst [vmem:[#allocation11 + $0x648] sm:$0xff] %v8011_v58  ;;  %v3015_v14 = vmax.f32 %v1220_v30, 0.0  ;;  %v1224_v40 = vadd.f32 %v1223_v24, %v9578_v7  ;;  %v1225_v6 = vpop.f32.mrb[55].mxu0  ;;  %v1417_v47 = vadd.f32 %v1416_v45, %v9583_v21  ;;  %v1418_v17 = vpop.f32.mrb[55].mxu1  ;;  %v9126_v9 = vld [vmem:[#allocation2 + $0x40] sm:$0xff]  }
 0x1ad   :  { %v3017_v26 = vmax.f32 %v1413_v44, 0.0  ;;  %v3016_v11 = vmax.f32 %v1222_v10, 0.0  ;;  %v1226_v34 = vadd.f32 %v1225_v6, %v9587_v51  ;;  %v3018_v32 = vmax.f32 %v1415_v20, 0.0 }
 0x1ae   :  { %v3031_v31 = vmax.f32 %v1224_v40, 0.0  ;;  %v1419_v23 = vadd.f32 %v1418_v17, %v9592_v27  ;;  %v3033_v30 = vmax.f32 %v1417_v47, 0.0 }
 0x1af   :  { %v8018_v58 = vpack.c.bf16 %v3016_v11, %v3015_v14  ;;  %v3032_v25 = vmax.f32 %v1226_v34, 0.0  ;;  %v8019_v24 = vpack.c.bf16 %v3018_v32, %v3017_v26 }
 0x1b0   :  { %1940 = vmatmul.mubr.bf16.gmra.mrb[160].mxu0 %v9126_v9  ;;  %v9987_v44 = vpack.c.bf16 %v3031_v31, %v3015_v14  ;;  %v3034_v10 = vmax.f32 %v1419_v23, 0.0  ;;  %v9990_v45 = vpack.c.bf16 %v3033_v30, %v3017_v26 }
 0x1b1   :  { %2133 = vmatmul.mubr.bf16.gmra.mrb[160].mxu1 %v9126_v9  ;;  %1949 = vmatprep.mubr.bf16.mxu0 %v11476_v59  ;;  %4855 = vst [vmem:[#allocation11 + $0x680] sm:$0xff] %v8018_v58  ;;  %v8026_v20 = vpack.c.bf16 %v3032_v25, %v3031_v31  ;;  %v1229_v40 = vpop.f32.mrb[56].mxu0  ;;  %v9992_v6 = vpack.c.bf16 %v3032_v25, %v3016_v11  ;;  %4856 = vst [vmem:[#allocation11 + $0x688] sm:$0xff] %v8019_v24  ;;  %v1422_v9 = vpop.f32.mrb[56].mxu1 }
 0x1b2   :  { %11498 = vst [vmem:[#allocation37_spill] sm:$0xff] %v9987_v44  ;;  %2142 = vmatprep.mubr.bf16.mxu1 %v11476_v59  ;;  %11499 = vst [vmem:[#allocation38_spill] sm:$0xff] %v9990_v45  ;;  %v8027_v17 = vpack.c.bf16 %v3034_v10, %v3033_v30  ;;  %v1230_v47 = vadd.f32 %v1229_v40, %v9578_v7  ;;  %v1231_v34 = vpop.f32.mrb[57].mxu0  ;;  %v9995_v37 = vpack.c.bf16 %v3034_v10, %v3018_v32  ;;  %v1424_v58 = vpop.f32.mrb[57].mxu1 }
 0x1b3   :  { %11500 = vst [vmem:[#allocation39_spill] sm:$0xff] %v9992_v6  ;;  %4863 = vst [vmem:[#allocation11 + $0x6c0] sm:$0xff] %v8026_v20  ;;  %v1423_v14 = vadd.f32 %v1422_v9, %v9583_v21  ;;  %v1232_v23 = vadd.f32 %v1231_v34, %v9587_v51  ;;  %v1233_v26 = vpop.f32.mrb[58].mxu0  ;;  %v1425_v11 = vadd.f32 %v1424_v58, %v9592_v27  ;;  %v1426_v30 = vpop.f32.mrb[58].mxu1 }
 0x1b4   :  { %11501 = vst [vmem:[#allocation40_spill] sm:$0xff] %v9995_v37  ;;  %4864 = vst [vmem:[#allocation11 + $0x6c8] sm:$0xff] %v8027_v17  ;;  %v3047_v31 = vmax.f32 %v1230_v47, 0.0  ;;  %v1234_v25 = vadd.f32 %v1233_v26, %v9578_v7  ;;  %v1235_v24 = vpop.f32.mrb[59].mxu0  ;;  %v1427_v32 = vadd.f32 %v1426_v30, %v9583_v21  ;;  %v1428_v20 = vpop.f32.mrb[59].mxu1  ;;  %v9127_v37 = vld [vmem:[#allocation2 + $0x48] sm:$0xff]  }
 0x1b5   :  { %v3049_v40 = vmax.f32 %v1423_v14, 0.0  ;;  %v3048_v45 = vmax.f32 %v1232_v23, 0.0  ;;  %v1236_v10 = vadd.f32 %v1235_v24, %v9587_v51  ;;  %v3050_v9 = vmax.f32 %v1425_v11, 0.0 }
 0x1b6   :  { %v3063_v44 = vmax.f32 %v1234_v25, 0.0  ;;  %v1429_v34 = vadd.f32 %v1428_v20, %v9592_v27  ;;  %v3065_v47 = vmax.f32 %v1427_v32, 0.0 }
 0x1b7   :  { %v8034_v17 = vpack.c.bf16 %v3048_v45, %v3047_v31  ;;  %v3064_v58 = vmax.f32 %v1236_v10, 0.0  ;;  %v8035_v23 = vpack.c.bf16 %v3050_v9, %v3049_v40 }
 0x1b8   :  { %1950 = vmatmul.mubr.bf16.gmra.mrb[164].mxu0 %v9127_v37  ;;  %v10006_v26 = vpack.c.bf16 %v3063_v44, %v3047_v31  ;;  %v3066_v30 = vmax.f32 %v1429_v34, 0.0  ;;  %v10009_v11 = vpack.c.bf16 %v3065_v47, %v3049_v40 }
 0x1b9   :  { %2143 = vmatmul.mubr.bf16.gmra.mrb[164].mxu1 %v9127_v37  ;;  %1959 = vmatprep.mubr.bf16.mxu0 %v11476_v59  ;;  %4871 = vst [vmem:[#allocation11 + $0x700] sm:$0xff] %v8034_v17  ;;  %v8042_v25 = vpack.c.bf16 %v3064_v58, %v3063_v44  ;;  %v1239_v24 = vpop.f32.mrb[60].mxu0  ;;  %v10011_v20 = vpack.c.bf16 %v3064_v58, %v3048_v45  ;;  %4872 = vst [vmem:[#allocation11 + $0x708] sm:$0xff] %v8035_v23  ;;  %v1432_v10 = vpop.f32.mrb[60].mxu1  ;;  %v11506_v45 = vsub.s32 4, %v9566_v12 }
 0x1ba   :  { %11502 = vst [vmem:[#allocation41_spill] sm:$0xff] %v10006_v26  ;;  %2152 = vmatprep.mubr.bf16.mxu1 %v11476_v59  ;;  %11503 = vst [vmem:[#allocation42_spill] sm:$0xff] %v10009_v11  ;;  %v8043_v32 = vpack.c.bf16 %v3066_v30, %v3065_v47  ;;  %v1240_v37 = vadd.f32 %v1239_v24, %v9578_v7  ;;  %v1241_v6 = vpop.f32.mrb[61].mxu0  ;;  %v10015_v31 = vpack.c.bf16 %v3066_v30, %v3050_v9  ;;  %v1434_v17 = vpop.f32.mrb[61].mxu1  ;;  %v9128_v11 = vld [vmem:[#allocation7] sm:$0xff] }
 0x1bb   :  { %11504 = vst [vmem:[#allocation43_spill] sm:$0xff] %v10011_v20  ;;  %4879 = vst [vmem:[#allocation11 + $0x740] sm:$0xff] %v8042_v25  ;;  %v1433_v34 = vadd.f32 %v1432_v10, %v9583_v21  ;;  %v1242_v40 = vadd.f32 %v1241_v6, %v9587_v51  ;;  %v1243_v44 = vpop.f32.mrb[62].mxu0  ;;  %v10021_v58 = vrot.slane %v9128_v11, %v11506_v45  ;;  %v1436_v30 = vpop.f32.mrb[62].mxu1 }
 0x1bc   :  { %11505 = vst [vmem:[#allocation44_spill] sm:$0xff] %v10015_v31  ;;  %4880 = vst [vmem:[#allocation11 + $0x748] sm:$0xff] %v8043_v32  ;;  %v3079_v23 = vmax.f32 %v1240_v37, 0.0  ;;  %v1435_v24 = vadd.f32 %v1434_v17, %v9592_v27  ;;  %v1244_v9 = vadd.f32 %v1243_v44, %v9578_v7  ;;  %v1245_v25 = vpop.f32.mrb[63].mxu0  ;;  %v1437_v26 = vadd.f32 %v1436_v30, %v9583_v21  ;;  %v1438_v45 = vpop.f32.mrb[63].mxu1  ;;  %v9129_v37 = vld [vmem:[#allocation2 + $0x50] sm:$0xff]  }
 0x1bd   :  { %v3081_v6 = vmax.f32 %v1433_v34, 0.0  ;;  %v3080_v14 = vmax.f32 %v1242_v40, 0.0  ;;  %v1246_v31 = vadd.f32 %v1245_v25, %v9587_v51  ;;  %v1439_v32 = vadd.f32 %v1438_v45, %v9592_v27 }
 0x1be   :  { %v3082_v20 = vmax.f32 %v1435_v24, 0.0  ;;  %v3095_v18 = vmax.f32 %v1244_v9, 0.0  ;;  %v11507_v17 = vsub.s32 5, %v9566_v12  ;;  %v3097_v47 = vmax.f32 %v1437_v26, 0.0 }
 0x1bf   :  { %v8050_v44 = vpack.c.bf16 %v3080_v14, %v3079_v23  ;;  %v3096_v10 = vmax.f32 %v1246_v31, 0.0  ;;  %v11508_v34 = vsub.s32 6, %v9566_v12  ;;  %v3098_v27 = vmax.f32 %v1439_v32, 0.0 }
 0x1c0   :  { %1960 = vmatmul.mubr.bf16.gmra.mrb[168].mxu0 %v9129_v37  ;;  %v10032_v7 = vrot.slane %v9128_v11, %v11507_v17  ;;  %v8051_v51 = vpack.c.bf16 %v3082_v20, %v3081_v6  ;;  %v10039_v40 = vpack.c.bf16 %v3095_v18, %v3079_v23  ;;  %v11510_v24 = vsub.s32 7, %v9566_v12 }
 0x1c1   :  { %2153 = vmatmul.mubr.bf16.gmra.mrb[168].mxu1 %v9129_v37  ;;  %v10036_v21 = vrot.slane %v9128_v11, %v11508_v34  ;;  %1969 = vmatprep.mubr.bf16.mxu0 %v11476_v59  ;;  %4887 = vst [vmem:[#allocation11 + $0x780] sm:$0xff] %v8050_v44  ;;  %v10046_v26 = vpack.c.bf16 %v3097_v47, %v3081_v6  ;;  %v1475_v30 = vpop.f32.mrb[64].mxu0  ;;  %v1668_v23 = vpop.f32.mrb[64].mxu1 }
 0x1c2   :  { %11509 = vst [vmem:[#allocation45_spill] sm:$0xff] %v10039_v40  ;;  %v10043_v9 = vrot.slane %v9128_v11, %v11510_v24  ;;  %2162 = vmatprep.mubr.bf16.mxu1 %v11476_v59  ;;  %v8058_v31 = vpack.c.bf16 %v3096_v10, %v3095_v18  ;;  %v10048_v25 = vpack.c.bf16 %v3096_v10, %v3080_v14  ;;  %4888 = vst [vmem:[#allocation11 + $0x788] sm:$0xff] %v8051_v51  ;;  %v1477_v17 = vpop.f32.mrb[65].mxu0  ;;  %v1670_v44 = vpop.f32.mrb[65].mxu1  ;;  %v9130_v40 = vld [vmem:[#allocation2 + $0x58] sm:$0xff]  }
 0x1c3   :  { %11511 = vst [vmem:[#allocation46_spill] sm:$0xff] %v10046_v26  ;;  %v8059_v45 = vpack.c.bf16 %v3098_v27, %v3097_v47  ;;  %v1476_v37 = vadd.f32 %v1475_v30, %v10021_v58  ;;  %v10051_v32 = vpack.c.bf16 %v3098_v27, %v3082_v20  ;;  %v1669_v11 = vadd.f32 %v1668_v23, %v10036_v21  ;;  %v1479_v6 = vpop.f32.mrb[66].mxu0  ;;  %v1672_v47 = vpop.f32.mrb[66].mxu1 }
 0x1c4   :  { %11512 = vst [vmem:[#allocation47_spill] sm:$0xff] %v10048_v25  ;;  %4895 = vst [vmem:[#allocation11 + $0x7c0] sm:$0xff] %v8058_v31  ;;  %v1478_v34 = vadd.f32 %v1477_v17, %v10032_v7  ;;  %v1671_v14 = vadd.f32 %v1670_v44, %v10043_v9  ;;  %v1480_v10 = vadd.f32 %v1479_v6, %v10021_v58  ;;  %v1481_v51 = vpop.f32.mrb[67].mxu0  ;;  %v1674_v31 = vpop.f32.mrb[67].mxu1 }
 0x1c5   :  { %11513 = vst [vmem:[#allocation48_spill] sm:$0xff] %v10051_v32  ;;  %4896 = vst [vmem:[#allocation11 + $0x7c8] sm:$0xff] %v8059_v45  ;;  %v2603_v18 = vmax.f32 %v1476_v37, 0.0  ;;  %v2605_v24 = vmax.f32 %v1669_v11, 0.0  ;;  %v1673_v20 = vadd.f32 %v1672_v47, %v10036_v21  ;;  %v1482_v27 = vadd.f32 %v1481_v51, %v10032_v7 }
 0x1c6   :  { %v2604_v30 = vmax.f32 %v1478_v34, 0.0  ;;  %v2606_v23 = vmax.f32 %v1671_v14, 0.0  ;;  %v2619_v26 = vmax.f32 %v1480_v10, 0.0  ;;  %v1675_v17 = vadd.f32 %v1674_v31, %v10043_v9 }
 0x1c7   :  { %v2621_v37 = vmax.f32 %v1673_v20, 0.0  ;;  %v2620_v44 = vmax.f32 %v1482_v27, 0.0 }
 0x1c8   :  { %1970 = vmatmul.mubr.bf16.gmra.mrb[172].mxu0 %v9130_v40  ;;  %v7812_v45 = vpack.c.bf16 %v2604_v30, %v2603_v18  ;;  %v7813_v6 = vpack.c.bf16 %v2606_v23, %v2605_v24  ;;  %v10061_v11 = vpack.c.bf16 %v2619_v26, %v2603_v18  ;;  %v2622_v34 = vmax.f32 %v1675_v17, 0.0 }
 0x1c9   :  { %2163 = vmatmul.mubr.bf16.gmra.mrb[172].mxu1 %v9130_v40  ;;  %1979 = vmatprep.mubr.bf16.mxu0 %v11476_v59  ;;  %v10064_v47 = vpack.c.bf16 %v2621_v37, %v2605_v24  ;;  %v7820_v14 = vpack.c.bf16 %v2620_v44, %v2619_v26  ;;  %v1485_v10 = vpop.f32.mrb[68].mxu0  ;;  %v10066_v51 = vpack.c.bf16 %v2620_v44, %v2604_v30  ;;  %v1678_v40 = vpop.f32.mrb[68].mxu1 }
 0x1ca   :  { %11514 = vst [vmem:[#allocation49_spill] sm:$0xff] %v10061_v11  ;;  %2172 = vmatprep.mubr.bf16.mxu1 %v11476_v59  ;;  %4649 = vst [vmem:[#allocation11 + $0x10] sm:$0xff] %v7812_v45  ;;  %v7821_v31 = vpack.c.bf16 %v2622_v34, %v2621_v37  ;;  %v1486_v20 = vadd.f32 %v1485_v10, %v10021_v58  ;;  %v1487_v27 = vpop.f32.mrb[69].mxu0  ;;  %v10069_v32 = vpack.c.bf16 %v2622_v34, %v2606_v23  ;;  %v1680_v45 = vpop.f32.mrb[69].mxu1 }
 0x1cb   :  { %11515 = vst [vmem:[#allocation50_spill] sm:$0xff] %v10064_v47  ;;  %11516 = vst [vmem:[#allocation51_spill] sm:$0xff] %v10066_v51  ;;  %v1679_v18 = vadd.f32 %v1678_v40, %v10036_v21  ;;  %v1488_v17 = vadd.f32 %v1487_v27, %v10032_v7  ;;  %v1489_v24 = vpop.f32.mrb[70].mxu0  ;;  %v1681_v30 = vadd.f32 %v1680_v45, %v10043_v9  ;;  %v1682_v37 = vpop.f32.mrb[70].mxu1 }
 0x1cc   :  { %4650 = vst [vmem:[#allocation11 + $0x18] sm:$0xff] %v7813_v6  ;;  %11517 = vst [vmem:[#allocation52_spill] sm:$0xff] %v10069_v32  ;;  %v2635_v26 = vmax.f32 %v1486_v20, 0.0  ;;  %v1490_v44 = vadd.f32 %v1489_v24, %v10021_v58  ;;  %v1491_v6 = vpop.f32.mrb[71].mxu0  ;;  %v1683_v23 = vadd.f32 %v1682_v37, %v10036_v21  ;;  %v9131_v32 = vld [vmem:[#allocation2 + $0x60] sm:$0xff]  }
 0x1cd   :  { %4657 = vst [vmem:[#allocation11 + $0x50] sm:$0xff] %v7820_v14  ;;  %4658 = vst [vmem:[#allocation11 + $0x58] sm:$0xff] %v7821_v31  ;;  %v2637_v10 = vmax.f32 %v1679_v18, 0.0  ;;  %v2636_v47 = vmax.f32 %v1488_v17, 0.0  ;;  %v1492_v34 = vadd.f32 %v1491_v6, %v10032_v7  ;;  %v1684_v14 = vpop.f32.mrb[71].mxu1  ;;  %v2638_v40 = vmax.f32 %v1681_v30, 0.0 }
 0x1ce   :  { %v2651_v11 = vmax.f32 %v1490_v44, 0.0  ;;  %v1685_v27 = vadd.f32 %v1684_v14, %v10043_v9  ;;  %v2653_v20 = vmax.f32 %v1683_v23, 0.0 }
 0x1cf   :  { %v7828_v31 = vpack.c.bf16 %v2636_v47, %v2635_v26  ;;  %v2652_v45 = vmax.f32 %v1492_v34, 0.0  ;;  %v7829_v24 = vpack.c.bf16 %v2638_v40, %v2637_v10 }
 0x1d0   :  { %1980 = vmatmul.mubr.bf16.gmra.mrb[176].mxu0 %v9131_v32  ;;  %v10079_v18 = vpack.c.bf16 %v2651_v11, %v2635_v26  ;;  %v2654_v17 = vmax.f32 %v1685_v27, 0.0  ;;  %v10082_v37 = vpack.c.bf16 %v2653_v20, %v2637_v10 }
 0x1d1   :  { %2173 = vmatmul.mubr.bf16.gmra.mrb[176].mxu1 %v9131_v32  ;;  %1989 = vmatprep.mubr.bf16.mxu0 %v11476_v59  ;;  %4665 = vst [vmem:[#allocation11 + $0x90] sm:$0xff] %v7828_v31  ;;  %v7836_v30 = vpack.c.bf16 %v2652_v45, %v2651_v11  ;;  %v1495_v44 = vpop.f32.mrb[72].mxu0  ;;  %v10084_v6 = vpack.c.bf16 %v2652_v45, %v2636_v47  ;;  %4666 = vst [vmem:[#allocation11 + $0x98] sm:$0xff] %v7829_v24  ;;  %v1688_v32 = vpop.f32.mrb[72].mxu1 }
 0x1d2   :  { %11518 = vst [vmem:[#allocation53_spill] sm:$0xff] %v10079_v18  ;;  %2182 = vmatprep.mubr.bf16.mxu1 %v11476_v59  ;;  %11519 = vst [vmem:[#allocation54_spill] sm:$0xff] %v10082_v37  ;;  %v7837_v14 = vpack.c.bf16 %v2654_v17, %v2653_v20  ;;  %v1496_v23 = vadd.f32 %v1495_v44, %v10021_v58  ;;  %v1497_v34 = vpop.f32.mrb[73].mxu0  ;;  %v10087_v51 = vpack.c.bf16 %v2654_v17, %v2638_v40  ;;  %v1690_v31 = vpop.f32.mrb[73].mxu1 }
 0x1d3   :  { %11520 = vst [vmem:[#allocation55_spill] sm:$0xff] %v10084_v6  ;;  %4673 = vst [vmem:[#allocation11 + $0xd0] sm:$0xff] %v7836_v30  ;;  %v1689_v26 = vadd.f32 %v1688_v32, %v10036_v21  ;;  %v1498_v27 = vadd.f32 %v1497_v34, %v10032_v7  ;;  %v1499_v10 = vpop.f32.mrb[74].mxu0  ;;  %v1691_v47 = vadd.f32 %v1690_v31, %v10043_v9  ;;  %v1692_v20 = vpop.f32.mrb[74].mxu1 }
 0x1d4   :  { %11521 = vst [vmem:[#allocation56_spill] sm:$0xff] %v10087_v51  ;;  %4674 = vst [vmem:[#allocation11 + $0xd8] sm:$0xff] %v7837_v14  ;;  %v2667_v11 = vmax.f32 %v1496_v23, 0.0  ;;  %v1500_v45 = vadd.f32 %v1499_v10, %v10021_v58  ;;  %v1501_v24 = vpop.f32.mrb[75].mxu0  ;;  %v1693_v40 = vadd.f32 %v1692_v20, %v10036_v21  ;;  %v1694_v30 = vpop.f32.mrb[75].mxu1  ;;  %v9132_v51 = vld [vmem:[#allocation2 + $0x68] sm:$0xff]  }
 0x1d5   :  { %v2669_v44 = vmax.f32 %v1689_v26, 0.0  ;;  %v2668_v37 = vmax.f32 %v1498_v27, 0.0  ;;  %v1502_v17 = vadd.f32 %v1501_v24, %v10032_v7  ;;  %v2670_v32 = vmax.f32 %v1691_v47, 0.0 }
 0x1d6   :  { %v2683_v18 = vmax.f32 %v1500_v45, 0.0  ;;  %v1695_v34 = vadd.f32 %v1694_v30, %v10043_v9  ;;  %v2685_v23 = vmax.f32 %v1693_v40, 0.0 }
 0x1d7   :  { %v7844_v14 = vpack.c.bf16 %v2668_v37, %v2667_v11  ;;  %v2684_v31 = vmax.f32 %v1502_v17, 0.0  ;;  %v7845_v10 = vpack.c.bf16 %v2670_v32, %v2669_v44 }
 0x1d8   :  { %1990 = vmatmul.mubr.bf16.gmra.mrb[180].mxu0 %v9132_v51  ;;  %v10097_v26 = vpack.c.bf16 %v2683_v18, %v2667_v11  ;;  %v2686_v27 = vmax.f32 %v1695_v34, 0.0  ;;  %v10100_v20 = vpack.c.bf16 %v2685_v23, %v2669_v44 }
 0x1d9   :  { %2183 = vmatmul.mubr.bf16.gmra.mrb[180].mxu1 %v9132_v51  ;;  %1999 = vmatprep.mubr.bf16.mxu0 %v11476_v59  ;;  %4681 = vst [vmem:[#allocation11 + $0x110] sm:$0xff] %v7844_v14  ;;  %v7852_v47 = vpack.c.bf16 %v2684_v31, %v2683_v18  ;;  %v1505_v45 = vpop.f32.mrb[76].mxu0  ;;  %v10102_v24 = vpack.c.bf16 %v2684_v31, %v2668_v37  ;;  %4682 = vst [vmem:[#allocation11 + $0x118] sm:$0xff] %v7845_v10  ;;  %v1698_v51 = vpop.f32.mrb[76].mxu1 }
 0x1da   :  { %11522 = vst [vmem:[#allocation57_spill] sm:$0xff] %v10097_v26  ;;  %2192 = vmatprep.mubr.bf16.mxu1 %v11476_v59  ;;  %11523 = vst [vmem:[#allocation58_spill] sm:$0xff] %v10100_v20  ;;  %v7853_v30 = vpack.c.bf16 %v2686_v27, %v2685_v23  ;;  %v1506_v40 = vadd.f32 %v1505_v45, %v10021_v58  ;;  %v1507_v17 = vpop.f32.mrb[77].mxu0  ;;  %v10105_v6 = vpack.c.bf16 %v2686_v27, %v2670_v32  ;;  %v1700_v14 = vpop.f32.mrb[77].mxu1 }
 0x1db   :  { %11524 = vst [vmem:[#allocation59_spill] sm:$0xff] %v10102_v24  ;;  %4689 = vst [vmem:[#allocation11 + $0x150] sm:$0xff] %v7852_v47  ;;  %v1699_v11 = vadd.f32 %v1698_v51, %v10036_v21  ;;  %v1508_v34 = vadd.f32 %v1507_v17, %v10032_v7  ;;  %v1509_v44 = vpop.f32.mrb[78].mxu0  ;;  %v1701_v37 = vadd.f32 %v1700_v14, %v10043_v9  ;;  %v1702_v23 = vpop.f32.mrb[78].mxu1 }
 0x1dc   :  { %11525 = vst [vmem:[#allocation60_spill] sm:$0xff] %v10105_v6  ;;  %4690 = vst [vmem:[#allocation11 + $0x158] sm:$0xff] %v7853_v30  ;;  %v2699_v18 = vmax.f32 %v1506_v40, 0.0  ;;  %v1510_v31 = vadd.f32 %v1509_v44, %v10021_v58  ;;  %v1511_v10 = vpop.f32.mrb[79].mxu0  ;;  %v1703_v32 = vadd.f32 %v1702_v23, %v10036_v21  ;;  %v1704_v47 = vpop.f32.mrb[79].mxu1  ;;  %v9133_v6 = vld [vmem:[#allocation2 + $0x70] sm:$0xff]  }
 0x1dd   :  { %v2701_v45 = vmax.f32 %v1699_v11, 0.0  ;;  %v2700_v20 = vmax.f32 %v1508_v34, 0.0  ;;  %v1512_v27 = vadd.f32 %v1511_v10, %v10032_v7  ;;  %v2702_v51 = vmax.f32 %v1701_v37, 0.0 }
 0x1de   :  { %v2715_v26 = vmax.f32 %v1510_v31, 0.0  ;;  %v1705_v17 = vadd.f32 %v1704_v47, %v10043_v9  ;;  %v2717_v40 = vmax.f32 %v1703_v32, 0.0 }
 0x1df   :  { %v7860_v30 = vpack.c.bf16 %v2700_v20, %v2699_v18  ;;  %v2716_v14 = vmax.f32 %v1512_v27, 0.0  ;;  %v7861_v44 = vpack.c.bf16 %v2702_v51, %v2701_v45 }
 0x1e0   :  { %2000 = vmatmul.mubr.bf16.gmra.mrb[184].mxu0 %v9133_v6  ;;  %v10115_v11 = vpack.c.bf16 %v2715_v26, %v2699_v18  ;;  %v2718_v34 = vmax.f32 %v1705_v17, 0.0  ;;  %v10118_v23 = vpack.c.bf16 %v2717_v40, %v2701_v45 }
 0x1e1   :  { %2193 = vmatmul.mubr.bf16.gmra.mrb[184].mxu1 %v9133_v6  ;;  %2009 = vmatprep.mubr.bf16.mxu0 %v11476_v59  ;;  %4697 = vst [vmem:[#allocation11 + $0x190] sm:$0xff] %v7860_v30  ;;  %v7868_v37 = vpack.c.bf16 %v2716_v14, %v2715_v26  ;;  %v1515_v31 = vpop.f32.mrb[80].mxu0  ;;  %v10120_v10 = vpack.c.bf16 %v2716_v14, %v2700_v20  ;;  %4698 = vst [vmem:[#allocation11 + $0x198] sm:$0xff] %v7861_v44  ;;  %v1708_v6 = vpop.f32.mrb[80].mxu1 }
 0x1e2   :  { %11526 = vst [vmem:[#allocation61_spill] sm:$0xff] %v10115_v11  ;;  %2202 = vmatprep.mubr.bf16.mxu1 %v11476_v59  ;;  %11527 = vst [vmem:[#allocation62_spill] sm:$0xff] %v10118_v23  ;;  %v7869_v47 = vpack.c.bf16 %v2718_v34, %v2717_v40  ;;  %v1516_v32 = vadd.f32 %v1515_v31, %v10021_v58  ;;  %v1517_v27 = vpop.f32.mrb[81].mxu0  ;;  %v10123_v24 = vpack.c.bf16 %v2718_v34, %v2702_v51  ;;  %v1710_v30 = vpop.f32.mrb[81].mxu1 }
 0x1e3   :  { %11528 = vst [vmem:[#allocation63_spill] sm:$0xff] %v10120_v10  ;;  %4705 = vst [vmem:[#allocation11 + $0x1d0] sm:$0xff] %v7868_v37  ;;  %v1709_v18 = vadd.f32 %v1708_v6, %v10036_v21  ;;  %v1518_v17 = vadd.f32 %v1517_v27, %v10032_v7  ;;  %v1519_v45 = vpop.f32.mrb[82].mxu0  ;;  %v1711_v20 = vadd.f32 %v1710_v30, %v10043_v9  ;;  %v1712_v40 = vpop.f32.mrb[82].mxu1 }
 0x1e4   :  { %11529 = vst [vmem:[#allocation64_spill] sm:$0xff] %v10123_v24  ;;  %4706 = vst [vmem:[#allocation11 + $0x1d8] sm:$0xff] %v7869_v47  ;;  %v2731_v26 = vmax.f32 %v1516_v32, 0.0  ;;  %v1520_v14 = vadd.f32 %v1519_v45, %v10021_v58  ;;  %v1521_v44 = vpop.f32.mrb[83].mxu0  ;;  %v1713_v51 = vadd.f32 %v1712_v40, %v10036_v21  ;;  %v1714_v37 = vpop.f32.mrb[83].mxu1  ;;  %v9134_v24 = vld [vmem:[#allocation2 + $0x78] sm:$0xff]  }
 0x1e5   :  { %v2733_v31 = vmax.f32 %v1709_v18, 0.0  ;;  %v2732_v23 = vmax.f32 %v1518_v17, 0.0  ;;  %v1522_v34 = vadd.f32 %v1521_v44, %v10032_v7  ;;  %v2734_v6 = vmax.f32 %v1711_v20, 0.0 }
 0x1e6   :  { %v2747_v11 = vmax.f32 %v1520_v14, 0.0  ;;  %v1715_v27 = vadd.f32 %v1714_v37, %v10043_v9  ;;  %v2749_v32 = vmax.f32 %v1713_v51, 0.0 }
 0x1e7   :  { %v7876_v47 = vpack.c.bf16 %v2732_v23, %v2731_v26  ;;  %v2748_v30 = vmax.f32 %v1522_v34, 0.0  ;;  %v7877_v45 = vpack.c.bf16 %v2734_v6, %v2733_v31 }
 0x1e8   :  { %2010 = vmatmul.mubr.bf16.gmra.mrb[188].mxu0 %v9134_v24  ;;  %v10133_v18 = vpack.c.bf16 %v2747_v11, %v2731_v26  ;;  %v2750_v17 = vmax.f32 %v1715_v27, 0.0  ;;  %v10136_v40 = vpack.c.bf16 %v2749_v32, %v2733_v31 }
 0x1e9   :  { %2203 = vmatmul.mubr.bf16.gmra.mrb[188].mxu1 %v9134_v24  ;;  %2245 = vmatprep.mubr.bf16.mxu0 %v11476_v59  ;;  %4713 = vst [vmem:[#allocation11 + $0x210] sm:$0xff] %v7876_v47  ;;  %v7884_v20 = vpack.c.bf16 %v2748_v30, %v2747_v11  ;;  %v1525_v14 = vpop.f32.mrb[84].mxu0  ;;  %v10138_v44 = vpack.c.bf16 %v2748_v30, %v2732_v23  ;;  %4714 = vst [vmem:[#allocation11 + $0x218] sm:$0xff] %v7877_v45  ;;  %v1718_v24 = vpop.f32.mrb[84].mxu1 }
 0x1ea   :  { %11530 = vst [vmem:[#allocation65_spill] sm:$0xff] %v10133_v18  ;;  %2438 = vmatprep.mubr.bf16.mxu1 %v11476_v59  ;;  %11531 = vst [vmem:[#allocation66_spill] sm:$0xff] %v10136_v40  ;;  %v7885_v37 = vpack.c.bf16 %v2750_v17, %v2749_v32  ;;  %v1526_v51 = vadd.f32 %v1525_v14, %v10021_v58  ;;  %v1527_v34 = vpop.f32.mrb[85].mxu0  ;;  %v10141_v10 = vpack.c.bf16 %v2750_v17, %v2734_v6  ;;  %v1720_v47 = vpop.f32.mrb[85].mxu1  ;;  %v8991_v40 = vld [vmem:[#allocation8] sm:$0xff]  }
 0x1eb   :  { %11532 = vst [vmem:[#allocation67_spill] sm:$0xff] %v10138_v44  ;;  %4721 = vst [vmem:[#allocation11 + $0x250] sm:$0xff] %v7884_v20  ;;  %v1719_v26 = vadd.f32 %v1718_v24, %v10036_v21  ;;  %v1528_v27 = vadd.f32 %v1527_v34, %v10032_v7  ;;  %v1529_v31 = vpop.f32.mrb[86].mxu0  ;;  %v1721_v23 = vadd.f32 %v1720_v47, %v10043_v9  ;;  %v1722_v30 = vpop.f32.mrb[86].mxu1  ;;  %v8993_v14 = vld [vmem:[#allocation8 + $0x80] sm:$0xff]   ;;  %v8994_v34 = vld [vmem:[#allocation8 + $0x48] sm:$0xff]  }
 0x1ec   :  { %11533 = vst [vmem:[#allocation68_spill] sm:$0xff] %v10141_v10  ;;  %4722 = vst [vmem:[#allocation11 + $0x258] sm:$0xff] %v7885_v37  ;;  %v2763_v11 = vmax.f32 %v1526_v51, 0.0  ;;  %v1530_v32 = vadd.f32 %v1529_v31, %v10021_v58  ;;  %v1531_v45 = vpop.f32.mrb[87].mxu0  ;;  %v1723_v17 = vadd.f32 %v1722_v30, %v10036_v21  ;;  %v1724_v24 = vpop.f32.mrb[87].mxu1  ;;  %v9135_v51 = vld [vmem:[#allocation2] sm:$0xff]  }
 0x1ed   :  { %v2765_v18 = vmax.f32 %v1719_v26, 0.0  ;;  %v2764_v6 = vmax.f32 %v1528_v27, 0.0  ;;  %v1532_v20 = vadd.f32 %v1531_v45, %v10032_v7  ;;  %v2766_v10 = vmax.f32 %v1721_v23, 0.0  ;;  %v8996_v47 = vld [vmem:[#allocation8 + $0xc8] sm:$0xff]  }
 0x1ee   :  { %v2779_v44 = vmax.f32 %v1530_v32, 0.0  ;;  %v1725_v37 = vadd.f32 %v1724_v24, %v10043_v9  ;;  %v2781_v31 = vmax.f32 %v1723_v17, 0.0  ;;  %v8995_v26 = vld [vmem:[#allocation8 + $0x8] sm:$0xff]   ;;  %v8998_v32 = vld [vmem:[#allocation8 + $0x50] sm:$0xff]  }
 0x1ef   :  { %v7892_v25 = vpack.c.bf16 %v2764_v6, %v2763_v11  ;;  %v2780_v60 = vmax.f32 %v1532_v20, 0.0  ;;  %v7893_v27 = vpack.c.bf16 %v2766_v10, %v2765_v18  ;;  %v8997_v23 = vld [vmem:[#allocation8 + $0x88] sm:$0xff]   ;;  %v9000_v17 = vld [vmem:[#allocation8 + $0xd0] sm:$0xff]  }
 0x1f0   :  { %2246 = vmatmul.mubr.bf16.vlgmr.msra.gmra.mrb[192].mxu0 %v9135_v51  ;;  %v10150_v53 = vpack.c.bf16 %v2779_v44, %v2763_v11  ;;  %v2782_v30 = vmax.f32 %v1725_v37, 0.0  ;;  %v10153_v45 = vpack.c.bf16 %v2781_v31, %v2765_v18 }
 0x1f1   :  { %2439 = vmatmul.mubr.bf16.vlgmr.msra.gmra.mrb[192].mxu1 %v9135_v51  ;;  %8067 = vmatpush3.bf16.msra.mxu0 %v8991_v40  ;;  %4729 = vst [vmem:[#allocation11 + $0x290] sm:$0xff] %v7892_v25  ;;  %v7900_v24 = vpack.c.bf16 %v2780_v60, %v2779_v44  ;;  %v1535_v43 = vpop.f32.mrb[88].mxu0  ;;  %v10156_v40 = vpack.c.bf16 %v2780_v60, %v2764_v6  ;;  %4730 = vst [vmem:[#allocation11 + $0x298] sm:$0xff] %v7893_v27 }
 0x1f2   :  { %11534 = vst [vmem:[#allocation69_spill] sm:$0xff] %v10150_v53  ;;  %8179 = vmatpush3.bf16.msra.mxu1 %v8993_v14  ;;  %2255 = vmatprep.mubr.bf16.mxu0 %v11476_v59  ;;  %11535 = vst [vmem:[#allocation70_spill] sm:$0xff] %v10153_v45  ;;  %v7901_v11 = vpack.c.bf16 %v2782_v30, %v2781_v31  ;;  %v1536_v20 = vadd.f32 %v1535_v43, %v10021_v58  ;;  %v1728_v14 = vpop.f32.mrb[88].mxu1  ;;  %v1537_v37 = vpop.f32.mrb[89].mxu0  ;;  %v9004_v53 = vld [vmem:[#allocation8 + $0xd8] sm:$0xff]  }
 0x1f3   :  { %2448 = vmatprep.mubr.bf16.mxu1 %v11476_v59  ;;  %8068 = vmatprep.subr.bf16.mxu0 %v8994_v34  ;;  %11536 = vst [vmem:[#allocation71_spill] sm:$0xff] %v10156_v40  ;;  %v10159_v51 = vpack.c.bf16 %v2782_v30, %v2766_v10  ;;  %4737 = vst [vmem:[#allocation11 + $0x2d0] sm:$0xff] %v7900_v24  ;;  %v1729_v25 = vadd.f32 %v1728_v14, %v10036_v21  ;;  %v1730_v44 = vpop.f32.mrb[89].mxu1  ;;  %v1539_v45 = vpop.f32.mrb[90].mxu0  ;;  %v8999_v10 = vld [vmem:[#allocation8 + $0x10] sm:$0xff]  }
 0x1f4   :  { %8180 = vmatprep.subr.bf16.mxu1 %v8996_v47  ;;  %v1538_v18 = vadd.f32 %v1537_v37, %v10032_v7  ;;  %4738 = vst [vmem:[#allocation11 + $0x2d8] sm:$0xff] %v7901_v11  ;;  %v2795_v60 = vmax.f32 %v1536_v20, 0.0  ;;  %v1731_v6 = vadd.f32 %v1730_v44, %v10043_v9  ;;  %v1540_v34 = vadd.f32 %v1539_v45, %v10021_v58  ;;  %v1732_v43 = vpop.f32.mrb[90].mxu1  ;;  %v1541_v31 = vpop.f32.mrb[91].mxu0  ;;  %v9002_v11 = vld [vmem:[#allocation8 + $0x58] sm:$0xff]  }
 0x1f5   :  { %11537 = vst [vmem:[#allocation72_spill] sm:$0xff] %v10159_v51  ;;  %8069 = vmatpush3.bf16.msra.mxu0 %v8995_v26  ;;  %v2797_v47 = vmax.f32 %v1729_v25, 0.0  ;;  %v1733_v30 = vadd.f32 %v1732_v43, %v10036_v21  ;;  %v1542_v24 = vadd.f32 %v1541_v31, %v10032_v7  ;;  %v1734_v14 = vpop.f32.mrb[91].mxu1  ;;  %v9001_v26 = vld [vmem:[#allocation8 + $0x90] sm:$0xff]   ;;  %v9136_v45 = vld [vmem:[#allocation2 + $0x8] sm:$0xff]  }
 0x1f6   :  { %8181 = vmatpush3.bf16.msra.mxu1 %v8997_v23  ;;  %8070 = vmatprep.subr.bf16.mxu0 %v8998_v32  ;;  %v2796_v27 = vmax.f32 %v1538_v18, 0.0  ;;  %v2798_v20 = vmax.f32 %v1731_v6, 0.0  ;;  %v2811_v37 = vmax.f32 %v1540_v34, 0.0  ;;  %v1735_v44 = vadd.f32 %v1734_v14, %v10043_v9 }
 0x1f7   :  { %8182 = vmatprep.subr.bf16.mxu1 %v9000_v17  ;;  %v2813_v32 = vmax.f32 %v1733_v30, 0.0  ;;  %v2812_v51 = vmax.f32 %v1542_v24, 0.0  ;;  %v9003_v17 = vld [vmem:[#allocation8 + $0x18] sm:$0xff]   ;;  %v9006_v24 = vld [vmem:[#allocation8 + $0x60] sm:$0xff]  }
 0x1f8   :  { %2256 = vmatmul.mubr.bf16.gmra.mrb[196].mxu0 %v9136_v45  ;;  %v7908_v23 = vpack.c.bf16 %v2796_v27, %v2795_v60  ;;  %v7909_v25 = vpack.c.bf16 %v2798_v20, %v2797_v47  ;;  %v10169_v18 = vpack.c.bf16 %v2811_v37, %v2795_v60  ;;  %v2814_v43 = vmax.f32 %v1735_v44, 0.0  ;;  %v9005_v30 = vld [vmem:[#allocation8 + $0x98] sm:$0xff]  }
 0x1f9   :  { %2449 = vmatmul.mubr.bf16.gmra.mrb[196].mxu1 %v9136_v45  ;;  %2265 = vmatprep.mubr.bf16.mxu0 %v11476_v59  ;;  %v10172_v6 = vpack.c.bf16 %v2813_v32, %v2797_v47  ;;  %v7916_v34 = vpack.c.bf16 %v2812_v51, %v2811_v37  ;;  %v1545_v31 = vpop.f32.mrb[92].mxu0  ;;  %v10174_v14 = vpack.c.bf16 %v2812_v51, %v2796_v27  ;;  %v1738_v44 = vpop.f32.mrb[92].mxu1 }
 0x1fa   :  { %11538 = vst [vmem:[#allocation73_spill] sm:$0xff] %v10169_v18  ;;  %2458 = vmatprep.mubr.bf16.mxu1 %v11476_v59  ;;  %8071 = vmatpush3.bf16.msra.mxu0 %v8999_v10  ;;  %4745 = vst [vmem:[#allocation11 + $0x310] sm:$0xff] %v7908_v23  ;;  %v7917_v45 = vpack.c.bf16 %v2814_v43, %v2813_v32  ;;  %v1546_v60 = vadd.f32 %v1545_v31, %v10021_v58  ;;  %v1547_v18 = vpop.f32.mrb[93].mxu0  ;;  %v9008_v10 = vld [vmem:[#allocation8 + $0xe0] sm:$0xff]  }
 0x1fb   :  { %11539 = vst [vmem:[#allocation74_spill] sm:$0xff] %v10172_v6  ;;  %8183 = vmatpush3.bf16.msra.mxu1 %v9001_v26  ;;  %8072 = vmatprep.subr.bf16.mxu0 %v9002_v11  ;;  %11540 = vst [vmem:[#allocation75_spill] sm:$0xff] %v10174_v14  ;;  %v10177_v40 = vpack.c.bf16 %v2814_v43, %v2798_v20  ;;  %v1739_v47 = vadd.f32 %v1738_v44, %v10036_v21  ;;  %v1740_v11 = vpop.f32.mrb[93].mxu1  ;;  %v1549_v37 = vpop.f32.mrb[94].mxu0 }
 0x1fc   :  { %4746 = vst [vmem:[#allocation11 + $0x318] sm:$0xff] %v7909_v25  ;;  %8184 = vmatprep.subr.bf16.mxu1 %v9004_v53  ;;  %4753 = vst [vmem:[#allocation11 + $0x350] sm:$0xff] %v7916_v34  ;;  %v1548_v26 = vadd.f32 %v1547_v18, %v10032_v7  ;;  %v2827_v51 = vmax.f32 %v1546_v60, 0.0  ;;  %v1741_v27 = vadd.f32 %v1740_v11, %v10043_v9  ;;  %v1742_v32 = vpop.f32.mrb[94].mxu1  ;;  %v1551_v25 = vpop.f32.mrb[95].mxu0  ;;  %v9007_v53 = vld [vmem:[#allocation8 + $0x20] sm:$0xff]  }
 0x1fd   :  { %11541 = vst [vmem:[#allocation76_spill] sm:$0xff] %v10177_v40  ;;  %4754 = vst [vmem:[#allocation11 + $0x358] sm:$0xff] %v7917_v45  ;;  %v1550_v23 = vadd.f32 %v1549_v37, %v10021_v58  ;;  %v2829_v31 = vmax.f32 %v1739_v47, 0.0  ;;  %v1743_v43 = vadd.f32 %v1742_v32, %v10036_v21  ;;  %v1552_v34 = vadd.f32 %v1551_v25, %v10032_v7  ;;  %v1744_v44 = vpop.f32.mrb[95].mxu1  ;;  %v9009_v18 = vld [vmem:[#allocation8 + $0xa0] sm:$0xff]   ;;  %v9010_v45 = vld [vmem:[#allocation8 + $0x68] sm:$0xff]  }
 0x1fe   :  { %8073 = vmatpush3.bf16.msra.mxu0 %v9003_v17  ;;  %v2828_v20 = vmax.f32 %v1548_v26, 0.0  ;;  %v2830_v60 = vmax.f32 %v1741_v27, 0.0  ;;  %v1745_v11 = vadd.f32 %v1744_v44, %v10043_v9  ;;  %v9137_v37 = vld [vmem:[#allocation2 + $0x10] sm:$0xff]   ;;  %v9012_v17 = vld [vmem:[#allocation8 + $0xe8] sm:$0xff]  }
 0x1ff   :  { %8185 = vmatpush3.bf16.msra.mxu1 %v9005_v30  ;;  %8074 = vmatprep.subr.bf16.mxu0 %v9006_v24  ;;  %v2843_v6 = vmax.f32 %v1550_v23, 0.0  ;;  %v2845_v47 = vmax.f32 %v1743_v43, 0.0  ;;  %v2844_v26 = vmax.f32 %v1552_v34, 0.0  ;;  %v9011_v24 = vld [vmem:[#allocation8 + $0x28] sm:$0xff]   ;;  %v9014_v34 = vld [vmem:[#allocation8 + $0x70] sm:$0xff]  }
 0x200   :  { %2266 = vmatmul.mubr.bf16.gmra.mrb[200].mxu0 %v9137_v37  ;;  %8186 = vmatprep.subr.bf16.mxu1 %v9008_v10  ;;  %v7924_v40 = vpack.c.bf16 %v2828_v20, %v2827_v51  ;;  %v7925_v32 = vpack.c.bf16 %v2830_v60, %v2829_v31  ;;  %v2846_v30 = vmax.f32 %v1745_v11, 0.0  ;;  %v9013_v43 = vld [vmem:[#allocation8 + $0xa8] sm:$0xff]  }
 0x201   :  { %2459 = vmatmul.mubr.bf16.gmra.mrb[200].mxu1 %v9137_v37  ;;  %2275 = vmatprep.mubr.bf16.mxu0 %v11476_v59  ;;  %v10187_v25 = vpack.c.bf16 %v2843_v6, %v2827_v51  ;;  %v10190_v27 = vpack.c.bf16 %v2845_v47, %v2829_v31  ;;  %v7932_v23 = vpack.c.bf16 %v2844_v26, %v2843_v6  ;;  %v1555_v10 = vpop.f32.mrb[96].mxu0  ;;  %v1748_v11 = vpop.f32.mrb[96].mxu1 }
 0x202   :  { %2468 = vmatprep.mubr.bf16.mxu1 %v11476_v59  ;;  %8075 = vmatpush3.bf16.msra.mxu0 %v9007_v53  ;;  %4761 = vst [vmem:[#allocation11 + $0x390] sm:$0xff] %v7924_v40  ;;  %v10192_v44 = vpack.c.bf16 %v2844_v26, %v2828_v20  ;;  %4762 = vst [vmem:[#allocation11 + $0x398] sm:$0xff] %v7925_v32  ;;  %v7933_v37 = vpack.c.bf16 %v2846_v30, %v2845_v47  ;;  %v9016_v53 = vld [vmem:[#allocation8 + $0xf0] sm:$0xff]   ;;  %v1750_v31 = vpop.f32.mrb[97].mxu1 }
 0x203   :  { %11542 = vst [vmem:[#allocation77_spill] sm:$0xff] %v10187_v25  ;;  %11543 = vst [vmem:[#allocation78_spill] sm:$0xff] %v10190_v27  ;;  %8187 = vmatpush3.bf16.msra.mxu1 %v9009_v18  ;;  %8076 = vmatprep.subr.bf16.mxu0 %v9010_v45  ;;  %v1556_v51 = vadd.f32 %v1555_v10, %v10021_v58  ;;  %v1557_v25 = vpop.f32.mrb[97].mxu0  ;;  %v10195_v14 = vpack.c.bf16 %v2846_v30, %v2830_v60  ;;  %v1752_v26 = vpop.f32.mrb[98].mxu1 }
 0x204   :  { %11544 = vst [vmem:[#allocation79_spill] sm:$0xff] %v10192_v44  ;;  %8188 = vmatprep.subr.bf16.mxu1 %v9012_v17  ;;  %4769 = vst [vmem:[#allocation11 + $0x3d0] sm:$0xff] %v7932_v23  ;;  %v1749_v40 = vadd.f32 %v1748_v11, %v10036_v21  ;;  %v1558_v6 = vadd.f32 %v1557_v25, %v10032_v7  ;;  %v1559_v18 = vpop.f32.mrb[98].mxu0  ;;  %v1751_v45 = vadd.f32 %v1750_v31, %v10043_v9  ;;  %v9015_v17 = vld [vmem:[#allocation8 + $0x30] sm:$0xff]   ;;  %v1754_v11 = vpop.f32.mrb[99].mxu1 }
 0x205   :  { %11545 = vst [vmem:[#allocation80_spill] sm:$0xff] %v10195_v14  ;;  %4770 = vst [vmem:[#allocation11 + $0x3d8] sm:$0xff] %v7933_v37  ;;  %v2859_v20 = vmax.f32 %v1556_v51, 0.0  ;;  %v1560_v47 = vadd.f32 %v1559_v18, %v10021_v58  ;;  %v1561_v32 = vpop.f32.mrb[99].mxu0  ;;  %v1753_v30 = vadd.f32 %v1752_v26, %v10036_v21  ;;  %v9017_v25 = vld [vmem:[#allocation8 + $0xb0] sm:$0xff]   ;;  %v9018_v37 = vld [vmem:[#allocation8 + $0x78] sm:$0xff]   ;;  %v1755_v31 = vadd.f32 %v1754_v11, %v10043_v9 }
 0x206   :  { %8077 = vmatpush3.bf16.msra.mxu0 %v9011_v24  ;;  %v2861_v10 = vmax.f32 %v1749_v40, 0.0  ;;  %v2860_v60 = vmax.f32 %v1558_v6, 0.0  ;;  %v1562_v23 = vadd.f32 %v1561_v32, %v10032_v7  ;;  %v2862_v51 = vmax.f32 %v1751_v45, 0.0  ;;  %v9138_v18 = vld [vmem:[#allocation2 + $0x18] sm:$0xff]   ;;  %v9020_v24 = vld [vmem:[#allocation8 + $0xf8] sm:$0xff]  }
 0x207   :  { %8189 = vmatpush3.bf16.msra.mxu1 %v9013_v43  ;;  %8078 = vmatprep.subr.bf16.mxu0 %v9014_v34  ;;  %v2875_v27 = vmax.f32 %v1560_v47, 0.0  ;;  %v2877_v40 = vmax.f32 %v1753_v30, 0.0  ;;  %v2878_v43 = vmax.f32 %v1755_v31, 0.0  ;;  %v9019_v34 = vld [vmem:[#allocation8 + $0x38] sm:$0xff]  }
 0x208   :  { %2276 = vmatmul.mubr.bf16.gmra.mrb[204].mxu0 %v9138_v18  ;;  %8190 = vmatprep.subr.bf16.mxu1 %v9016_v53  ;;  %v7940_v14 = vpack.c.bf16 %v2860_v60, %v2859_v20  ;;  %v2876_v6 = vmax.f32 %v1562_v23, 0.0  ;;  %v7941_v26 = vpack.c.bf16 %v2862_v51, %v2861_v10  ;;  %v9021_v30 = vld [vmem:[#allocation8 + $0xb8] sm:$0xff]   ;;  %v9022_v23 = vld [vmem:[#allocation8 + $0x140] sm:$0xff]  }
 0x209   :  { %2469 = vmatmul.mubr.bf16.gmra.mrb[204].mxu1 %v9138_v18  ;;  %2285 = vmatprep.mubr.bf16.mxu0 %v11476_v59  ;;  %v10205_v32 = vpack.c.bf16 %v2875_v27, %v2859_v20  ;;  %v10208_v45 = vpack.c.bf16 %v2877_v40, %v2861_v10  ;;  %v1565_v53 = vpop.f32.mrb[100].mxu0  ;;  %v7949_v18 = vpack.c.bf16 %v2878_v43, %v2877_v40  ;;  %v1758_v31 = vpop.f32.mrb[100].mxu1 }
 0x20a   :  { %2478 = vmatprep.mubr.bf16.mxu1 %v11476_v59  ;;  %8079 = vmatpush3.bf16.msra.mxu0 %v9015_v17  ;;  %4777 = vst [vmem:[#allocation11 + $0x410] sm:$0xff] %v7940_v14  ;;  %v7948_v47 = vpack.c.bf16 %v2876_v6, %v2875_v27  ;;  %v10210_v11 = vpack.c.bf16 %v2876_v6, %v2860_v60  ;;  %4778 = vst [vmem:[#allocation11 + $0x418] sm:$0xff] %v7941_v26  ;;  %v9024_v17 = vld [vmem:[#allocation8 + $0x1c0] sm:$0xff]   ;;  %v1760_v10 = vpop.f32.mrb[101].mxu1 }
 0x20b   :  { %11546 = vst [vmem:[#allocation81_spill] sm:$0xff] %v10205_v32  ;;  %11547 = vst [vmem:[#allocation82_spill] sm:$0xff] %v10208_v45  ;;  %8191 = vmatpush3.bf16.msra.mxu1 %v9017_v25  ;;  %8080 = vmatprep.subr.bf16.mxu0 %v9018_v37  ;;  %v1566_v20 = vadd.f32 %v1565_v53, %v10021_v58  ;;  %v1567_v32 = vpop.f32.mrb[101].mxu0  ;;  %v10213_v44 = vpack.c.bf16 %v2878_v43, %v2862_v51  ;;  %v1762_v6 = vpop.f32.mrb[102].mxu1 }
 0x20c   :  { %8192 = vmatprep.subr.bf16.mxu1 %v9020_v24  ;;  %4785 = vst [vmem:[#allocation11 + $0x450] sm:$0xff] %v7948_v47  ;;  %v1759_v14 = vadd.f32 %v1758_v31, %v10036_v21  ;;  %v1568_v27 = vadd.f32 %v1567_v32, %v10032_v7  ;;  %v1569_v25 = vpop.f32.mrb[102].mxu0  ;;  %4786 = vst [vmem:[#allocation11 + $0x458] sm:$0xff] %v7949_v18  ;;  %v1761_v37 = vadd.f32 %v1760_v10, %v10043_v9  ;;  %v1764_v47 = vpop.f32.mrb[103].mxu1 }
 0x20d   :  { %v2891_v60 = vmax.f32 %v1566_v20, 0.0  ;;  %v1570_v40 = vadd.f32 %v1569_v25, %v10021_v58  ;;  %v1571_v26 = vpop.f32.mrb[103].mxu0  ;;  %v1763_v51 = vadd.f32 %v1762_v6, %v10036_v21  ;;  %v1765_v18 = vadd.f32 %v1764_v47, %v10043_v9  ;;  %v9139_v20 = vld [vmem:[#allocation2 + $0x20] sm:$0xff]  }
 0x20e   :  { %8081 = vmatpush3.bf16.msra.mxu0 %v9019_v34  ;;  %v2893_v24 = vmax.f32 %v1759_v14, 0.0  ;;  %v2892_v53 = vmax.f32 %v1568_v27, 0.0  ;;  %v1572_v43 = vadd.f32 %v1571_v26, %v10032_v7  ;;  %v2894_v32 = vmax.f32 %v1761_v37, 0.0 }
 0x20f   :  { %8193 = vmatpush3.bf16.msra.mxu1 %v9021_v30  ;;  %8290 = vmatprep.subr.bf16.mxu0 %v9022_v23  ;;  %v2907_v31 = vmax.f32 %v1570_v40, 0.0  ;;  %v2909_v25 = vmax.f32 %v1763_v51, 0.0  ;;  %v2910_v27 = vmax.f32 %v1765_v18, 0.0 }
 0x210   :  { %2286 = vmatmul.mubr.bf16.gmra.mrb[208].mxu0 %v9139_v20  ;;  %8402 = vmatprep.subr.bf16.mxu1 %v9024_v17  ;;  %v7956_v10 = vpack.c.bf16 %v2892_v53, %v2891_v60  ;;  %v2908_v45 = vmax.f32 %v1572_v43, 0.0  ;;  %v7957_v34 = vpack.c.bf16 %v2894_v32, %v2893_v24 }
 0x211   :  { %2479 = vmatmul.mubr.bf16.gmra.mrb[208].mxu1 %v9139_v20  ;;  %2295 = vmatprep.mubr.bf16.mxu0 %v11476_v59  ;;  %v10223_v14 = vpack.c.bf16 %v2907_v31, %v2891_v60  ;;  %v10226_v30 = vpack.c.bf16 %v2909_v25, %v2893_v24  ;;  %v1575_v37 = vpop.f32.mrb[104].mxu0  ;;  %v7965_v17 = vpack.c.bf16 %v2910_v27, %v2909_v25  ;;  %v1768_v26 = vpop.f32.mrb[104].mxu1 }
 0x212   :  { %2488 = vmatprep.mubr.bf16.mxu1 %v11476_v59  ;;  %4793 = vst [vmem:[#allocation11 + $0x490] sm:$0xff] %v7956_v10  ;;  %v7964_v23 = vpack.c.bf16 %v2908_v45, %v2907_v31  ;;  %v10228_v40 = vpack.c.bf16 %v2908_v45, %v2892_v53  ;;  %4794 = vst [vmem:[#allocation11 + $0x498] sm:$0xff] %v7957_v34  ;;  %v1576_v6 = vadd.f32 %v1575_v37, %v10021_v58  ;;  %v1577_v51 = vpop.f32.mrb[105].mxu0  ;;  %v1770_v18 = vpop.f32.mrb[105].mxu1 }
 0x213   :  { %11548 = vst [vmem:[#allocation83_spill] sm:$0xff] %v10223_v14  ;;  %11549 = vst [vmem:[#allocation84_spill] sm:$0xff] %v10226_v30  ;;  %v10231_v43 = vpack.c.bf16 %v2910_v27, %v2894_v32  ;;  %v1769_v60 = vadd.f32 %v1768_v26, %v10036_v21  ;;  %v1578_v47 = vadd.f32 %v1577_v51, %v10032_v7  ;;  %v1579_v24 = vpop.f32.mrb[106].mxu0  ;;  %v1772_v20 = vpop.f32.mrb[106].mxu1  ;;  %v9140_v30 = vld [vmem:[#allocation2 + $0x28] sm:$0xff]  }
 0x214   :  { %4801 = vst [vmem:[#allocation11 + $0x4d0] sm:$0xff] %v7964_v23  ;;  %4802 = vst [vmem:[#allocation11 + $0x4d8] sm:$0xff] %v7965_v17  ;;  %v2923_v31 = vmax.f32 %v1576_v6, 0.0  ;;  %v1771_v45 = vadd.f32 %v1770_v18, %v10043_v9  ;;  %v1580_v53 = vadd.f32 %v1579_v24, %v10021_v58  ;;  %v1581_v10 = vpop.f32.mrb[107].mxu0  ;;  %v1773_v32 = vadd.f32 %v1772_v20, %v10036_v21  ;;  %v1774_v23 = vpop.f32.mrb[107].mxu1 }
 0x215   :  { %11550 = vst [vmem:[#allocation85_spill] sm:$0xff] %v10231_v43  ;;  %v2925_v25 = vmax.f32 %v1769_v60, 0.0  ;;  %v2924_v34 = vmax.f32 %v1578_v47, 0.0  ;;  %v1582_v27 = vadd.f32 %v1581_v10, %v10032_v7  ;;  %v1775_v51 = vadd.f32 %v1774_v23, %v10043_v9 }
 0x216   :  { %v2926_v37 = vmax.f32 %v1771_v45, 0.0  ;;  %v2939_v26 = vmax.f32 %v1580_v53, 0.0  ;;  %v2941_v6 = vmax.f32 %v1773_v32, 0.0 }
 0x217   :  { %v7972_v17 = vpack.c.bf16 %v2924_v34, %v2923_v31  ;;  %v2940_v18 = vmax.f32 %v1582_v27, 0.0  ;;  %v2942_v47 = vmax.f32 %v1775_v51, 0.0 }
 0x218   :  { %2296 = vmatmul.mubr.bf16.gmra.mrb[212].mxu0 %v9140_v30  ;;  %v7973_v24 = vpack.c.bf16 %v2926_v37, %v2925_v25  ;;  %v10241_v60 = vpack.c.bf16 %v2939_v26, %v2923_v31  ;;  %v10244_v20 = vpack.c.bf16 %v2941_v6, %v2925_v25 }
 0x219   :  { %2489 = vmatmul.mubr.bf16.gmra.mrb[212].mxu1 %v9140_v30  ;;  %2305 = vmatprep.mubr.bf16.mxu0 %v11476_v59  ;;  %4809 = vst [vmem:[#allocation11 + $0x510] sm:$0xff] %v7972_v17  ;;  %v7980_v45 = vpack.c.bf16 %v2940_v18, %v2939_v26  ;;  %v1585_v53 = vpop.f32.mrb[108].mxu0  ;;  %v10246_v10 = vpack.c.bf16 %v2940_v18, %v2924_v34  ;;  %v1778_v30 = vpop.f32.mrb[108].mxu1 }
 0x21a   :  { %11551 = vst [vmem:[#allocation86_spill] sm:$0xff] %v10241_v60  ;;  %2498 = vmatprep.mubr.bf16.mxu1 %v11476_v59  ;;  %11552 = vst [vmem:[#allocation87_spill] sm:$0xff] %v10244_v20  ;;  %v7981_v23 = vpack.c.bf16 %v2942_v47, %v2941_v6  ;;  %v1586_v32 = vadd.f32 %v1585_v53, %v10021_v58  ;;  %v1587_v27 = vpop.f32.mrb[109].mxu0  ;;  %v10249_v14 = vpack.c.bf16 %v2942_v47, %v2926_v37  ;;  %v1780_v17 = vpop.f32.mrb[109].mxu1 }
 0x21b   :  { %11553 = vst [vmem:[#allocation88_spill] sm:$0xff] %v10246_v10  ;;  %4810 = vst [vmem:[#allocation11 + $0x518] sm:$0xff] %v7973_v24  ;;  %v1779_v31 = vadd.f32 %v1778_v30, %v10036_v21  ;;  %v1588_v51 = vadd.f32 %v1587_v27, %v10032_v7  ;;  %v1589_v25 = vpop.f32.mrb[110].mxu0  ;;  %v1781_v34 = vadd.f32 %v1780_v17, %v10043_v9  ;;  %v1782_v6 = vpop.f32.mrb[110].mxu1 }
 0x21c   :  { %11554 = vst [vmem:[#allocation89_spill] sm:$0xff] %v10249_v14  ;;  %4817 = vst [vmem:[#allocation11 + $0x550] sm:$0xff] %v7980_v45  ;;  %v2955_v26 = vmax.f32 %v1586_v32, 0.0  ;;  %v1590_v18 = vadd.f32 %v1589_v25, %v10021_v58  ;;  %v1591_v24 = vpop.f32.mrb[111].mxu0  ;;  %v1783_v37 = vadd.f32 %v1782_v6, %v10036_v21  ;;  %v1784_v45 = vpop.f32.mrb[111].mxu1  ;;  %v9141_v14 = vld [vmem:[#allocation2 + $0x30] sm:$0xff]  }
 0x21d   :  { %4818 = vst [vmem:[#allocation11 + $0x558] sm:$0xff] %v7981_v23  ;;  %v2957_v53 = vmax.f32 %v1779_v31, 0.0  ;;  %v2956_v20 = vmax.f32 %v1588_v51, 0.0  ;;  %v1592_v47 = vadd.f32 %v1591_v24, %v10032_v7  ;;  %v2958_v30 = vmax.f32 %v1781_v34, 0.0 }
 0x21e   :  { %v2971_v60 = vmax.f32 %v1590_v18, 0.0  ;;  %v1785_v27 = vadd.f32 %v1784_v45, %v10043_v9  ;;  %v2973_v32 = vmax.f32 %v1783_v37, 0.0 }
 0x21f   :  { %v7988_v23 = vpack.c.bf16 %v2956_v20, %v2955_v26  ;;  %v2972_v17 = vmax.f32 %v1592_v47, 0.0  ;;  %v7989_v25 = vpack.c.bf16 %v2958_v30, %v2957_v53 }
 0x220   :  { %2306 = vmatmul.mubr.bf16.gmra.mrb[216].mxu0 %v9141_v14  ;;  %v10259_v31 = vpack.c.bf16 %v2971_v60, %v2955_v26  ;;  %v2974_v51 = vmax.f32 %v1785_v27, 0.0  ;;  %v10262_v6 = vpack.c.bf16 %v2973_v32, %v2957_v53 }
 0x221   :  { %2499 = vmatmul.mubr.bf16.gmra.mrb[216].mxu1 %v9141_v14  ;;  %2315 = vmatprep.mubr.bf16.mxu0 %v11476_v59  ;;  %4825 = vst [vmem:[#allocation11 + $0x590] sm:$0xff] %v7988_v23  ;;  %v7996_v34 = vpack.c.bf16 %v2972_v17, %v2971_v60  ;;  %v1595_v18 = vpop.f32.mrb[112].mxu0  ;;  %v10264_v24 = vpack.c.bf16 %v2972_v17, %v2956_v20  ;;  %4826 = vst [vmem:[#allocation11 + $0x598] sm:$0xff] %v7989_v25  ;;  %v1788_v14 = vpop.f32.mrb[112].mxu1 }
 0x222   :  { %11555 = vst [vmem:[#allocation90_spill] sm:$0xff] %v10259_v31  ;;  %2508 = vmatprep.mubr.bf16.mxu1 %v11476_v59  ;;  %11556 = vst [vmem:[#allocation91_spill] sm:$0xff] %v10262_v6  ;;  %v7997_v45 = vpack.c.bf16 %v2974_v51, %v2973_v32  ;;  %v1596_v37 = vadd.f32 %v1595_v18, %v10021_v58  ;;  %v1597_v47 = vpop.f32.mrb[113].mxu0  ;;  %v10267_v10 = vpack.c.bf16 %v2974_v51, %v2958_v30  ;;  %v1790_v23 = vpop.f32.mrb[113].mxu1 }
 0x223   :  { %11557 = vst [vmem:[#allocation92_spill] sm:$0xff] %v10264_v24  ;;  %4833 = vst [vmem:[#allocation11 + $0x5d0] sm:$0xff] %v7996_v34  ;;  %v1789_v26 = vadd.f32 %v1788_v14, %v10036_v21  ;;  %v1598_v27 = vadd.f32 %v1597_v47, %v10032_v7  ;;  %v1599_v53 = vpop.f32.mrb[114].mxu0  ;;  %v1791_v20 = vadd.f32 %v1790_v23, %v10043_v9  ;;  %v1792_v32 = vpop.f32.mrb[114].mxu1 }
 0x224   :  { %11558 = vst [vmem:[#allocation93_spill] sm:$0xff] %v10267_v10  ;;  %4834 = vst [vmem:[#allocation11 + $0x5d8] sm:$0xff] %v7997_v45  ;;  %v2987_v60 = vmax.f32 %v1596_v37, 0.0  ;;  %v1600_v17 = vadd.f32 %v1599_v53, %v10021_v58  ;;  %v1601_v25 = vpop.f32.mrb[115].mxu0  ;;  %v1793_v30 = vadd.f32 %v1792_v32, %v10036_v21  ;;  %v1794_v34 = vpop.f32.mrb[115].mxu1  ;;  %v9142_v10 = vld [vmem:[#allocation2 + $0x38] sm:$0xff]  }
 0x225   :  { %v2989_v18 = vmax.f32 %v1789_v26, 0.0  ;;  %v2988_v6 = vmax.f32 %v1598_v27, 0.0  ;;  %v1602_v51 = vadd.f32 %v1601_v25, %v10032_v7  ;;  %v2990_v14 = vmax.f32 %v1791_v20, 0.0 }
 0x226   :  { %v3003_v31 = vmax.f32 %v1600_v17, 0.0  ;;  %v1795_v47 = vadd.f32 %v1794_v34, %v10043_v9  ;;  %v3005_v37 = vmax.f32 %v1793_v30, 0.0 }
 0x227   :  { %v8004_v45 = vpack.c.bf16 %v2988_v6, %v2987_v60  ;;  %v3004_v23 = vmax.f32 %v1602_v51, 0.0  ;;  %v8005_v53 = vpack.c.bf16 %v2990_v14, %v2989_v18 }
 0x228   :  { %2316 = vmatmul.mubr.bf16.gmra.mrb[220].mxu0 %v9142_v10  ;;  %v10277_v26 = vpack.c.bf16 %v3003_v31, %v2987_v60  ;;  %v3006_v27 = vmax.f32 %v1795_v47, 0.0  ;;  %v10280_v32 = vpack.c.bf16 %v3005_v37, %v2989_v18 }
 0x229   :  { %2509 = vmatmul.mubr.bf16.gmra.mrb[220].mxu1 %v9142_v10  ;;  %2325 = vmatprep.mubr.bf16.mxu0 %v11476_v59  ;;  %4841 = vst [vmem:[#allocation11 + $0x610] sm:$0xff] %v8004_v45  ;;  %v8012_v20 = vpack.c.bf16 %v3004_v23, %v3003_v31  ;;  %v1605_v17 = vpop.f32.mrb[116].mxu0  ;;  %v10282_v25 = vpack.c.bf16 %v3004_v23, %v2988_v6  ;;  %4842 = vst [vmem:[#allocation11 + $0x618] sm:$0xff] %v8005_v53  ;;  %v1798_v10 = vpop.f32.mrb[116].mxu1 }
 0x22a   :  { %11559 = vst [vmem:[#allocation94_spill] sm:$0xff] %v10277_v26  ;;  %2518 = vmatprep.mubr.bf16.mxu1 %v11476_v59  ;;  %11560 = vst [vmem:[#allocation95_spill] sm:$0xff] %v10280_v32  ;;  %v8013_v34 = vpack.c.bf16 %v3006_v27, %v3005_v37  ;;  %v1606_v30 = vadd.f32 %v1605_v17, %v10021_v58  ;;  %v1607_v51 = vpop.f32.mrb[117].mxu0  ;;  %v10285_v24 = vpack.c.bf16 %v3006_v27, %v2990_v14  ;;  %v1800_v45 = vpop.f32.mrb[117].mxu1 }
 0x22b   :  { %11561 = vst [vmem:[#allocation96_spill] sm:$0xff] %v10282_v25  ;;  %4849 = vst [vmem:[#allocation11 + $0x650] sm:$0xff] %v8012_v20  ;;  %v1799_v60 = vadd.f32 %v1798_v10, %v10036_v21  ;;  %v1608_v47 = vadd.f32 %v1607_v51, %v10032_v7  ;;  %v1609_v18 = vpop.f32.mrb[118].mxu0  ;;  %v1801_v6 = vadd.f32 %v1800_v45, %v10043_v9  ;;  %v1802_v37 = vpop.f32.mrb[118].mxu1 }
 0x22c   :  { %11562 = vst [vmem:[#allocation97_spill] sm:$0xff] %v10285_v24  ;;  %4850 = vst [vmem:[#allocation11 + $0x658] sm:$0xff] %v8013_v34  ;;  %v3019_v31 = vmax.f32 %v1606_v30, 0.0  ;;  %v1610_v23 = vadd.f32 %v1609_v18, %v10021_v58  ;;  %v1611_v53 = vpop.f32.mrb[119].mxu0  ;;  %v1803_v14 = vadd.f32 %v1802_v37, %v10036_v21  ;;  %v1804_v20 = vpop.f32.mrb[119].mxu1  ;;  %v9143_v24 = vld [vmem:[#allocation2 + $0x40] sm:$0xff]  }
 0x22d   :  { %v3021_v17 = vmax.f32 %v1799_v60, 0.0  ;;  %v3020_v32 = vmax.f32 %v1608_v47, 0.0  ;;  %v1612_v27 = vadd.f32 %v1611_v53, %v10032_v7  ;;  %v3022_v10 = vmax.f32 %v1801_v6, 0.0 }
 0x22e   :  { %v3035_v26 = vmax.f32 %v1610_v23, 0.0  ;;  %v1805_v51 = vadd.f32 %v1804_v20, %v10043_v9  ;;  %v3037_v30 = vmax.f32 %v1803_v14, 0.0 }
 0x22f   :  { %v8020_v34 = vpack.c.bf16 %v3020_v32, %v3019_v31  ;;  %v3036_v45 = vmax.f32 %v1612_v27, 0.0  ;;  %v8021_v18 = vpack.c.bf16 %v3022_v10, %v3021_v17 }
 0x230   :  { %2326 = vmatmul.mubr.bf16.gmra.mrb[224].mxu0 %v9143_v24  ;;  %v10295_v60 = vpack.c.bf16 %v3035_v26, %v3019_v31  ;;  %v3038_v47 = vmax.f32 %v1805_v51, 0.0  ;;  %v10298_v37 = vpack.c.bf16 %v3037_v30, %v3021_v17 }
 0x231   :  { %2519 = vmatmul.mubr.bf16.gmra.mrb[224].mxu1 %v9143_v24  ;;  %2335 = vmatprep.mubr.bf16.mxu0 %v11476_v59  ;;  %4857 = vst [vmem:[#allocation11 + $0x690] sm:$0xff] %v8020_v34  ;;  %v8028_v6 = vpack.c.bf16 %v3036_v45, %v3035_v26  ;;  %v1615_v23 = vpop.f32.mrb[120].mxu0  ;;  %v10300_v53 = vpack.c.bf16 %v3036_v45, %v3020_v32  ;;  %4858 = vst [vmem:[#allocation11 + $0x698] sm:$0xff] %v8021_v18  ;;  %v1808_v24 = vpop.f32.mrb[120].mxu1 }
 0x232   :  { %11563 = vst [vmem:[#allocation98_spill] sm:$0xff] %v10295_v60  ;;  %2528 = vmatprep.mubr.bf16.mxu1 %v11476_v59  ;;  %11564 = vst [vmem:[#allocation99_spill] sm:$0xff] %v10298_v37  ;;  %v8029_v20 = vpack.c.bf16 %v3038_v47, %v3037_v30  ;;  %v1616_v14 = vadd.f32 %v1615_v23, %v10021_v58  ;;  %v1617_v27 = vpop.f32.mrb[121].mxu0  ;;  %v10303_v25 = vpack.c.bf16 %v3038_v47, %v3022_v10  ;;  %v1810_v34 = vpop.f32.mrb[121].mxu1 }
 0x233   :  { %11565 = vst [vmem:[#allocation100_spill] sm:$0xff] %v10300_v53  ;;  %4865 = vst [vmem:[#allocation11 + $0x6d0] sm:$0xff] %v8028_v6  ;;  %v1809_v31 = vadd.f32 %v1808_v24, %v10036_v21  ;;  %v1618_v51 = vadd.f32 %v1617_v27, %v10032_v7  ;;  %v1619_v17 = vpop.f32.mrb[122].mxu0  ;;  %v1811_v32 = vadd.f32 %v1810_v34, %v10043_v9  ;;  %v1812_v30 = vpop.f32.mrb[122].mxu1 }
 0x234   :  { %11566 = vst [vmem:[#allocation101_spill] sm:$0xff] %v10303_v25  ;;  %4866 = vst [vmem:[#allocation11 + $0x6d8] sm:$0xff] %v8029_v20  ;;  %v3051_v26 = vmax.f32 %v1616_v14, 0.0  ;;  %v1620_v45 = vadd.f32 %v1619_v17, %v10021_v58  ;;  %v1621_v18 = vpop.f32.mrb[123].mxu0  ;;  %v1813_v10 = vadd.f32 %v1812_v30, %v10036_v21  ;;  %v1814_v6 = vpop.f32.mrb[123].mxu1  ;;  %v9144_v25 = vld [vmem:[#allocation2 + $0x48] sm:$0xff]  }
 0x235   :  { %v3053_v23 = vmax.f32 %v1809_v31, 0.0  ;;  %v3052_v37 = vmax.f32 %v1618_v51, 0.0  ;;  %v1622_v47 = vadd.f32 %v1621_v18, %v10032_v7  ;;  %v3054_v24 = vmax.f32 %v1811_v32, 0.0  ;;  %v236_v18 = vld [vmem:[#allocation7 + $0x8] sm:$0xff] }
 0x236   :  { %v3067_v60 = vmax.f32 %v1620_v45, 0.0  ;;  %v1815_v27 = vadd.f32 %v1814_v6, %v10043_v9  ;;  %v3069_v14 = vmax.f32 %v1813_v10, 0.0 }
 0x237   :  { %v8036_v20 = vpack.c.bf16 %v3052_v37, %v3051_v26  ;;  %v3068_v34 = vmax.f32 %v1622_v47, 0.0  ;;  %v8037_v17 = vpack.c.bf16 %v3054_v24, %v3053_v23 }
 0x238   :  { %2336 = vmatmul.mubr.bf16.gmra.mrb[228].mxu0 %v9144_v25  ;;  %v10313_v31 = vpack.c.bf16 %v3067_v60, %v3051_v26  ;;  %v3070_v51 = vmax.f32 %v1815_v27, 0.0  ;;  %v10316_v30 = vpack.c.bf16 %v3069_v14, %v3053_v23 }
 0x239   :  { %2529 = vmatmul.mubr.bf16.gmra.mrb[228].mxu1 %v9144_v25  ;;  %2345 = vmatprep.mubr.bf16.mxu0 %v11476_v59  ;;  %4873 = vst [vmem:[#allocation11 + $0x710] sm:$0xff] %v8036_v20  ;;  %v8044_v32 = vpack.c.bf16 %v3068_v34, %v3067_v60  ;;  %v1625_v45 = vpop.f32.mrb[124].mxu0  ;;  %v10318_v6 = vpack.c.bf16 %v3068_v34, %v3052_v37  ;;  %4874 = vst [vmem:[#allocation11 + $0x718] sm:$0xff] %v8037_v17  ;;  %v1818_v47 = vpop.f32.mrb[124].mxu1 }
 0x23a   :  { %11567 = vst [vmem:[#allocation102_spill] sm:$0xff] %v10313_v31  ;;  %2538 = vmatprep.mubr.bf16.mxu1 %v11476_v59  ;;  %11568 = vst [vmem:[#allocation103_spill] sm:$0xff] %v10316_v30  ;;  %v8045_v10 = vpack.c.bf16 %v3070_v51, %v3069_v14  ;;  %v1626_v25 = vadd.f32 %v1625_v45, %v10021_v58  ;;  %v1627_v53 = vpop.f32.mrb[125].mxu0  ;;  %v10321_v43 = vpack.c.bf16 %v3070_v51, %v3054_v24  ;;  %v1820_v23 = vpop.f32.mrb[125].mxu1 }
 0x23b   :  { %11569 = vst [vmem:[#allocation104_spill] sm:$0xff] %v10318_v6  ;;  %4881 = vst [vmem:[#allocation11 + $0x750] sm:$0xff] %v8044_v32  ;;  %v1819_v26 = vadd.f32 %v1818_v47, %v10036_v21  ;;  %v1628_v27 = vadd.f32 %v1627_v53, %v10032_v7  ;;  %v1629_v20 = vpop.f32.mrb[126].mxu0  ;;  %v1821_v37 = vadd.f32 %v1820_v23, %v10043_v9  ;;  %v1822_v14 = vpop.f32.mrb[126].mxu1  ;;  %v11571_v45 = vsub.s32 0, %v9566_v12  ;;  %v9145_v23 = vld [vmem:[#allocation2 + $0x50] sm:$0xff]  }
 0x23c   :  { %11570 = vst [vmem:[#allocation105_spill] sm:$0xff] %v10321_v43  ;;  %4882 = vst [vmem:[#allocation11 + $0x758] sm:$0xff] %v8045_v10  ;;  %v3083_v60 = vmax.f32 %v1626_v25, 0.0  ;;  %v1630_v34 = vadd.f32 %v1629_v20, %v10021_v58  ;;  %v1631_v17 = vpop.f32.mrb[127].mxu0  ;;  %v1823_v32 = vadd.f32 %v1822_v14, %v10036_v21  ;;  %v1824_v47 = vpop.f32.mrb[127].mxu1  ;;  %v11572_v58 = vsub.s32 1, %v9566_v12 }
 0x23d   :  { %v10329_v30 = vrot.slane %v236_v18, %v11571_v45  ;;  %v3085_v24 = vmax.f32 %v1819_v26, 0.0  ;;  %v3084_v51 = vmax.f32 %v1628_v27, 0.0  ;;  %v1632_v53 = vadd.f32 %v1631_v17, %v10032_v7 }
 0x23e   :  { %v3086_v31 = vmax.f32 %v1821_v37, 0.0  ;;  %v3099_v10 = vmax.f32 %v1630_v34, 0.0  ;;  %v1825_v25 = vadd.f32 %v1824_v47, %v10043_v9  ;;  %v10336_v20 = vrot.slane %v236_v18, %v11572_v58 }
 0x23f   :  { %v8052_v43 = vpack.c.bf16 %v3084_v51, %v3083_v60  ;;  %v3101_v45 = vmax.f32 %v1823_v32, 0.0  ;;  %v3100_v6 = vmax.f32 %v1632_v53, 0.0  ;;  %v11573_v26 = vsub.s32 2, %v9566_v12 }
 0x240   :  { %2346 = vmatmul.mubr.bf16.gmra.mrb[232].mxu0 %v9145_v23  ;;  %v8053_v7 = vpack.c.bf16 %v3086_v31, %v3085_v24  ;;  %v10343_v27 = vpack.c.bf16 %v3099_v10, %v3083_v60  ;;  %v3102_v9 = vmax.f32 %v1825_v25, 0.0  ;;  %v11575_v37 = vsub.s32 3, %v9566_v12 }
 0x241   :  { %2539 = vmatmul.mubr.bf16.gmra.mrb[232].mxu1 %v9145_v23  ;;  %v10340_v21 = vrot.slane %v236_v18, %v11573_v26  ;;  %2355 = vmatprep.mubr.bf16.mxu0 %v11476_v59  ;;  %4889 = vst [vmem:[#allocation11 + $0x790] sm:$0xff] %v8052_v43  ;;  %v10350_v14 = vpack.c.bf16 %v3101_v45, %v3085_v24  ;;  %v1861_v32 = vpop.f32.mrb[128].mxu0  ;;  %v2054_v60 = vpop.f32.mrb[128].mxu1 }
 0x242   :  { %11574 = vst [vmem:[#allocation106_spill] sm:$0xff] %v10343_v27  ;;  %v10347_v34 = vrot.slane %v236_v18, %v11575_v37  ;;  %2548 = vmatprep.mubr.bf16.mxu1 %v11476_v59  ;;  %v8060_v17 = vpack.c.bf16 %v3100_v6, %v3099_v10  ;;  %v10352_v53 = vpack.c.bf16 %v3100_v6, %v3084_v51  ;;  %4890 = vst [vmem:[#allocation11 + $0x798] sm:$0xff] %v8053_v7  ;;  %v1863_v58 = vpop.f32.mrb[129].mxu0  ;;  %v2056_v43 = vpop.f32.mrb[129].mxu1  ;;  %v9146_v27 = vld [vmem:[#allocation2 + $0x58] sm:$0xff]  }
 0x243   :  { %11576 = vst [vmem:[#allocation107_spill] sm:$0xff] %v10350_v14  ;;  %v8061_v47 = vpack.c.bf16 %v3102_v9, %v3101_v45  ;;  %v1862_v23 = vadd.f32 %v1861_v32, %v10329_v30  ;;  %v10355_v25 = vpack.c.bf16 %v3102_v9, %v3086_v31  ;;  %v2055_v18 = vadd.f32 %v2054_v60, %v10340_v21  ;;  %v1865_v24 = vpop.f32.mrb[130].mxu0  ;;  %v2058_v45 = vpop.f32.mrb[130].mxu1 }
 0x244   :  { %4897 = vst [vmem:[#allocation11 + $0x7d0] sm:$0xff] %v8060_v17  ;;  %v1864_v26 = vadd.f32 %v1863_v58, %v10336_v20  ;;  %v2057_v6 = vadd.f32 %v2056_v43, %v10347_v34  ;;  %v1866_v51 = vadd.f32 %v1865_v24, %v10329_v30  ;;  %v1867_v7 = vpop.f32.mrb[131].mxu0  ;;  %v2059_v31 = vadd.f32 %v2058_v45, %v10340_v21  ;;  %v2060_v17 = vpop.f32.mrb[131].mxu1 }
 0x245   :  { %11577 = vst [vmem:[#allocation108_spill] sm:$0xff] %v10355_v25  ;;  %4898 = vst [vmem:[#allocation11 + $0x7d8] sm:$0xff] %v8061_v47  ;;  %v2607_v10 = vmax.f32 %v1862_v23, 0.0  ;;  %v2609_v37 = vmax.f32 %v2055_v18, 0.0  ;;  %v1868_v9 = vadd.f32 %v1867_v7, %v10336_v20  ;;  %v2061_v58 = vadd.f32 %v2060_v17, %v10347_v34 }
 0x246   :  { %v2608_v32 = vmax.f32 %v1864_v26, 0.0  ;;  %v2610_v60 = vmax.f32 %v2057_v6, 0.0  ;;  %v2623_v14 = vmax.f32 %v1866_v51, 0.0  ;;  %v2625_v23 = vmax.f32 %v2059_v31, 0.0 }
 0x247   :  { %v2624_v43 = vmax.f32 %v1868_v9, 0.0  ;;  %v2626_v26 = vmax.f32 %v2061_v58, 0.0 }
 0x248   :  { %2356 = vmatmul.mubr.bf16.gmra.mrb[236].mxu0 %v9146_v27  ;;  %v7814_v47 = vpack.c.bf16 %v2608_v32, %v2607_v10  ;;  %v7815_v24 = vpack.c.bf16 %v2610_v60, %v2609_v37  ;;  %v10365_v18 = vpack.c.bf16 %v2623_v14, %v2607_v10  ;;  %v10368_v45 = vpack.c.bf16 %v2625_v23, %v2609_v37 }
 0x249   :  { %2549 = vmatmul.mubr.bf16.gmra.mrb[236].mxu1 %v9146_v27  ;;  %2365 = vmatprep.mubr.bf16.mxu0 %v11476_v59  ;;  %v7822_v6 = vpack.c.bf16 %v2624_v43, %v2623_v14  ;;  %v1871_v51 = vpop.f32.mrb[132].mxu0  ;;  %v10370_v7 = vpack.c.bf16 %v2624_v43, %v2608_v32  ;;  %v7823_v17 = vpack.c.bf16 %v2626_v26, %v2625_v23  ;;  %v2064_v27 = vpop.f32.mrb[132].mxu1 }
 0x24a   :  { %11578 = vst [vmem:[#allocation109_spill] sm:$0xff] %v10365_v18  ;;  %2558 = vmatprep.mubr.bf16.mxu1 %v11476_v59  ;;  %4651 = vst [vmem:[#allocation11 + $0x20] sm:$0xff] %v7814_v47  ;;  %v1872_v31 = vadd.f32 %v1871_v51, %v10329_v30  ;;  %v1873_v9 = vpop.f32.mrb[133].mxu0  ;;  %v10373_v25 = vpack.c.bf16 %v2626_v26, %v2610_v60  ;;  %v2065_v10 = vadd.f32 %v2064_v27, %v10340_v21  ;;  %v2066_v47 = vpop.f32.mrb[133].mxu1 }
 0x24b   :  { %11579 = vst [vmem:[#allocation110_spill] sm:$0xff] %v10368_v45  ;;  %11580 = vst [vmem:[#allocation111_spill] sm:$0xff] %v10370_v7  ;;  %v1874_v58 = vadd.f32 %v1873_v9, %v10336_v20  ;;  %v1875_v37 = vpop.f32.mrb[134].mxu0  ;;  %v2067_v32 = vadd.f32 %v2066_v47, %v10347_v34  ;;  %v2068_v23 = vpop.f32.mrb[134].mxu1 }
 0x24c   :  { %4652 = vst [vmem:[#allocation11 + $0x28] sm:$0xff] %v7815_v24  ;;  %11581 = vst [vmem:[#allocation112_spill] sm:$0xff] %v10373_v25  ;;  %v2639_v14 = vmax.f32 %v1872_v31, 0.0  ;;  %v1876_v43 = vadd.f32 %v1875_v37, %v10329_v30  ;;  %v1877_v24 = vpop.f32.mrb[135].mxu0  ;;  %v2641_v51 = vmax.f32 %v2065_v10, 0.0  ;;  %v2069_v60 = vadd.f32 %v2068_v23, %v10340_v21  ;;  %v9147_v25 = vld [vmem:[#allocation2 + $0x60] sm:$0xff]  }
 0x24d   :  { %4659 = vst [vmem:[#allocation11 + $0x60] sm:$0xff] %v7822_v6  ;;  %4660 = vst [vmem:[#allocation11 + $0x68] sm:$0xff] %v7823_v17  ;;  %v2640_v45 = vmax.f32 %v1874_v58, 0.0  ;;  %v1878_v26 = vadd.f32 %v1877_v24, %v10336_v20  ;;  %v2070_v6 = vpop.f32.mrb[135].mxu1  ;;  %v2642_v27 = vmax.f32 %v2067_v32, 0.0 }
 0x24e   :  { %v2655_v18 = vmax.f32 %v1876_v43, 0.0  ;;  %v2071_v9 = vadd.f32 %v2070_v6, %v10347_v34  ;;  %v2657_v31 = vmax.f32 %v2069_v60, 0.0 }
 0x24f   :  { %v7830_v17 = vpack.c.bf16 %v2640_v45, %v2639_v14  ;;  %v2656_v47 = vmax.f32 %v1878_v26, 0.0  ;;  %v7831_v37 = vpack.c.bf16 %v2642_v27, %v2641_v51 }
 0x250   :  { %2366 = vmatmul.mubr.bf16.gmra.mrb[240].mxu0 %v9147_v25  ;;  %v10383_v10 = vpack.c.bf16 %v2655_v18, %v2639_v14  ;;  %v2658_v58 = vmax.f32 %v2071_v9, 0.0  ;;  %v10386_v23 = vpack.c.bf16 %v2657_v31, %v2641_v51 }
 0x251   :  { %2559 = vmatmul.mubr.bf16.gmra.mrb[240].mxu1 %v9147_v25  ;;  %2375 = vmatprep.mubr.bf16.mxu0 %v11476_v59  ;;  %4667 = vst [vmem:[#allocation11 + $0xa0] sm:$0xff] %v7830_v17  ;;  %v7838_v32 = vpack.c.bf16 %v2656_v47, %v2655_v18  ;;  %v1881_v43 = vpop.f32.mrb[136].mxu0  ;;  %v10388_v24 = vpack.c.bf16 %v2656_v47, %v2640_v45  ;;  %4668 = vst [vmem:[#allocation11 + $0xa8] sm:$0xff] %v7831_v37  ;;  %v2074_v25 = vpop.f32.mrb[136].mxu1 }
 0x252   :  { %11582 = vst [vmem:[#allocation113_spill] sm:$0xff] %v10383_v10  ;;  %2568 = vmatprep.mubr.bf16.mxu1 %v11476_v59  ;;  %11583 = vst [vmem:[#allocation114_spill] sm:$0xff] %v10386_v23  ;;  %v7839_v6 = vpack.c.bf16 %v2658_v58, %v2657_v31  ;;  %v1882_v60 = vadd.f32 %v1881_v43, %v10329_v30  ;;  %v1883_v26 = vpop.f32.mrb[137].mxu0  ;;  %v10391_v7 = vpack.c.bf16 %v2658_v58, %v2642_v27  ;;  %v2076_v17 = vpop.f32.mrb[137].mxu1 }
 0x253   :  { %11584 = vst [vmem:[#allocation115_spill] sm:$0xff] %v10388_v24  ;;  %4675 = vst [vmem:[#allocation11 + $0xe0] sm:$0xff] %v7838_v32  ;;  %v2075_v14 = vadd.f32 %v2074_v25, %v10340_v21  ;;  %v1884_v9 = vadd.f32 %v1883_v26, %v10336_v20  ;;  %v1885_v51 = vpop.f32.mrb[138].mxu0  ;;  %v2077_v45 = vadd.f32 %v2076_v17, %v10347_v34  ;;  %v2078_v31 = vpop.f32.mrb[138].mxu1 }
 0x254   :  { %11585 = vst [vmem:[#allocation116_spill] sm:$0xff] %v10391_v7  ;;  %4676 = vst [vmem:[#allocation11 + $0xe8] sm:$0xff] %v7839_v6  ;;  %v2671_v18 = vmax.f32 %v1882_v60, 0.0  ;;  %v1886_v47 = vadd.f32 %v1885_v51, %v10329_v30  ;;  %v1887_v37 = vpop.f32.mrb[139].mxu0  ;;  %v2079_v27 = vadd.f32 %v2078_v31, %v10340_v21  ;;  %v2080_v32 = vpop.f32.mrb[139].mxu1  ;;  %v9148_v7 = vld [vmem:[#allocation2 + $0x68] sm:$0xff]  }
 0x255   :  { %v2673_v43 = vmax.f32 %v2075_v14, 0.0  ;;  %v2672_v23 = vmax.f32 %v1884_v9, 0.0  ;;  %v1888_v58 = vadd.f32 %v1887_v37, %v10336_v20  ;;  %v2674_v25 = vmax.f32 %v2077_v45, 0.0 }
 0x256   :  { %v2687_v10 = vmax.f32 %v1886_v47, 0.0  ;;  %v2081_v26 = vadd.f32 %v2080_v32, %v10347_v34  ;;  %v2689_v60 = vmax.f32 %v2079_v27, 0.0 }
 0x257   :  { %v7846_v6 = vpack.c.bf16 %v2672_v23, %v2671_v18  ;;  %v2688_v17 = vmax.f32 %v1888_v58, 0.0  ;;  %v7847_v51 = vpack.c.bf16 %v2674_v25, %v2673_v43 }
 0x258   :  { %2376 = vmatmul.mubr.bf16.gmra.mrb[244].mxu0 %v9148_v7  ;;  %v10401_v14 = vpack.c.bf16 %v2687_v10, %v2671_v18  ;;  %v2690_v9 = vmax.f32 %v2081_v26, 0.0  ;;  %v10404_v31 = vpack.c.bf16 %v2689_v60, %v2673_v43 }
 0x259   :  { %2569 = vmatmul.mubr.bf16.gmra.mrb[244].mxu1 %v9148_v7  ;;  %2385 = vmatprep.mubr.bf16.mxu0 %v11476_v59  ;;  %4683 = vst [vmem:[#allocation11 + $0x120] sm:$0xff] %v7846_v6  ;;  %v7854_v45 = vpack.c.bf16 %v2688_v17, %v2687_v10  ;;  %v1891_v47 = vpop.f32.mrb[140].mxu0  ;;  %v10406_v37 = vpack.c.bf16 %v2688_v17, %v2672_v23  ;;  %4684 = vst [vmem:[#allocation11 + $0x128] sm:$0xff] %v7847_v51  ;;  %v2084_v7 = vpop.f32.mrb[140].mxu1 }
 0x25a   :  { %11586 = vst [vmem:[#allocation117_spill] sm:$0xff] %v10401_v14  ;;  %2578 = vmatprep.mubr.bf16.mxu1 %v11476_v59  ;;  %11587 = vst [vmem:[#allocation118_spill] sm:$0xff] %v10404_v31  ;;  %v7855_v32 = vpack.c.bf16 %v2690_v9, %v2689_v60  ;;  %v1892_v27 = vadd.f32 %v1891_v47, %v10329_v30  ;;  %v1893_v58 = vpop.f32.mrb[141].mxu0  ;;  %v10409_v24 = vpack.c.bf16 %v2690_v9, %v2674_v25  ;;  %v2086_v6 = vpop.f32.mrb[141].mxu1 }
 0x25b   :  { %11588 = vst [vmem:[#allocation119_spill] sm:$0xff] %v10406_v37  ;;  %4691 = vst [vmem:[#allocation11 + $0x160] sm:$0xff] %v7854_v45  ;;  %v2085_v18 = vadd.f32 %v2084_v7, %v10340_v21  ;;  %v1894_v26 = vadd.f32 %v1893_v58, %v10336_v20  ;;  %v1895_v43 = vpop.f32.mrb[142].mxu0  ;;  %v2087_v23 = vadd.f32 %v2086_v6, %v10347_v34  ;;  %v2088_v60 = vpop.f32.mrb[142].mxu1 }
 0x25c   :  { %11589 = vst [vmem:[#allocation120_spill] sm:$0xff] %v10409_v24  ;;  %4692 = vst [vmem:[#allocation11 + $0x168] sm:$0xff] %v7855_v32  ;;  %v2703_v10 = vmax.f32 %v1892_v27, 0.0  ;;  %v1896_v17 = vadd.f32 %v1895_v43, %v10329_v30  ;;  %v1897_v51 = vpop.f32.mrb[143].mxu0  ;;  %v2089_v25 = vadd.f32 %v2088_v60, %v10340_v21  ;;  %v2090_v45 = vpop.f32.mrb[143].mxu1  ;;  %v9149_v24 = vld [vmem:[#allocation2 + $0x70] sm:$0xff]  }
 0x25d   :  { %v2705_v47 = vmax.f32 %v2085_v18, 0.0  ;;  %v2704_v31 = vmax.f32 %v1894_v26, 0.0  ;;  %v1898_v9 = vadd.f32 %v1897_v51, %v10336_v20  ;;  %v2706_v7 = vmax.f32 %v2087_v23, 0.0 }
 0x25e   :  { %v2719_v14 = vmax.f32 %v1896_v17, 0.0  ;;  %v2091_v58 = vadd.f32 %v2090_v45, %v10347_v34  ;;  %v2721_v27 = vmax.f32 %v2089_v25, 0.0 }
 0x25f   :  { %v7862_v32 = vpack.c.bf16 %v2704_v31, %v2703_v10  ;;  %v2720_v6 = vmax.f32 %v1898_v9, 0.0  ;;  %v7863_v43 = vpack.c.bf16 %v2706_v7, %v2705_v47 }
 0x260   :  { %2386 = vmatmul.mubr.bf16.gmra.mrb[248].mxu0 %v9149_v24  ;;  %v10419_v18 = vpack.c.bf16 %v2719_v14, %v2703_v10  ;;  %v2722_v26 = vmax.f32 %v2091_v58, 0.0  ;;  %v10422_v60 = vpack.c.bf16 %v2721_v27, %v2705_v47 }
 0x261   :  { %2579 = vmatmul.mubr.bf16.gmra.mrb[248].mxu1 %v9149_v24  ;;  %2395 = vmatprep.mubr.bf16.mxu0 %v11476_v59  ;;  %4699 = vst [vmem:[#allocation11 + $0x1a0] sm:$0xff] %v7862_v32  ;;  %v7870_v23 = vpack.c.bf16 %v2720_v6, %v2719_v14  ;;  %v10424_v51 = vpack.c.bf16 %v2720_v6, %v2704_v31  ;;  %4700 = vst [vmem:[#allocation11 + $0x1a8] sm:$0xff] %v7863_v43 }
 0x262   :  { %11590 = vst [vmem:[#allocation121_spill] sm:$0xff] %v10419_v18  ;;  %2588 = vmatprep.mubr.bf16.mxu1 %v11476_v59  ;;  %11591 = vst [vmem:[#allocation122_spill] sm:$0xff] %v10422_v60  ;;  %v7871_v45 = vpack.c.bf16 %v2722_v26, %v2721_v27  ;;  %v10427_v37 = vpack.c.bf16 %v2722_v26, %v2706_v7  ;;  %v9150_v18 = vld [vmem:[#allocation2 + $0x78] sm:$0xff]  }
 0x263   :  { %v1901_v17 = vpop.f32.mrb[144].mxu0  ;;  %4707 = vst [vmem:[#allocation11 + $0x1e0] sm:$0xff] %v7870_v23 }
 0x264   :  { %v1902_v25 = vadd.f32 %v1901_v17, %v10329_v30  ;;  %v2094_v24 = vpop.f32.mrb[144].mxu1  ;;  %v1903_v9 = vpop.f32.mrb[145].mxu0  ;;  %4708 = vst [vmem:[#allocation11 + $0x1e8] sm:$0xff] %v7871_v45 }
 0x265   :  { %v2095_v10 = vadd.f32 %v2094_v24, %v10340_v21  ;;  %v1904_v59 = vadd.f32 %v1903_v9, %v10336_v20  ;;  %v2096_v58 = vpop.f32.mrb[145].mxu1  ;;  %v1905_v47 = vpop.f32.mrb[146].mxu0 }
 0x266   :  { %v2735_v14 = vmax.f32 %v1902_v25, 0.0  ;;  %v2097_v31 = vadd.f32 %v2096_v58, %v10347_v34  ;;  %v1906_v32 = vadd.f32 %v1905_v47, %v10329_v30  ;;  %v2098_v27 = vpop.f32.mrb[146].mxu1  ;;  %v1907_v6 = vpop.f32.mrb[147].mxu0 }
 0x267   :  { %v2737_v43 = vmax.f32 %v2095_v10, 0.0  ;;  %v2736_v17 = vmax.f32 %v1904_v59, 0.0  ;;  %v2099_v7 = vadd.f32 %v2098_v27, %v10340_v21  ;;  %v1908_v26 = vadd.f32 %v1907_v6, %v10336_v20  ;;  %v2100_v23 = vpop.f32.mrb[147].mxu1 }
 0x268   :  { %v2738_v24 = vmax.f32 %v2097_v31, 0.0  ;;  %v2751_v60 = vmax.f32 %v1906_v32, 0.0  ;;  %v2101_v9 = vadd.f32 %v2100_v23, %v10347_v34  ;;  %2396 = vmatmul.mubr.bf16.gmra.mrb[252].mxu0 %v9150_v18 }
 0x269   :  { %v7878_v45 = vpack.c.bf16 %v2736_v17, %v2735_v14  ;;  %v2753_v25 = vmax.f32 %v2099_v7, 0.0  ;;  %v2752_v58 = vmax.f32 %v1908_v26, 0.0  ;;  %2589 = vmatmul.mubr.bf16.gmra.mrb[252].mxu1 %v9150_v18  ;;  %5959 = vmatprep.mubr.bf16.mxu0 %v9611_v39 }
 0x26a   :  { %v7879_v47 = vpack.c.bf16 %v2738_v24, %v2737_v43  ;;  %v10437_v10 = vpack.c.bf16 %v2751_v60, %v2735_v14  ;;  %v2754_v59 = vmax.f32 %v2101_v9, 0.0  ;;  %6120 = vmatprep.mubr.bf16.mxu1 %v9614_v42 }
 0x26b   :  { %4715 = vst [vmem:[#allocation11 + $0x220] sm:$0xff] %v7878_v45  ;;  %v10440_v27 = vpack.c.bf16 %v2753_v25, %v2737_v43  ;;  %v7886_v31 = vpack.c.bf16 %v2752_v58, %v2751_v60  ;;  %v1911_v32 = vpop.f32.mrb[148].mxu0  ;;  %v10442_v6 = vpack.c.bf16 %v2752_v58, %v2736_v17 }
 0x26c   :  { %11592 = vst [vmem:[#allocation123_spill] sm:$0xff] %v10437_v10  ;;  %4716 = vst [vmem:[#allocation11 + $0x228] sm:$0xff] %v7879_v47  ;;  %v7887_v23 = vpack.c.bf16 %v2754_v59, %v2753_v25  ;;  %v1912_v7 = vadd.f32 %v1911_v32, %v10329_v30  ;;  %v2104_v18 = vpop.f32.mrb[148].mxu1  ;;  %v1913_v26 = vpop.f32.mrb[149].mxu0  ;;  %v10445_v39 = vpack.c.bf16 %v2754_v59, %v2738_v24  ;;  %v9023_v47 = vld [vmem:[#allocation8 + $0x100] sm:$0xff]  }
 0x26d   :  { %11593 = vst [vmem:[#allocation124_spill] sm:$0xff] %v10440_v27  ;;  %11594 = vst [vmem:[#allocation125_spill] sm:$0xff] %v10442_v6  ;;  %v2105_v14 = vadd.f32 %v2104_v18, %v10340_v21  ;;  %v1914_v42 = vadd.f32 %v1913_v26, %v10336_v20  ;;  %v2106_v9 = vpop.f32.mrb[149].mxu1  ;;  %v1915_v43 = vpop.f32.mrb[150].mxu0  ;;  %v9025_v18 = vld [vmem:[#allocation8 + $0x180] sm:$0xff]   ;;  %v9026_v26 = vld [vmem:[#allocation8 + $0x148] sm:$0xff]  }
 0x26e   :  { %11595 = vst [vmem:[#allocation126_spill] sm:$0xff] %v10445_v39  ;;  %4723 = vst [vmem:[#allocation11 + $0x260] sm:$0xff] %v7886_v31  ;;  %v2767_v60 = vmax.f32 %v1912_v7, 0.0  ;;  %v2107_v17 = vadd.f32 %v2106_v9, %v10347_v34  ;;  %v1916_v45 = vadd.f32 %v1915_v43, %v10329_v30  ;;  %v2108_v25 = vpop.f32.mrb[150].mxu1  ;;  %v1917_v58 = vpop.f32.mrb[151].mxu0  ;;  %v9028_v7 = vld [vmem:[#allocation8 + $0x1c8] sm:$0xff]  }
 0x26f   :  { %4724 = vst [vmem:[#allocation11 + $0x268] sm:$0xff] %v7887_v23  ;;  %v2769_v32 = vmax.f32 %v2105_v14, 0.0  ;;  %v2768_v27 = vmax.f32 %v1914_v42, 0.0  ;;  %v2109_v24 = vadd.f32 %v2108_v25, %v10340_v21  ;;  %v1918_v59 = vadd.f32 %v1917_v58, %v10336_v20  ;;  %v2110_v31 = vpop.f32.mrb[151].mxu1 }
 0x270   :  { %v2770_v10 = vmax.f32 %v2107_v17, 0.0  ;;  %v2783_v39 = vmax.f32 %v1916_v45, 0.0  ;;  %v2111_v23 = vadd.f32 %v2110_v31, %v10347_v34  ;;  %5960 = vmatmul.mubr.bf16.vlgmr.msra.gmra.mrb[0].mxu0 %v9606_v16  ;;  %v9027_v17 = vld [vmem:[#allocation8 + $0x108] sm:$0xff]  }
 0x271   :  { %v7894_v9 = vpack.c.bf16 %v2768_v27, %v2767_v60  ;;  %v2785_v43 = vmax.f32 %v2109_v24, 0.0  ;;  %v2784_v6 = vmax.f32 %v1918_v59, 0.0  ;;  %6121 = vmatmul.mubr.bf16.vlgmr.msra.gmra.mrb[0].mxu1 %v9609_v36  ;;  %5967 = vmatprep.mubr.bf16.mxu0 %v9631_v8  ;;  %v9029_v24 = vld [vmem:[#allocation8 + $0x188] sm:$0xff]   ;;  %v9030_v59 = vld [vmem:[#allocation8 + $0x150] sm:$0xff]  }
 0x272   :  { %v7895_v14 = vpack.c.bf16 %v2770_v10, %v2769_v32  ;;  %v10457_v42 = vpack.c.bf16 %v2783_v39, %v2767_v60  ;;  %v2786_v25 = vmax.f32 %v2111_v23, 0.0  ;;  %6128 = vmatprep.mubr.bf16.mxu1 %v9634_v13  ;;  %8291 = vmatpush3.bf16.msra.mxu0 %v9023_v47  ;;  %v9032_v13 = vld [vmem:[#allocation8 + $0x1d0] sm:$0xff]  }
 0x273   :  { %4731 = vst [vmem:[#allocation11 + $0x2a0] sm:$0xff] %v7894_v9  ;;  %v10460_v45 = vpack.c.bf16 %v2785_v43, %v2769_v32  ;;  %v7902_v16 = vpack.c.bf16 %v2784_v6, %v2783_v39  ;;  %v1921_v58 = vpop.f32.mrb[152].mxu0  ;;  %8403 = vmatpush3.bf16.msra.mxu1 %v9025_v18  ;;  %8292 = vmatprep.subr.bf16.mxu0 %v9026_v26 }
 0x274   :  { %v10462_v36 = vpack.c.bf16 %v2784_v6, %v2768_v27  ;;  %4732 = vst [vmem:[#allocation11 + $0x2a8] sm:$0xff] %v7895_v14  ;;  %v7903_v8 = vpack.c.bf16 %v2786_v25, %v2785_v43  ;;  %v1922_v60 = vadd.f32 %v1921_v58, %v10329_v30  ;;  %v2114_v31 = vpop.f32.mrb[152].mxu1  ;;  %v1923_v23 = vpop.f32.mrb[153].mxu0  ;;  %8404 = vmatprep.subr.bf16.mxu1 %v9028_v7  ;;  %v9031_v7 = vld [vmem:[#allocation8 + $0x110] sm:$0xff]  }
 0x275   :  { %11596 = vst [vmem:[#allocation127_spill] sm:$0xff] %v10460_v45  ;;  %v10465_v47 = vpack.c.bf16 %v2786_v25, %v2770_v10  ;;  %4739 = vst [vmem:[#allocation11 + $0x2e0] sm:$0xff] %v7902_v16  ;;  %v2115_v39 = vadd.f32 %v2114_v31, %v10340_v21  ;;  %v1924_v32 = vadd.f32 %v1923_v23, %v10336_v20  ;;  %v2116_v18 = vpop.f32.mrb[153].mxu1  ;;  %v1925_v26 = vpop.f32.mrb[154].mxu0  ;;  %v9033_v23 = vld [vmem:[#allocation8 + $0x190] sm:$0xff]  }
 0x276   :  { %4740 = vst [vmem:[#allocation11 + $0x2e8] sm:$0xff] %v7903_v8  ;;  %v2799_v27 = vmax.f32 %v1922_v60, 0.0  ;;  %v2117_v6 = vadd.f32 %v2116_v18, %v10347_v34  ;;  %v1926_v9 = vadd.f32 %v1925_v26, %v10329_v30  ;;  %v2118_v43 = vpop.f32.mrb[154].mxu1  ;;  %v1927_v14 = vpop.f32.mrb[155].mxu0  ;;  %8293 = vmatpush3.bf16.msra.mxu0 %v9027_v17  ;;  %v9034_v8 = vld [vmem:[#allocation8 + $0x158] sm:$0xff]  }
 0x277   :  { %v2801_v58 = vmax.f32 %v2115_v39, 0.0  ;;  %v2800_v10 = vmax.f32 %v1924_v32, 0.0  ;;  %v2119_v25 = vadd.f32 %v2118_v43, %v10340_v21  ;;  %v1928_v16 = vadd.f32 %v1927_v14, %v10336_v20  ;;  %v2120_v31 = vpop.f32.mrb[155].mxu1  ;;  %8405 = vmatpush3.bf16.msra.mxu1 %v9029_v24  ;;  %8294 = vmatprep.subr.bf16.mxu0 %v9030_v59  ;;  %v9036_v17 = vld [vmem:[#allocation8 + $0x1d8] sm:$0xff]  }
 0x278   :  { %v2802_v60 = vmax.f32 %v2117_v6, 0.0  ;;  %v2815_v45 = vmax.f32 %v1926_v9, 0.0  ;;  %v2121_v18 = vadd.f32 %v2120_v31, %v10347_v34  ;;  %5968 = vmatmul.mubr.bf16.gmra.mrb[4].mxu0 %v9626_v3  ;;  %8406 = vmatprep.subr.bf16.mxu1 %v9032_v13  ;;  %v9035_v6 = vld [vmem:[#allocation8 + $0x118] sm:$0xff]  }
 0x279   :  { %v7910_v26 = vpack.c.bf16 %v2800_v10, %v2799_v27  ;;  %v2817_v39 = vmax.f32 %v2119_v25, 0.0  ;;  %v2816_v32 = vmax.f32 %v1928_v16, 0.0  ;;  %6129 = vmatmul.mubr.bf16.gmra.mrb[4].mxu1 %v9629_v5  ;;  %5975 = vmatprep.mubr.bf16.mxu0 %v9651_v62  ;;  %v9037_v14 = vld [vmem:[#allocation8 + $0x198] sm:$0xff]   ;;  %v9038_v25 = vld [vmem:[#allocation8 + $0x160] sm:$0xff]  }
 0x27a   :  { %v7911_v43 = vpack.c.bf16 %v2802_v60, %v2801_v58  ;;  %v10477_v24 = vpack.c.bf16 %v2815_v45, %v2799_v27  ;;  %v2818_v59 = vmax.f32 %v2121_v18, 0.0  ;;  %6136 = vmatprep.mubr.bf16.mxu1 %v9654_v4  ;;  %8295 = vmatpush3.bf16.msra.mxu0 %v9031_v7  ;;  %v9040_v4 = vld [vmem:[#allocation8 + $0x1e0] sm:$0xff]  }
 0x27b   :  { %4747 = vst [vmem:[#allocation11 + $0x320] sm:$0xff] %v7910_v26  ;;  %v10480_v9 = vpack.c.bf16 %v2817_v39, %v2801_v58  ;;  %v7918_v3 = vpack.c.bf16 %v2816_v32, %v2815_v45  ;;  %v1931_v13 = vpop.f32.mrb[156].mxu0  ;;  %8407 = vmatpush3.bf16.msra.mxu1 %v9033_v23  ;;  %8296 = vmatprep.subr.bf16.mxu0 %v9034_v8 }
 0x27c   :  { %v10482_v5 = vpack.c.bf16 %v2816_v32, %v2800_v10  ;;  %4748 = vst [vmem:[#allocation11 + $0x328] sm:$0xff] %v7911_v43  ;;  %v7919_v62 = vpack.c.bf16 %v2818_v59, %v2817_v39  ;;  %v1932_v27 = vadd.f32 %v1931_v13, %v10329_v30  ;;  %v2124_v16 = vpop.f32.mrb[156].mxu1  ;;  %v1933_v31 = vpop.f32.mrb[157].mxu0  ;;  %8408 = vmatprep.subr.bf16.mxu1 %v9036_v17  ;;  %v9039_v17 = vld [vmem:[#allocation8 + $0x120] sm:$0xff]  }
 0x27d   :  { %v10485_v7 = vpack.c.bf16 %v2818_v59, %v2802_v60  ;;  %4755 = vst [vmem:[#allocation11 + $0x360] sm:$0xff] %v7918_v3  ;;  %v2125_v45 = vadd.f32 %v2124_v16, %v10340_v21  ;;  %v1934_v58 = vadd.f32 %v1933_v31, %v10336_v20  ;;  %v2126_v23 = vpop.f32.mrb[157].mxu1  ;;  %v1935_v8 = vpop.f32.mrb[158].mxu0  ;;  %v9041_v16 = vld [vmem:[#allocation8 + $0x1a0] sm:$0xff]  }
 0x27e   :  { %4756 = vst [vmem:[#allocation11 + $0x368] sm:$0xff] %v7919_v62  ;;  %v2831_v10 = vmax.f32 %v1932_v27, 0.0  ;;  %v2127_v18 = vadd.f32 %v2126_v23, %v10347_v34  ;;  %v1936_v26 = vadd.f32 %v1935_v8, %v10329_v30  ;;  %v2128_v39 = vpop.f32.mrb[158].mxu1  ;;  %v1937_v32 = vpop.f32.mrb[159].mxu0  ;;  %8297 = vmatpush3.bf16.msra.mxu0 %v9035_v6  ;;  %v9042_v62 = vld [vmem:[#allocation8 + $0x168] sm:$0xff]  }
 0x27f   :  { %v2833_v43 = vmax.f32 %v2125_v45, 0.0  ;;  %v2832_v60 = vmax.f32 %v1934_v58, 0.0  ;;  %v2129_v59 = vadd.f32 %v2128_v39, %v10340_v21  ;;  %v1938_v3 = vadd.f32 %v1937_v32, %v10336_v20  ;;  %v2130_v13 = vpop.f32.mrb[159].mxu1  ;;  %8409 = vmatpush3.bf16.msra.mxu1 %v9037_v14  ;;  %8298 = vmatprep.subr.bf16.mxu0 %v9038_v25  ;;  %v9044_v6 = vld [vmem:[#allocation8 + $0x1e8] sm:$0xff]  }
 0x280   :  { %v2834_v27 = vmax.f32 %v2127_v18, 0.0  ;;  %v2847_v31 = vmax.f32 %v1936_v26, 0.0  ;;  %v2131_v23 = vadd.f32 %v2130_v13, %v10347_v34  ;;  %5976 = vmatmul.mubr.bf16.gmra.mrb[8].mxu0 %v9646_v55  ;;  %8410 = vmatprep.subr.bf16.mxu1 %v9040_v4  ;;  %v9043_v18 = vld [vmem:[#allocation8 + $0x128] sm:$0xff]  }
 0x281   :  { %v7926_v8 = vpack.c.bf16 %v2832_v60, %v2831_v10  ;;  %v2849_v45 = vmax.f32 %v2129_v59, 0.0  ;;  %v2848_v58 = vmax.f32 %v1938_v3, 0.0  ;;  %6137 = vmatmul.mubr.bf16.gmra.mrb[8].mxu1 %v9649_v57  ;;  %5983 = vmatprep.mubr.bf16.mxu0 %v9671_v52  ;;  %v9045_v32 = vld [vmem:[#allocation8 + $0x1a8] sm:$0xff]   ;;  %v9046_v59 = vld [vmem:[#allocation8 + $0x170] sm:$0xff]  }
 0x282   :  { %v7927_v39 = vpack.c.bf16 %v2834_v27, %v2833_v43  ;;  %v10497_v14 = vpack.c.bf16 %v2847_v31, %v2831_v10  ;;  %v2850_v25 = vmax.f32 %v2131_v23, 0.0  ;;  %6144 = vmatprep.mubr.bf16.mxu1 %v9674_v63  ;;  %8299 = vmatpush3.bf16.msra.mxu0 %v9039_v17  ;;  %v9048_v63 = vld [vmem:[#allocation8 + $0x1f0] sm:$0xff]  }
 0x283   :  { %4763 = vst [vmem:[#allocation11 + $0x3a0] sm:$0xff] %v7926_v8  ;;  %v10500_v26 = vpack.c.bf16 %v2849_v45, %v2833_v43  ;;  %v7934_v55 = vpack.c.bf16 %v2848_v58, %v2847_v31  ;;  %v1941_v4 = vpop.f32.mrb[160].mxu0  ;;  %8411 = vmatpush3.bf16.msra.mxu1 %v9041_v16  ;;  %8300 = vmatprep.subr.bf16.mxu0 %v9042_v62 }
 0x284   :  { %v10502_v57 = vpack.c.bf16 %v2848_v58, %v2832_v60  ;;  %4764 = vst [vmem:[#allocation11 + $0x3a8] sm:$0xff] %v7927_v39  ;;  %v7935_v52 = vpack.c.bf16 %v2850_v25, %v2849_v45  ;;  %v1942_v10 = vadd.f32 %v1941_v4, %v10329_v30  ;;  %v2134_v3 = vpop.f32.mrb[160].mxu1  ;;  %v1943_v13 = vpop.f32.mrb[161].mxu0  ;;  %8412 = vmatprep.subr.bf16.mxu1 %v9044_v6  ;;  %v9047_v6 = vld [vmem:[#allocation8 + $0x130] sm:$0xff]  }
 0x285   :  { %v10505_v17 = vpack.c.bf16 %v2850_v25, %v2834_v27  ;;  %4771 = vst [vmem:[#allocation11 + $0x3e0] sm:$0xff] %v7934_v55  ;;  %v2135_v43 = vadd.f32 %v2134_v3, %v10340_v21  ;;  %v1944_v16 = vadd.f32 %v1943_v13, %v10336_v20  ;;  %v2136_v62 = vpop.f32.mrb[161].mxu1  ;;  %v1945_v31 = vpop.f32.mrb[162].mxu0  ;;  %v9049_v3 = vld [vmem:[#allocation8 + $0x1b0] sm:$0xff]  }
 0x286   :  { %4772 = vst [vmem:[#allocation11 + $0x3e8] sm:$0xff] %v7935_v52  ;;  %v2863_v60 = vmax.f32 %v1942_v10, 0.0  ;;  %v2137_v23 = vadd.f32 %v2136_v62, %v10347_v34  ;;  %v1946_v8 = vadd.f32 %v1945_v31, %v10329_v30  ;;  %v2138_v45 = vpop.f32.mrb[162].mxu1  ;;  %v1947_v58 = vpop.f32.mrb[163].mxu0  ;;  %8301 = vmatpush3.bf16.msra.mxu0 %v9043_v18  ;;  %v9050_v52 = vld [vmem:[#allocation8 + $0x178] sm:$0xff]  }
 0x287   :  { %v2865_v39 = vmax.f32 %v2135_v43, 0.0  ;;  %v2864_v27 = vmax.f32 %v1944_v16, 0.0  ;;  %v2139_v25 = vadd.f32 %v2138_v45, %v10340_v21  ;;  %v1948_v55 = vadd.f32 %v1947_v58, %v10336_v20  ;;  %v2140_v4 = vpop.f32.mrb[163].mxu1  ;;  %8413 = vmatpush3.bf16.msra.mxu1 %v9045_v32  ;;  %8302 = vmatprep.subr.bf16.mxu0 %v9046_v59  ;;  %v9052_v18 = vld [vmem:[#allocation8 + $0x1f8] sm:$0xff]  }
 0x288   :  { %v2866_v10 = vmax.f32 %v2137_v23, 0.0  ;;  %v2879_v13 = vmax.f32 %v1946_v8, 0.0  ;;  %v2141_v62 = vadd.f32 %v2140_v4, %v10347_v34  ;;  %5984 = vmatmul.mubr.bf16.gmra.mrb[12].mxu0 %v9666_v61  ;;  %8414 = vmatprep.subr.bf16.mxu1 %v9048_v63  ;;  %v9051_v23 = vld [vmem:[#allocation8 + $0x138] sm:$0xff]  }
 0x289   :  { %v7942_v31 = vpack.c.bf16 %v2864_v27, %v2863_v60  ;;  %v2881_v43 = vmax.f32 %v2139_v25, 0.0  ;;  %v2880_v16 = vmax.f32 %v1948_v55, 0.0  ;;  %6145 = vmatmul.mubr.bf16.gmra.mrb[12].mxu1 %v9669_v28  ;;  %5991 = vmatprep.mubr.bf16.mxu0 %v9699_v29  ;;  %v9053_v58 = vld [vmem:[#allocation8 + $0x1b8] sm:$0xff]   ;;  %v9054_v25 = vld [vmem:[#allocation8 + $0x240] sm:$0xff]  }
 0x28a   :  { %v7943_v45 = vpack.c.bf16 %v2866_v10, %v2865_v39  ;;  %v10517_v32 = vpack.c.bf16 %v2879_v13, %v2863_v60  ;;  %v2882_v59 = vmax.f32 %v2141_v62, 0.0  ;;  %6152 = vmatprep.mubr.bf16.mxu1 %v9704_v22  ;;  %8303 = vmatpush3.bf16.msra.mxu0 %v9047_v6  ;;  %v9056_v22 = vld [vmem:[#allocation8 + $0x2c0] sm:$0xff]  }
 0x28b   :  { %4779 = vst [vmem:[#allocation11 + $0x420] sm:$0xff] %v7942_v31  ;;  %v10520_v8 = vpack.c.bf16 %v2881_v43, %v2865_v39  ;;  %v7950_v61 = vpack.c.bf16 %v2880_v16, %v2879_v13  ;;  %v1951_v63 = vpop.f32.mrb[164].mxu0  ;;  %8415 = vmatpush3.bf16.msra.mxu1 %v9049_v3  ;;  %8304 = vmatprep.subr.bf16.mxu0 %v9050_v52 }
 0x28c   :  { %v10522_v28 = vpack.c.bf16 %v2880_v16, %v2864_v27  ;;  %4780 = vst [vmem:[#allocation11 + $0x428] sm:$0xff] %v7943_v45  ;;  %v7951_v29 = vpack.c.bf16 %v2882_v59, %v2881_v43  ;;  %v1952_v60 = vadd.f32 %v1951_v63, %v10329_v30  ;;  %v2144_v55 = vpop.f32.mrb[164].mxu1  ;;  %v1953_v4 = vpop.f32.mrb[165].mxu0  ;;  %8416 = vmatprep.subr.bf16.mxu1 %v9052_v18 }
 0x28d   :  { %v10525_v6 = vpack.c.bf16 %v2882_v59, %v2866_v10  ;;  %4787 = vst [vmem:[#allocation11 + $0x460] sm:$0xff] %v7950_v61  ;;  %v2145_v39 = vadd.f32 %v2144_v55, %v10340_v21  ;;  %v1954_v3 = vadd.f32 %v1953_v4, %v10336_v20  ;;  %v2146_v52 = vpop.f32.mrb[165].mxu1  ;;  %v1955_v13 = vpop.f32.mrb[166].mxu0 }
 0x28e   :  { %4788 = vst [vmem:[#allocation11 + $0x468] sm:$0xff] %v7951_v29  ;;  %v2895_v27 = vmax.f32 %v1952_v60, 0.0  ;;  %v2147_v62 = vadd.f32 %v2146_v52, %v10347_v34  ;;  %v1956_v31 = vadd.f32 %v1955_v13, %v10329_v30  ;;  %v2148_v43 = vpop.f32.mrb[166].mxu1  ;;  %v1957_v16 = vpop.f32.mrb[167].mxu0  ;;  %8305 = vmatpush3.bf16.msra.mxu0 %v9051_v23 }
 0x28f   :  { %v2897_v18 = vmax.f32 %v2145_v39, 0.0  ;;  %v2896_v45 = vmax.f32 %v1954_v3, 0.0  ;;  %v2149_v10 = vadd.f32 %v2148_v43, %v10340_v21  ;;  %v1958_v59 = vadd.f32 %v1957_v16, %v10336_v20  ;;  %v2150_v61 = vpop.f32.mrb[167].mxu1  ;;  %8417 = vmatpush3.bf16.msra.mxu1 %v9053_v58  ;;  %8514 = vmatprep.subr.bf16.mxu0 %v9054_v25 }
 0x290   :  { %v2898_v63 = vmax.f32 %v2147_v62, 0.0  ;;  %v2911_v55 = vmax.f32 %v1956_v31, 0.0  ;;  %v2151_v29 = vadd.f32 %v2150_v61, %v10347_v34  ;;  %5992 = vmatmul.mubr.bf16.gmra.mrb[16].mxu0 %v9690_v49  ;;  %8626 = vmatprep.subr.bf16.mxu1 %v9056_v22 }
 0x291   :  { %v7958_v60 = vpack.c.bf16 %v2896_v45, %v2895_v27  ;;  %v2913_v4 = vmax.f32 %v2149_v10, 0.0  ;;  %v2912_v52 = vmax.f32 %v1958_v59, 0.0  ;;  %6153 = vmatmul.mubr.bf16.gmra.mrb[16].mxu1 %v9697_v56  ;;  %5999 = vmatprep.mubr.bf16.mxu0 %v9753_v54 }
 0x292   :  { %v7959_v23 = vpack.c.bf16 %v2898_v63, %v2897_v18  ;;  %v10537_v39 = vpack.c.bf16 %v2911_v55, %v2895_v27  ;;  %v2914_v3 = vmax.f32 %v2151_v29, 0.0  ;;  %6160 = vmatprep.mubr.bf16.mxu1 %v9758_v2 }
 0x293   :  { %4795 = vst [vmem:[#allocation11 + $0x4a0] sm:$0xff] %v7958_v60  ;;  %v10540_v58 = vpack.c.bf16 %v2913_v4, %v2897_v18  ;;  %v7966_v25 = vpack.c.bf16 %v2912_v52, %v2911_v55  ;;  %v1961_v13 = vpop.f32.mrb[168].mxu0  ;;  %v10542_v49 = vpack.c.bf16 %v2912_v52, %v2896_v45 }
 0x294   :  { %4796 = vst [vmem:[#allocation11 + $0x4a8] sm:$0xff] %v7959_v23  ;;  %v7967_v22 = vpack.c.bf16 %v2914_v3, %v2913_v4  ;;  %v1962_v62 = vadd.f32 %v1961_v13, %v10329_v30  ;;  %v2154_v56 = vpop.f32.mrb[168].mxu1  ;;  %v1963_v31 = vpop.f32.mrb[169].mxu0  ;;  %v10545_v54 = vpack.c.bf16 %v2914_v3, %v2898_v63 }
 0x295   :  { %4803 = vst [vmem:[#allocation11 + $0x4e0] sm:$0xff] %v7966_v25  ;;  %v2155_v27 = vadd.f32 %v2154_v56, %v10340_v21  ;;  %v1964_v2 = vadd.f32 %v1963_v31, %v10336_v20  ;;  %v2156_v43 = vpop.f32.mrb[169].mxu1  ;;  %v1965_v16 = vpop.f32.mrb[170].mxu0 }
 0x296   :  { %4804 = vst [vmem:[#allocation11 + $0x4e8] sm:$0xff] %v7967_v22  ;;  %v2927_v18 = vmax.f32 %v1962_v62, 0.0  ;;  %v2157_v45 = vadd.f32 %v2156_v43, %v10347_v34  ;;  %v1966_v10 = vadd.f32 %v1965_v16, %v10329_v30  ;;  %v2158_v59 = vpop.f32.mrb[170].mxu1  ;;  %v1967_v61 = vpop.f32.mrb[171].mxu0 }
 0x297   :  { %v2929_v55 = vmax.f32 %v2155_v27, 0.0  ;;  %v2928_v29 = vmax.f32 %v1964_v2, 0.0  ;;  %v2159_v63 = vadd.f32 %v2158_v59, %v10340_v21  ;;  %v1968_v60 = vadd.f32 %v1967_v61, %v10336_v20  ;;  %v2160_v4 = vpop.f32.mrb[171].mxu1 }
 0x298   :  { %v2930_v52 = vmax.f32 %v2157_v45, 0.0  ;;  %v2943_v23 = vmax.f32 %v1966_v10, 0.0  ;;  %v2161_v3 = vadd.f32 %v2160_v4, %v10347_v34  ;;  %6000 = vmatmul.mubr.bf16.gmra.mrb[20].mxu0 %v9734_v41 }
 0x299   :  { %v7974_v25 = vpack.c.bf16 %v2928_v29, %v2927_v18  ;;  %v2945_v13 = vmax.f32 %v2159_v63, 0.0  ;;  %v2944_v22 = vmax.f32 %v1968_v60, 0.0  ;;  %6161 = vmatmul.mubr.bf16.gmra.mrb[20].mxu1 %v9746_v33  ;;  %6007 = vmatprep.mubr.bf16.mxu0 %v9806_v35 }
 0x29a   :  { %v7975_v62 = vpack.c.bf16 %v2930_v52, %v2929_v55  ;;  %v10557_v56 = vpack.c.bf16 %v2943_v23, %v2927_v18  ;;  %v2946_v31 = vmax.f32 %v2161_v3, 0.0  ;;  %6168 = vmatprep.mubr.bf16.mxu1 %v9811_v46 }
 0x29b   :  { %4811 = vst [vmem:[#allocation11 + $0x520] sm:$0xff] %v7974_v25  ;;  %v10560_v27 = vpack.c.bf16 %v2945_v13, %v2929_v55  ;;  %v7982_v2 = vpack.c.bf16 %v2944_v22, %v2943_v23  ;;  %v1971_v43 = vpop.f32.mrb[172].mxu0  ;;  %v10562_v16 = vpack.c.bf16 %v2944_v22, %v2928_v29 }
 0x29c   :  { %4812 = vst [vmem:[#allocation11 + $0x528] sm:$0xff] %v7975_v62  ;;  %v7983_v41 = vpack.c.bf16 %v2946_v31, %v2945_v13  ;;  %v1972_v45 = vadd.f32 %v1971_v43, %v10329_v30  ;;  %v2164_v33 = vpop.f32.mrb[172].mxu1  ;;  %v1973_v10 = vpop.f32.mrb[173].mxu0  ;;  %v10565_v35 = vpack.c.bf16 %v2946_v31, %v2930_v52 }
 0x29d   :  { %4819 = vst [vmem:[#allocation11 + $0x560] sm:$0xff] %v7982_v2  ;;  %v2165_v18 = vadd.f32 %v2164_v33, %v10340_v21  ;;  %v1974_v46 = vadd.f32 %v1973_v10, %v10336_v20  ;;  %v2166_v59 = vpop.f32.mrb[173].mxu1  ;;  %v1975_v61 = vpop.f32.mrb[174].mxu0 }
 0x29e   :  { %4820 = vst [vmem:[#allocation11 + $0x568] sm:$0xff] %v7983_v41  ;;  %v2959_v55 = vmax.f32 %v1972_v45, 0.0  ;;  %v2167_v29 = vadd.f32 %v2166_v59, %v10347_v34  ;;  %v1976_v63 = vadd.f32 %v1975_v61, %v10329_v30  ;;  %v2168_v60 = vpop.f32.mrb[174].mxu1  ;;  %v1977_v4 = vpop.f32.mrb[175].mxu0 }
 0x29f   :  { %v2961_v23 = vmax.f32 %v2165_v18, 0.0  ;;  %v2960_v3 = vmax.f32 %v1974_v46, 0.0  ;;  %v2169_v52 = vadd.f32 %v2168_v60, %v10340_v21  ;;  %v1978_v25 = vadd.f32 %v1977_v4, %v10336_v20  ;;  %v2170_v13 = vpop.f32.mrb[175].mxu1  ;;  %v11597_v18 = vld [vmem:[#allocation20_spill] sm:$0xff] }
 0x2a0   :  { %v2962_v22 = vmax.f32 %v2167_v29, 0.0  ;;  %v2975_v62 = vmax.f32 %v1976_v63, 0.0  ;;  %v2171_v31 = vadd.f32 %v2170_v13, %v10347_v34  ;;  %6008 = vmatmul.mubr.bf16.gmra.mrb[24].mxu0 %v9792_v1 }
 0x2a1   :  { %v7990_v2 = vpack.c.bf16 %v2960_v3, %v2959_v55  ;;  %v2977_v43 = vmax.f32 %v2169_v52, 0.0  ;;  %v2976_v41 = vmax.f32 %v1978_v25, 0.0  ;;  %6169 = vmatmul.mubr.bf16.gmra.mrb[24].mxu1 %v9804_v38  ;;  %6015 = vmatprep.mubr.bf16.mxu0 %v9863_v48 }
 0x2a2   :  { %v7991_v45 = vpack.c.bf16 %v2962_v22, %v2961_v23  ;;  %v10577_v33 = vpack.c.bf16 %v2975_v62, %v2959_v55  ;;  %v2978_v10 = vmax.f32 %v2171_v31, 0.0  ;;  %6176 = vmatprep.mubr.bf16.mxu1 %v11597_v18 }
 0x2a3   :  { %4827 = vst [vmem:[#allocation11 + $0x5a0] sm:$0xff] %v7990_v2  ;;  %v10580_v46 = vpack.c.bf16 %v2977_v43, %v2961_v23  ;;  %v7998_v59 = vpack.c.bf16 %v2976_v41, %v2975_v62  ;;  %v1981_v61 = vpop.f32.mrb[176].mxu0  ;;  %v10582_v29 = vpack.c.bf16 %v2976_v41, %v2960_v3 }
 0x2a4   :  { %4828 = vst [vmem:[#allocation11 + $0x5a8] sm:$0xff] %v7991_v45  ;;  %v7999_v1 = vpack.c.bf16 %v2978_v10, %v2977_v43  ;;  %v1982_v63 = vadd.f32 %v1981_v61, %v10329_v30  ;;  %v2174_v38 = vpop.f32.mrb[176].mxu1  ;;  %v1983_v60 = vpop.f32.mrb[177].mxu0  ;;  %v10585_v48 = vpack.c.bf16 %v2978_v10, %v2962_v22  ;;  %v11598_v61 = vld [vmem:[#allocation18_spill] sm:$0xff] }
 0x2a5   :  { %4835 = vst [vmem:[#allocation11 + $0x5e0] sm:$0xff] %v7998_v59  ;;  %v2175_v55 = vadd.f32 %v2174_v38, %v10340_v21  ;;  %v1984_v4 = vadd.f32 %v1983_v60, %v10336_v20  ;;  %v2176_v52 = vpop.f32.mrb[177].mxu1  ;;  %v1985_v23 = vpop.f32.mrb[178].mxu0  ;;  %v11599_v60 = vld [vmem:[#allocation19_spill] sm:$0xff] }
 0x2a6   :  { %4836 = vst [vmem:[#allocation11 + $0x5e8] sm:$0xff] %v7999_v1  ;;  %v2991_v25 = vmax.f32 %v1982_v63, 0.0  ;;  %v2177_v3 = vadd.f32 %v2176_v52, %v10347_v34  ;;  %v1986_v13 = vadd.f32 %v1985_v23, %v10329_v30  ;;  %v2178_v62 = vpop.f32.mrb[178].mxu1  ;;  %v1987_v31 = vpop.f32.mrb[179].mxu0 }
 0x2a7   :  { %v2993_v2 = vmax.f32 %v2175_v55, 0.0  ;;  %v2992_v43 = vmax.f32 %v1984_v4, 0.0  ;;  %v2179_v22 = vadd.f32 %v2178_v62, %v10340_v21  ;;  %v1988_v41 = vadd.f32 %v1987_v31, %v10336_v20  ;;  %v2180_v45 = vpop.f32.mrb[179].mxu1 }
 0x2a8   :  { %v2994_v10 = vmax.f32 %v2177_v3, 0.0  ;;  %v3007_v18 = vmax.f32 %v1986_v13, 0.0  ;;  %v2181_v59 = vadd.f32 %v2180_v45, %v10347_v34  ;;  %6016 = vmatmul.mubr.bf16.gmra.mrb[28].mxu0 %v11598_v61 }
 0x2a9   :  { %v8006_v1 = vpack.c.bf16 %v2992_v43, %v2991_v25  ;;  %v3009_v63 = vmax.f32 %v2179_v22, 0.0  ;;  %v3008_v38 = vmax.f32 %v1988_v41, 0.0  ;;  %6177 = vmatmul.mubr.bf16.gmra.mrb[28].mxu1 %v11599_v60  ;;  %6023 = vmatprep.mubr.bf16.mxu0 %v9902_v19 }
 0x2aa   :  { %v8007_v55 = vpack.c.bf16 %v2994_v10, %v2993_v2  ;;  %v10597_v4 = vpack.c.bf16 %v3007_v18, %v2991_v25  ;;  %v3010_v52 = vmax.f32 %v2181_v59, 0.0  ;;  %6184 = vmatprep.mubr.bf16.mxu1 %v9905_v50 }
 0x2ab   :  { %4843 = vst [vmem:[#allocation11 + $0x620] sm:$0xff] %v8006_v1  ;;  %v10600_v23 = vpack.c.bf16 %v3009_v63, %v2993_v2  ;;  %v8014_v3 = vpack.c.bf16 %v3008_v38, %v3007_v18  ;;  %v1991_v13 = vpop.f32.mrb[180].mxu0  ;;  %v10602_v62 = vpack.c.bf16 %v3008_v38, %v2992_v43 }
 0x2ac   :  { %11600 = vst [vmem:[#allocation20_spill] sm:$0xff] %v10597_v4  ;;  %4844 = vst [vmem:[#allocation11 + $0x628] sm:$0xff] %v8007_v55  ;;  %v8015_v31 = vpack.c.bf16 %v3010_v52, %v3009_v63  ;;  %v1992_v22 = vadd.f32 %v1991_v13, %v10329_v30  ;;  %v2184_v41 = vpop.f32.mrb[180].mxu1  ;;  %v1993_v45 = vpop.f32.mrb[181].mxu0  ;;  %v10605_v19 = vpack.c.bf16 %v3010_v52, %v2994_v10  ;;  %v11673_v4 = vld [vmem:[#allocation56_spill] sm:$0xff] }
 0x2ad   :  { %11601 = vst [vmem:[#allocation18_spill] sm:$0xff] %v10600_v23  ;;  %4851 = vst [vmem:[#allocation11 + $0x660] sm:$0xff] %v8014_v3  ;;  %v2185_v25 = vadd.f32 %v2184_v41, %v10340_v21  ;;  %v1994_v50 = vadd.f32 %v1993_v45, %v10336_v20  ;;  %v2186_v59 = vpop.f32.mrb[181].mxu1  ;;  %v1995_v2 = vpop.f32.mrb[182].mxu0  ;;  %v11670_v23 = vld [vmem:[#allocation50_spill] sm:$0xff] }
 0x2ae   :  { %11602 = vst [vmem:[#allocation19_spill] sm:$0xff] %v10605_v19  ;;  %4852 = vst [vmem:[#allocation11 + $0x668] sm:$0xff] %v8015_v31  ;;  %v3023_v18 = vmax.f32 %v1992_v22, 0.0  ;;  %v2187_v43 = vadd.f32 %v2186_v59, %v10347_v34  ;;  %v1996_v61 = vadd.f32 %v1995_v2, %v10329_v30  ;;  %v2188_v1 = vpop.f32.mrb[182].mxu1  ;;  %v1997_v63 = vpop.f32.mrb[183].mxu0  ;;  %v11603_v59 = vld [vmem:[#allocation23_spill] sm:$0xff] }
 0x2af   :  { %v3025_v38 = vmax.f32 %v2185_v25, 0.0  ;;  %v3024_v60 = vmax.f32 %v1994_v50, 0.0  ;;  %v2189_v10 = vadd.f32 %v2188_v1, %v10340_v21  ;;  %v1998_v55 = vadd.f32 %v1997_v63, %v10336_v20  ;;  %v2190_v52 = vpop.f32.mrb[183].mxu1  ;;  %v11605_v1 = vld [vmem:[#allocation24_spill] sm:$0xff] }
 0x2b0   :  { %v3026_v3 = vmax.f32 %v2187_v43, 0.0  ;;  %v3039_v13 = vmax.f32 %v1996_v61, 0.0  ;;  %v2191_v41 = vadd.f32 %v2190_v52, %v10347_v34  ;;  %6024 = vmatmul.mubr.bf16.gmra.mrb[32].mxu0 %v9895_v0  ;;  %v11681_v19 = vld [vmem:[#allocation60_spill] sm:$0xff] }
 0x2b1   :  { %v8022_v31 = vpack.c.bf16 %v3024_v60, %v3023_v18  ;;  %v3041_v22 = vmax.f32 %v2189_v10, 0.0  ;;  %v3040_v45 = vmax.f32 %v1998_v55, 0.0  ;;  %6185 = vmatmul.mubr.bf16.gmra.mrb[32].mxu1 %v9900_v15  ;;  %6031 = vmatprep.mubr.bf16.mxu0 %v11603_v59 }
 0x2b2   :  { %v8023_v25 = vpack.c.bf16 %v3026_v3, %v3025_v38  ;;  %v10617_v50 = vpack.c.bf16 %v3039_v13, %v3023_v18  ;;  %v3042_v2 = vmax.f32 %v2191_v41, 0.0  ;;  %6192 = vmatprep.mubr.bf16.mxu1 %v11605_v1 }
 0x2b3   :  { %4859 = vst [vmem:[#allocation11 + $0x6a0] sm:$0xff] %v8022_v31  ;;  %v10620_v43 = vpack.c.bf16 %v3041_v22, %v3025_v38  ;;  %v8030_v61 = vpack.c.bf16 %v3040_v45, %v3039_v13  ;;  %v2001_v63 = vpop.f32.mrb[184].mxu0  ;;  %v10622_v52 = vpack.c.bf16 %v3040_v45, %v3024_v60 }
 0x2b4   :  { %11604 = vst [vmem:[#allocation23_spill] sm:$0xff] %v10617_v50  ;;  %4860 = vst [vmem:[#allocation11 + $0x6a8] sm:$0xff] %v8023_v25  ;;  %v8031_v0 = vpack.c.bf16 %v3042_v2, %v3041_v22  ;;  %v2002_v10 = vadd.f32 %v2001_v63, %v10329_v30  ;;  %v2194_v15 = vpop.f32.mrb[184].mxu1  ;;  %v2003_v55 = vpop.f32.mrb[185].mxu0  ;;  %v10625_v59 = vpack.c.bf16 %v3042_v2, %v3026_v3  ;;  %v11609_v50 = vld [vmem:[#allocation21_spill] sm:$0xff] }
 0x2b5   :  { %11606 = vst [vmem:[#allocation24_spill] sm:$0xff] %v10620_v43  ;;  %11607 = vst [vmem:[#allocation128_spill] sm:$0xff] %v10622_v52  ;;  %v2195_v18 = vadd.f32 %v2194_v15, %v10340_v21  ;;  %v2004_v41 = vadd.f32 %v2003_v55, %v10336_v20  ;;  %v2196_v31 = vpop.f32.mrb[185].mxu1  ;;  %v2005_v38 = vpop.f32.mrb[186].mxu0  ;;  %v11613_v52 = vld [vmem:[#allocation28_spill] sm:$0xff] }
 0x2b6   :  { %11608 = vst [vmem:[#allocation129_spill] sm:$0xff] %v10625_v59  ;;  %4867 = vst [vmem:[#allocation11 + $0x6e0] sm:$0xff] %v8030_v61  ;;  %v3055_v13 = vmax.f32 %v2002_v10, 0.0  ;;  %v2197_v60 = vadd.f32 %v2196_v31, %v10347_v34  ;;  %v2006_v45 = vadd.f32 %v2005_v38, %v10329_v30  ;;  %v2198_v22 = vpop.f32.mrb[186].mxu1  ;;  %v2007_v25 = vpop.f32.mrb[187].mxu0  ;;  %v11610_v59 = vld [vmem:[#allocation22_spill] sm:$0xff] }
 0x2b7   :  { %4868 = vst [vmem:[#allocation11 + $0x6e8] sm:$0xff] %v8031_v0  ;;  %v3057_v1 = vmax.f32 %v2195_v18, 0.0  ;;  %v3056_v63 = vmax.f32 %v2004_v41, 0.0  ;;  %v2199_v3 = vadd.f32 %v2198_v22, %v10340_v21  ;;  %v2008_v2 = vadd.f32 %v2007_v25, %v10336_v20  ;;  %v2200_v61 = vpop.f32.mrb[187].mxu1  ;;  %v11611_v38 = vld [vmem:[#allocation27_spill] sm:$0xff] }
 0x2b8   :  { %v3058_v15 = vmax.f32 %v2197_v60, 0.0  ;;  %v3071_v43 = vmax.f32 %v2006_v45, 0.0  ;;  %v2201_v55 = vadd.f32 %v2200_v61, %v10347_v34  ;;  %6032 = vmatmul.mubr.bf16.gmra.mrb[36].mxu0 %v11609_v50 }
 0x2b9   :  { %v8038_v0 = vpack.c.bf16 %v3056_v63, %v3055_v13  ;;  %v3073_v10 = vmax.f32 %v2199_v3, 0.0  ;;  %v3072_v31 = vmax.f32 %v2008_v2, 0.0  ;;  %6193 = vmatmul.mubr.bf16.gmra.mrb[36].mxu1 %v11610_v59  ;;  %6039 = vmatprep.mubr.bf16.mxu0 %v11611_v38 }
 0x2ba   :  { %v8039_v18 = vpack.c.bf16 %v3058_v15, %v3057_v1  ;;  %v10637_v41 = vpack.c.bf16 %v3071_v43, %v3055_v13  ;;  %v3074_v22 = vmax.f32 %v2201_v55, 0.0  ;;  %6200 = vmatprep.mubr.bf16.mxu1 %v11613_v52 }
 0x2bb   :  { %4875 = vst [vmem:[#allocation11 + $0x720] sm:$0xff] %v8038_v0  ;;  %v10640_v60 = vpack.c.bf16 %v3073_v10, %v3057_v1  ;;  %v8046_v45 = vpack.c.bf16 %v3072_v31, %v3071_v43  ;;  %v2011_v25 = vpop.f32.mrb[188].mxu0  ;;  %v10642_v61 = vpack.c.bf16 %v3072_v31, %v3056_v63 }
 0x2bc   :  { %11612 = vst [vmem:[#allocation21_spill] sm:$0xff] %v10637_v41  ;;  %4876 = vst [vmem:[#allocation11 + $0x728] sm:$0xff] %v8039_v18  ;;  %v8047_v50 = vpack.c.bf16 %v3074_v22, %v3073_v10  ;;  %v2012_v3 = vadd.f32 %v2011_v25, %v10329_v30  ;;  %v2204_v59 = vpop.f32.mrb[188].mxu1  ;;  %v2013_v2 = vpop.f32.mrb[189].mxu0  ;;  %v10645_v38 = vpack.c.bf16 %v3074_v22, %v3058_v15  ;;  %v9151_v18 = vld [vmem:[#allocation7 + $0x8] sm:$0xff]  ;;  %v11617_v25 = vsub.s32 4, %v9566_v12 }
 0x2bd   :  { %11614 = vst [vmem:[#allocation22_spill] sm:$0xff] %v10640_v60  ;;  %11615 = vst [vmem:[#allocation27_spill] sm:$0xff] %v10642_v61  ;;  %v2205_v13 = vadd.f32 %v2204_v59, %v10340_v21  ;;  %v2014_v52 = vadd.f32 %v2013_v2, %v10336_v20  ;;  %v2206_v55 = vpop.f32.mrb[189].mxu1  ;;  %v2015_v1 = vpop.f32.mrb[190].mxu0  ;;  %v11618_v41 = vld [vmem:[#allocation25_spill] sm:$0xff] }
 0x2be   :  { %11616 = vst [vmem:[#allocation28_spill] sm:$0xff] %v10645_v38  ;;  %4883 = vst [vmem:[#allocation11 + $0x760] sm:$0xff] %v8046_v45  ;;  %v3087_v43 = vmax.f32 %v2012_v3, 0.0  ;;  %v2207_v63 = vadd.f32 %v2206_v55, %v10347_v34  ;;  %v2016_v0 = vadd.f32 %v2015_v1, %v10329_v30  ;;  %v2208_v10 = vpop.f32.mrb[190].mxu1  ;;  %v2017_v31 = vpop.f32.mrb[191].mxu0  ;;  %v10653_v15 = vrot.slane %v9151_v18, %v11617_v25 }
 0x2bf   :  { %4884 = vst [vmem:[#allocation11 + $0x768] sm:$0xff] %v8047_v50  ;;  %v3089_v22 = vmax.f32 %v2205_v13, 0.0  ;;  %v3088_v45 = vmax.f32 %v2014_v52, 0.0  ;;  %v2209_v59 = vadd.f32 %v2208_v10, %v10340_v21  ;;  %v2018_v2 = vadd.f32 %v2017_v31, %v10336_v20  ;;  %v2210_v60 = vpop.f32.mrb[191].mxu1  ;;  %v11620_v13 = vld [vmem:[#allocation26_spill] sm:$0xff]  ;;  %v11621_v52 = vld [vmem:[#allocation31_spill] sm:$0xff] }
 0x2c0   :  { %v3090_v50 = vmax.f32 %v2207_v63, 0.0  ;;  %v3103_v3 = vmax.f32 %v2016_v0, 0.0  ;;  %v2211_v55 = vadd.f32 %v2210_v60, %v10347_v34  ;;  %6040 = vmatmul.mubr.bf16.gmra.mrb[40].mxu0 %v11618_v41  ;;  %v11619_v30 = vsub.s32 5, %v9566_v12  ;;  %v11624_v41 = vld [vmem:[#allocation32_spill] sm:$0xff] }
 0x2c1   :  { %v8054_v38 = vpack.c.bf16 %v3088_v45, %v3087_v43  ;;  %v3105_v25 = vmax.f32 %v2209_v59, 0.0  ;;  %v3104_v61 = vmax.f32 %v2018_v2, 0.0  ;;  %6201 = vmatmul.mubr.bf16.gmra.mrb[40].mxu1 %v11620_v13  ;;  %6047 = vmatprep.mubr.bf16.mxu0 %v11621_v52  ;;  %v11622_v20 = vsub.s32 6, %v9566_v12 }
 0x2c2   :  { %v10661_v1 = vrot.slane %v9151_v18, %v11619_v30  ;;  %v8055_v63 = vpack.c.bf16 %v3090_v50, %v3089_v22  ;;  %v10669_v0 = vpack.c.bf16 %v3103_v3, %v3087_v43  ;;  %v3106_v34 = vmax.f32 %v2211_v55, 0.0  ;;  %6208 = vmatprep.mubr.bf16.mxu1 %v11624_v41 }
 0x2c3   :  { %v10667_v21 = vrot.slane %v9151_v18, %v11622_v20  ;;  %v11625_v60 = vsub.s32 7, %v9566_v12  ;;  %4891 = vst [vmem:[#allocation11 + $0x7a0] sm:$0xff] %v8054_v38  ;;  %v10676_v31 = vpack.c.bf16 %v3105_v25, %v3089_v22  ;;  %v8062_v59 = vpack.c.bf16 %v3104_v61, %v3103_v3  ;;  %v2247_v2 = vpop.f32.mrb[192].mxu0 }
 0x2c4   :  { %11623 = vst [vmem:[#allocation25_spill] sm:$0xff] %v10669_v0  ;;  %v10678_v30 = vpack.c.bf16 %v3104_v61, %v3088_v45  ;;  %4892 = vst [vmem:[#allocation11 + $0x7a8] sm:$0xff] %v8055_v63  ;;  %v8063_v13 = vpack.c.bf16 %v3106_v34, %v3105_v25  ;;  %v2248_v52 = vadd.f32 %v2247_v2, %v10653_v15  ;;  %v2440_v43 = vpop.f32.mrb[192].mxu1  ;;  %v2249_v20 = vpop.f32.mrb[193].mxu0  ;;  %v11630_v0 = vld [vmem:[#allocation30_spill] sm:$0xff] }
 0x2c5   :  { %v10674_v10 = vrot.slane %v9151_v18, %v11625_v60  ;;  %11626 = vst [vmem:[#allocation26_spill] sm:$0xff] %v10676_v31  ;;  %v10681_v55 = vpack.c.bf16 %v3106_v34, %v3090_v50  ;;  %4899 = vst [vmem:[#allocation11 + $0x7e0] sm:$0xff] %v8062_v59  ;;  %v2441_v12 = vadd.f32 %v2440_v43, %v10667_v21  ;;  %v2442_v38 = vpop.f32.mrb[193].mxu1  ;;  %v2251_v22 = vpop.f32.mrb[194].mxu0  ;;  %v11629_v31 = vld [vmem:[#allocation29_spill] sm:$0xff] }
 0x2c6   :  { %11627 = vst [vmem:[#allocation31_spill] sm:$0xff] %v10678_v30  ;;  %v2250_v18 = vadd.f32 %v2249_v20, %v10661_v1  ;;  %4900 = vst [vmem:[#allocation11 + $0x7e8] sm:$0xff] %v8063_v13  ;;  %v2611_v3 = vmax.f32 %v2248_v52, 0.0  ;;  %v2252_v45 = vadd.f32 %v2251_v22, %v10653_v15  ;;  %v2444_v25 = vpop.f32.mrb[194].mxu1  ;;  %v2253_v63 = vpop.f32.mrb[195].mxu0  ;;  %v11631_v22 = vld [vmem:[#allocation35_spill] sm:$0xff] }
 0x2c7   :  { %11628 = vst [vmem:[#allocation32_spill] sm:$0xff] %v10681_v55  ;;  %v2443_v61 = vadd.f32 %v2442_v38, %v10674_v10  ;;  %v2613_v41 = vmax.f32 %v2441_v12, 0.0  ;;  %v2445_v50 = vadd.f32 %v2444_v25, %v10667_v21  ;;  %v2254_v34 = vadd.f32 %v2253_v63, %v10661_v1  ;;  %v2446_v59 = vpop.f32.mrb[195].mxu1  ;;  %v11633_v55 = vld [vmem:[#allocation36_spill] sm:$0xff] }
 0x2c8   :  { %v2612_v60 = vmax.f32 %v2250_v18, 0.0  ;;  %v2627_v43 = vmax.f32 %v2252_v45, 0.0  ;;  %v2447_v20 = vadd.f32 %v2446_v59, %v10674_v10  ;;  %6048 = vmatmul.mubr.bf16.gmra.mrb[44].mxu0 %v11629_v31 }
 0x2c9   :  { %v2614_v2 = vmax.f32 %v2443_v61, 0.0  ;;  %v2629_v52 = vmax.f32 %v2445_v50, 0.0  ;;  %v2628_v38 = vmax.f32 %v2254_v34, 0.0  ;;  %6209 = vmatmul.mubr.bf16.gmra.mrb[44].mxu1 %v11630_v0  ;;  %6055 = vmatprep.mubr.bf16.mxu0 %v11631_v22 }
 0x2ca   :  { %v7816_v13 = vpack.c.bf16 %v2612_v60, %v2611_v3  ;;  %v10693_v18 = vpack.c.bf16 %v2627_v43, %v2611_v3  ;;  %v2630_v25 = vmax.f32 %v2447_v20, 0.0  ;;  %6216 = vmatprep.mubr.bf16.mxu1 %v11633_v55 }
 0x2cb   :  { %v7817_v12 = vpack.c.bf16 %v2614_v2, %v2613_v41  ;;  %v10696_v61 = vpack.c.bf16 %v2629_v52, %v2613_v41  ;;  %v7824_v45 = vpack.c.bf16 %v2628_v38, %v2627_v43  ;;  %v2257_v63 = vpop.f32.mrb[196].mxu0  ;;  %v10698_v59 = vpack.c.bf16 %v2628_v38, %v2612_v60 }
 0x2cc   :  { %11632 = vst [vmem:[#allocation29_spill] sm:$0xff] %v10693_v18  ;;  %4653 = vst [vmem:[#allocation11 + $0x30] sm:$0xff] %v7816_v13  ;;  %v7825_v31 = vpack.c.bf16 %v2630_v25, %v2629_v52  ;;  %v2258_v50 = vadd.f32 %v2257_v63, %v10653_v15  ;;  %v2450_v0 = vpop.f32.mrb[196].mxu1  ;;  %v2259_v34 = vpop.f32.mrb[197].mxu0  ;;  %v10701_v22 = vpack.c.bf16 %v2630_v25, %v2614_v2  ;;  %v11637_v18 = vld [vmem:[#allocation33_spill] sm:$0xff] }
 0x2cd   :  { %11634 = vst [vmem:[#allocation30_spill] sm:$0xff] %v10696_v61  ;;  %11635 = vst [vmem:[#allocation35_spill] sm:$0xff] %v10698_v59  ;;  %v2451_v3 = vadd.f32 %v2450_v0, %v10667_v21  ;;  %v2260_v55 = vadd.f32 %v2259_v34, %v10661_v1  ;;  %v2452_v20 = vpop.f32.mrb[197].mxu1  ;;  %v2261_v41 = vpop.f32.mrb[198].mxu0  ;;  %v11641_v59 = vld [vmem:[#allocation40_spill] sm:$0xff] }
 0x2ce   :  { %4654 = vst [vmem:[#allocation11 + $0x38] sm:$0xff] %v7817_v12  ;;  %11636 = vst [vmem:[#allocation36_spill] sm:$0xff] %v10701_v22  ;;  %v2643_v43 = vmax.f32 %v2258_v50, 0.0  ;;  %v2453_v60 = vadd.f32 %v2452_v20, %v10674_v10  ;;  %v2262_v13 = vadd.f32 %v2261_v41, %v10653_v15  ;;  %v2454_v52 = vpop.f32.mrb[198].mxu1  ;;  %v2263_v38 = vpop.f32.mrb[199].mxu0  ;;  %v11638_v22 = vld [vmem:[#allocation34_spill] sm:$0xff] }
 0x2cf   :  { %4661 = vst [vmem:[#allocation11 + $0x70] sm:$0xff] %v7824_v45  ;;  %4662 = vst [vmem:[#allocation11 + $0x78] sm:$0xff] %v7825_v31  ;;  %v2645_v12 = vmax.f32 %v2451_v3, 0.0  ;;  %v2644_v63 = vmax.f32 %v2260_v55, 0.0  ;;  %v2455_v2 = vadd.f32 %v2454_v52, %v10667_v21  ;;  %v2264_v25 = vadd.f32 %v2263_v38, %v10661_v1  ;;  %v2456_v45 = vpop.f32.mrb[199].mxu1  ;;  %v11639_v41 = vld [vmem:[#allocation39_spill] sm:$0xff] }
 0x2d0   :  { %v2646_v0 = vmax.f32 %v2453_v60, 0.0  ;;  %v2659_v61 = vmax.f32 %v2262_v13, 0.0  ;;  %v2457_v34 = vadd.f32 %v2456_v45, %v10674_v10  ;;  %6056 = vmatmul.mubr.bf16.gmra.mrb[48].mxu0 %v11637_v18 }
 0x2d1   :  { %v7832_v31 = vpack.c.bf16 %v2644_v63, %v2643_v43  ;;  %v2661_v50 = vmax.f32 %v2455_v2, 0.0  ;;  %v2660_v20 = vmax.f32 %v2264_v25, 0.0  ;;  %6217 = vmatmul.mubr.bf16.gmra.mrb[48].mxu1 %v11638_v22  ;;  %6063 = vmatprep.mubr.bf16.mxu0 %v11639_v41 }
 0x2d2   :  { %v7833_v3 = vpack.c.bf16 %v2646_v0, %v2645_v12  ;;  %v10713_v55 = vpack.c.bf16 %v2659_v61, %v2643_v43  ;;  %v2662_v52 = vmax.f32 %v2457_v34, 0.0  ;;  %6224 = vmatprep.mubr.bf16.mxu1 %v11641_v59 }
 0x2d3   :  { %4669 = vst [vmem:[#allocation11 + $0xb0] sm:$0xff] %v7832_v31  ;;  %v10716_v60 = vpack.c.bf16 %v2661_v50, %v2645_v12  ;;  %v7840_v13 = vpack.c.bf16 %v2660_v20, %v2659_v61  ;;  %v2267_v38 = vpop.f32.mrb[200].mxu0  ;;  %v10718_v45 = vpack.c.bf16 %v2660_v20, %v2644_v63 }
 0x2d4   :  { %11640 = vst [vmem:[#allocation33_spill] sm:$0xff] %v10713_v55  ;;  %4670 = vst [vmem:[#allocation11 + $0xb8] sm:$0xff] %v7833_v3  ;;  %v7841_v18 = vpack.c.bf16 %v2662_v52, %v2661_v50  ;;  %v2268_v2 = vadd.f32 %v2267_v38, %v10653_v15  ;;  %v2460_v22 = vpop.f32.mrb[200].mxu1  ;;  %v2269_v25 = vpop.f32.mrb[201].mxu0  ;;  %v10721_v41 = vpack.c.bf16 %v2662_v52, %v2646_v0  ;;  %v11645_v55 = vld [vmem:[#allocation37_spill] sm:$0xff] }
 0x2d5   :  { %11642 = vst [vmem:[#allocation34_spill] sm:$0xff] %v10716_v60  ;;  %11643 = vst [vmem:[#allocation39_spill] sm:$0xff] %v10718_v45  ;;  %v2461_v43 = vadd.f32 %v2460_v22, %v10667_v21  ;;  %v2270_v59 = vadd.f32 %v2269_v25, %v10661_v1  ;;  %v2462_v34 = vpop.f32.mrb[201].mxu1  ;;  %v2271_v12 = vpop.f32.mrb[202].mxu0  ;;  %v11649_v45 = vld [vmem:[#allocation44_spill] sm:$0xff] }
 0x2d6   :  { %11644 = vst [vmem:[#allocation40_spill] sm:$0xff] %v10721_v41  ;;  %4677 = vst [vmem:[#allocation11 + $0xf0] sm:$0xff] %v7840_v13  ;;  %v2675_v61 = vmax.f32 %v2268_v2, 0.0  ;;  %v2463_v63 = vadd.f32 %v2462_v34, %v10674_v10  ;;  %v2272_v31 = vadd.f32 %v2271_v12, %v10653_v15  ;;  %v2464_v50 = vpop.f32.mrb[202].mxu1  ;;  %v2273_v20 = vpop.f32.mrb[203].mxu0  ;;  %v11646_v41 = vld [vmem:[#allocation38_spill] sm:$0xff] }
 0x2d7   :  { %4678 = vst [vmem:[#allocation11 + $0xf8] sm:$0xff] %v7841_v18  ;;  %v2677_v3 = vmax.f32 %v2461_v43, 0.0  ;;  %v2676_v38 = vmax.f32 %v2270_v59, 0.0  ;;  %v2465_v0 = vadd.f32 %v2464_v50, %v10667_v21  ;;  %v2274_v52 = vadd.f32 %v2273_v20, %v10661_v1  ;;  %v2466_v13 = vpop.f32.mrb[203].mxu1  ;;  %v11647_v12 = vld [vmem:[#allocation43_spill] sm:$0xff] }
 0x2d8   :  { %v2678_v22 = vmax.f32 %v2463_v63, 0.0  ;;  %v2691_v60 = vmax.f32 %v2272_v31, 0.0  ;;  %v2467_v25 = vadd.f32 %v2466_v13, %v10674_v10  ;;  %6064 = vmatmul.mubr.bf16.gmra.mrb[52].mxu0 %v11645_v55 }
 0x2d9   :  { %v7848_v18 = vpack.c.bf16 %v2676_v38, %v2675_v61  ;;  %v2693_v2 = vmax.f32 %v2465_v0, 0.0  ;;  %v2692_v34 = vmax.f32 %v2274_v52, 0.0  ;;  %6225 = vmatmul.mubr.bf16.gmra.mrb[52].mxu1 %v11646_v41  ;;  %6071 = vmatprep.mubr.bf16.mxu0 %v11647_v12 }
 0x2da   :  { %v7849_v43 = vpack.c.bf16 %v2678_v22, %v2677_v3  ;;  %v10733_v59 = vpack.c.bf16 %v2691_v60, %v2675_v61  ;;  %v2694_v50 = vmax.f32 %v2467_v25, 0.0  ;;  %6232 = vmatprep.mubr.bf16.mxu1 %v11649_v45 }
 0x2db   :  { %4685 = vst [vmem:[#allocation11 + $0x130] sm:$0xff] %v7848_v18  ;;  %v10736_v63 = vpack.c.bf16 %v2693_v2, %v2677_v3  ;;  %v7856_v31 = vpack.c.bf16 %v2692_v34, %v2691_v60  ;;  %v2277_v20 = vpop.f32.mrb[204].mxu0  ;;  %v10738_v13 = vpack.c.bf16 %v2692_v34, %v2676_v38 }
 0x2dc   :  { %11648 = vst [vmem:[#allocation37_spill] sm:$0xff] %v10733_v59  ;;  %4686 = vst [vmem:[#allocation11 + $0x138] sm:$0xff] %v7849_v43  ;;  %v7857_v55 = vpack.c.bf16 %v2694_v50, %v2693_v2  ;;  %v2278_v0 = vadd.f32 %v2277_v20, %v10653_v15  ;;  %v2470_v41 = vpop.f32.mrb[204].mxu1  ;;  %v2279_v52 = vpop.f32.mrb[205].mxu0  ;;  %v10741_v12 = vpack.c.bf16 %v2694_v50, %v2678_v22  ;;  %v11653_v59 = vld [vmem:[#allocation41_spill] sm:$0xff] }
 0x2dd   :  { %11650 = vst [vmem:[#allocation38_spill] sm:$0xff] %v10736_v63  ;;  %11651 = vst [vmem:[#allocation43_spill] sm:$0xff] %v10738_v13  ;;  %v2471_v61 = vadd.f32 %v2470_v41, %v10667_v21  ;;  %v2280_v45 = vadd.f32 %v2279_v52, %v10661_v1  ;;  %v2472_v25 = vpop.f32.mrb[205].mxu1  ;;  %v2281_v3 = vpop.f32.mrb[206].mxu0  ;;  %v11657_v13 = vld [vmem:[#allocation48_spill] sm:$0xff] }
 0x2de   :  { %11652 = vst [vmem:[#allocation44_spill] sm:$0xff] %v10741_v12  ;;  %4693 = vst [vmem:[#allocation11 + $0x170] sm:$0xff] %v7856_v31  ;;  %v2707_v60 = vmax.f32 %v2278_v0, 0.0  ;;  %v2473_v38 = vadd.f32 %v2472_v25, %v10674_v10  ;;  %v2282_v18 = vadd.f32 %v2281_v3, %v10653_v15  ;;  %v2474_v2 = vpop.f32.mrb[206].mxu1  ;;  %v2283_v34 = vpop.f32.mrb[207].mxu0  ;;  %v11654_v12 = vld [vmem:[#allocation42_spill] sm:$0xff] }
 0x2df   :  { %4694 = vst [vmem:[#allocation11 + $0x178] sm:$0xff] %v7857_v55  ;;  %v2709_v43 = vmax.f32 %v2471_v61, 0.0  ;;  %v2708_v20 = vmax.f32 %v2280_v45, 0.0  ;;  %v2475_v22 = vadd.f32 %v2474_v2, %v10667_v21  ;;  %v2284_v50 = vadd.f32 %v2283_v34, %v10661_v1  ;;  %v2476_v31 = vpop.f32.mrb[207].mxu1  ;;  %v11655_v3 = vld [vmem:[#allocation47_spill] sm:$0xff] }
 0x2e0   :  { %v2710_v41 = vmax.f32 %v2473_v38, 0.0  ;;  %v2723_v63 = vmax.f32 %v2282_v18, 0.0  ;;  %v2477_v52 = vadd.f32 %v2476_v31, %v10674_v10  ;;  %6072 = vmatmul.mubr.bf16.gmra.mrb[56].mxu0 %v11653_v59 }
 0x2e1   :  { %v7864_v55 = vpack.c.bf16 %v2708_v20, %v2707_v60  ;;  %v2725_v0 = vmax.f32 %v2475_v22, 0.0  ;;  %v2724_v25 = vmax.f32 %v2284_v50, 0.0  ;;  %6233 = vmatmul.mubr.bf16.gmra.mrb[56].mxu1 %v11654_v12  ;;  %6079 = vmatprep.mubr.bf16.mxu0 %v11655_v3 }
 0x2e2   :  { %v7865_v61 = vpack.c.bf16 %v2710_v41, %v2709_v43  ;;  %v10753_v45 = vpack.c.bf16 %v2723_v63, %v2707_v60  ;;  %v2726_v2 = vmax.f32 %v2477_v52, 0.0  ;;  %6240 = vmatprep.mubr.bf16.mxu1 %v11657_v13 }
 0x2e3   :  { %4701 = vst [vmem:[#allocation11 + $0x1b0] sm:$0xff] %v7864_v55  ;;  %v10756_v38 = vpack.c.bf16 %v2725_v0, %v2709_v43  ;;  %v7872_v18 = vpack.c.bf16 %v2724_v25, %v2723_v63  ;;  %v2287_v34 = vpop.f32.mrb[208].mxu0  ;;  %v10758_v31 = vpack.c.bf16 %v2724_v25, %v2708_v20 }
 0x2e4   :  { %11656 = vst [vmem:[#allocation41_spill] sm:$0xff] %v10753_v45  ;;  %4702 = vst [vmem:[#allocation11 + $0x1b8] sm:$0xff] %v7865_v61  ;;  %v7873_v59 = vpack.c.bf16 %v2726_v2, %v2725_v0  ;;  %v2288_v22 = vadd.f32 %v2287_v34, %v10653_v15  ;;  %v2480_v12 = vpop.f32.mrb[208].mxu1  ;;  %v2289_v50 = vpop.f32.mrb[209].mxu0  ;;  %v10761_v3 = vpack.c.bf16 %v2726_v2, %v2710_v41  ;;  %v11661_v45 = vld [vmem:[#allocation45_spill] sm:$0xff] }
 0x2e5   :  { %11658 = vst [vmem:[#allocation42_spill] sm:$0xff] %v10756_v38  ;;  %11659 = vst [vmem:[#allocation47_spill] sm:$0xff] %v10758_v31  ;;  %v2481_v60 = vadd.f32 %v2480_v12, %v10667_v21  ;;  %v2290_v13 = vadd.f32 %v2289_v50, %v10661_v1  ;;  %v2482_v52 = vpop.f32.mrb[209].mxu1  ;;  %v2291_v43 = vpop.f32.mrb[210].mxu0  ;;  %v11665_v31 = vld [vmem:[#allocation52_spill] sm:$0xff] }
 0x2e6   :  { %11660 = vst [vmem:[#allocation48_spill] sm:$0xff] %v10761_v3  ;;  %4709 = vst [vmem:[#allocation11 + $0x1f0] sm:$0xff] %v7872_v18  ;;  %v2739_v63 = vmax.f32 %v2288_v22, 0.0  ;;  %v2483_v20 = vadd.f32 %v2482_v52, %v10674_v10  ;;  %v2292_v55 = vadd.f32 %v2291_v43, %v10653_v15  ;;  %v2484_v0 = vpop.f32.mrb[210].mxu1  ;;  %v2293_v25 = vpop.f32.mrb[211].mxu0  ;;  %v11662_v3 = vld [vmem:[#allocation46_spill] sm:$0xff] }
 0x2e7   :  { %4710 = vst [vmem:[#allocation11 + $0x1f8] sm:$0xff] %v7873_v59  ;;  %v2741_v61 = vmax.f32 %v2481_v60, 0.0  ;;  %v2740_v34 = vmax.f32 %v2290_v13, 0.0  ;;  %v2485_v41 = vadd.f32 %v2484_v0, %v10667_v21  ;;  %v2294_v2 = vadd.f32 %v2293_v25, %v10661_v1  ;;  %v2486_v18 = vpop.f32.mrb[211].mxu1  ;;  %v11663_v43 = vld [vmem:[#allocation51_spill] sm:$0xff] }
 0x2e8   :  { %v2742_v12 = vmax.f32 %v2483_v20, 0.0  ;;  %v2755_v38 = vmax.f32 %v2292_v55, 0.0  ;;  %v2487_v50 = vadd.f32 %v2486_v18, %v10674_v10  ;;  %6080 = vmatmul.mubr.bf16.gmra.mrb[60].mxu0 %v11661_v45 }
 0x2e9   :  { %v7880_v59 = vpack.c.bf16 %v2740_v34, %v2739_v63  ;;  %v2757_v22 = vmax.f32 %v2485_v41, 0.0  ;;  %v2756_v52 = vmax.f32 %v2294_v2, 0.0  ;;  %6241 = vmatmul.mubr.bf16.gmra.mrb[60].mxu1 %v11662_v3  ;;  %6281 = vmatprep.mubr.bf16.mxu0 %v11663_v43 }
 0x2ea   :  { %v7881_v60 = vpack.c.bf16 %v2742_v12, %v2741_v61  ;;  %v10773_v13 = vpack.c.bf16 %v2755_v38, %v2739_v63  ;;  %v2758_v0 = vmax.f32 %v2487_v50, 0.0  ;;  %6442 = vmatprep.mubr.bf16.mxu1 %v11665_v31 }
 0x2eb   :  { %4717 = vst [vmem:[#allocation11 + $0x230] sm:$0xff] %v7880_v59  ;;  %v10776_v20 = vpack.c.bf16 %v2757_v22, %v2741_v61  ;;  %v7888_v55 = vpack.c.bf16 %v2756_v52, %v2755_v38  ;;  %v2297_v25 = vpop.f32.mrb[212].mxu0  ;;  %v10778_v18 = vpack.c.bf16 %v2756_v52, %v2740_v34 }
 0x2ec   :  { %11664 = vst [vmem:[#allocation45_spill] sm:$0xff] %v10773_v13  ;;  %4718 = vst [vmem:[#allocation11 + $0x238] sm:$0xff] %v7881_v60  ;;  %v7889_v45 = vpack.c.bf16 %v2758_v0, %v2757_v22  ;;  %v2298_v41 = vadd.f32 %v2297_v25, %v10653_v15  ;;  %v2490_v3 = vpop.f32.mrb[212].mxu1  ;;  %v2299_v2 = vpop.f32.mrb[213].mxu0  ;;  %v10781_v43 = vpack.c.bf16 %v2758_v0, %v2742_v12  ;;  %v9055_v60 = vld [vmem:[#allocation8 + $0x200] sm:$0xff]  }
 0x2ed   :  { %11666 = vst [vmem:[#allocation46_spill] sm:$0xff] %v10776_v20  ;;  %11667 = vst [vmem:[#allocation51_spill] sm:$0xff] %v10778_v18  ;;  %v2491_v63 = vadd.f32 %v2490_v3, %v10667_v21  ;;  %v2300_v31 = vadd.f32 %v2299_v2, %v10661_v1  ;;  %v2492_v50 = vpop.f32.mrb[213].mxu1  ;;  %v2301_v61 = vpop.f32.mrb[214].mxu0  ;;  %v9057_v3 = vld [vmem:[#allocation8 + $0x280] sm:$0xff]   ;;  %v9058_v2 = vld [vmem:[#allocation8 + $0x248] sm:$0xff]  }
 0x2ee   :  { %11668 = vst [vmem:[#allocation52_spill] sm:$0xff] %v10781_v43  ;;  %4725 = vst [vmem:[#allocation11 + $0x270] sm:$0xff] %v7888_v55  ;;  %v2771_v38 = vmax.f32 %v2298_v41, 0.0  ;;  %v2493_v34 = vadd.f32 %v2492_v50, %v10674_v10  ;;  %v2302_v59 = vadd.f32 %v2301_v61, %v10653_v15  ;;  %v2494_v22 = vpop.f32.mrb[214].mxu1  ;;  %v2303_v52 = vpop.f32.mrb[215].mxu0  ;;  %v11669_v41 = vld [vmem:[#allocation49_spill] sm:$0xff] }
 0x2ef   :  { %4726 = vst [vmem:[#allocation11 + $0x278] sm:$0xff] %v7889_v45  ;;  %v2773_v25 = vmax.f32 %v2491_v63, 0.0  ;;  %v2772_v20 = vmax.f32 %v2300_v31, 0.0  ;;  %v2495_v12 = vadd.f32 %v2494_v22, %v10667_v21  ;;  %v2304_v0 = vadd.f32 %v2303_v52, %v10661_v1  ;;  %v2496_v55 = vpop.f32.mrb[215].mxu1  ;;  %v9060_v50 = vld [vmem:[#allocation8 + $0x2c8] sm:$0xff]  }
 0x2f0   :  { %v2774_v13 = vmax.f32 %v2493_v34, 0.0  ;;  %v2787_v43 = vmax.f32 %v2302_v59, 0.0  ;;  %v2497_v45 = vadd.f32 %v2496_v55, %v10674_v10  ;;  %6282 = vmatmul.mubr.bf16.vlgmr.msra.gmra.mrb[64].mxu0 %v11669_v41  ;;  %v11671_v63 = vld [vmem:[#allocation55_spill] sm:$0xff] }
 0x2f1   :  { %v7896_v61 = vpack.c.bf16 %v2772_v20, %v2771_v38  ;;  %v2789_v18 = vmax.f32 %v2495_v12, 0.0  ;;  %v2788_v30 = vmax.f32 %v2304_v0, 0.0  ;;  %6443 = vmatmul.mubr.bf16.vlgmr.msra.gmra.mrb[64].mxu1 %v11670_v23  ;;  %6289 = vmatprep.mubr.bf16.mxu0 %v11671_v63  ;;  %v9059_v34 = vld [vmem:[#allocation8 + $0x208] sm:$0xff]   ;;  %v9062_v0 = vld [vmem:[#allocation8 + $0x250] sm:$0xff]  }
 0x2f2   :  { %v7897_v31 = vpack.c.bf16 %v2774_v13, %v2773_v25  ;;  %v10793_v22 = vpack.c.bf16 %v2787_v43, %v2771_v38  ;;  %v2790_v52 = vmax.f32 %v2497_v45, 0.0  ;;  %6450 = vmatprep.mubr.bf16.mxu1 %v11673_v4  ;;  %8515 = vmatpush3.bf16.msra.mxu0 %v9055_v60  ;;  %v9061_v12 = vld [vmem:[#allocation8 + $0x288] sm:$0xff]   ;;  %v9064_v4 = vld [vmem:[#allocation8 + $0x2d0] sm:$0xff]  }
 0x2f3   :  { %4733 = vst [vmem:[#allocation11 + $0x2b0] sm:$0xff] %v7896_v61  ;;  %v10796_v59 = vpack.c.bf16 %v2789_v18, %v2773_v25  ;;  %v7904_v55 = vpack.c.bf16 %v2788_v30, %v2787_v43  ;;  %v2307_v41 = vpop.f32.mrb[216].mxu0  ;;  %8627 = vmatpush3.bf16.msra.mxu1 %v9057_v3  ;;  %8516 = vmatprep.subr.bf16.mxu0 %v9058_v2 }
 0x2f4   :  { %11672 = vst [vmem:[#allocation49_spill] sm:$0xff] %v10793_v22  ;;  %v10798_v23 = vpack.c.bf16 %v2788_v30, %v2772_v20  ;;  %4734 = vst [vmem:[#allocation11 + $0x2b8] sm:$0xff] %v7897_v31  ;;  %v7905_v63 = vpack.c.bf16 %v2790_v52, %v2789_v18  ;;  %v2308_v38 = vadd.f32 %v2307_v41, %v10653_v15  ;;  %v2500_v45 = vpop.f32.mrb[216].mxu1  ;;  %v2309_v22 = vpop.f32.mrb[217].mxu0  ;;  %8628 = vmatprep.subr.bf16.mxu1 %v9060_v50  ;;  %v9063_v50 = vld [vmem:[#allocation8 + $0x210] sm:$0xff]  }
 0x2f5   :  { %11674 = vst [vmem:[#allocation50_spill] sm:$0xff] %v10796_v59  ;;  %v10801_v60 = vpack.c.bf16 %v2790_v52, %v2774_v13  ;;  %4741 = vst [vmem:[#allocation11 + $0x2f0] sm:$0xff] %v7904_v55  ;;  %v2501_v43 = vadd.f32 %v2500_v45, %v10667_v21  ;;  %v2310_v25 = vadd.f32 %v2309_v22, %v10661_v1  ;;  %v2502_v3 = vpop.f32.mrb[217].mxu1  ;;  %v2311_v2 = vpop.f32.mrb[218].mxu0  ;;  %v9065_v22 = vld [vmem:[#allocation8 + $0x290] sm:$0xff]  }
 0x2f6   :  { %11675 = vst [vmem:[#allocation55_spill] sm:$0xff] %v10798_v23  ;;  %4742 = vst [vmem:[#allocation11 + $0x2f8] sm:$0xff] %v7905_v63  ;;  %v2803_v30 = vmax.f32 %v2308_v38, 0.0  ;;  %v2503_v20 = vadd.f32 %v2502_v3, %v10674_v10  ;;  %v2312_v18 = vadd.f32 %v2311_v2, %v10653_v15  ;;  %v2504_v61 = vpop.f32.mrb[218].mxu1  ;;  %v2313_v31 = vpop.f32.mrb[219].mxu0  ;;  %8517 = vmatpush3.bf16.msra.mxu0 %v9059_v34  ;;  %v9066_v63 = vld [vmem:[#allocation8 + $0x258] sm:$0xff]  }
 0x2f7   :  { %11676 = vst [vmem:[#allocation56_spill] sm:$0xff] %v10801_v60  ;;  %v2805_v41 = vmax.f32 %v2501_v43, 0.0  ;;  %v2804_v13 = vmax.f32 %v2310_v25, 0.0  ;;  %v2505_v52 = vadd.f32 %v2504_v61, %v10667_v21  ;;  %v2314_v55 = vadd.f32 %v2313_v31, %v10661_v1  ;;  %v2506_v45 = vpop.f32.mrb[219].mxu1  ;;  %8629 = vmatpush3.bf16.msra.mxu1 %v9061_v12  ;;  %8518 = vmatprep.subr.bf16.mxu0 %v9062_v0  ;;  %v11677_v2 = vld [vmem:[#allocation53_spill] sm:$0xff]  ;;  %v11678_v23 = vld [vmem:[#allocation54_spill] sm:$0xff] }
 0x2f8   :  { %v2806_v38 = vmax.f32 %v2503_v20, 0.0  ;;  %v2819_v59 = vmax.f32 %v2312_v18, 0.0  ;;  %v2507_v3 = vadd.f32 %v2506_v45, %v10674_v10  ;;  %6290 = vmatmul.mubr.bf16.gmra.mrb[68].mxu0 %v11677_v2  ;;  %8630 = vmatprep.subr.bf16.mxu1 %v9064_v4  ;;  %v9068_v34 = vld [vmem:[#allocation8 + $0x2d8] sm:$0xff]   ;;  %v11679_v61 = vld [vmem:[#allocation59_spill] sm:$0xff] }
 0x2f9   :  { %v7912_v60 = vpack.c.bf16 %v2804_v13, %v2803_v30  ;;  %v2821_v43 = vmax.f32 %v2505_v52, 0.0  ;;  %v2820_v25 = vmax.f32 %v2314_v55, 0.0  ;;  %6451 = vmatmul.mubr.bf16.gmra.mrb[68].mxu1 %v11678_v23  ;;  %6297 = vmatprep.mubr.bf16.mxu0 %v11679_v61  ;;  %v9067_v20 = vld [vmem:[#allocation8 + $0x218] sm:$0xff]   ;;  %v9070_v55 = vld [vmem:[#allocation8 + $0x260] sm:$0xff]  }
 0x2fa   :  { %v7913_v31 = vpack.c.bf16 %v2806_v38, %v2805_v41  ;;  %v10813_v12 = vpack.c.bf16 %v2819_v59, %v2803_v30  ;;  %v2822_v0 = vmax.f32 %v2507_v3, 0.0  ;;  %6458 = vmatprep.mubr.bf16.mxu1 %v11681_v19  ;;  %8519 = vmatpush3.bf16.msra.mxu0 %v9063_v50  ;;  %v9069_v52 = vld [vmem:[#allocation8 + $0x298] sm:$0xff]   ;;  %v9072_v19 = vld [vmem:[#allocation8 + $0x2e0] sm:$0xff]  }
 0x2fb   :  { %4749 = vst [vmem:[#allocation11 + $0x330] sm:$0xff] %v7912_v60  ;;  %v10816_v18 = vpack.c.bf16 %v2821_v43, %v2805_v41  ;;  %v7920_v4 = vpack.c.bf16 %v2820_v25, %v2819_v59  ;;  %v2317_v45 = vpop.f32.mrb[220].mxu0  ;;  %8631 = vmatpush3.bf16.msra.mxu1 %v9065_v22  ;;  %8520 = vmatprep.subr.bf16.mxu0 %v9066_v63 }
 0x2fc   :  { %11680 = vst [vmem:[#allocation53_spill] sm:$0xff] %v10813_v12  ;;  %v10818_v23 = vpack.c.bf16 %v2820_v25, %v2804_v13  ;;  %4750 = vst [vmem:[#allocation11 + $0x338] sm:$0xff] %v7913_v31  ;;  %v7921_v2 = vpack.c.bf16 %v2822_v0, %v2821_v43  ;;  %v2318_v30 = vadd.f32 %v2317_v45, %v10653_v15  ;;  %v2510_v3 = vpop.f32.mrb[220].mxu1  ;;  %v2319_v61 = vpop.f32.mrb[221].mxu0  ;;  %8632 = vmatprep.subr.bf16.mxu1 %v9068_v34  ;;  %v9071_v34 = vld [vmem:[#allocation8 + $0x220] sm:$0xff]  }
 0x2fd   :  { %11682 = vst [vmem:[#allocation54_spill] sm:$0xff] %v10816_v18  ;;  %v10821_v50 = vpack.c.bf16 %v2822_v0, %v2806_v38  ;;  %4757 = vst [vmem:[#allocation11 + $0x370] sm:$0xff] %v7920_v4  ;;  %v2511_v59 = vadd.f32 %v2510_v3, %v10667_v21  ;;  %v2320_v60 = vadd.f32 %v2319_v61, %v10661_v1  ;;  %v2512_v41 = vpop.f32.mrb[221].mxu1  ;;  %v2321_v22 = vpop.f32.mrb[222].mxu0  ;;  %v9073_v61 = vld [vmem:[#allocation8 + $0x2a0] sm:$0xff]  }
 0x2fe   :  { %11683 = vst [vmem:[#allocation59_spill] sm:$0xff] %v10818_v23  ;;  %4758 = vst [vmem:[#allocation11 + $0x378] sm:$0xff] %v7921_v2  ;;  %v2835_v13 = vmax.f32 %v2318_v30, 0.0  ;;  %v2513_v63 = vadd.f32 %v2512_v41, %v10674_v10  ;;  %v2322_v43 = vadd.f32 %v2321_v22, %v10653_v15  ;;  %v2514_v25 = vpop.f32.mrb[222].mxu1  ;;  %v2323_v31 = vpop.f32.mrb[223].mxu0  ;;  %8521 = vmatpush3.bf16.msra.mxu0 %v9067_v20  ;;  %v9074_v2 = vld [vmem:[#allocation8 + $0x268] sm:$0xff]  }
 0x2ff   :  { %11684 = vst [vmem:[#allocation60_spill] sm:$0xff] %v10821_v50  ;;  %v2837_v45 = vmax.f32 %v2511_v59, 0.0  ;;  %v2836_v38 = vmax.f32 %v2320_v60, 0.0  ;;  %v2515_v0 = vadd.f32 %v2514_v25, %v10667_v21  ;;  %v2324_v4 = vadd.f32 %v2323_v31, %v10661_v1  ;;  %v2516_v3 = vpop.f32.mrb[223].mxu1  ;;  %8633 = vmatpush3.bf16.msra.mxu1 %v9069_v52  ;;  %8522 = vmatprep.subr.bf16.mxu0 %v9070_v55  ;;  %v11685_v22 = vld [vmem:[#allocation57_spill] sm:$0xff]  ;;  %v9076_v20 = vld [vmem:[#allocation8 + $0x2e8] sm:$0xff]  }
 0x300   :  { %v2838_v30 = vmax.f32 %v2513_v63, 0.0  ;;  %v2851_v18 = vmax.f32 %v2322_v43, 0.0  ;;  %v2517_v41 = vadd.f32 %v2516_v3, %v10674_v10  ;;  %6298 = vmatmul.mubr.bf16.gmra.mrb[72].mxu0 %v11685_v22  ;;  %8634 = vmatprep.subr.bf16.mxu1 %v9072_v19  ;;  %v11686_v50 = vld [vmem:[#allocation58_spill] sm:$0xff]  ;;  %v11687_v25 = vld [vmem:[#allocation63_spill] sm:$0xff]  ;;  %v11689_v23 = vld [vmem:[#allocation64_spill] sm:$0xff] }
 0x301   :  { %v7928_v12 = vpack.c.bf16 %v2836_v38, %v2835_v13  ;;  %v2853_v59 = vmax.f32 %v2515_v0, 0.0  ;;  %v2852_v60 = vmax.f32 %v2324_v4, 0.0  ;;  %6459 = vmatmul.mubr.bf16.gmra.mrb[72].mxu1 %v11686_v50  ;;  %6305 = vmatprep.mubr.bf16.mxu0 %v11687_v25  ;;  %v9075_v63 = vld [vmem:[#allocation8 + $0x228] sm:$0xff]   ;;  %v9078_v4 = vld [vmem:[#allocation8 + $0x270] sm:$0xff]  }
 0x302   :  { %v7929_v31 = vpack.c.bf16 %v2838_v30, %v2837_v45  ;;  %v10833_v52 = vpack.c.bf16 %v2851_v18, %v2835_v13  ;;  %v2854_v55 = vmax.f32 %v2517_v41, 0.0  ;;  %6466 = vmatprep.mubr.bf16.mxu1 %v11689_v23  ;;  %8523 = vmatpush3.bf16.msra.mxu0 %v9071_v34  ;;  %v9077_v0 = vld [vmem:[#allocation8 + $0x2a8] sm:$0xff]   ;;  %v9080_v23 = vld [vmem:[#allocation8 + $0x2f0] sm:$0xff]  }
 0x303   :  { %4765 = vst [vmem:[#allocation11 + $0x3b0] sm:$0xff] %v7928_v12  ;;  %v10836_v43 = vpack.c.bf16 %v2853_v59, %v2837_v45  ;;  %v7936_v19 = vpack.c.bf16 %v2852_v60, %v2851_v18  ;;  %v2327_v3 = vpop.f32.mrb[224].mxu0  ;;  %8635 = vmatpush3.bf16.msra.mxu1 %v9073_v61  ;;  %8524 = vmatprep.subr.bf16.mxu0 %v9074_v2 }
 0x304   :  { %11688 = vst [vmem:[#allocation57_spill] sm:$0xff] %v10833_v52  ;;  %v10838_v50 = vpack.c.bf16 %v2852_v60, %v2836_v38  ;;  %4766 = vst [vmem:[#allocation11 + $0x3b8] sm:$0xff] %v7929_v31  ;;  %v7937_v22 = vpack.c.bf16 %v2854_v55, %v2853_v59  ;;  %v2328_v13 = vadd.f32 %v2327_v3, %v10653_v15  ;;  %v2520_v41 = vpop.f32.mrb[224].mxu1  ;;  %v2329_v25 = vpop.f32.mrb[225].mxu0  ;;  %8636 = vmatprep.subr.bf16.mxu1 %v9076_v20  ;;  %v9079_v20 = vld [vmem:[#allocation8 + $0x230] sm:$0xff]  }
 0x305   :  { %11690 = vst [vmem:[#allocation58_spill] sm:$0xff] %v10836_v43  ;;  %v10841_v34 = vpack.c.bf16 %v2854_v55, %v2838_v30  ;;  %4773 = vst [vmem:[#allocation11 + $0x3f0] sm:$0xff] %v7936_v19  ;;  %v2521_v12 = vadd.f32 %v2520_v41, %v10667_v21  ;;  %v2330_v18 = vadd.f32 %v2329_v25, %v10661_v1  ;;  %v2522_v45 = vpop.f32.mrb[225].mxu1  ;;  %v2331_v61 = vpop.f32.mrb[226].mxu0  ;;  %v9081_v25 = vld [vmem:[#allocation8 + $0x2b0] sm:$0xff]  }
 0x306   :  { %11691 = vst [vmem:[#allocation63_spill] sm:$0xff] %v10838_v50  ;;  %4774 = vst [vmem:[#allocation11 + $0x3f8] sm:$0xff] %v7937_v22  ;;  %v2867_v38 = vmax.f32 %v2328_v13, 0.0  ;;  %v2523_v2 = vadd.f32 %v2522_v45, %v10674_v10  ;;  %v2332_v59 = vadd.f32 %v2331_v61, %v10653_v15  ;;  %v2524_v60 = vpop.f32.mrb[226].mxu1  ;;  %v2333_v31 = vpop.f32.mrb[227].mxu0  ;;  %8525 = vmatpush3.bf16.msra.mxu0 %v9075_v63  ;;  %v9082_v22 = vld [vmem:[#allocation8 + $0x278] sm:$0xff]  }
 0x307   :  { %11692 = vst [vmem:[#allocation64_spill] sm:$0xff] %v10841_v34  ;;  %v2869_v3 = vmax.f32 %v2521_v12, 0.0  ;;  %v2868_v30 = vmax.f32 %v2330_v18, 0.0  ;;  %v2525_v55 = vadd.f32 %v2524_v60, %v10667_v21  ;;  %v2334_v19 = vadd.f32 %v2333_v31, %v10661_v1  ;;  %v2526_v41 = vpop.f32.mrb[227].mxu1  ;;  %8637 = vmatpush3.bf16.msra.mxu1 %v9077_v0  ;;  %8526 = vmatprep.subr.bf16.mxu0 %v9078_v4  ;;  %v11693_v61 = vld [vmem:[#allocation61_spill] sm:$0xff]  ;;  %v11694_v34 = vld [vmem:[#allocation62_spill] sm:$0xff] }
 0x308   :  { %v2870_v13 = vmax.f32 %v2523_v2, 0.0  ;;  %v2883_v43 = vmax.f32 %v2332_v59, 0.0  ;;  %v2527_v45 = vadd.f32 %v2526_v41, %v10674_v10  ;;  %6306 = vmatmul.mubr.bf16.gmra.mrb[76].mxu0 %v11693_v61  ;;  %8638 = vmatprep.subr.bf16.mxu1 %v9080_v23  ;;  %v9084_v63 = vld [vmem:[#allocation8 + $0x2f8] sm:$0xff]   ;;  %v11695_v60 = vld [vmem:[#allocation67_spill] sm:$0xff]  ;;  %v11697_v50 = vld [vmem:[#allocation68_spill] sm:$0xff] }
 0x309   :  { %v7944_v52 = vpack.c.bf16 %v2868_v30, %v2867_v38  ;;  %v2885_v12 = vmax.f32 %v2525_v55, 0.0  ;;  %v2884_v18 = vmax.f32 %v2334_v19, 0.0  ;;  %6467 = vmatmul.mubr.bf16.gmra.mrb[76].mxu1 %v11694_v34  ;;  %6313 = vmatprep.mubr.bf16.mxu0 %v11695_v60  ;;  %v9083_v2 = vld [vmem:[#allocation8 + $0x238] sm:$0xff]   ;;  %v9086_v19 = vld [vmem:[#allocation8 + $0x340] sm:$0xff]  }
 0x30a   :  { %v7945_v31 = vpack.c.bf16 %v2870_v13, %v2869_v3  ;;  %v10853_v0 = vpack.c.bf16 %v2883_v43, %v2867_v38  ;;  %v2886_v4 = vmax.f32 %v2527_v45, 0.0  ;;  %6474 = vmatprep.mubr.bf16.mxu1 %v11697_v50  ;;  %8527 = vmatpush3.bf16.msra.mxu0 %v9079_v20  ;;  %v9085_v55 = vld [vmem:[#allocation8 + $0x2b8] sm:$0xff]   ;;  %v9088_v50 = vld [vmem:[#allocation8 + $0x3c0] sm:$0xff]  }
 0x30b   :  { %4781 = vst [vmem:[#allocation11 + $0x430] sm:$0xff] %v7944_v52  ;;  %v10856_v59 = vpack.c.bf16 %v2885_v12, %v2869_v3  ;;  %v7952_v23 = vpack.c.bf16 %v2884_v18, %v2883_v43  ;;  %v2337_v41 = vpop.f32.mrb[228].mxu0  ;;  %8639 = vmatpush3.bf16.msra.mxu1 %v9081_v25  ;;  %8528 = vmatprep.subr.bf16.mxu0 %v9082_v22 }
 0x30c   :  { %11696 = vst [vmem:[#allocation61_spill] sm:$0xff] %v10853_v0  ;;  %v10858_v34 = vpack.c.bf16 %v2884_v18, %v2868_v30  ;;  %4782 = vst [vmem:[#allocation11 + $0x438] sm:$0xff] %v7945_v31  ;;  %v7953_v61 = vpack.c.bf16 %v2886_v4, %v2885_v12  ;;  %v2338_v38 = vadd.f32 %v2337_v41, %v10653_v15  ;;  %v2530_v45 = vpop.f32.mrb[228].mxu1  ;;  %v2339_v60 = vpop.f32.mrb[229].mxu0  ;;  %8640 = vmatprep.subr.bf16.mxu1 %v9084_v63 }
 0x30d   :  { %11698 = vst [vmem:[#allocation62_spill] sm:$0xff] %v10856_v59  ;;  %v10861_v20 = vpack.c.bf16 %v2886_v4, %v2870_v13  ;;  %4789 = vst [vmem:[#allocation11 + $0x470] sm:$0xff] %v7952_v23  ;;  %v2531_v52 = vadd.f32 %v2530_v45, %v10667_v21  ;;  %v2340_v43 = vadd.f32 %v2339_v60, %v10661_v1  ;;  %v2532_v3 = vpop.f32.mrb[229].mxu1  ;;  %v2341_v25 = vpop.f32.mrb[230].mxu0 }
 0x30e   :  { %11699 = vst [vmem:[#allocation67_spill] sm:$0xff] %v10858_v34  ;;  %4790 = vst [vmem:[#allocation11 + $0x478] sm:$0xff] %v7953_v61  ;;  %v2899_v30 = vmax.f32 %v2338_v38, 0.0  ;;  %v2533_v22 = vadd.f32 %v2532_v3, %v10674_v10  ;;  %v2342_v12 = vadd.f32 %v2341_v25, %v10653_v15  ;;  %v2534_v18 = vpop.f32.mrb[230].mxu1  ;;  %v2343_v31 = vpop.f32.mrb[231].mxu0  ;;  %8529 = vmatpush3.bf16.msra.mxu0 %v9083_v2  ;;  %v11701_v38 = vld [vmem:[#allocation65_spill] sm:$0xff] }
 0x30f   :  { %11700 = vst [vmem:[#allocation68_spill] sm:$0xff] %v10861_v20  ;;  %v2901_v63 = vmax.f32 %v2531_v52, 0.0  ;;  %v2900_v41 = vmax.f32 %v2340_v43, 0.0  ;;  %v2535_v13 = vadd.f32 %v2534_v18, %v10667_v21  ;;  %v2344_v4 = vadd.f32 %v2343_v31, %v10661_v1  ;;  %v2536_v23 = vpop.f32.mrb[231].mxu1  ;;  %8641 = vmatpush3.bf16.msra.mxu1 %v9085_v55  ;;  %8738 = vmatprep.subr.bf16.mxu0 %v9086_v19  ;;  %v11702_v2 = vld [vmem:[#allocation66_spill] sm:$0xff]  ;;  %v11703_v52 = vld [vmem:[#allocation71_spill] sm:$0xff] }
 0x310   :  { %v2902_v45 = vmax.f32 %v2533_v22, 0.0  ;;  %v2915_v60 = vmax.f32 %v2342_v12, 0.0  ;;  %v2537_v61 = vadd.f32 %v2536_v23, %v10674_v10  ;;  %6314 = vmatmul.mubr.bf16.gmra.mrb[80].mxu0 %v11701_v38  ;;  %8850 = vmatprep.subr.bf16.mxu1 %v9088_v50  ;;  %v11705_v55 = vld [vmem:[#allocation72_spill] sm:$0xff]  ;;  %v11778_v34 = vld [vmem:[#allocation113_spill] sm:$0xff] }
 0x311   :  { %v7960_v3 = vpack.c.bf16 %v2900_v41, %v2899_v30  ;;  %v2917_v25 = vmax.f32 %v2535_v13, 0.0  ;;  %v2916_v59 = vmax.f32 %v2344_v4, 0.0  ;;  %6475 = vmatmul.mubr.bf16.gmra.mrb[80].mxu1 %v11702_v2  ;;  %6321 = vmatprep.mubr.bf16.mxu0 %v11703_v52 }
 0x312   :  { %v7961_v43 = vpack.c.bf16 %v2902_v45, %v2901_v63  ;;  %v10873_v18 = vpack.c.bf16 %v2915_v60, %v2899_v30  ;;  %v2918_v31 = vmax.f32 %v2537_v61, 0.0  ;;  %6482 = vmatprep.mubr.bf16.mxu1 %v11705_v55 }
 0x313   :  { %4797 = vst [vmem:[#allocation11 + $0x4b0] sm:$0xff] %v7960_v3  ;;  %v10876_v19 = vpack.c.bf16 %v2917_v25, %v2901_v63  ;;  %v7968_v22 = vpack.c.bf16 %v2916_v59, %v2915_v60  ;;  %v2347_v12 = vpop.f32.mrb[232].mxu0  ;;  %v10878_v23 = vpack.c.bf16 %v2916_v59, %v2900_v41 }
 0x314   :  { %11704 = vst [vmem:[#allocation65_spill] sm:$0xff] %v10873_v18  ;;  %4798 = vst [vmem:[#allocation11 + $0x4b8] sm:$0xff] %v7961_v43  ;;  %v7969_v50 = vpack.c.bf16 %v2918_v31, %v2917_v25  ;;  %v2348_v13 = vadd.f32 %v2347_v12, %v10653_v15  ;;  %v2540_v4 = vpop.f32.mrb[232].mxu1  ;;  %v2349_v38 = vpop.f32.mrb[233].mxu0  ;;  %v10881_v2 = vpack.c.bf16 %v2918_v31, %v2902_v45  ;;  %v11710_v18 = vld [vmem:[#allocation70_spill] sm:$0xff] }
 0x315   :  { %11706 = vst [vmem:[#allocation66_spill] sm:$0xff] %v10876_v19  ;;  %11707 = vst [vmem:[#allocation71_spill] sm:$0xff] %v10878_v23  ;;  %v2541_v30 = vadd.f32 %v2540_v4, %v10667_v21  ;;  %v2350_v61 = vadd.f32 %v2349_v38, %v10661_v1  ;;  %v2542_v3 = vpop.f32.mrb[233].mxu1  ;;  %v2351_v63 = vpop.f32.mrb[234].mxu0  ;;  %v11709_v19 = vld [vmem:[#allocation69_spill] sm:$0xff] }
 0x316   :  { %11708 = vst [vmem:[#allocation72_spill] sm:$0xff] %v10881_v2  ;;  %4805 = vst [vmem:[#allocation11 + $0x4f0] sm:$0xff] %v7968_v22  ;;  %v2931_v60 = vmax.f32 %v2348_v13, 0.0  ;;  %v2543_v59 = vadd.f32 %v2542_v3, %v10674_v10  ;;  %v2352_v41 = vadd.f32 %v2351_v63, %v10653_v15  ;;  %v2544_v25 = vpop.f32.mrb[234].mxu1  ;;  %v2353_v52 = vpop.f32.mrb[235].mxu0  ;;  %v11711_v63 = vld [vmem:[#allocation75_spill] sm:$0xff] }
 0x317   :  { %4806 = vst [vmem:[#allocation11 + $0x4f8] sm:$0xff] %v7969_v50  ;;  %v2933_v43 = vmax.f32 %v2541_v30, 0.0  ;;  %v2932_v55 = vmax.f32 %v2350_v61, 0.0  ;;  %v2545_v45 = vadd.f32 %v2544_v25, %v10667_v21  ;;  %v2354_v31 = vadd.f32 %v2353_v52, %v10661_v1  ;;  %v2546_v22 = vpop.f32.mrb[235].mxu1  ;;  %v11713_v2 = vld [vmem:[#allocation76_spill] sm:$0xff] }
 0x318   :  { %v2934_v12 = vmax.f32 %v2543_v59, 0.0  ;;  %v2947_v4 = vmax.f32 %v2352_v41, 0.0  ;;  %v2547_v38 = vadd.f32 %v2546_v22, %v10674_v10  ;;  %6322 = vmatmul.mubr.bf16.gmra.mrb[84].mxu0 %v11709_v19 }
 0x319   :  { %v7976_v50 = vpack.c.bf16 %v2932_v55, %v2931_v60  ;;  %v2949_v13 = vmax.f32 %v2545_v45, 0.0  ;;  %v2948_v3 = vmax.f32 %v2354_v31, 0.0  ;;  %6483 = vmatmul.mubr.bf16.gmra.mrb[84].mxu1 %v11710_v18  ;;  %6329 = vmatprep.mubr.bf16.mxu0 %v11711_v63 }
 0x31a   :  { %v7977_v30 = vpack.c.bf16 %v2934_v12, %v2933_v43  ;;  %v10893_v61 = vpack.c.bf16 %v2947_v4, %v2931_v60  ;;  %v2950_v25 = vmax.f32 %v2547_v38, 0.0  ;;  %6490 = vmatprep.mubr.bf16.mxu1 %v11713_v2 }
 0x31b   :  { %4813 = vst [vmem:[#allocation11 + $0x530] sm:$0xff] %v7976_v50  ;;  %v10896_v59 = vpack.c.bf16 %v2949_v13, %v2933_v43  ;;  %v7984_v41 = vpack.c.bf16 %v2948_v3, %v2947_v4  ;;  %v2357_v52 = vpop.f32.mrb[236].mxu0  ;;  %v10898_v22 = vpack.c.bf16 %v2948_v3, %v2932_v55 }
 0x31c   :  { %11712 = vst [vmem:[#allocation69_spill] sm:$0xff] %v10893_v61  ;;  %4814 = vst [vmem:[#allocation11 + $0x538] sm:$0xff] %v7977_v30  ;;  %v7985_v19 = vpack.c.bf16 %v2950_v25, %v2949_v13  ;;  %v2358_v45 = vadd.f32 %v2357_v52, %v10653_v15  ;;  %v2550_v18 = vpop.f32.mrb[236].mxu1  ;;  %v2359_v31 = vpop.f32.mrb[237].mxu0  ;;  %v10901_v63 = vpack.c.bf16 %v2950_v25, %v2934_v12  ;;  %v11717_v61 = vld [vmem:[#allocation73_spill] sm:$0xff] }
 0x31d   :  { %11714 = vst [vmem:[#allocation70_spill] sm:$0xff] %v10896_v59  ;;  %11715 = vst [vmem:[#allocation75_spill] sm:$0xff] %v10898_v22  ;;  %v2551_v60 = vadd.f32 %v2550_v18, %v10667_v21  ;;  %v2360_v2 = vadd.f32 %v2359_v31, %v10661_v1  ;;  %v2552_v38 = vpop.f32.mrb[237].mxu1  ;;  %v2361_v43 = vpop.f32.mrb[238].mxu0  ;;  %v11721_v22 = vld [vmem:[#allocation80_spill] sm:$0xff] }
 0x31e   :  { %11716 = vst [vmem:[#allocation76_spill] sm:$0xff] %v10901_v63  ;;  %4821 = vst [vmem:[#allocation11 + $0x570] sm:$0xff] %v7984_v41  ;;  %v2963_v4 = vmax.f32 %v2358_v45, 0.0  ;;  %v2553_v55 = vadd.f32 %v2552_v38, %v10674_v10  ;;  %v2362_v50 = vadd.f32 %v2361_v43, %v10653_v15  ;;  %v2554_v13 = vpop.f32.mrb[238].mxu1  ;;  %v2363_v3 = vpop.f32.mrb[239].mxu0  ;;  %v11718_v63 = vld [vmem:[#allocation74_spill] sm:$0xff] }
 0x31f   :  { %4822 = vst [vmem:[#allocation11 + $0x578] sm:$0xff] %v7985_v19  ;;  %v2965_v30 = vmax.f32 %v2551_v60, 0.0  ;;  %v2964_v52 = vmax.f32 %v2360_v2, 0.0  ;;  %v2555_v12 = vadd.f32 %v2554_v13, %v10667_v21  ;;  %v2364_v25 = vadd.f32 %v2363_v3, %v10661_v1  ;;  %v2556_v41 = vpop.f32.mrb[239].mxu1  ;;  %v11719_v43 = vld [vmem:[#allocation79_spill] sm:$0xff] }
 0x320   :  { %v2966_v18 = vmax.f32 %v2553_v55, 0.0  ;;  %v2979_v59 = vmax.f32 %v2362_v50, 0.0  ;;  %v2557_v31 = vadd.f32 %v2556_v41, %v10674_v10  ;;  %6330 = vmatmul.mubr.bf16.gmra.mrb[88].mxu0 %v11717_v61 }
 0x321   :  { %v7992_v19 = vpack.c.bf16 %v2964_v52, %v2963_v4  ;;  %v2981_v45 = vmax.f32 %v2555_v12, 0.0  ;;  %v2980_v38 = vmax.f32 %v2364_v25, 0.0  ;;  %6491 = vmatmul.mubr.bf16.gmra.mrb[88].mxu1 %v11718_v63  ;;  %6337 = vmatprep.mubr.bf16.mxu0 %v11719_v43 }
 0x322   :  { %v7993_v60 = vpack.c.bf16 %v2966_v18, %v2965_v30  ;;  %v10913_v2 = vpack.c.bf16 %v2979_v59, %v2963_v4  ;;  %v2982_v13 = vmax.f32 %v2557_v31, 0.0  ;;  %6498 = vmatprep.mubr.bf16.mxu1 %v11721_v22 }
 0x323   :  { %4829 = vst [vmem:[#allocation11 + $0x5b0] sm:$0xff] %v7992_v19  ;;  %v10916_v55 = vpack.c.bf16 %v2981_v45, %v2965_v30  ;;  %v8000_v50 = vpack.c.bf16 %v2980_v38, %v2979_v59  ;;  %v2367_v3 = vpop.f32.mrb[240].mxu0  ;;  %v10918_v41 = vpack.c.bf16 %v2980_v38, %v2964_v52 }
 0x324   :  { %11720 = vst [vmem:[#allocation73_spill] sm:$0xff] %v10913_v2  ;;  %4830 = vst [vmem:[#allocation11 + $0x5b8] sm:$0xff] %v7993_v60  ;;  %v8001_v61 = vpack.c.bf16 %v2982_v13, %v2981_v45  ;;  %v2368_v12 = vadd.f32 %v2367_v3, %v10653_v15  ;;  %v2560_v63 = vpop.f32.mrb[240].mxu1  ;;  %v2369_v25 = vpop.f32.mrb[241].mxu0  ;;  %v10921_v43 = vpack.c.bf16 %v2982_v13, %v2966_v18  ;;  %v11725_v2 = vld [vmem:[#allocation77_spill] sm:$0xff] }
 0x325   :  { %11722 = vst [vmem:[#allocation74_spill] sm:$0xff] %v10916_v55  ;;  %11723 = vst [vmem:[#allocation79_spill] sm:$0xff] %v10918_v41  ;;  %v2561_v4 = vadd.f32 %v2560_v63, %v10667_v21  ;;  %v2370_v22 = vadd.f32 %v2369_v25, %v10661_v1  ;;  %v2562_v31 = vpop.f32.mrb[241].mxu1  ;;  %v2371_v30 = vpop.f32.mrb[242].mxu0  ;;  %v11775_v41 = vld [vmem:[#allocation115_spill] sm:$0xff] }
 0x326   :  { %11724 = vst [vmem:[#allocation80_spill] sm:$0xff] %v10921_v43  ;;  %4837 = vst [vmem:[#allocation11 + $0x5f0] sm:$0xff] %v8000_v50  ;;  %v2995_v59 = vmax.f32 %v2368_v12, 0.0  ;;  %v2563_v52 = vadd.f32 %v2562_v31, %v10674_v10  ;;  %v2372_v19 = vadd.f32 %v2371_v30, %v10653_v15  ;;  %v2564_v45 = vpop.f32.mrb[242].mxu1  ;;  %v2373_v38 = vpop.f32.mrb[243].mxu0  ;;  %v11726_v43 = vld [vmem:[#allocation78_spill] sm:$0xff] }
 0x327   :  { %4838 = vst [vmem:[#allocation11 + $0x5f8] sm:$0xff] %v8001_v61  ;;  %v2997_v60 = vmax.f32 %v2561_v4, 0.0  ;;  %v2996_v3 = vmax.f32 %v2370_v22, 0.0  ;;  %v2565_v18 = vadd.f32 %v2564_v45, %v10667_v21  ;;  %v2374_v13 = vadd.f32 %v2373_v38, %v10661_v1  ;;  %v2566_v50 = vpop.f32.mrb[243].mxu1 }
 0x328   :  { %v2998_v63 = vmax.f32 %v2563_v52, 0.0  ;;  %v3011_v55 = vmax.f32 %v2372_v19, 0.0  ;;  %v2567_v25 = vadd.f32 %v2566_v50, %v10674_v10  ;;  %6338 = vmatmul.mubr.bf16.gmra.mrb[92].mxu0 %v11725_v2 }
 0x329   :  { %v8008_v61 = vpack.c.bf16 %v2996_v3, %v2995_v59  ;;  %v3013_v12 = vmax.f32 %v2565_v18, 0.0  ;;  %v3012_v31 = vmax.f32 %v2374_v13, 0.0  ;;  %6499 = vmatmul.mubr.bf16.gmra.mrb[92].mxu1 %v11726_v43  ;;  %6345 = vmatprep.mubr.bf16.mxu0 %v10210_v11 }
 0x32a   :  { %v8009_v4 = vpack.c.bf16 %v2998_v63, %v2997_v60  ;;  %v10933_v22 = vpack.c.bf16 %v3011_v55, %v2995_v59  ;;  %v3014_v30 = vmax.f32 %v2567_v25, 0.0  ;;  %6506 = vmatprep.mubr.bf16.mxu1 %v10213_v44 }
 0x32b   :  { %4845 = vst [vmem:[#allocation11 + $0x630] sm:$0xff] %v8008_v61  ;;  %v10936_v52 = vpack.c.bf16 %v3013_v12, %v2997_v60  ;;  %v8016_v19 = vpack.c.bf16 %v3012_v31, %v3011_v55  ;;  %v2377_v45 = vpop.f32.mrb[244].mxu0  ;;  %v10938_v38 = vpack.c.bf16 %v3012_v31, %v2996_v3 }
 0x32c   :  { %11727 = vst [vmem:[#allocation77_spill] sm:$0xff] %v10933_v22  ;;  %4846 = vst [vmem:[#allocation11 + $0x638] sm:$0xff] %v8009_v4  ;;  %v8017_v2 = vpack.c.bf16 %v3014_v30, %v3013_v12  ;;  %v2378_v18 = vadd.f32 %v2377_v45, %v10653_v15  ;;  %v2570_v43 = vpop.f32.mrb[244].mxu1  ;;  %v2379_v13 = vpop.f32.mrb[245].mxu0  ;;  %v10941_v11 = vpack.c.bf16 %v3014_v30, %v2998_v63  ;;  %v11732_v22 = vld [vmem:[#allocation82_spill] sm:$0xff] }
 0x32d   :  { %11728 = vst [vmem:[#allocation78_spill] sm:$0xff] %v10936_v52  ;;  %11729 = vst [vmem:[#allocation130_spill] sm:$0xff] %v10938_v38  ;;  %v2571_v59 = vadd.f32 %v2570_v43, %v10667_v21  ;;  %v2380_v44 = vadd.f32 %v2379_v13, %v10661_v1  ;;  %v2572_v50 = vpop.f32.mrb[245].mxu1  ;;  %v2381_v60 = vpop.f32.mrb[246].mxu0  ;;  %v11731_v52 = vld [vmem:[#allocation81_spill] sm:$0xff] }
 0x32e   :  { %11730 = vst [vmem:[#allocation131_spill] sm:$0xff] %v10941_v11  ;;  %4853 = vst [vmem:[#allocation11 + $0x670] sm:$0xff] %v8016_v19  ;;  %v3027_v55 = vmax.f32 %v2378_v18, 0.0  ;;  %v2573_v3 = vadd.f32 %v2572_v50, %v10674_v10  ;;  %v2382_v25 = vadd.f32 %v2381_v60, %v10653_v15  ;;  %v2574_v61 = vpop.f32.mrb[246].mxu1  ;;  %v2383_v12 = vpop.f32.mrb[247].mxu0  ;;  %v9089_v11 = vld [vmem:[#allocation8 + $0x380] sm:$0xff]  }
 0x32f   :  { %4854 = vst [vmem:[#allocation11 + $0x678] sm:$0xff] %v8017_v2  ;;  %v3029_v31 = vmax.f32 %v2571_v59, 0.0  ;;  %v3028_v4 = vmax.f32 %v2380_v44, 0.0  ;;  %v2575_v63 = vadd.f32 %v2574_v61, %v10667_v21  ;;  %v2384_v30 = vadd.f32 %v2383_v12, %v10661_v1  ;;  %v2576_v19 = vpop.f32.mrb[247].mxu1  ;;  %v11734_v61 = vld [vmem:[#allocation85_spill] sm:$0xff] }
 0x330   :  { %v3030_v45 = vmax.f32 %v2573_v3, 0.0  ;;  %v3043_v43 = vmax.f32 %v2382_v25, 0.0  ;;  %v2577_v13 = vadd.f32 %v2576_v19, %v10674_v10  ;;  %6346 = vmatmul.mubr.bf16.gmra.mrb[96].mxu0 %v11731_v52 }
 0x331   :  { %v8024_v2 = vpack.c.bf16 %v3028_v4, %v3027_v55  ;;  %v3045_v18 = vmax.f32 %v2575_v63, 0.0  ;;  %v3044_v50 = vmax.f32 %v2384_v30, 0.0  ;;  %6507 = vmatmul.mubr.bf16.gmra.mrb[96].mxu1 %v11732_v22  ;;  %6353 = vmatprep.mubr.bf16.mxu0 %v10228_v40 }
 0x332   :  { %v8025_v59 = vpack.c.bf16 %v3030_v45, %v3029_v31  ;;  %v10953_v44 = vpack.c.bf16 %v3043_v43, %v3027_v55  ;;  %v3046_v60 = vmax.f32 %v2577_v13, 0.0  ;;  %6514 = vmatprep.mubr.bf16.mxu1 %v11734_v61 }
 0x333   :  { %4861 = vst [vmem:[#allocation11 + $0x6b0] sm:$0xff] %v8024_v2  ;;  %v10956_v3 = vpack.c.bf16 %v3045_v18, %v3029_v31  ;;  %v8032_v25 = vpack.c.bf16 %v3044_v50, %v3043_v43  ;;  %v2387_v12 = vpop.f32.mrb[248].mxu0  ;;  %v10958_v19 = vpack.c.bf16 %v3044_v50, %v3028_v4 }
 0x334   :  { %11733 = vst [vmem:[#allocation81_spill] sm:$0xff] %v10953_v44  ;;  %4862 = vst [vmem:[#allocation11 + $0x6b8] sm:$0xff] %v8025_v59  ;;  %v8033_v52 = vpack.c.bf16 %v3046_v60, %v3045_v18  ;;  %v2388_v63 = vadd.f32 %v2387_v12, %v10653_v15  ;;  %v2580_v22 = vpop.f32.mrb[248].mxu1  ;;  %v2389_v30 = vpop.f32.mrb[249].mxu0  ;;  %v10961_v40 = vpack.c.bf16 %v3046_v60, %v3030_v45  ;;  %v11738_v44 = vld [vmem:[#allocation83_spill] sm:$0xff] }
 0x335   :  { %11735 = vst [vmem:[#allocation82_spill] sm:$0xff] %v10956_v3  ;;  %11736 = vst [vmem:[#allocation85_spill] sm:$0xff] %v10958_v19  ;;  %v2581_v55 = vadd.f32 %v2580_v22, %v10667_v21  ;;  %v2390_v13 = vadd.f32 %v2389_v30, %v10661_v1  ;;  %v2582_v2 = vpop.f32.mrb[249].mxu1  ;;  %v2391_v31 = vpop.f32.mrb[250].mxu0  ;;  %v11742_v19 = vld [vmem:[#allocation89_spill] sm:$0xff] }
 0x336   :  { %11737 = vst [vmem:[#allocation132_spill] sm:$0xff] %v10961_v40  ;;  %4869 = vst [vmem:[#allocation11 + $0x6f0] sm:$0xff] %v8032_v25  ;;  %v3059_v43 = vmax.f32 %v2388_v63, 0.0  ;;  %v2583_v4 = vadd.f32 %v2582_v2, %v10674_v10  ;;  %v2392_v50 = vadd.f32 %v2391_v31, %v10653_v15  ;;  %v2584_v18 = vpop.f32.mrb[250].mxu1  ;;  %v2393_v59 = vpop.f32.mrb[251].mxu0  ;;  %v11739_v40 = vld [vmem:[#allocation84_spill] sm:$0xff] }
 0x337   :  { %4870 = vst [vmem:[#allocation11 + $0x6f8] sm:$0xff] %v8033_v52  ;;  %v3061_v61 = vmax.f32 %v2581_v55, 0.0  ;;  %v3060_v12 = vmax.f32 %v2390_v13, 0.0  ;;  %v2585_v45 = vadd.f32 %v2584_v18, %v10667_v21  ;;  %v2394_v60 = vadd.f32 %v2393_v59, %v10661_v1  ;;  %v2586_v25 = vpop.f32.mrb[251].mxu1  ;;  %v11740_v31 = vld [vmem:[#allocation88_spill] sm:$0xff] }
 0x338   :  { %v3062_v22 = vmax.f32 %v2583_v4, 0.0  ;;  %v3075_v3 = vmax.f32 %v2392_v50, 0.0  ;;  %v2587_v30 = vadd.f32 %v2586_v25, %v10674_v10  ;;  %6354 = vmatmul.mubr.bf16.gmra.mrb[100].mxu0 %v11738_v44 }
 0x339   :  { %v8040_v52 = vpack.c.bf16 %v3060_v12, %v3059_v43  ;;  %v3077_v63 = vmax.f32 %v2585_v45, 0.0  ;;  %v3076_v2 = vmax.f32 %v2394_v60, 0.0  ;;  %6515 = vmatmul.mubr.bf16.gmra.mrb[100].mxu1 %v11739_v40  ;;  %6361 = vmatprep.mubr.bf16.mxu0 %v11740_v31 }
 0x33a   :  { %v8041_v55 = vpack.c.bf16 %v3062_v22, %v3061_v61  ;;  %v10973_v13 = vpack.c.bf16 %v3075_v3, %v3059_v43  ;;  %v3078_v18 = vmax.f32 %v2587_v30, 0.0  ;;  %6522 = vmatprep.mubr.bf16.mxu1 %v11742_v19 }
 0x33b   :  { %4877 = vst [vmem:[#allocation11 + $0x730] sm:$0xff] %v8040_v52  ;;  %v10976_v4 = vpack.c.bf16 %v3077_v63, %v3061_v61  ;;  %v8048_v50 = vpack.c.bf16 %v3076_v2, %v3075_v3  ;;  %v2397_v59 = vpop.f32.mrb[252].mxu0  ;;  %v10978_v25 = vpack.c.bf16 %v3076_v2, %v3060_v12 }
 0x33c   :  { %11741 = vst [vmem:[#allocation83_spill] sm:$0xff] %v10973_v13  ;;  %4878 = vst [vmem:[#allocation11 + $0x738] sm:$0xff] %v8041_v55  ;;  %v8049_v44 = vpack.c.bf16 %v3078_v18, %v3077_v63  ;;  %v2398_v45 = vadd.f32 %v2397_v59, %v10653_v15  ;;  %v2590_v40 = vpop.f32.mrb[252].mxu1  ;;  %v2399_v60 = vpop.f32.mrb[253].mxu0  ;;  %v10981_v31 = vpack.c.bf16 %v3078_v18, %v3062_v22  ;;  %v11746_v13 = vld [vmem:[#allocation86_spill] sm:$0xff] }
 0x33d   :  { %11743 = vst [vmem:[#allocation84_spill] sm:$0xff] %v10976_v4  ;;  %11744 = vst [vmem:[#allocation88_spill] sm:$0xff] %v10978_v25  ;;  %v2591_v43 = vadd.f32 %v2590_v40, %v10667_v21  ;;  %v2400_v19 = vadd.f32 %v2399_v60, %v10661_v1  ;;  %v2592_v30 = vpop.f32.mrb[253].mxu1  ;;  %v2401_v61 = vpop.f32.mrb[254].mxu0 }
 0x33e   :  { %11745 = vst [vmem:[#allocation89_spill] sm:$0xff] %v10981_v31  ;;  %4885 = vst [vmem:[#allocation11 + $0x770] sm:$0xff] %v8048_v50  ;;  %v3091_v3 = vmax.f32 %v2398_v45, 0.0  ;;  %v2593_v12 = vadd.f32 %v2592_v30, %v10674_v10  ;;  %v2402_v52 = vadd.f32 %v2401_v61, %v10653_v15  ;;  %v2594_v63 = vpop.f32.mrb[254].mxu1  ;;  %v2403_v2 = vpop.f32.mrb[255].mxu0  ;;  %v11747_v31 = vld [vmem:[#allocation87_spill] sm:$0xff] }
 0x33f   :  { %4886 = vst [vmem:[#allocation11 + $0x778] sm:$0xff] %v8049_v44  ;;  %v3093_v55 = vmax.f32 %v2591_v43, 0.0  ;;  %v3092_v59 = vmax.f32 %v2400_v19, 0.0  ;;  %v2595_v22 = vadd.f32 %v2594_v63, %v10667_v21  ;;  %v2404_v18 = vadd.f32 %v2403_v2, %v10661_v1  ;;  %v2596_v50 = vpop.f32.mrb[255].mxu1  ;;  %v11748_v15 = vld [vmem:[#allocation92_spill] sm:$0xff]  ;;  %v11750_v61 = vld [vmem:[#allocation93_spill] sm:$0xff] }
 0x340   :  { %v3094_v40 = vmax.f32 %v2593_v12, 0.0  ;;  %v3107_v4 = vmax.f32 %v2402_v52, 0.0  ;;  %v2597_v60 = vadd.f32 %v2596_v50, %v10674_v10  ;;  %6362 = vmatmul.mubr.bf16.gmra.mrb[104].mxu0 %v11746_v13 }
 0x341   :  { %v8056_v44 = vpack.c.bf16 %v3092_v59, %v3091_v3  ;;  %v3109_v45 = vmax.f32 %v2595_v22, 0.0  ;;  %v3108_v30 = vmax.f32 %v2404_v18, 0.0  ;;  %6523 = vmatmul.mubr.bf16.gmra.mrb[104].mxu1 %v11747_v31  ;;  %6369 = vmatprep.mubr.bf16.mxu0 %v11748_v15 }
 0x342   :  { %v8057_v43 = vpack.c.bf16 %v3094_v40, %v3093_v55  ;;  %v10993_v19 = vpack.c.bf16 %v3107_v4, %v3091_v3  ;;  %v3110_v21 = vmax.f32 %v2597_v60, 0.0  ;;  %6530 = vmatprep.mubr.bf16.mxu1 %v11750_v61 }
 0x343   :  { %4893 = vst [vmem:[#allocation11 + $0x7b0] sm:$0xff] %v8056_v44  ;;  %v10996_v1 = vpack.c.bf16 %v3109_v45, %v3093_v55  ;;  %v8064_v12 = vpack.c.bf16 %v3108_v30, %v3107_v4  ;;  %v8082_v10 = vpop.f32.mrb[0].mxu0  ;;  %v10998_v52 = vpack.c.bf16 %v3108_v30, %v3092_v59  ;;  %v11754_v30 = vld [vmem:[#allocation90_spill] sm:$0xff] }
 0x344   :  { %11749 = vst [vmem:[#allocation86_spill] sm:$0xff] %v10993_v19  ;;  %4894 = vst [vmem:[#allocation11 + $0x7b8] sm:$0xff] %v8057_v43  ;;  %v8065_v13 = vpack.c.bf16 %v3110_v21, %v3109_v45  ;;  %v8194_v63 = vpop.f32.mrb[0].mxu1  ;;  %v8083_v2 = vpop.f32.mrb[1].mxu0  ;;  %v11000_v31 = vpack.c.bf16 %v3110_v21, %v3094_v40  ;;  %v11755_v45 = vld [vmem:[#allocation91_spill] sm:$0xff]  ;;  %v11756_v43 = vld [vmem:[#allocation96_spill] sm:$0xff] }
 0x345   :  { %11751 = vst [vmem:[#allocation87_spill] sm:$0xff] %v10996_v1  ;;  %11752 = vst [vmem:[#allocation92_spill] sm:$0xff] %v10998_v52  ;;  %v8084_v22 = vadd.f32 %v8083_v2, %v8082_v10  ;;  %v8195_v3 = vpop.f32.mrb[1].mxu1  ;;  %v8085_v18 = vpop.f32.mrb[2].mxu0  ;;  %v11757_v21 = vld [vmem:[#allocation97_spill] sm:$0xff]  ;;  %v11762_v1 = vld [vmem:[#allocation98_spill] sm:$0xff] }
 0x346   :  { %11753 = vst [vmem:[#allocation93_spill] sm:$0xff] %v11000_v31  ;;  %4901 = vst [vmem:[#allocation11 + $0x7f0] sm:$0xff] %v8064_v12  ;;  %v8196_v50 = vadd.f32 %v8195_v3, %v8194_v63  ;;  %v8197_v60 = vpop.f32.mrb[2].mxu1  ;;  %v8086_v44 = vpop.f32.mrb[3].mxu0  ;;  %v11766_v31 = vld [vmem:[#allocation102_spill] sm:$0xff] }
 0x347   :  { %4902 = vst [vmem:[#allocation11 + $0x7f8] sm:$0xff] %v8065_v13  ;;  %v8087_v55 = vadd.f32 %v8086_v44, %v8085_v18  ;;  %v8198_v15 = vpop.f32.mrb[3].mxu1  ;;  %v11769_v52 = vld [vmem:[#allocation106_spill] sm:$0xff] }
 0x348   :  { %v11002_v4 = vadd.f32 %v8196_v50, %v8084_v22  ;;  %v8199_v59 = vadd.f32 %v8198_v15, %v8197_v60  ;;  %6370 = vmatmul.mubr.bf16.gmra.mrb[108].mxu0 %v11754_v30  ;;  %v11758_v30 = vld [vmem:[#allocation94_spill] sm:$0xff] }
 0x349   :  { %6531 = vmatmul.mubr.bf16.gmra.mrb[108].mxu1 %v11755_v45  ;;  %6377 = vmatprep.mubr.bf16.mxu0 %v11756_v43  ;;  %v11761_v43 = vld [vmem:[#allocation101_spill] sm:$0xff] }
 0x34a   :  { %v11007_v40 = vadd.f32 %v8199_v59, %v8087_v55  ;;  %6538 = vmatprep.mubr.bf16.mxu1 %v11757_v21  ;;  %v11759_v55 = vld [vmem:[#allocation95_spill] sm:$0xff]  ;;  %v11760_v59 = vld [vmem:[#allocation100_spill] sm:$0xff] }
 0x34b   :  { %v8088_v61 = vpop.f32.mrb[4].mxu0 }
 0x34c   :  { %v8200_v12 = vpop.f32.mrb[4].mxu1  ;;  %v8089_v10 = vpop.f32.mrb[5].mxu0 }
 0x34d   :  { %v8090_v13 = vadd.f32 %v8089_v10, %v8088_v61  ;;  %v8201_v63 = vpop.f32.mrb[5].mxu1  ;;  %v8091_v2 = vpop.f32.mrb[6].mxu0 }
 0x34e   :  { %v8202_v3 = vadd.f32 %v8201_v63, %v8200_v12  ;;  %v8203_v22 = vpop.f32.mrb[6].mxu1  ;;  %v8092_v18 = vpop.f32.mrb[7].mxu0 }
 0x34f   :  { %v8093_v50 = vadd.f32 %v8092_v18, %v8091_v2  ;;  %v8204_v60 = vpop.f32.mrb[7].mxu1 }
 0x350   :  { %v11010_v44 = vadd.f32 %v8202_v3, %v8090_v13  ;;  %v8205_v15 = vadd.f32 %v8204_v60, %v8203_v22  ;;  %6378 = vmatmul.mubr.bf16.gmra.mrb[112].mxu0 %v11758_v30 }
 0x351   :  { %6539 = vmatmul.mubr.bf16.gmra.mrb[112].mxu1 %v11759_v55  ;;  %6385 = vmatprep.mubr.bf16.mxu0 %v11760_v59 }
 0x352   :  { %v11015_v45 = vadd.f32 %v8205_v15, %v8093_v50  ;;  %6546 = vmatprep.mubr.bf16.mxu1 %v11761_v43  ;;  %v11763_v50 = vld [vmem:[#allocation99_spill] sm:$0xff]  ;;  %v11764_v15 = vld [vmem:[#allocation104_spill] sm:$0xff]  ;;  %v11765_v43 = vld [vmem:[#allocation105_spill] sm:$0xff] }
 0x353   :  { %v8094_v21 = vpop.f32.mrb[8].mxu0 }
 0x354   :  { %v8206_v61 = vpop.f32.mrb[8].mxu1  ;;  %v8095_v12 = vpop.f32.mrb[9].mxu0 }
 0x355   :  { %v8096_v10 = vadd.f32 %v8095_v12, %v8094_v21  ;;  %v8207_v63 = vpop.f32.mrb[9].mxu1  ;;  %v8097_v2 = vpop.f32.mrb[10].mxu0 }
 0x356   :  { %v8208_v18 = vadd.f32 %v8207_v63, %v8206_v61  ;;  %v8209_v13 = vpop.f32.mrb[10].mxu1  ;;  %v8098_v3 = vpop.f32.mrb[11].mxu0 }
 0x357   :  { %v8099_v22 = vadd.f32 %v8098_v3, %v8097_v2  ;;  %v8210_v60 = vpop.f32.mrb[11].mxu1 }
 0x358   :  { %v11018_v30 = vadd.f32 %v8208_v18, %v8096_v10  ;;  %v8211_v55 = vadd.f32 %v8210_v60, %v8209_v13  ;;  %6386 = vmatmul.mubr.bf16.gmra.mrb[116].mxu0 %v11762_v1 }
 0x359   :  { %6547 = vmatmul.mubr.bf16.gmra.mrb[116].mxu1 %v11763_v50  ;;  %6393 = vmatprep.mubr.bf16.mxu0 %v11764_v15  ;;  %v11768_v15 = vld [vmem:[#allocation108_spill] sm:$0xff] }
 0x35a   :  { %v11023_v59 = vadd.f32 %v8211_v55, %v8099_v22  ;;  %6554 = vmatprep.mubr.bf16.mxu1 %v11765_v43  ;;  %v11767_v22 = vld [vmem:[#allocation103_spill] sm:$0xff] }
 0x35b   :  { %v8100_v21 = vpop.f32.mrb[12].mxu0 }
 0x35c   :  { %v8212_v12 = vpop.f32.mrb[12].mxu1  ;;  %v8101_v61 = vpop.f32.mrb[13].mxu0 }
 0x35d   :  { %v8102_v63 = vadd.f32 %v8101_v61, %v8100_v21  ;;  %v8213_v19 = vpop.f32.mrb[13].mxu1  ;;  %v8103_v2 = vpop.f32.mrb[14].mxu0 }
 0x35e   :  { %v8214_v3 = vadd.f32 %v8213_v19, %v8212_v12  ;;  %v8215_v10 = vpop.f32.mrb[14].mxu1  ;;  %v8104_v18 = vpop.f32.mrb[15].mxu0 }
 0x35f   :  { %v8105_v13 = vadd.f32 %v8104_v18, %v8103_v2  ;;  %v8216_v60 = vpop.f32.mrb[15].mxu1 }
 0x360   :  { %v11026_v1 = vadd.f32 %v8214_v3, %v8102_v63  ;;  %v8217_v50 = vadd.f32 %v8216_v60, %v8215_v10  ;;  %6394 = vmatmul.mubr.bf16.gmra.mrb[120].mxu0 %v11766_v31 }
 0x361   :  { %6555 = vmatmul.mubr.bf16.gmra.mrb[120].mxu1 %v11767_v22  ;;  %6401 = vmatprep.mubr.bf16.mxu0 %v10352_v53  ;;  %v11770_v53 = vld [vmem:[#allocation107_spill] sm:$0xff] }
 0x362   :  { %v11031_v55 = vadd.f32 %v8217_v50, %v8105_v13  ;;  %6562 = vmatprep.mubr.bf16.mxu1 %v11768_v15  ;;  %v11771_v13 = vld [vmem:[#allocation111_spill] sm:$0xff]  ;;  %v11772_v15 = vld [vmem:[#allocation112_spill] sm:$0xff] }
 0x363   :  { %v8106_v43 = vpop.f32.mrb[16].mxu0 }
 0x364   :  { %v8218_v21 = vpop.f32.mrb[16].mxu1  ;;  %v8107_v19 = vpop.f32.mrb[17].mxu0 }
 0x365   :  { %v8108_v12 = vadd.f32 %v8107_v19, %v8106_v43  ;;  %v8219_v61 = vpop.f32.mrb[17].mxu1  ;;  %v8109_v2 = vpop.f32.mrb[18].mxu0 }
 0x366   :  { %v8220_v18 = vadd.f32 %v8219_v61, %v8218_v21  ;;  %v8221_v63 = vpop.f32.mrb[18].mxu1  ;;  %v8110_v3 = vpop.f32.mrb[19].mxu0 }
 0x367   :  { %v8111_v10 = vadd.f32 %v8110_v3, %v8109_v2  ;;  %v8222_v60 = vpop.f32.mrb[19].mxu1 }
 0x368   :  { %v11034_v31 = vadd.f32 %v8220_v18, %v8108_v12  ;;  %v8223_v22 = vadd.f32 %v8222_v60, %v8221_v63  ;;  %6402 = vmatmul.mubr.bf16.gmra.mrb[124].mxu0 %v11769_v52  ;;  %v9087_v63 = vld [vmem:[#allocation8 + $0x300] sm:$0xff]  }
 0x369   :  { %6563 = vmatmul.mubr.bf16.gmra.mrb[124].mxu1 %v11770_v53  ;;  %6603 = vmatprep.mubr.bf16.mxu0 %v11771_v13  ;;  %v9090_v53 = vld [vmem:[#allocation8 + $0x348] sm:$0xff]  }
 0x36a   :  { %v11039_v50 = vadd.f32 %v8223_v22, %v8111_v10  ;;  %6764 = vmatprep.mubr.bf16.mxu1 %v11772_v15  ;;  %v11773_v22 = vld [vmem:[#allocation109_spill] sm:$0xff]  ;;  %v9092_v13 = vld [vmem:[#allocation8 + $0x3c8] sm:$0xff]   ;;  %v11774_v15 = vld [vmem:[#allocation110_spill] sm:$0xff] }
 0x36b   :  { %v8112_v43 = vpop.f32.mrb[20].mxu0 }
 0x36c   :  { %v8224_v19 = vpop.f32.mrb[20].mxu1  ;;  %v8113_v21 = vpop.f32.mrb[21].mxu0 }
 0x36d   :  { %v8114_v61 = vadd.f32 %v8113_v21, %v8112_v43  ;;  %v8225_v25 = vpop.f32.mrb[21].mxu1  ;;  %v8115_v2 = vpop.f32.mrb[22].mxu0 }
 0x36e   :  { %v8226_v3 = vadd.f32 %v8225_v25, %v8224_v19  ;;  %v8227_v12 = vpop.f32.mrb[22].mxu1  ;;  %v8116_v18 = vpop.f32.mrb[23].mxu0  ;;  %v11776_v25 = vld [vmem:[#allocation116_spill] sm:$0xff]  ;;  %v9091_v19 = vld [vmem:[#allocation8 + $0x308] sm:$0xff]  }
 0x36f   :  { %v8117_v60 = vadd.f32 %v8116_v18, %v8115_v2  ;;  %v8228_v52 = vpop.f32.mrb[23].mxu1  ;;  %v9093_v2 = vld [vmem:[#allocation8 + $0x388] sm:$0xff]   ;;  %v9096_v18 = vld [vmem:[#allocation8 + $0x3d0] sm:$0xff]  }
 0x370   :  { %v11042_v38 = vadd.f32 %v8226_v3, %v8114_v61  ;;  %v8229_v10 = vadd.f32 %v8228_v52, %v8227_v12  ;;  %6604 = vmatmul.mubr.bf16.vlgmr.msra.gmra.mrb[128].mxu0 %v11773_v22  ;;  %v9094_v61 = vld [vmem:[#allocation8 + $0x350] sm:$0xff]  }
 0x371   :  { %6765 = vmatmul.mubr.bf16.vlgmr.msra.gmra.mrb[128].mxu1 %v11774_v15  ;;  %6611 = vmatprep.mubr.bf16.mxu0 %v11775_v41 }
 0x372   :  { %v11047_v43 = vadd.f32 %v8229_v10, %v8117_v60  ;;  %6772 = vmatprep.mubr.bf16.mxu1 %v11776_v25  ;;  %8739 = vmatpush3.bf16.msra.mxu0 %v9087_v63  ;;  %v9095_v10 = vld [vmem:[#allocation8 + $0x310] sm:$0xff]  }
 0x373   :  { %v8118_v21 = vpop.f32.mrb[24].mxu0  ;;  %8851 = vmatpush3.bf16.msra.mxu1 %v9089_v11  ;;  %8740 = vmatprep.subr.bf16.mxu0 %v9090_v53  ;;  %v9097_v11 = vld [vmem:[#allocation8 + $0x390] sm:$0xff]   ;;  %v9098_v53 = vld [vmem:[#allocation8 + $0x358] sm:$0xff]  }
 0x374   :  { %v8230_v3 = vpop.f32.mrb[24].mxu1  ;;  %v8119_v12 = vpop.f32.mrb[25].mxu0  ;;  %8852 = vmatprep.subr.bf16.mxu1 %v9092_v13  ;;  %v9100_v13 = vld [vmem:[#allocation8 + $0x3d8] sm:$0xff]  }
 0x375   :  { %v8120_v52 = vadd.f32 %v8119_v12, %v8118_v21  ;;  %v8231_v22 = vpop.f32.mrb[25].mxu1  ;;  %v8121_v15 = vpop.f32.mrb[26].mxu0  ;;  %v11779_v21 = vld [vmem:[#allocation114_spill] sm:$0xff] }
 0x376   :  { %v8232_v23 = vadd.f32 %v8231_v22, %v8230_v3  ;;  %v8233_v41 = vpop.f32.mrb[26].mxu1  ;;  %v8122_v60 = vpop.f32.mrb[27].mxu0  ;;  %8741 = vmatpush3.bf16.msra.mxu0 %v9091_v19  ;;  %v11780_v3 = vld [vmem:[#allocation119_spill] sm:$0xff]  ;;  %v11782_v19 = vld [vmem:[#allocation120_spill] sm:$0xff] }
 0x377   :  { %v8123_v25 = vadd.f32 %v8122_v60, %v8121_v15  ;;  %v8234_v63 = vpop.f32.mrb[27].mxu1  ;;  %8853 = vmatpush3.bf16.msra.mxu1 %v9093_v2  ;;  %8742 = vmatprep.subr.bf16.mxu0 %v9094_v61  ;;  %v9099_v2 = vld [vmem:[#allocation8 + $0x318] sm:$0xff]  }
 0x378   :  { %v11050_v0 = vadd.f32 %v8232_v23, %v8120_v52  ;;  %v8235_v20 = vadd.f32 %v8234_v63, %v8233_v41  ;;  %6612 = vmatmul.mubr.bf16.gmra.mrb[132].mxu0 %v11778_v34  ;;  %8854 = vmatprep.subr.bf16.mxu1 %v9096_v18  ;;  %v9101_v23 = vld [vmem:[#allocation8 + $0x398] sm:$0xff]   ;;  %v9102_v52 = vld [vmem:[#allocation8 + $0x360] sm:$0xff]  }
 0x379   :  { %6773 = vmatmul.mubr.bf16.gmra.mrb[132].mxu1 %v11779_v21  ;;  %6619 = vmatprep.mubr.bf16.mxu0 %v11780_v3  ;;  %v9104_v34 = vld [vmem:[#allocation8 + $0x3e0] sm:$0xff]  }
 0x37a   :  { %11777 = vst [vmem:[#allocation90_spill] sm:$0xff] %v11050_v0  ;;  %v11055_v12 = vadd.f32 %v8235_v20, %v8123_v25  ;;  %6780 = vmatprep.mubr.bf16.mxu1 %v11782_v19  ;;  %8743 = vmatpush3.bf16.msra.mxu0 %v9095_v10  ;;  %v9103_v25 = vld [vmem:[#allocation8 + $0x320] sm:$0xff]   ;;  %v11783_v0 = vld [vmem:[#allocation117_spill] sm:$0xff] }
 0x37b   :  { %v8124_v61 = vpop.f32.mrb[28].mxu0  ;;  %8855 = vmatpush3.bf16.msra.mxu1 %v9097_v11  ;;  %8744 = vmatprep.subr.bf16.mxu0 %v9098_v53  ;;  %v9105_v11 = vld [vmem:[#allocation8 + $0x3a0] sm:$0xff]   ;;  %v9106_v53 = vld [vmem:[#allocation8 + $0x368] sm:$0xff]  }
 0x37c   :  { %11781 = vst [vmem:[#allocation91_spill] sm:$0xff] %v11055_v12  ;;  %v8236_v22 = vpop.f32.mrb[28].mxu1  ;;  %v8125_v15 = vpop.f32.mrb[29].mxu0  ;;  %8856 = vmatprep.subr.bf16.mxu1 %v9100_v13  ;;  %v9108_v13 = vld [vmem:[#allocation8 + $0x3e8] sm:$0xff]  }
 0x37d   :  { %v8126_v18 = vadd.f32 %v8125_v15, %v8124_v61  ;;  %v8237_v41 = vpop.f32.mrb[29].mxu1  ;;  %v8127_v60 = vpop.f32.mrb[30].mxu0  ;;  %v11784_v61 = vld [vmem:[#allocation118_spill] sm:$0xff]  ;;  %v9110_v15 = vld [vmem:[#allocation8 + $0x370] sm:$0xff]  }
 0x37e   :  { %v8238_v63 = vadd.f32 %v8237_v41, %v8236_v22  ;;  %v8239_v21 = vpop.f32.mrb[30].mxu1  ;;  %v8128_v20 = vpop.f32.mrb[31].mxu0  ;;  %8745 = vmatpush3.bf16.msra.mxu0 %v9099_v2  ;;  %v9107_v2 = vld [vmem:[#allocation8 + $0x328] sm:$0xff]  }
 0x37f   :  { %v8129_v3 = vadd.f32 %v8128_v20, %v8127_v60  ;;  %v8240_v10 = vpop.f32.mrb[31].mxu1  ;;  %8857 = vmatpush3.bf16.msra.mxu1 %v9101_v23  ;;  %8746 = vmatprep.subr.bf16.mxu0 %v9102_v52  ;;  %v9109_v52 = vld [vmem:[#allocation8 + $0x3a8] sm:$0xff]   ;;  %v9111_v20 = vld [vmem:[#allocation8 + $0x330] sm:$0xff]  }
 0x380   :  { %v11058_v19 = vadd.f32 %v8238_v63, %v8126_v18  ;;  %v8241_v12 = vadd.f32 %v8240_v10, %v8239_v21  ;;  %6620 = vmatmul.mubr.bf16.gmra.mrb[136].mxu0 %v11783_v0  ;;  %8858 = vmatprep.subr.bf16.mxu1 %v9104_v34  ;;  %v9112_v0 = vld [vmem:[#allocation8 + $0x3f0] sm:$0xff]   ;;  %v9114_v10 = vld [vmem:[#allocation8 + $0x378] sm:$0xff]  }
 0x381   :  { %6781 = vmatmul.mubr.bf16.gmra.mrb[136].mxu1 %v11784_v61  ;;  %6627 = vmatprep.mubr.bf16.mxu0 %v10424_v51  ;;  %v11785_v61 = vld [vmem:[#allocation121_spill] sm:$0xff] }
 0x382   :  { %v11063_v22 = vadd.f32 %v8241_v12, %v8129_v3  ;;  %6788 = vmatprep.mubr.bf16.mxu1 %v10427_v37  ;;  %8747 = vmatpush3.bf16.msra.mxu0 %v9103_v25  ;;  %v9113_v3 = vld [vmem:[#allocation8 + $0x3b0] sm:$0xff]  }
 0x383   :  { %v8130_v23 = vpop.f32.mrb[32].mxu0  ;;  %8859 = vmatpush3.bf16.msra.mxu1 %v9105_v11  ;;  %8748 = vmatprep.subr.bf16.mxu0 %v9106_v53 }
 0x384   :  { %v8242_v18 = vpop.f32.mrb[32].mxu1  ;;  %v8131_v41 = vpop.f32.mrb[33].mxu0  ;;  %8860 = vmatprep.subr.bf16.mxu1 %v9108_v13  ;;  %v9116_v13 = vld [vmem:[#allocation8 + $0x3f8] sm:$0xff]  }
 0x385   :  { %v8132_v34 = vadd.f32 %v8131_v41, %v8130_v23  ;;  %v8243_v60 = vpop.f32.mrb[33].mxu1  ;;  %v8133_v63 = vpop.f32.mrb[34].mxu0  ;;  %v11786_v23 = vld [vmem:[#allocation122_spill] sm:$0xff] }
 0x386   :  { %v8244_v21 = vadd.f32 %v8243_v60, %v8242_v18  ;;  %v8245_v51 = vpop.f32.mrb[34].mxu1  ;;  %v8134_v12 = vpop.f32.mrb[35].mxu0  ;;  %8749 = vmatpush3.bf16.msra.mxu0 %v9107_v2  ;;  %v11787_v18 = vld [vmem:[#allocation125_spill] sm:$0xff]  ;;  %v11788_v2 = vld [vmem:[#allocation126_spill] sm:$0xff] }
 0x387   :  { %v8135_v37 = vadd.f32 %v8134_v12, %v8133_v63  ;;  %v8246_v25 = vpop.f32.mrb[35].mxu1  ;;  %8861 = vmatpush3.bf16.msra.mxu1 %v9109_v52  ;;  %8750 = vmatprep.subr.bf16.mxu0 %v9110_v15  ;;  %v9115_v52 = vld [vmem:[#allocation8 + $0x338] sm:$0xff]  }
 0x388   :  { %v11066_v11 = vadd.f32 %v8244_v21, %v8132_v34  ;;  %v8247_v53 = vadd.f32 %v8246_v25, %v8245_v51  ;;  %6628 = vmatmul.mubr.bf16.gmra.mrb[140].mxu0 %v11785_v61  ;;  %8862 = vmatprep.subr.bf16.mxu1 %v9112_v0  ;;  %v9117_v34 = vld [vmem:[#allocation8 + $0x3b8] sm:$0xff]  }
 0x389   :  { %6789 = vmatmul.mubr.bf16.gmra.mrb[140].mxu1 %v11786_v23  ;;  %6635 = vmatprep.mubr.bf16.mxu0 %v11787_v18  ;;  %v11789_v18 = vld [vmem:[#allocation123_spill] sm:$0xff] }
 0x38a   :  { %v11071_v41 = vadd.f32 %v8247_v53, %v8135_v37  ;;  %6796 = vmatprep.mubr.bf16.mxu1 %v11788_v2  ;;  %8751 = vmatpush3.bf16.msra.mxu0 %v9111_v20 }
 0x38b   :  { %v8136_v15 = vpop.f32.mrb[36].mxu0  ;;  %8863 = vmatpush3.bf16.msra.mxu1 %v9113_v3  ;;  %8752 = vmatprep.subr.bf16.mxu0 %v9114_v10  ;;  %v11790_v3 = vld [vmem:[#allocation124_spill] sm:$0xff] }
 0x38c   :  { %v8248_v60 = vpop.f32.mrb[36].mxu1  ;;  %v8137_v63 = vpop.f32.mrb[37].mxu0  ;;  %8864 = vmatprep.subr.bf16.mxu1 %v9116_v13 }
 0x38d   :  { %v8138_v21 = vadd.f32 %v8137_v63, %v8136_v15  ;;  %v8249_v0 = vpop.f32.mrb[37].mxu1  ;;  %v8139_v51 = vpop.f32.mrb[38].mxu0 }
 0x38e   :  { %v8250_v12 = vadd.f32 %v8249_v0, %v8248_v60  ;;  %v8251_v25 = vpop.f32.mrb[38].mxu1  ;;  %v8140_v61 = vpop.f32.mrb[39].mxu0  ;;  %8753 = vmatpush3.bf16.msra.mxu0 %v9115_v52 }
 0x38f   :  { %v8141_v37 = vadd.f32 %v8140_v61, %v8139_v51  ;;  %v8252_v53 = vpop.f32.mrb[39].mxu1  ;;  %8865 = vmatpush3.bf16.msra.mxu1 %v9117_v34 }
 0x390   :  { %v11074_v23 = vadd.f32 %v8250_v12, %v8138_v21  ;;  %v8253_v20 = vadd.f32 %v8252_v53, %v8251_v25  ;;  %6636 = vmatmul.mubr.bf16.gmra.mrb[144].mxu0 %v11789_v18 }
 0x391   :  { %6797 = vmatmul.mubr.bf16.gmra.mrb[144].mxu1 %v11790_v3  ;;  %6643 = vmatprep.mubr.bf16.mxu0 %v10462_v36  ;;  %v11791_v36 = vld [vmem:[#allocation127_spill] sm:$0xff] }
 0x392   :  { %v11079_v10 = vadd.f32 %v8253_v20, %v8141_v37  ;;  %6804 = vmatprep.mubr.bf16.mxu1 %v10465_v47 }
 0x393   :  { %v8142_v13 = vpop.f32.mrb[40].mxu0 }
 0x394   :  { %v8254_v2 = vpop.f32.mrb[40].mxu1  ;;  %v8143_v15 = vpop.f32.mrb[41].mxu0 }
 0x395   :  { %v8144_v52 = vadd.f32 %v8143_v15, %v8142_v13  ;;  %v8255_v60 = vpop.f32.mrb[41].mxu1  ;;  %v8145_v63 = vpop.f32.mrb[42].mxu0 }
 0x396   :  { %v8256_v34 = vadd.f32 %v8255_v60, %v8254_v2  ;;  %v8257_v21 = vpop.f32.mrb[42].mxu1  ;;  %v8146_v0 = vpop.f32.mrb[43].mxu0 }
 0x397   :  { %v8147_v51 = vadd.f32 %v8146_v0, %v8145_v63  ;;  %v8258_v12 = vpop.f32.mrb[43].mxu1 }
 0x398   :  { %v11082_v25 = vadd.f32 %v8256_v34, %v8144_v52  ;;  %v8259_v61 = vadd.f32 %v8258_v12, %v8257_v21  ;;  %6644 = vmatmul.mubr.bf16.gmra.mrb[148].mxu0 %v10457_v42 }
 0x399   :  { %6805 = vmatmul.mubr.bf16.gmra.mrb[148].mxu1 %v11791_v36  ;;  %6651 = vmatprep.mubr.bf16.mxu0 %v10482_v5 }
 0x39a   :  { %v11087_v47 = vadd.f32 %v8259_v61, %v8147_v51  ;;  %6812 = vmatprep.mubr.bf16.mxu1 %v10485_v7 }
 0x39b   :  { %v8148_v37 = vpop.f32.mrb[44].mxu0 }
 0x39c   :  { %v8260_v53 = vpop.f32.mrb[44].mxu1  ;;  %v8149_v20 = vpop.f32.mrb[45].mxu0 }
 0x39d   :  { %v8150_v18 = vadd.f32 %v8149_v20, %v8148_v37  ;;  %v8261_v3 = vpop.f32.mrb[45].mxu1  ;;  %v8151_v13 = vpop.f32.mrb[46].mxu0 }
 0x39e   :  { %v8262_v2 = vadd.f32 %v8261_v3, %v8260_v53  ;;  %v8263_v15 = vpop.f32.mrb[46].mxu1  ;;  %v8152_v52 = vpop.f32.mrb[47].mxu0 }
 0x39f   :  { %v8153_v60 = vadd.f32 %v8152_v52, %v8151_v13  ;;  %v8264_v63 = vpop.f32.mrb[47].mxu1 }
 0x3a0   :  { %v11090_v42 = vadd.f32 %v8262_v2, %v8150_v18  ;;  %v8265_v34 = vadd.f32 %v8264_v63, %v8263_v15  ;;  %6652 = vmatmul.mubr.bf16.gmra.mrb[152].mxu0 %v10477_v24 }
 0x3a1   :  { %6813 = vmatmul.mubr.bf16.gmra.mrb[152].mxu1 %v10480_v9  ;;  %6659 = vmatprep.mubr.bf16.mxu0 %v10502_v57 }
 0x3a2   :  { %v11095_v5 = vadd.f32 %v8265_v34, %v8153_v60  ;;  %6820 = vmatprep.mubr.bf16.mxu1 %v10505_v17 }
 0x3a3   :  { %v8154_v7 = vpop.f32.mrb[48].mxu0 }
 0x3a4   :  { %v8266_v21 = vpop.f32.mrb[48].mxu1  ;;  %v8155_v0 = vpop.f32.mrb[49].mxu0 }
 0x3a5   :  { %v8156_v51 = vadd.f32 %v8155_v0, %v8154_v7  ;;  %v8267_v12 = vpop.f32.mrb[49].mxu1  ;;  %v8157_v61 = vpop.f32.mrb[50].mxu0 }
 0x3a6   :  { %v8268_v36 = vadd.f32 %v8267_v12, %v8266_v21  ;;  %v8269_v37 = vpop.f32.mrb[50].mxu1  ;;  %v8158_v53 = vpop.f32.mrb[51].mxu0 }
 0x3a7   :  { %v8159_v20 = vadd.f32 %v8158_v53, %v8157_v61  ;;  %v8270_v18 = vpop.f32.mrb[51].mxu1 }
 0x3a8   :  { %v11098_v24 = vadd.f32 %v8268_v36, %v8156_v51  ;;  %v8271_v9 = vadd.f32 %v8270_v18, %v8269_v37  ;;  %6660 = vmatmul.mubr.bf16.gmra.mrb[156].mxu0 %v10497_v14 }
 0x3a9   :  { %6821 = vmatmul.mubr.bf16.gmra.mrb[156].mxu1 %v10500_v26  ;;  %6667 = vmatprep.mubr.bf16.mxu0 %v10522_v28 }
 0x3aa   :  { %v11103_v57 = vadd.f32 %v8271_v9, %v8159_v20  ;;  %6828 = vmatprep.mubr.bf16.mxu1 %v10525_v6 }
 0x3ab   :  { %v8160_v17 = vpop.f32.mrb[52].mxu0 }
 0x3ac   :  { %v8272_v3 = vpop.f32.mrb[52].mxu1  ;;  %v8161_v13 = vpop.f32.mrb[53].mxu0 }
 0x3ad   :  { %v8162_v2 = vadd.f32 %v8161_v13, %v8160_v17  ;;  %v8273_v15 = vpop.f32.mrb[53].mxu1  ;;  %v8163_v52 = vpop.f32.mrb[54].mxu0 }
 0x3ae   :  { %v8274_v60 = vadd.f32 %v8273_v15, %v8272_v3  ;;  %v8275_v63 = vpop.f32.mrb[54].mxu1  ;;  %v8164_v34 = vpop.f32.mrb[55].mxu0 }
 0x3af   :  { %v8165_v7 = vadd.f32 %v8164_v34, %v8163_v52  ;;  %v8276_v21 = vpop.f32.mrb[55].mxu1 }
 0x3b0   :  { %v11106_v14 = vadd.f32 %v8274_v60, %v8162_v2  ;;  %v8277_v26 = vadd.f32 %v8276_v21, %v8275_v63  ;;  %6668 = vmatmul.mubr.bf16.gmra.mrb[160].mxu0 %v10517_v32 }
 0x3b1   :  { %6829 = vmatmul.mubr.bf16.gmra.mrb[160].mxu1 %v10520_v8  ;;  %6675 = vmatprep.mubr.bf16.mxu0 %v10542_v49 }
 0x3b2   :  { %v11111_v28 = vadd.f32 %v8277_v26, %v8165_v7  ;;  %6836 = vmatprep.mubr.bf16.mxu1 %v10545_v54 }
 0x3b3   :  { %v8166_v6 = vpop.f32.mrb[56].mxu0 }
 0x3b4   :  { %v8278_v0 = vpop.f32.mrb[56].mxu1  ;;  %v8167_v51 = vpop.f32.mrb[57].mxu0 }
 0x3b5   :  { %v8168_v12 = vadd.f32 %v8167_v51, %v8166_v6  ;;  %v8279_v61 = vpop.f32.mrb[57].mxu1  ;;  %v8169_v36 = vpop.f32.mrb[58].mxu0 }
 0x3b6   :  { %v8280_v37 = vadd.f32 %v8279_v61, %v8278_v0  ;;  %v8281_v53 = vpop.f32.mrb[58].mxu1  ;;  %v8170_v20 = vpop.f32.mrb[59].mxu0 }
 0x3b7   :  { %v8171_v18 = vadd.f32 %v8170_v20, %v8169_v36  ;;  %v8282_v9 = vpop.f32.mrb[59].mxu1  ;;  %v11792_v20 = vld [vmem:[#allocation19_spill] sm:$0xff] }
 0x3b8   :  { %v11114_v32 = vadd.f32 %v8280_v37, %v8168_v12  ;;  %v8283_v8 = vadd.f32 %v8282_v9, %v8281_v53  ;;  %6676 = vmatmul.mubr.bf16.gmra.mrb[164].mxu0 %v10537_v39 }
 0x3b9   :  { %6837 = vmatmul.mubr.bf16.gmra.mrb[164].mxu1 %v10540_v58  ;;  %6683 = vmatprep.mubr.bf16.mxu0 %v10562_v16 }
 0x3ba   :  { %v11119_v49 = vadd.f32 %v8283_v8, %v8171_v18  ;;  %6844 = vmatprep.mubr.bf16.mxu1 %v10565_v35 }
 0x3bb   :  { %v8172_v54 = vpop.f32.mrb[60].mxu0 }
 0x3bc   :  { %v8284_v17 = vpop.f32.mrb[60].mxu1  ;;  %v8173_v3 = vpop.f32.mrb[61].mxu0 }
 0x3bd   :  { %v8174_v13 = vadd.f32 %v8173_v3, %v8172_v54  ;;  %v8285_v2 = vpop.f32.mrb[61].mxu1  ;;  %v8175_v15 = vpop.f32.mrb[62].mxu0 }
 0x3be   :  { %v8286_v52 = vadd.f32 %v8285_v2, %v8284_v17  ;;  %v8287_v60 = vpop.f32.mrb[62].mxu1  ;;  %v8176_v63 = vpop.f32.mrb[63].mxu0 }
 0x3bf   :  { %v8177_v34 = vadd.f32 %v8176_v63, %v8175_v15  ;;  %v8288_v7 = vpop.f32.mrb[63].mxu1 }
 0x3c0   :  { %v11122_v39 = vadd.f32 %v8286_v52, %v8174_v13  ;;  %v8289_v58 = vadd.f32 %v8288_v7, %v8287_v60  ;;  %6684 = vmatmul.mubr.bf16.gmra.mrb[168].mxu0 %v10557_v56  ;;  %v11793_v60 = vld [vmem:[#allocation20_spill] sm:$0xff] }
 0x3c1   :  { %6845 = vmatmul.mubr.bf16.gmra.mrb[168].mxu1 %v10560_v27  ;;  %6691 = vmatprep.mubr.bf16.mxu0 %v10582_v29  ;;  %v11795_v7 = vld [vmem:[#allocation128_spill] sm:$0xff] }
 0x3c2   :  { %v11127_v16 = vadd.f32 %v8289_v58, %v8177_v34  ;;  %6852 = vmatprep.mubr.bf16.mxu1 %v10585_v48  ;;  %v11794_v34 = vld [vmem:[#allocation18_spill] sm:$0xff]  ;;  %v11796_v58 = vld [vmem:[#allocation129_spill] sm:$0xff] }
 0x3c3   :  { %v8306_v35 = vpop.f32.mrb[64].mxu0 }
 0x3c4   :  { %v8418_v21 = vpop.f32.mrb[64].mxu1  ;;  %v8307_v26 = vpop.f32.mrb[65].mxu0 }
 0x3c5   :  { %v8308_v6 = vadd.f32 %v8307_v26, %v8306_v35  ;;  %v8419_v0 = vpop.f32.mrb[65].mxu1  ;;  %v8309_v51 = vpop.f32.mrb[66].mxu0 }
 0x3c6   :  { %v8420_v12 = vadd.f32 %v8419_v0, %v8418_v21  ;;  %v8421_v61 = vpop.f32.mrb[66].mxu1  ;;  %v8310_v36 = vpop.f32.mrb[67].mxu0 }
 0x3c7   :  { %v6284_v37 = vadd.f32 %v8308_v6, %v11002_v4  ;;  %v8311_v56 = vadd.f32 %v8310_v36, %v8309_v51  ;;  %v8422_v53 = vpop.f32.mrb[67].mxu1 }
 0x3c8   :  { %v8423_v27 = vadd.f32 %v8422_v53, %v8421_v61  ;;  %6692 = vmatmul.mubr.bf16.gmra.mrb[172].mxu0 %v10577_v33 }
 0x3c9   :  { %v11132_v29 = vadd.f32 %v8420_v12, %v6284_v37  ;;  %v6287_v48 = vadd.f32 %v8311_v56, %v11007_v40  ;;  %6853 = vmatmul.mubr.bf16.gmra.mrb[172].mxu1 %v10580_v46  ;;  %6699 = vmatprep.mubr.bf16.mxu0 %v10602_v62 }
 0x3ca   :  { %6860 = vmatprep.mubr.bf16.mxu1 %v11792_v20 }
 0x3cb   :  { %v11138_v18 = vadd.f32 %v8423_v27, %v6287_v48  ;;  %v8312_v9 = vpop.f32.mrb[68].mxu0  ;;  %v11797_v27 = vld [vmem:[#allocation23_spill] sm:$0xff] }
 0x3cc   :  { %v8424_v8 = vpop.f32.mrb[68].mxu1  ;;  %v8313_v4 = vpop.f32.mrb[69].mxu0 }
 0x3cd   :  { %v8314_v54 = vadd.f32 %v8313_v4, %v8312_v9  ;;  %v8425_v17 = vpop.f32.mrb[69].mxu1  ;;  %v8315_v3 = vpop.f32.mrb[70].mxu0  ;;  %v11798_v9 = vld [vmem:[#allocation24_spill] sm:$0xff] }
 0x3ce   :  { %v8426_v13 = vadd.f32 %v8425_v17, %v8424_v8  ;;  %v8427_v33 = vpop.f32.mrb[70].mxu1  ;;  %v8316_v2 = vpop.f32.mrb[71].mxu0  ;;  %v11799_v8 = vld [vmem:[#allocation27_spill] sm:$0xff]  ;;  %v11800_v4 = vld [vmem:[#allocation28_spill] sm:$0xff] }
 0x3cf   :  { %v6292_v15 = vadd.f32 %v8314_v54, %v11010_v44  ;;  %v8317_v40 = vadd.f32 %v8316_v2, %v8315_v3  ;;  %v8428_v52 = vpop.f32.mrb[71].mxu1 }
 0x3d0   :  { %v8429_v46 = vadd.f32 %v8428_v52, %v8427_v33  ;;  %6700 = vmatmul.mubr.bf16.gmra.mrb[176].mxu0 %v11793_v60 }
 0x3d1   :  { %v11142_v62 = vadd.f32 %v8426_v13, %v6292_v15  ;;  %v6295_v63 = vadd.f32 %v8317_v40, %v11015_v45  ;;  %6861 = vmatmul.mubr.bf16.gmra.mrb[176].mxu1 %v11794_v34  ;;  %6707 = vmatprep.mubr.bf16.mxu0 %v11795_v7  ;;  %v11801_v34 = vld [vmem:[#allocation21_spill] sm:$0xff] }
 0x3d2   :  { %6868 = vmatprep.mubr.bf16.mxu1 %v11796_v58 }
 0x3d3   :  { %v11148_v35 = vadd.f32 %v8429_v46, %v6295_v63  ;;  %v8318_v21 = vpop.f32.mrb[72].mxu0 }
 0x3d4   :  { %v8430_v26 = vpop.f32.mrb[72].mxu1  ;;  %v8319_v44 = vpop.f32.mrb[73].mxu0 }
 0x3d5   :  { %v8320_v6 = vadd.f32 %v8319_v44, %v8318_v21  ;;  %v8431_v0 = vpop.f32.mrb[73].mxu1  ;;  %v8321_v51 = vpop.f32.mrb[74].mxu0  ;;  %v11802_v21 = vld [vmem:[#allocation22_spill] sm:$0xff]  ;;  %v11804_v44 = vld [vmem:[#allocation32_spill] sm:$0xff] }
 0x3d6   :  { %v8432_v12 = vadd.f32 %v8431_v0, %v8430_v26  ;;  %v8433_v61 = vpop.f32.mrb[74].mxu1  ;;  %v8322_v36 = vpop.f32.mrb[75].mxu0  ;;  %v11803_v26 = vld [vmem:[#allocation31_spill] sm:$0xff] }
 0x3d7   :  { %v6300_v37 = vadd.f32 %v8320_v6, %v11018_v30  ;;  %v8323_v45 = vadd.f32 %v8322_v36, %v8321_v51  ;;  %v8434_v56 = vpop.f32.mrb[75].mxu1 }
 0x3d8   :  { %v8435_v53 = vadd.f32 %v8434_v56, %v8433_v61  ;;  %6708 = vmatmul.mubr.bf16.gmra.mrb[180].mxu0 %v11797_v27 }
 0x3d9   :  { %v11152_v48 = vadd.f32 %v8432_v12, %v6300_v37  ;;  %v6303_v20 = vadd.f32 %v8323_v45, %v11023_v59  ;;  %6869 = vmatmul.mubr.bf16.gmra.mrb[180].mxu1 %v11798_v9  ;;  %6715 = vmatprep.mubr.bf16.mxu0 %v11799_v8  ;;  %v11805_v9 = vld [vmem:[#allocation25_spill] sm:$0xff] }
 0x3da   :  { %6876 = vmatprep.mubr.bf16.mxu1 %v11800_v4 }
 0x3db   :  { %v11158_v54 = vadd.f32 %v8435_v53, %v6303_v20  ;;  %v8324_v17 = vpop.f32.mrb[76].mxu0 }
 0x3dc   :  { %v8436_v3 = vpop.f32.mrb[76].mxu1  ;;  %v8325_v30 = vpop.f32.mrb[77].mxu0 }
 0x3dd   :  { %v8326_v13 = vadd.f32 %v8325_v30, %v8324_v17  ;;  %v8437_v33 = vpop.f32.mrb[77].mxu1  ;;  %v8327_v2 = vpop.f32.mrb[78].mxu0  ;;  %v11806_v17 = vld [vmem:[#allocation26_spill] sm:$0xff]  ;;  %v11808_v30 = vld [vmem:[#allocation36_spill] sm:$0xff] }
 0x3de   :  { %v8438_v15 = vadd.f32 %v8437_v33, %v8436_v3  ;;  %v8439_v40 = vpop.f32.mrb[78].mxu1  ;;  %v8328_v52 = vpop.f32.mrb[79].mxu0  ;;  %v11807_v3 = vld [vmem:[#allocation35_spill] sm:$0xff] }
 0x3df   :  { %v6308_v46 = vadd.f32 %v8326_v13, %v11026_v1  ;;  %v8329_v59 = vadd.f32 %v8328_v52, %v8327_v2  ;;  %v8440_v60 = vpop.f32.mrb[79].mxu1 }
 0x3e0   :  { %v8441_v63 = vadd.f32 %v8440_v60, %v8439_v40  ;;  %6716 = vmatmul.mubr.bf16.gmra.mrb[184].mxu0 %v11801_v34 }
 0x3e1   :  { %v11162_v7 = vadd.f32 %v8438_v15, %v6308_v46  ;;  %v6311_v58 = vadd.f32 %v8329_v59, %v11031_v55  ;;  %6877 = vmatmul.mubr.bf16.gmra.mrb[184].mxu1 %v11802_v21  ;;  %6723 = vmatprep.mubr.bf16.mxu0 %v11803_v26  ;;  %v11809_v21 = vld [vmem:[#allocation29_spill] sm:$0xff] }
 0x3e2   :  { %6884 = vmatprep.mubr.bf16.mxu1 %v11804_v44 }
 0x3e3   :  { %v11168_v6 = vadd.f32 %v8441_v63, %v6311_v58  ;;  %v8330_v0 = vpop.f32.mrb[80].mxu0 }
 0x3e4   :  { %v8442_v51 = vpop.f32.mrb[80].mxu1  ;;  %v8331_v1 = vpop.f32.mrb[81].mxu0 }
 0x3e5   :  { %v8332_v12 = vadd.f32 %v8331_v1, %v8330_v0  ;;  %v8443_v61 = vpop.f32.mrb[81].mxu1  ;;  %v8333_v36 = vpop.f32.mrb[82].mxu0  ;;  %v11810_v0 = vld [vmem:[#allocation30_spill] sm:$0xff]  ;;  %v11812_v1 = vld [vmem:[#allocation40_spill] sm:$0xff] }
 0x3e6   :  { %v8444_v37 = vadd.f32 %v8443_v61, %v8442_v51  ;;  %v8445_v45 = vpop.f32.mrb[82].mxu1  ;;  %v8334_v56 = vpop.f32.mrb[83].mxu0  ;;  %v11811_v51 = vld [vmem:[#allocation39_spill] sm:$0xff] }
 0x3e7   :  { %v6316_v53 = vadd.f32 %v8332_v12, %v11034_v31  ;;  %v8335_v55 = vadd.f32 %v8334_v56, %v8333_v36  ;;  %v8446_v27 = vpop.f32.mrb[83].mxu1 }
 0x3e8   :  { %v8447_v20 = vadd.f32 %v8446_v27, %v8445_v45  ;;  %6724 = vmatmul.mubr.bf16.gmra.mrb[188].mxu0 %v11805_v9 }
 0x3e9   :  { %v11172_v8 = vadd.f32 %v8444_v37, %v6316_v53  ;;  %v6319_v4 = vadd.f32 %v8335_v55, %v11039_v50  ;;  %6885 = vmatmul.mubr.bf16.gmra.mrb[188].mxu1 %v11806_v17  ;;  %6925 = vmatprep.mubr.bf16.mxu0 %v11807_v3  ;;  %v11814_v3 = vld [vmem:[#allocation33_spill] sm:$0xff] }
 0x3ea   :  { %7086 = vmatprep.mubr.bf16.mxu1 %v11808_v30 }
 0x3eb   :  { %v11178_v13 = vadd.f32 %v8447_v20, %v6319_v4  ;;  %v8336_v33 = vpop.f32.mrb[84].mxu0  ;;  %v11813_v20 = vld [vmem:[#allocation90_spill] sm:$0xff] }
 0x3ec   :  { %v8448_v2 = vpop.f32.mrb[84].mxu1  ;;  %v8337_v31 = vpop.f32.mrb[85].mxu0 }
 0x3ed   :  { %v8338_v15 = vadd.f32 %v8337_v31, %v8336_v33  ;;  %v8449_v40 = vpop.f32.mrb[85].mxu1  ;;  %v8339_v52 = vpop.f32.mrb[86].mxu0  ;;  %v11815_v33 = vld [vmem:[#allocation91_spill] sm:$0xff]  ;;  %v11816_v31 = vld [vmem:[#allocation34_spill] sm:$0xff] }
 0x3ee   :  { %v8450_v46 = vadd.f32 %v8449_v40, %v8448_v2  ;;  %v8451_v59 = vpop.f32.mrb[86].mxu1  ;;  %v8340_v60 = vpop.f32.mrb[87].mxu0  ;;  %v11818_v40 = vld [vmem:[#allocation44_spill] sm:$0xff] }
 0x3ef   :  { %v6324_v63 = vadd.f32 %v8338_v15, %v11042_v38  ;;  %v8341_v50 = vadd.f32 %v8340_v60, %v8339_v52  ;;  %v8452_v34 = vpop.f32.mrb[87].mxu1  ;;  %v11817_v15 = vld [vmem:[#allocation43_spill] sm:$0xff] }
 0x3f0   :  { %v8453_v58 = vadd.f32 %v8452_v34, %v8451_v59  ;;  %6926 = vmatmul.mubr.bf16.vlgmr.msra.gmra.mrb[192].mxu0 %v11809_v21 }
 0x3f1   :  { %v11182_v26 = vadd.f32 %v8450_v46, %v6324_v63  ;;  %v6327_v44 = vadd.f32 %v8341_v50, %v11047_v43  ;;  %7087 = vmatmul.mubr.bf16.vlgmr.msra.gmra.mrb[192].mxu1 %v11810_v0  ;;  %6933 = vmatprep.mubr.bf16.mxu0 %v11811_v51 }
 0x3f2   :  { %7094 = vmatprep.mubr.bf16.mxu1 %v11812_v1 }
 0x3f3   :  { %v11188_v12 = vadd.f32 %v8453_v58, %v6327_v44  ;;  %v8342_v61 = vpop.f32.mrb[88].mxu0 }
 0x3f4   :  { %v8454_v36 = vpop.f32.mrb[88].mxu1  ;;  %v8343_v38 = vpop.f32.mrb[89].mxu0 }
 0x3f5   :  { %v8344_v37 = vadd.f32 %v8343_v38, %v8342_v61  ;;  %v8455_v45 = vpop.f32.mrb[89].mxu1  ;;  %v8345_v56 = vpop.f32.mrb[90].mxu0 }
 0x3f6   :  { %v8456_v53 = vadd.f32 %v8455_v45, %v8454_v36  ;;  %v8457_v55 = vpop.f32.mrb[90].mxu1  ;;  %v8346_v27 = vpop.f32.mrb[91].mxu0  ;;  %v11819_v36 = vld [vmem:[#allocation37_spill] sm:$0xff]  ;;  %v11820_v45 = vld [vmem:[#allocation38_spill] sm:$0xff] }
 0x3f7   :  { %v6332_v9 = vadd.f32 %v8344_v37, %v11813_v20  ;;  %v8347_v43 = vadd.f32 %v8346_v27, %v8345_v56  ;;  %v8458_v4 = vpop.f32.mrb[91].mxu1  ;;  %v11821_v56 = vld [vmem:[#allocation47_spill] sm:$0xff] }
 0x3f8   :  { %v8459_v17 = vadd.f32 %v8458_v4, %v8457_v55  ;;  %6934 = vmatmul.mubr.bf16.gmra.mrb[196].mxu0 %v11814_v3 }
 0x3f9   :  { %v11192_v30 = vadd.f32 %v8456_v53, %v6332_v9  ;;  %v6335_v2 = vadd.f32 %v8347_v43, %v11815_v33  ;;  %7095 = vmatmul.mubr.bf16.gmra.mrb[196].mxu1 %v11816_v31  ;;  %6941 = vmatprep.mubr.bf16.mxu0 %v11817_v15  ;;  %v11822_v53 = vld [vmem:[#allocation48_spill] sm:$0xff] }
 0x3fa   :  { %7102 = vmatprep.mubr.bf16.mxu1 %v11818_v40  ;;  %v11823_v40 = vld [vmem:[#allocation41_spill] sm:$0xff] }
 0x3fb   :  { %v11198_v52 = vadd.f32 %v8459_v17, %v6335_v2  ;;  %v8348_v46 = vpop.f32.mrb[92].mxu0 }
 0x3fc   :  { %v8460_v59 = vpop.f32.mrb[92].mxu1  ;;  %v8349_v60 = vpop.f32.mrb[93].mxu0 }
 0x3fd   :  { %v8350_v63 = vadd.f32 %v8349_v60, %v8348_v46  ;;  %v8461_v50 = vpop.f32.mrb[93].mxu1  ;;  %v8351_v34 = vpop.f32.mrb[94].mxu0  ;;  %v11824_v60 = vld [vmem:[#allocation42_spill] sm:$0xff] }
 0x3fe   :  { %v8462_v58 = vadd.f32 %v8461_v50, %v8460_v59  ;;  %v8463_v21 = vpop.f32.mrb[94].mxu1  ;;  %v8352_v44 = vpop.f32.mrb[95].mxu0  ;;  %v11826_v50 = vld [vmem:[#allocation52_spill] sm:$0xff] }
 0x3ff   :  { %v6340_v0 = vadd.f32 %v8350_v63, %v11058_v19  ;;  %v8353_v51 = vadd.f32 %v8352_v44, %v8351_v34  ;;  %v8464_v1 = vpop.f32.mrb[95].mxu1  ;;  %v11825_v63 = vld [vmem:[#allocation51_spill] sm:$0xff] }
 0x400   :  { %v8465_v61 = vadd.f32 %v8464_v1, %v8463_v21  ;;  %6942 = vmatmul.mubr.bf16.gmra.mrb[200].mxu0 %v11819_v36 }
 0x401   :  { %v11202_v38 = vadd.f32 %v8462_v58, %v6340_v0  ;;  %v6343_v37 = vadd.f32 %v8353_v51, %v11063_v22  ;;  %7103 = vmatmul.mubr.bf16.gmra.mrb[200].mxu1 %v11820_v45  ;;  %6949 = vmatprep.mubr.bf16.mxu0 %v11821_v56 }
 0x402   :  { %7110 = vmatprep.mubr.bf16.mxu1 %v11822_v53  ;;  %v11827_v53 = vld [vmem:[#allocation45_spill] sm:$0xff] }
 0x403   :  { %v11208_v55 = vadd.f32 %v8465_v61, %v6343_v37  ;;  %v8354_v27 = vpop.f32.mrb[96].mxu0 }
 0x404   :  { %v8466_v20 = vpop.f32.mrb[96].mxu1  ;;  %v8355_v19 = vpop.f32.mrb[97].mxu0 }
 0x405   :  { %v8356_v9 = vadd.f32 %v8355_v19, %v8354_v27  ;;  %v8467_v43 = vpop.f32.mrb[97].mxu1  ;;  %v8357_v4 = vpop.f32.mrb[98].mxu0  ;;  %v11828_v19 = vld [vmem:[#allocation46_spill] sm:$0xff] }
 0x406   :  { %v8468_v17 = vadd.f32 %v8467_v43, %v8466_v20  ;;  %v8469_v3 = vpop.f32.mrb[98].mxu1  ;;  %v8358_v33 = vpop.f32.mrb[99].mxu0  ;;  %v11830_v43 = vld [vmem:[#allocation56_spill] sm:$0xff] }
 0x407   :  { %v6348_v2 = vadd.f32 %v8356_v9, %v11066_v11  ;;  %v8359_v22 = vadd.f32 %v8358_v33, %v8357_v4  ;;  %v8470_v31 = vpop.f32.mrb[99].mxu1  ;;  %v11829_v9 = vld [vmem:[#allocation55_spill] sm:$0xff] }
 0x408   :  { %v8471_v15 = vadd.f32 %v8470_v31, %v8469_v3  ;;  %6950 = vmatmul.mubr.bf16.gmra.mrb[204].mxu0 %v11823_v40 }
 0x409   :  { %v11212_v46 = vadd.f32 %v8468_v17, %v6348_v2  ;;  %v6351_v59 = vadd.f32 %v8359_v22, %v11071_v41  ;;  %7111 = vmatmul.mubr.bf16.gmra.mrb[204].mxu1 %v11824_v60  ;;  %6957 = vmatprep.mubr.bf16.mxu0 %v11825_v63 }
 0x40a   :  { %7118 = vmatprep.mubr.bf16.mxu1 %v11826_v50  ;;  %v11831_v50 = vld [vmem:[#allocation49_spill] sm:$0xff] }
 0x40b   :  { %v11218_v34 = vadd.f32 %v8471_v15, %v6351_v59  ;;  %v8360_v58 = vpop.f32.mrb[100].mxu0 }
 0x40c   :  { %v8472_v21 = vpop.f32.mrb[100].mxu1  ;;  %v8361_v11 = vpop.f32.mrb[101].mxu0 }
 0x40d   :  { %v8362_v44 = vadd.f32 %v8361_v11, %v8360_v58  ;;  %v8473_v0 = vpop.f32.mrb[101].mxu1  ;;  %v8363_v51 = vpop.f32.mrb[102].mxu0  ;;  %v11832_v11 = vld [vmem:[#allocation50_spill] sm:$0xff] }
 0x40e   :  { %v8474_v1 = vadd.f32 %v8473_v0, %v8472_v21  ;;  %v8475_v61 = vpop.f32.mrb[102].mxu1  ;;  %v8364_v36 = vpop.f32.mrb[103].mxu0  ;;  %v11834_v0 = vld [vmem:[#allocation60_spill] sm:$0xff] }
 0x40f   :  { %v6356_v37 = vadd.f32 %v8362_v44, %v11074_v23  ;;  %v8365_v41 = vadd.f32 %v8364_v36, %v8363_v51  ;;  %v8476_v45 = vpop.f32.mrb[103].mxu1  ;;  %v11833_v44 = vld [vmem:[#allocation59_spill] sm:$0xff] }
 0x410   :  { %v8477_v56 = vadd.f32 %v8476_v45, %v8475_v61  ;;  %6958 = vmatmul.mubr.bf16.gmra.mrb[208].mxu0 %v11827_v53 }
 0x411   :  { %v11222_v27 = vadd.f32 %v8474_v1, %v6356_v37  ;;  %v6359_v20 = vadd.f32 %v8365_v41, %v11079_v10  ;;  %7119 = vmatmul.mubr.bf16.gmra.mrb[208].mxu1 %v11828_v19  ;;  %6965 = vmatprep.mubr.bf16.mxu0 %v11829_v9 }
 0x412   :  { %7126 = vmatprep.mubr.bf16.mxu1 %v11830_v43  ;;  %v11835_v43 = vld [vmem:[#allocation53_spill] sm:$0xff] }
 0x413   :  { %v11228_v4 = vadd.f32 %v8477_v56, %v6359_v20  ;;  %v8366_v17 = vpop.f32.mrb[104].mxu0 }
 0x414   :  { %v8478_v3 = vpop.f32.mrb[104].mxu1  ;;  %v8367_v23 = vpop.f32.mrb[105].mxu0 }
 0x415   :  { %v8368_v33 = vadd.f32 %v8367_v23, %v8366_v17  ;;  %v8479_v2 = vpop.f32.mrb[105].mxu1  ;;  %v8369_v22 = vpop.f32.mrb[106].mxu0  ;;  %v11836_v23 = vld [vmem:[#allocation54_spill] sm:$0xff] }
 0x416   :  { %v8480_v31 = vadd.f32 %v8479_v2, %v8478_v3  ;;  %v8481_v15 = vpop.f32.mrb[106].mxu1  ;;  %v8370_v40 = vpop.f32.mrb[107].mxu0  ;;  %v11838_v2 = vld [vmem:[#allocation64_spill] sm:$0xff] }
 0x417   :  { %v6364_v59 = vadd.f32 %v8368_v33, %v11082_v25  ;;  %v8371_v10 = vadd.f32 %v8370_v40, %v8369_v22  ;;  %v8482_v60 = vpop.f32.mrb[107].mxu1  ;;  %v11837_v33 = vld [vmem:[#allocation63_spill] sm:$0xff] }
 0x418   :  { %v8483_v63 = vadd.f32 %v8482_v60, %v8481_v15  ;;  %6966 = vmatmul.mubr.bf16.gmra.mrb[212].mxu0 %v11831_v50 }
 0x419   :  { %v11232_v58 = vadd.f32 %v8480_v31, %v6364_v59  ;;  %v6367_v21 = vadd.f32 %v8371_v10, %v11087_v47  ;;  %7127 = vmatmul.mubr.bf16.gmra.mrb[212].mxu1 %v11832_v11  ;;  %6973 = vmatprep.mubr.bf16.mxu0 %v11833_v44 }
 0x41a   :  { %7134 = vmatprep.mubr.bf16.mxu1 %v11834_v0  ;;  %v11839_v0 = vld [vmem:[#allocation57_spill] sm:$0xff] }
 0x41b   :  { %v11238_v51 = vadd.f32 %v8483_v63, %v6367_v21  ;;  %v8372_v1 = vpop.f32.mrb[108].mxu0 }
 0x41c   :  { %v8484_v61 = vpop.f32.mrb[108].mxu1  ;;  %v8373_v25 = vpop.f32.mrb[109].mxu0 }
 0x41d   :  { %v8374_v36 = vadd.f32 %v8373_v25, %v8372_v1  ;;  %v8485_v37 = vpop.f32.mrb[109].mxu1  ;;  %v8375_v41 = vpop.f32.mrb[110].mxu0  ;;  %v11840_v25 = vld [vmem:[#allocation58_spill] sm:$0xff] }
 0x41e   :  { %v8486_v45 = vadd.f32 %v8485_v37, %v8484_v61  ;;  %v8487_v56 = vpop.f32.mrb[110].mxu1  ;;  %v8376_v53 = vpop.f32.mrb[111].mxu0  ;;  %v11842_v37 = vld [vmem:[#allocation68_spill] sm:$0xff] }
 0x41f   :  { %v6372_v20 = vadd.f32 %v8374_v36, %v11090_v42  ;;  %v8377_v47 = vadd.f32 %v8376_v53, %v8375_v41  ;;  %v8488_v19 = vpop.f32.mrb[111].mxu1  ;;  %v11841_v36 = vld [vmem:[#allocation67_spill] sm:$0xff] }
 0x420   :  { %v8489_v9 = vadd.f32 %v8488_v19, %v8487_v56  ;;  %6974 = vmatmul.mubr.bf16.gmra.mrb[216].mxu0 %v11835_v43 }
 0x421   :  { %v11242_v17 = vadd.f32 %v8486_v45, %v6372_v20  ;;  %v6375_v3 = vadd.f32 %v8377_v47, %v11095_v5  ;;  %7135 = vmatmul.mubr.bf16.gmra.mrb[216].mxu1 %v11836_v23  ;;  %6981 = vmatprep.mubr.bf16.mxu0 %v11837_v33 }
 0x422   :  { %7142 = vmatprep.mubr.bf16.mxu1 %v11838_v2  ;;  %v11843_v2 = vld [vmem:[#allocation61_spill] sm:$0xff] }
 0x423   :  { %v11248_v22 = vadd.f32 %v8489_v9, %v6375_v3  ;;  %v8378_v31 = vpop.f32.mrb[112].mxu0 }
 0x424   :  { %v8490_v15 = vpop.f32.mrb[112].mxu1  ;;  %v8379_v42 = vpop.f32.mrb[113].mxu0 }
 0x425   :  { %v8380_v40 = vadd.f32 %v8379_v42, %v8378_v31  ;;  %v8491_v59 = vpop.f32.mrb[113].mxu1  ;;  %v8381_v10 = vpop.f32.mrb[114].mxu0  ;;  %v11844_v42 = vld [vmem:[#allocation62_spill] sm:$0xff] }
 0x426   :  { %v8492_v60 = vadd.f32 %v8491_v59, %v8490_v15  ;;  %v8493_v63 = vpop.f32.mrb[114].mxu1  ;;  %v8382_v50 = vpop.f32.mrb[115].mxu0  ;;  %v11846_v59 = vld [vmem:[#allocation72_spill] sm:$0xff] }
 0x427   :  { %v6380_v21 = vadd.f32 %v8380_v40, %v11098_v24  ;;  %v8383_v5 = vadd.f32 %v8382_v50, %v8381_v10  ;;  %v8494_v11 = vpop.f32.mrb[115].mxu1  ;;  %v11845_v40 = vld [vmem:[#allocation71_spill] sm:$0xff] }
 0x428   :  { %v8495_v44 = vadd.f32 %v8494_v11, %v8493_v63  ;;  %6982 = vmatmul.mubr.bf16.gmra.mrb[220].mxu0 %v11839_v0 }
 0x429   :  { %v11252_v1 = vadd.f32 %v8492_v60, %v6380_v21  ;;  %v6383_v61 = vadd.f32 %v8383_v5, %v11103_v57  ;;  %7143 = vmatmul.mubr.bf16.gmra.mrb[220].mxu1 %v11840_v25  ;;  %6989 = vmatprep.mubr.bf16.mxu0 %v11841_v36 }
 0x42a   :  { %7150 = vmatprep.mubr.bf16.mxu1 %v11842_v37  ;;  %v11847_v37 = vld [vmem:[#allocation65_spill] sm:$0xff] }
 0x42b   :  { %v11258_v41 = vadd.f32 %v8495_v44, %v6383_v61  ;;  %v8384_v45 = vpop.f32.mrb[116].mxu0 }
 0x42c   :  { %v8496_v56 = vpop.f32.mrb[116].mxu1  ;;  %v8385_v24 = vpop.f32.mrb[117].mxu0 }
 0x42d   :  { %v8386_v53 = vadd.f32 %v8385_v24, %v8384_v45  ;;  %v8497_v20 = vpop.f32.mrb[117].mxu1  ;;  %v8387_v47 = vpop.f32.mrb[118].mxu0  ;;  %v11848_v24 = vld [vmem:[#allocation66_spill] sm:$0xff] }
 0x42e   :  { %v8498_v19 = vadd.f32 %v8497_v20, %v8496_v56  ;;  %v8499_v9 = vpop.f32.mrb[118].mxu1  ;;  %v8388_v43 = vpop.f32.mrb[119].mxu0  ;;  %v11850_v20 = vld [vmem:[#allocation76_spill] sm:$0xff] }
 0x42f   :  { %v6388_v3 = vadd.f32 %v8386_v53, %v11106_v14  ;;  %v8389_v57 = vadd.f32 %v8388_v43, %v8387_v47  ;;  %v8500_v23 = vpop.f32.mrb[119].mxu1  ;;  %v11849_v53 = vld [vmem:[#allocation75_spill] sm:$0xff] }
 0x430   :  { %v8501_v33 = vadd.f32 %v8500_v23, %v8499_v9  ;;  %6990 = vmatmul.mubr.bf16.gmra.mrb[224].mxu0 %v11843_v2 }
 0x431   :  { %v11262_v31 = vadd.f32 %v8498_v19, %v6388_v3  ;;  %v6391_v15 = vadd.f32 %v8389_v57, %v11111_v28  ;;  %7151 = vmatmul.mubr.bf16.gmra.mrb[224].mxu1 %v11844_v42  ;;  %6997 = vmatprep.mubr.bf16.mxu0 %v11845_v40 }
 0x432   :  { %7158 = vmatprep.mubr.bf16.mxu1 %v11846_v59  ;;  %v11851_v59 = vld [vmem:[#allocation69_spill] sm:$0xff] }
 0x433   :  { %v11268_v10 = vadd.f32 %v8501_v33, %v6391_v15  ;;  %v8390_v60 = vpop.f32.mrb[120].mxu0 }
 0x434   :  { %v8502_v63 = vpop.f32.mrb[120].mxu1  ;;  %v8391_v14 = vpop.f32.mrb[121].mxu0 }
 0x435   :  { %v8392_v50 = vadd.f32 %v8391_v14, %v8390_v60  ;;  %v8503_v21 = vpop.f32.mrb[121].mxu1  ;;  %v8393_v5 = vpop.f32.mrb[122].mxu0  ;;  %v11852_v14 = vld [vmem:[#allocation70_spill] sm:$0xff] }
 0x436   :  { %v8504_v11 = vadd.f32 %v8503_v21, %v8502_v63  ;;  %v8505_v44 = vpop.f32.mrb[122].mxu1  ;;  %v8394_v0 = vpop.f32.mrb[123].mxu0  ;;  %v11854_v21 = vld [vmem:[#allocation80_spill] sm:$0xff] }
 0x437   :  { %v6396_v61 = vadd.f32 %v8392_v50, %v11114_v32  ;;  %v8395_v28 = vadd.f32 %v8394_v0, %v8393_v5  ;;  %v8506_v25 = vpop.f32.mrb[123].mxu1  ;;  %v11853_v50 = vld [vmem:[#allocation79_spill] sm:$0xff] }
 0x438   :  { %v8507_v36 = vadd.f32 %v8506_v25, %v8505_v44  ;;  %6998 = vmatmul.mubr.bf16.gmra.mrb[228].mxu0 %v11847_v37 }
 0x439   :  { %v11272_v45 = vadd.f32 %v8504_v11, %v6396_v61  ;;  %v6399_v56 = vadd.f32 %v8395_v28, %v11119_v49  ;;  %7159 = vmatmul.mubr.bf16.gmra.mrb[228].mxu1 %v11848_v24  ;;  %7005 = vmatprep.mubr.bf16.mxu0 %v11849_v53 }
 0x43a   :  { %7166 = vmatprep.mubr.bf16.mxu1 %v11850_v20  ;;  %v11855_v20 = vld [vmem:[#allocation73_spill] sm:$0xff] }
 0x43b   :  { %v11278_v47 = vadd.f32 %v8507_v36, %v6399_v56  ;;  %v8396_v19 = vpop.f32.mrb[124].mxu0 }
 0x43c   :  { %v8508_v9 = vpop.f32.mrb[124].mxu1  ;;  %v8397_v32 = vpop.f32.mrb[125].mxu0 }
 0x43d   :  { %v8398_v43 = vadd.f32 %v8397_v32, %v8396_v19  ;;  %v8509_v3 = vpop.f32.mrb[125].mxu1  ;;  %v8399_v57 = vpop.f32.mrb[126].mxu0  ;;  %v11856_v32 = vld [vmem:[#allocation74_spill] sm:$0xff] }
 0x43e   :  { %v8510_v23 = vadd.f32 %v8509_v3, %v8508_v9  ;;  %v8511_v33 = vpop.f32.mrb[126].mxu1  ;;  %v8400_v2 = vpop.f32.mrb[127].mxu0  ;;  %v11858_v3 = vld [vmem:[#allocation131_spill] sm:$0xff] }
 0x43f   :  { %v6404_v15 = vadd.f32 %v8398_v43, %v11122_v39  ;;  %v8401_v49 = vadd.f32 %v8400_v2, %v8399_v57  ;;  %v8512_v42 = vpop.f32.mrb[127].mxu1  ;;  %v11857_v43 = vld [vmem:[#allocation130_spill] sm:$0xff] }
 0x440   :  { %v8513_v40 = vadd.f32 %v8512_v42, %v8511_v33  ;;  %7006 = vmatmul.mubr.bf16.gmra.mrb[232].mxu0 %v11851_v59 }
 0x441   :  { %v11282_v60 = vadd.f32 %v8510_v23, %v6404_v15  ;;  %v6407_v63 = vadd.f32 %v8401_v49, %v11127_v16  ;;  %7167 = vmatmul.mubr.bf16.gmra.mrb[232].mxu1 %v11852_v14  ;;  %7013 = vmatprep.mubr.bf16.mxu0 %v11853_v50 }
 0x442   :  { %7174 = vmatprep.mubr.bf16.mxu1 %v11854_v21  ;;  %v11859_v21 = vld [vmem:[#allocation77_spill] sm:$0xff] }
 0x443   :  { %v11288_v5 = vadd.f32 %v8513_v40, %v6407_v63  ;;  %v8530_v11 = vpop.f32.mrb[128].mxu0 }
 0x444   :  { %v8642_v44 = vpop.f32.mrb[128].mxu1  ;;  %v8531_v39 = vpop.f32.mrb[129].mxu0 }
 0x445   :  { %v8532_v0 = vadd.f32 %v8531_v39, %v8530_v11  ;;  %v8643_v61 = vpop.f32.mrb[129].mxu1  ;;  %v8533_v28 = vpop.f32.mrb[130].mxu0  ;;  %v11860_v39 = vld [vmem:[#allocation78_spill] sm:$0xff] }
 0x446   :  { %v8644_v25 = vadd.f32 %v8643_v61, %v8642_v44  ;;  %v8645_v36 = vpop.f32.mrb[130].mxu1  ;;  %v8534_v37 = vpop.f32.mrb[131].mxu0  ;;  %v11862_v61 = vld [vmem:[#allocation132_spill] sm:$0xff] }
 0x447   :  { %v6606_v56 = vadd.f32 %v8532_v0, %v11132_v29  ;;  %v8535_v16 = vadd.f32 %v8534_v37, %v8533_v28  ;;  %v8646_v24 = vpop.f32.mrb[131].mxu1  ;;  %v11861_v0 = vld [vmem:[#allocation85_spill] sm:$0xff] }
 0x448   :  { %v8647_v53 = vadd.f32 %v8646_v24, %v8645_v36  ;;  %7014 = vmatmul.mubr.bf16.gmra.mrb[236].mxu0 %v11855_v20 }
 0x449   :  { %v11292_v19 = vadd.f32 %v8644_v25, %v6606_v56  ;;  %v6609_v9 = vadd.f32 %v8535_v16, %v11138_v18  ;;  %7175 = vmatmul.mubr.bf16.gmra.mrb[236].mxu1 %v11856_v32  ;;  %7021 = vmatprep.mubr.bf16.mxu0 %v11857_v43 }
 0x44a   :  { %7182 = vmatprep.mubr.bf16.mxu1 %v11858_v3  ;;  %v11863_v3 = vld [vmem:[#allocation81_spill] sm:$0xff] }
 0x44b   :  { %v11298_v57 = vadd.f32 %v8647_v53, %v6609_v9  ;;  %v8536_v23 = vpop.f32.mrb[132].mxu0 }
 0x44c   :  { %v8648_v33 = vpop.f32.mrb[132].mxu1  ;;  %v8537_v29 = vpop.f32.mrb[133].mxu0 }
 0x44d   :  { %v8538_v2 = vadd.f32 %v8537_v29, %v8536_v23  ;;  %v8649_v15 = vpop.f32.mrb[133].mxu1  ;;  %v8539_v49 = vpop.f32.mrb[134].mxu0  ;;  %v11864_v29 = vld [vmem:[#allocation82_spill] sm:$0xff] }
 0x44e   :  { %v8650_v42 = vadd.f32 %v8649_v15, %v8648_v33  ;;  %v8651_v40 = vpop.f32.mrb[134].mxu1  ;;  %v8540_v59 = vpop.f32.mrb[135].mxu0  ;;  %v11866_v15 = vld [vmem:[#allocation89_spill] sm:$0xff] }
 0x44f   :  { %v6614_v63 = vadd.f32 %v8538_v2, %v11142_v62  ;;  %v8541_v18 = vadd.f32 %v8540_v59, %v8539_v49  ;;  %v8652_v14 = vpop.f32.mrb[135].mxu1  ;;  %v11865_v2 = vld [vmem:[#allocation88_spill] sm:$0xff] }
 0x450   :  { %v8653_v50 = vadd.f32 %v8652_v14, %v8651_v40  ;;  %7022 = vmatmul.mubr.bf16.gmra.mrb[240].mxu0 %v11859_v21 }
 0x451   :  { %v11302_v11 = vadd.f32 %v8650_v42, %v6614_v63  ;;  %v6617_v44 = vadd.f32 %v8541_v18, %v11148_v35  ;;  %7183 = vmatmul.mubr.bf16.gmra.mrb[240].mxu1 %v11860_v39  ;;  %7029 = vmatprep.mubr.bf16.mxu0 %v11861_v0 }
 0x452   :  { %7190 = vmatprep.mubr.bf16.mxu1 %v11862_v61  ;;  %v11867_v61 = vld [vmem:[#allocation83_spill] sm:$0xff] }
 0x453   :  { %v11308_v28 = vadd.f32 %v8653_v50, %v6617_v44  ;;  %v8542_v25 = vpop.f32.mrb[136].mxu0 }
 0x454   :  { %v8654_v36 = vpop.f32.mrb[136].mxu1  ;;  %v8543_v62 = vpop.f32.mrb[137].mxu0 }
 0x455   :  { %v8544_v37 = vadd.f32 %v8543_v62, %v8542_v25  ;;  %v8655_v56 = vpop.f32.mrb[137].mxu1  ;;  %v8545_v16 = vpop.f32.mrb[138].mxu0  ;;  %v11868_v62 = vld [vmem:[#allocation84_spill] sm:$0xff] }
 0x456   :  { %v8656_v24 = vadd.f32 %v8655_v56, %v8654_v36  ;;  %v8657_v53 = vpop.f32.mrb[138].mxu1  ;;  %v8546_v20 = vpop.f32.mrb[139].mxu0  ;;  %v11870_v56 = vld [vmem:[#allocation93_spill] sm:$0xff] }
 0x457   :  { %v6622_v9 = vadd.f32 %v8544_v37, %v11152_v48  ;;  %v8547_v35 = vadd.f32 %v8546_v20, %v8545_v16  ;;  %v8658_v32 = vpop.f32.mrb[139].mxu1  ;;  %v11869_v37 = vld [vmem:[#allocation92_spill] sm:$0xff] }
 0x458   :  { %v8659_v43 = vadd.f32 %v8658_v32, %v8657_v53  ;;  %7030 = vmatmul.mubr.bf16.gmra.mrb[244].mxu0 %v11863_v3 }
 0x459   :  { %v11312_v23 = vadd.f32 %v8656_v24, %v6622_v9  ;;  %v6625_v33 = vadd.f32 %v8547_v35, %v11158_v54  ;;  %7191 = vmatmul.mubr.bf16.gmra.mrb[244].mxu1 %v11864_v29  ;;  %7037 = vmatprep.mubr.bf16.mxu0 %v11865_v2 }
 0x45a   :  { %7198 = vmatprep.mubr.bf16.mxu1 %v11866_v15  ;;  %v11871_v15 = vld [vmem:[#allocation86_spill] sm:$0xff] }
 0x45b   :  { %v11318_v49 = vadd.f32 %v8659_v43, %v6625_v33  ;;  %v8548_v42 = vpop.f32.mrb[140].mxu0 }
 0x45c   :  { %v8660_v40 = vpop.f32.mrb[140].mxu1  ;;  %v8549_v48 = vpop.f32.mrb[141].mxu0 }
 0x45d   :  { %v8550_v59 = vadd.f32 %v8549_v48, %v8548_v42  ;;  %v8661_v63 = vpop.f32.mrb[141].mxu1  ;;  %v8551_v18 = vpop.f32.mrb[142].mxu0  ;;  %v11872_v48 = vld [vmem:[#allocation87_spill] sm:$0xff] }
 0x45e   :  { %v8662_v14 = vadd.f32 %v8661_v63, %v8660_v40  ;;  %v8663_v50 = vpop.f32.mrb[142].mxu1  ;;  %v8552_v21 = vpop.f32.mrb[143].mxu0 }
 0x45f   :  { %v6630_v44 = vadd.f32 %v8550_v59, %v11162_v7  ;;  %v8553_v54 = vadd.f32 %v8552_v21, %v8551_v18  ;;  %v8664_v39 = vpop.f32.mrb[143].mxu1 }
 0x460   :  { %v8665_v0 = vadd.f32 %v8664_v39, %v8663_v50  ;;  %7038 = vmatmul.mubr.bf16.gmra.mrb[248].mxu0 %v11867_v61 }
 0x461   :  { %v11322_v25 = vadd.f32 %v8662_v14, %v6630_v44  ;;  %v6633_v36 = vadd.f32 %v8553_v54, %v11168_v6  ;;  %7199 = vmatmul.mubr.bf16.gmra.mrb[248].mxu1 %v11868_v62  ;;  %7045 = vmatprep.mubr.bf16.mxu0 %v11869_v37 }
 0x462   :  { %7206 = vmatprep.mubr.bf16.mxu1 %v11870_v56 }
 0x463   :  { %v11328_v16 = vadd.f32 %v8665_v0, %v6633_v36  ;;  %v8554_v24 = vpop.f32.mrb[144].mxu0 }
 0x464   :  { %v8666_v53 = vpop.f32.mrb[144].mxu1  ;;  %v8555_v7 = vpop.f32.mrb[145].mxu0 }
 0x465   :  { %v8556_v20 = vadd.f32 %v8555_v7, %v8554_v24  ;;  %v8667_v9 = vpop.f32.mrb[145].mxu1  ;;  %v8557_v35 = vpop.f32.mrb[146].mxu0 }
 0x466   :  { %v8668_v32 = vadd.f32 %v8667_v9, %v8666_v53  ;;  %v8669_v43 = vpop.f32.mrb[146].mxu1  ;;  %v8558_v3 = vpop.f32.mrb[147].mxu0 }
 0x467   :  { %v6638_v33 = vadd.f32 %v8556_v20, %v11172_v8  ;;  %v8559_v6 = vadd.f32 %v8558_v3, %v8557_v35  ;;  %v8670_v29 = vpop.f32.mrb[147].mxu1 }
 0x468   :  { %v8671_v2 = vadd.f32 %v8670_v29, %v8669_v43  ;;  %7046 = vmatmul.mubr.bf16.gmra.mrb[252].mxu0 %v11871_v15 }
 0x469   :  { %v11332_v42 = vadd.f32 %v8668_v32, %v6638_v33  ;;  %v6641_v40 = vadd.f32 %v8559_v6, %v11178_v13  ;;  %7207 = vmatmul.mubr.bf16.gmra.mrb[252].mxu1 %v11872_v48 }
 0x46b   :  { %v11336_v59 = vadd.f32 %v8671_v2, %v6641_v40  ;;  %v8560_v63 = vpop.f32.mrb[148].mxu0 }
 0x46c   :  { %v8672_v18 = vpop.f32.mrb[148].mxu1  ;;  %v8561_v14 = vpop.f32.mrb[149].mxu0 }
 0x46d   :  { %v8562_v50 = vadd.f32 %v8561_v14, %v8560_v63  ;;  %v8673_v21 = vpop.f32.mrb[149].mxu1  ;;  %v8563_v44 = vpop.f32.mrb[150].mxu0 }
 0x46e   :  { %v8674_v8 = vadd.f32 %v8673_v21, %v8672_v18  ;;  %v8675_v54 = vpop.f32.mrb[150].mxu1  ;;  %v8564_v39 = vpop.f32.mrb[151].mxu0 }
 0x46f   :  { %v6646_v0 = vadd.f32 %v8562_v50, %v11182_v26  ;;  %v8565_v61 = vadd.f32 %v8564_v39, %v8563_v44  ;;  %v8676_v36 = vpop.f32.mrb[151].mxu1 }
 0x470   :  { %v8677_v62 = vadd.f32 %v8676_v36, %v8675_v54 }
 0x471   :  { %v11339_v37 = vadd.f32 %v8674_v8, %v6646_v0  ;;  %v6649_v13 = vadd.f32 %v8565_v61, %v11188_v12 }
 0x473   :  { %v11342_v56 = vadd.f32 %v8677_v62, %v6649_v13  ;;  %v8566_v24 = vpop.f32.mrb[152].mxu0 }
 0x474   :  { %v8678_v53 = vpop.f32.mrb[152].mxu1  ;;  %v8567_v7 = vpop.f32.mrb[153].mxu0 }
 0x475   :  { %v8568_v20 = vadd.f32 %v8567_v7, %v8566_v24  ;;  %v8679_v9 = vpop.f32.mrb[153].mxu1  ;;  %v8569_v35 = vpop.f32.mrb[154].mxu0 }
 0x476   :  { %v8680_v32 = vadd.f32 %v8679_v9, %v8678_v53  ;;  %v8681_v43 = vpop.f32.mrb[154].mxu1  ;;  %v8570_v3 = vpop.f32.mrb[155].mxu0 }
 0x477   :  { %v6654_v26 = vadd.f32 %v8568_v20, %v11192_v30  ;;  %v8571_v33 = vadd.f32 %v8570_v3, %v8569_v35  ;;  %v8682_v6 = vpop.f32.mrb[155].mxu1 }
 0x478   :  { %v8683_v29 = vadd.f32 %v8682_v6, %v8681_v43 }
 0x479   :  { %v11345_v2 = vadd.f32 %v8680_v32, %v6654_v26  ;;  %v6657_v12 = vadd.f32 %v8571_v33, %v11198_v52 }
 0x47b   :  { %v11348_v15 = vadd.f32 %v8683_v29, %v6657_v12  ;;  %v8572_v40 = vpop.f32.mrb[156].mxu0 }
 0x47c   :  { %v8684_v48 = vpop.f32.mrb[156].mxu1  ;;  %v8573_v63 = vpop.f32.mrb[157].mxu0 }
 0x47d   :  { %v8574_v18 = vadd.f32 %v8573_v63, %v8572_v40  ;;  %v8685_v14 = vpop.f32.mrb[157].mxu1  ;;  %v8575_v50 = vpop.f32.mrb[158].mxu0 }
 0x47e   :  { %v8686_v21 = vadd.f32 %v8685_v14, %v8684_v48  ;;  %v8687_v44 = vpop.f32.mrb[158].mxu1  ;;  %v8576_v8 = vpop.f32.mrb[159].mxu0 }
 0x47f   :  { %v6662_v30 = vadd.f32 %v8574_v18, %v11202_v38  ;;  %v8577_v54 = vadd.f32 %v8576_v8, %v8575_v50  ;;  %v8688_v39 = vpop.f32.mrb[159].mxu1 }
 0x480   :  { %v8689_v0 = vadd.f32 %v8688_v39, %v8687_v44 }
 0x481   :  { %v11351_v61 = vadd.f32 %v8686_v21, %v6662_v30  ;;  %v6665_v52 = vadd.f32 %v8577_v54, %v11208_v55 }
 0x483   :  { %v11354_v36 = vadd.f32 %v8689_v0, %v6665_v52  ;;  %v8578_v62 = vpop.f32.mrb[160].mxu0 }
 0x484   :  { %v8690_v13 = vpop.f32.mrb[160].mxu1  ;;  %v8579_v24 = vpop.f32.mrb[161].mxu0 }
 0x485   :  { %v8580_v53 = vadd.f32 %v8579_v24, %v8578_v62  ;;  %v8691_v7 = vpop.f32.mrb[161].mxu1  ;;  %v8581_v20 = vpop.f32.mrb[162].mxu0 }
 0x486   :  { %v8692_v9 = vadd.f32 %v8691_v7, %v8690_v13  ;;  %v8693_v35 = vpop.f32.mrb[162].mxu1  ;;  %v8582_v32 = vpop.f32.mrb[163].mxu0 }
 0x487   :  { %v6670_v38 = vadd.f32 %v8580_v53, %v11212_v46  ;;  %v8583_v43 = vadd.f32 %v8582_v32, %v8581_v20  ;;  %v8694_v3 = vpop.f32.mrb[163].mxu1 }
 0x488   :  { %v8695_v26 = vadd.f32 %v8694_v3, %v8693_v35 }
 0x489   :  { %v11357_v33 = vadd.f32 %v8692_v9, %v6670_v38  ;;  %v6673_v55 = vadd.f32 %v8583_v43, %v11218_v34 }
 0x48b   :  { %v11360_v6 = vadd.f32 %v8695_v26, %v6673_v55  ;;  %v8584_v29 = vpop.f32.mrb[164].mxu0 }
 0x48c   :  { %v8696_v12 = vpop.f32.mrb[164].mxu1  ;;  %v8585_v40 = vpop.f32.mrb[165].mxu0 }
 0x48d   :  { %v8586_v48 = vadd.f32 %v8585_v40, %v8584_v29  ;;  %v8697_v63 = vpop.f32.mrb[165].mxu1  ;;  %v8587_v18 = vpop.f32.mrb[166].mxu0 }
 0x48e   :  { %v8698_v14 = vadd.f32 %v8697_v63, %v8696_v12  ;;  %v8699_v50 = vpop.f32.mrb[166].mxu1  ;;  %v8588_v21 = vpop.f32.mrb[167].mxu0 }
 0x48f   :  { %v6678_v46 = vadd.f32 %v8586_v48, %v11222_v27  ;;  %v8589_v44 = vadd.f32 %v8588_v21, %v8587_v18  ;;  %v8700_v8 = vpop.f32.mrb[167].mxu1 }
 0x490   :  { %v8701_v30 = vadd.f32 %v8700_v8, %v8699_v50 }
 0x491   :  { %v11363_v54 = vadd.f32 %v8698_v14, %v6678_v46  ;;  %v6681_v34 = vadd.f32 %v8589_v44, %v11228_v4 }
 0x493   :  { %v11366_v39 = vadd.f32 %v8701_v30, %v6681_v34  ;;  %v8590_v0 = vpop.f32.mrb[168].mxu0 }
 0x494   :  { %v8702_v52 = vpop.f32.mrb[168].mxu1  ;;  %v8591_v62 = vpop.f32.mrb[169].mxu0 }
 0x495   :  { %v8592_v13 = vadd.f32 %v8591_v62, %v8590_v0  ;;  %v8703_v24 = vpop.f32.mrb[169].mxu1  ;;  %v8593_v53 = vpop.f32.mrb[170].mxu0 }
 0x496   :  { %v8704_v7 = vadd.f32 %v8703_v24, %v8702_v52  ;;  %v8705_v20 = vpop.f32.mrb[170].mxu1  ;;  %v8594_v9 = vpop.f32.mrb[171].mxu0 }
 0x497   :  { %v6686_v27 = vadd.f32 %v8592_v13, %v11232_v58  ;;  %v8595_v35 = vadd.f32 %v8594_v9, %v8593_v53  ;;  %v8706_v32 = vpop.f32.mrb[171].mxu1 }
 0x498   :  { %v8707_v38 = vadd.f32 %v8706_v32, %v8705_v20 }
 0x499   :  { %v11369_v43 = vadd.f32 %v8704_v7, %v6686_v27  ;;  %v6689_v4 = vadd.f32 %v8595_v35, %v11238_v51 }
 0x49b   :  { %v11372_v3 = vadd.f32 %v8707_v38, %v6689_v4  ;;  %v8596_v26 = vpop.f32.mrb[172].mxu0 }
 0x49c   :  { %v8708_v55 = vpop.f32.mrb[172].mxu1  ;;  %v8597_v29 = vpop.f32.mrb[173].mxu0 }
 0x49d   :  { %v8598_v12 = vadd.f32 %v8597_v29, %v8596_v26  ;;  %v8709_v40 = vpop.f32.mrb[173].mxu1  ;;  %v8599_v48 = vpop.f32.mrb[174].mxu0 }
 0x49e   :  { %v8710_v63 = vadd.f32 %v8709_v40, %v8708_v55  ;;  %v8711_v18 = vpop.f32.mrb[174].mxu1  ;;  %v8600_v14 = vpop.f32.mrb[175].mxu0 }
 0x49f   :  { %v6694_v58 = vadd.f32 %v8598_v12, %v11242_v17  ;;  %v8601_v50 = vadd.f32 %v8600_v14, %v8599_v48  ;;  %v8712_v21 = vpop.f32.mrb[175].mxu1 }
 0x4a0   :  { %v8713_v46 = vadd.f32 %v8712_v21, %v8711_v18 }
 0x4a1   :  { %v11375_v44 = vadd.f32 %v8710_v63, %v6694_v58  ;;  %v6697_v51 = vadd.f32 %v8601_v50, %v11248_v22 }
 0x4a3   :  { %v11378_v8 = vadd.f32 %v8713_v46, %v6697_v51  ;;  %v8602_v30 = vpop.f32.mrb[176].mxu0 }
 0x4a4   :  { %v8714_v34 = vpop.f32.mrb[176].mxu1  ;;  %v8603_v0 = vpop.f32.mrb[177].mxu0 }
 0x4a5   :  { %v8604_v52 = vadd.f32 %v8603_v0, %v8602_v30  ;;  %v8715_v62 = vpop.f32.mrb[177].mxu1  ;;  %v8605_v13 = vpop.f32.mrb[178].mxu0 }
 0x4a6   :  { %v8716_v24 = vadd.f32 %v8715_v62, %v8714_v34  ;;  %v8717_v53 = vpop.f32.mrb[178].mxu1  ;;  %v8606_v7 = vpop.f32.mrb[179].mxu0 }
 0x4a7   :  { %v6702_v17 = vadd.f32 %v8604_v52, %v11252_v1  ;;  %v8607_v20 = vadd.f32 %v8606_v7, %v8605_v13  ;;  %v8718_v9 = vpop.f32.mrb[179].mxu1 }
 0x4a8   :  { %v8719_v27 = vadd.f32 %v8718_v9, %v8717_v53 }
 0x4a9   :  { %v11381_v35 = vadd.f32 %v8716_v24, %v6702_v17  ;;  %v6705_v22 = vadd.f32 %v8607_v20, %v11258_v41 }
 0x4ab   :  { %v11384_v32 = vadd.f32 %v8719_v27, %v6705_v22  ;;  %v8608_v38 = vpop.f32.mrb[180].mxu0 }
 0x4ac   :  { %v8720_v4 = vpop.f32.mrb[180].mxu1  ;;  %v8609_v26 = vpop.f32.mrb[181].mxu0 }
 0x4ad   :  { %v8610_v55 = vadd.f32 %v8609_v26, %v8608_v38  ;;  %v8721_v29 = vpop.f32.mrb[181].mxu1  ;;  %v8611_v12 = vpop.f32.mrb[182].mxu0 }
 0x4ae   :  { %v8722_v40 = vadd.f32 %v8721_v29, %v8720_v4  ;;  %v8723_v48 = vpop.f32.mrb[182].mxu1  ;;  %v8612_v63 = vpop.f32.mrb[183].mxu0 }
 0x4af   :  { %v6710_v1 = vadd.f32 %v8610_v55, %v11262_v31  ;;  %v8613_v18 = vadd.f32 %v8612_v63, %v8611_v12  ;;  %v8724_v14 = vpop.f32.mrb[183].mxu1 }
 0x4b0   :  { %v8725_v58 = vadd.f32 %v8724_v14, %v8723_v48 }
 0x4b1   :  { %v11387_v50 = vadd.f32 %v8722_v40, %v6710_v1  ;;  %v6713_v41 = vadd.f32 %v8613_v18, %v11268_v10 }
 0x4b3   :  { %v11390_v21 = vadd.f32 %v8725_v58, %v6713_v41  ;;  %v8614_v46 = vpop.f32.mrb[184].mxu0 }
 0x4b4   :  { %v8726_v51 = vpop.f32.mrb[184].mxu1  ;;  %v8615_v30 = vpop.f32.mrb[185].mxu0 }
 0x4b5   :  { %v8616_v34 = vadd.f32 %v8615_v30, %v8614_v46  ;;  %v8727_v0 = vpop.f32.mrb[185].mxu1  ;;  %v8617_v52 = vpop.f32.mrb[186].mxu0 }
 0x4b6   :  { %v8728_v62 = vadd.f32 %v8727_v0, %v8726_v51  ;;  %v8729_v13 = vpop.f32.mrb[186].mxu1  ;;  %v8618_v24 = vpop.f32.mrb[187].mxu0 }
 0x4b7   :  { %v6718_v31 = vadd.f32 %v8616_v34, %v11272_v45  ;;  %v8619_v53 = vadd.f32 %v8618_v24, %v8617_v52  ;;  %v8730_v7 = vpop.f32.mrb[187].mxu1 }
 0x4b8   :  { %v8731_v17 = vadd.f32 %v8730_v7, %v8729_v13 }
 0x4b9   :  { %v11393_v20 = vadd.f32 %v8728_v62, %v6718_v31  ;;  %v6721_v10 = vadd.f32 %v8619_v53, %v11278_v47 }
 0x4bb   :  { %v11396_v9 = vadd.f32 %v8731_v17, %v6721_v10  ;;  %v8620_v27 = vpop.f32.mrb[188].mxu0 }
 0x4bc   :  { %v8732_v22 = vpop.f32.mrb[188].mxu1  ;;  %v8621_v38 = vpop.f32.mrb[189].mxu0 }
 0x4bd   :  { %v8622_v4 = vadd.f32 %v8621_v38, %v8620_v27  ;;  %v8733_v26 = vpop.f32.mrb[189].mxu1  ;;  %v8623_v55 = vpop.f32.mrb[190].mxu0 }
 0x4be   :  { %v8734_v29 = vadd.f32 %v8733_v26, %v8732_v22  ;;  %v8735_v12 = vpop.f32.mrb[190].mxu1  ;;  %v8624_v40 = vpop.f32.mrb[191].mxu0 }
 0x4bf   :  { %v6726_v45 = vadd.f32 %v8622_v4, %v11282_v60  ;;  %v8625_v48 = vadd.f32 %v8624_v40, %v8623_v55  ;;  %v8736_v63 = vpop.f32.mrb[191].mxu1 }
 0x4c0   :  { %v8737_v1 = vadd.f32 %v8736_v63, %v8735_v12 }
 0x4c1   :  { %v11399_v18 = vadd.f32 %v8734_v29, %v6726_v45  ;;  %v6729_v47 = vadd.f32 %v8625_v48, %v11288_v5 }
 0x4c3   :  { %v11402_v14 = vadd.f32 %v8737_v1, %v6729_v47  ;;  %v8754_v58 = vpop.f32.mrb[192].mxu0 }
 0x4c4   :  { %v8866_v41 = vpop.f32.mrb[192].mxu1  ;;  %v8755_v46 = vpop.f32.mrb[193].mxu0 }
 0x4c5   :  { %v8756_v51 = vadd.f32 %v8755_v46, %v8754_v58  ;;  %v8867_v30 = vpop.f32.mrb[193].mxu1  ;;  %v8757_v34 = vpop.f32.mrb[194].mxu0 }
 0x4c6   :  { %v8868_v0 = vadd.f32 %v8867_v30, %v8866_v41  ;;  %v8869_v52 = vpop.f32.mrb[194].mxu1  ;;  %v8758_v62 = vpop.f32.mrb[195].mxu0 }
 0x4c7   :  { %v6928_v60 = vadd.f32 %v8756_v51, %v11292_v19  ;;  %v8759_v13 = vadd.f32 %v8758_v62, %v8757_v34  ;;  %v8870_v24 = vpop.f32.mrb[195].mxu1 }
 0x4c8   :  { %v8871_v31 = vadd.f32 %v8870_v24, %v8869_v52 }
 0x4c9   :  { %v7089_v5 = vadd.f32 %v8868_v0, %v6928_v60  ;;  %v6931_v53 = vadd.f32 %v8759_v13, %v11298_v57 }
 0x4ca   :  { %9251 = shalt.err (!%p9248_p8)
}
 0x4cb   :  { %s9252_s21 = scalar_lea.hbm %s11468_s5, 32768 }
 0x4cc   :  { %p9253_p9 = scmp.ne.s32.totalorder %s11468_s5, %s9252_s21  ;;  %p9256_p10 = scmp.lt.u32.totalorder %s9252_s21, %s11468_s5 }
 0x4ce   :  { %p9258_p11 = pnand %p9256_p10, %p9253_p9 }
 0x4d0   :  { %9261 = shalt.err (!%p9258_p11)
}
 0x4d1   :  { %7270 = dma.vmem_to_hbm [thread:$0]  %s7265_s1, 32768, %s11468_s5, [#allocation12], %s9295_s28, %s9295_s28, %s9296_s29   ;;  %7215 = vst [vmem:[#allocation10] sm:$0xff] %v7089_v5  ;;  %v7092_v19 = vadd.f32 %v8871_v31, %v6931_v53  ;;  %v8760_v57 = vpop.f32.mrb[196].mxu0  ;;  %v8872_v7 = vpop.f32.mrb[196].mxu1 }
 0x4d2   :  { %v8761_v17 = vpop.f32.mrb[197].mxu0  ;;  %v8873_v27 = vpop.f32.mrb[197].mxu1  ;;  %s9303_s5 = smov [#allocation10]  }
 0x4d3   :  { %7216 = vst [vmem:[#allocation10 + $0x8] sm:$0xff] %v7092_v19  ;;  %v8762_v10 = vadd.f32 %v8761_v17, %v8760_v57  ;;  %v8763_v22 = vpop.f32.mrb[198].mxu0  ;;  %v8874_v38 = vadd.f32 %v8873_v27, %v8872_v7  ;;  %v8875_v4 = vpop.f32.mrb[198].mxu1  ;;  %s7252_s28 = sshll.u32 %s9303_s5, 4  ;;  %s7253_s28 = int_to_ptr.vmem [resolvable:$true] %s7252_s28 }
 0x4d4   :  { %v8764_v26 = vpop.f32.mrb[199].mxu0  ;;  %v8876_v12 = vpop.f32.mrb[199].mxu1  ;;  %s9262_s29 = scalar_lea.vmem %s7253_s28, 4096  ;;  %p9267_p13 = scmp.lt.s32.totalorder %s7253_s28, %s7253_s28 }
 0x4d5   :  { %v6936_v55 = vadd.f32 %v8762_v10, %v11302_v11  ;;  %v8765_v29 = vadd.f32 %v8764_v26, %v8763_v22  ;;  %v8877_v40 = vadd.f32 %v8876_v12, %v8875_v4  ;;  %v8766_v1 = vpop.f32.mrb[200].mxu0  ;;  %v8878_v47 = vpop.f32.mrb[200].mxu1  ;;  %p9263_p12 = scmp.ne.s32.totalorder %s7253_s28, %s9262_s29  ;;  %p9268_p0 = scmp.lt.s32.totalorder %s9262_s29, %s9262_s29 }
 0x4d6   :  { %v8767_v58 = vpop.f32.mrb[201].mxu0  ;;  %v8879_v46 = vpop.f32.mrb[201].mxu1 }
 0x4d7   :  { %v7097_v45 = vadd.f32 %v8874_v38, %v6936_v55  ;;  %v6939_v48 = vadd.f32 %v8765_v29, %v11308_v28  ;;  %v8768_v41 = vadd.f32 %v8767_v58, %v8766_v1  ;;  %v8769_v51 = vpop.f32.mrb[202].mxu0  ;;  %v8880_v30 = vadd.f32 %v8879_v46, %v8878_v47  ;;  %v8881_v34 = vpop.f32.mrb[202].mxu1  ;;  %p9269_p1 = por %p9268_p0, %p9267_p13 }
 0x4d8   :  { %v8770_v0 = vpop.f32.mrb[203].mxu0  ;;  %v8882_v62 = vpop.f32.mrb[203].mxu1 }
 0x4d9   :  { %7217 = vst [vmem:[#allocation10 + $0x10] sm:$0xff] %v7097_v45  ;;  %v7100_v63 = vadd.f32 %v8877_v40, %v6939_v48  ;;  %v6944_v11 = vadd.f32 %v8768_v41, %v11312_v23  ;;  %v8771_v52 = vadd.f32 %v8770_v0, %v8769_v51  ;;  %v8883_v60 = vadd.f32 %v8882_v62, %v8881_v34  ;;  %p9270_p2 = pnand %p9269_p1, %p9263_p12 }
 0x4db   :  { %7218 = vst [vmem:[#allocation10 + $0x18] sm:$0xff] %v7100_v63  ;;  %v7105_v13 = vadd.f32 %v8880_v30, %v6944_v11  ;;  %v6947_v28 = vadd.f32 %v8771_v52, %v11318_v49  ;;  %v8772_v31 = vpop.f32.mrb[204].mxu0 }
 0x4dc   :  { %v8884_v5 = vpop.f32.mrb[204].mxu1  ;;  %v8773_v53 = vpop.f32.mrb[205].mxu0 }
 0x4dd   :  { %7219 = vst [vmem:[#allocation10 + $0x20] sm:$0xff] %v7105_v13  ;;  %v7108_v24 = vadd.f32 %v8883_v60, %v6947_v28  ;;  %v8774_v19 = vadd.f32 %v8773_v53, %v8772_v31  ;;  %v8885_v57 = vpop.f32.mrb[205].mxu1  ;;  %v8775_v7 = vpop.f32.mrb[206].mxu0 }
 0x4de   :  { %v8886_v17 = vadd.f32 %v8885_v57, %v8884_v5  ;;  %v8887_v10 = vpop.f32.mrb[206].mxu1  ;;  %v8776_v27 = vpop.f32.mrb[207].mxu0 }
 0x4df   :  { %7220 = vst [vmem:[#allocation10 + $0x28] sm:$0xff] %v7108_v24  ;;  %v6952_v23 = vadd.f32 %v8774_v19, %v11322_v25  ;;  %v8777_v22 = vadd.f32 %v8776_v27, %v8775_v7  ;;  %v8888_v38 = vpop.f32.mrb[207].mxu1 }
 0x4e0   :  { %v8889_v4 = vadd.f32 %v8888_v38, %v8887_v10 }
 0x4e1   :  { %v7113_v26 = vadd.f32 %v8886_v17, %v6952_v23  ;;  %v6955_v49 = vadd.f32 %v8777_v22, %v11328_v16 }
 0x4e3   :  { %7221 = vst [vmem:[#allocation10 + $0x30] sm:$0xff] %v7113_v26  ;;  %v7116_v55 = vadd.f32 %v8889_v4, %v6955_v49  ;;  %v8778_v29 = vpop.f32.mrb[208].mxu0 }
 0x4e4   :  { %v8890_v12 = vpop.f32.mrb[208].mxu1  ;;  %v8779_v40 = vpop.f32.mrb[209].mxu0 }
 0x4e5   :  { %7222 = vst [vmem:[#allocation10 + $0x38] sm:$0xff] %v7116_v55  ;;  %v8780_v45 = vadd.f32 %v8779_v40, %v8778_v29  ;;  %v8891_v48 = vpop.f32.mrb[209].mxu1  ;;  %v8781_v63 = vpop.f32.mrb[210].mxu0 }
 0x4e6   :  { %v8892_v1 = vadd.f32 %v8891_v48, %v8890_v12  ;;  %v8893_v47 = vpop.f32.mrb[210].mxu1  ;;  %v8782_v58 = vpop.f32.mrb[211].mxu0 }
 0x4e7   :  { %v6960_v25 = vadd.f32 %v8780_v45, %v11332_v42  ;;  %v8783_v41 = vadd.f32 %v8782_v58, %v8781_v63  ;;  %v8894_v46 = vpop.f32.mrb[211].mxu1 }
 0x4e8   :  { %v8895_v51 = vadd.f32 %v8894_v46, %v8893_v47 }
 0x4e9   :  { %v7121_v30 = vadd.f32 %v8892_v1, %v6960_v25  ;;  %v6963_v16 = vadd.f32 %v8783_v41, %v11336_v59 }
 0x4eb   :  { %7223 = vst [vmem:[#allocation10 + $0x40] sm:$0xff] %v7121_v30  ;;  %v7124_v34 = vadd.f32 %v8895_v51, %v6963_v16  ;;  %v8784_v0 = vpop.f32.mrb[212].mxu0 }
 0x4ec   :  { %v8896_v11 = vpop.f32.mrb[212].mxu1  ;;  %v8785_v52 = vpop.f32.mrb[213].mxu0 }
 0x4ed   :  { %7224 = vst [vmem:[#allocation10 + $0x48] sm:$0xff] %v7124_v34  ;;  %v8786_v62 = vadd.f32 %v8785_v52, %v8784_v0  ;;  %v8897_v60 = vpop.f32.mrb[213].mxu1  ;;  %v8787_v13 = vpop.f32.mrb[214].mxu0 }
 0x4ee   :  { %v8898_v28 = vadd.f32 %v8897_v60, %v8896_v11  ;;  %v8899_v24 = vpop.f32.mrb[214].mxu1  ;;  %v8788_v31 = vpop.f32.mrb[215].mxu0 }
 0x4ef   :  { %v6968_v42 = vadd.f32 %v8786_v62, %v11339_v37  ;;  %v8789_v5 = vadd.f32 %v8788_v31, %v8787_v13  ;;  %v8900_v53 = vpop.f32.mrb[215].mxu1 }
 0x4f0   :  { %v8901_v19 = vadd.f32 %v8900_v53, %v8899_v24 }
 0x4f1   :  { %v7129_v57 = vadd.f32 %v8898_v28, %v6968_v42  ;;  %v6971_v59 = vadd.f32 %v8789_v5, %v11342_v56 }
 0x4f3   :  { %7225 = vst [vmem:[#allocation10 + $0x50] sm:$0xff] %v7129_v57  ;;  %v7132_v7 = vadd.f32 %v8901_v19, %v6971_v59  ;;  %v8790_v17 = vpop.f32.mrb[216].mxu0 }
 0x4f4   :  { %v8902_v10 = vpop.f32.mrb[216].mxu1  ;;  %v8791_v27 = vpop.f32.mrb[217].mxu0 }
 0x4f5   :  { %7226 = vst [vmem:[#allocation10 + $0x58] sm:$0xff] %v7132_v7  ;;  %v8792_v23 = vadd.f32 %v8791_v27, %v8790_v17  ;;  %v8903_v22 = vpop.f32.mrb[217].mxu1  ;;  %v8793_v38 = vpop.f32.mrb[218].mxu0 }
 0x4f6   :  { %v8904_v4 = vadd.f32 %v8903_v22, %v8902_v10  ;;  %v8905_v26 = vpop.f32.mrb[218].mxu1  ;;  %v8794_v49 = vpop.f32.mrb[219].mxu0 }
 0x4f7   :  { %v6976_v37 = vadd.f32 %v8792_v23, %v11345_v2  ;;  %v8795_v55 = vadd.f32 %v8794_v49, %v8793_v38  ;;  %v8906_v29 = vpop.f32.mrb[219].mxu1 }
 0x4f8   :  { %v8907_v12 = vadd.f32 %v8906_v29, %v8905_v26 }
 0x4f9   :  { %v7137_v40 = vadd.f32 %v8904_v4, %v6976_v37  ;;  %v6979_v56 = vadd.f32 %v8795_v55, %v11348_v15 }
 0x4fb   :  { %7227 = vst [vmem:[#allocation10 + $0x60] sm:$0xff] %v7137_v40  ;;  %v7140_v45 = vadd.f32 %v8907_v12, %v6979_v56  ;;  %v8796_v48 = vpop.f32.mrb[220].mxu0 }
 0x4fc   :  { %v8908_v63 = vpop.f32.mrb[220].mxu1  ;;  %v8797_v1 = vpop.f32.mrb[221].mxu0 }
 0x4fd   :  { %7228 = vst [vmem:[#allocation10 + $0x68] sm:$0xff] %v7140_v45  ;;  %v8798_v47 = vadd.f32 %v8797_v1, %v8796_v48  ;;  %v8909_v58 = vpop.f32.mrb[221].mxu1  ;;  %v8799_v25 = vpop.f32.mrb[222].mxu0 }
 0x4fe   :  { %v8910_v41 = vadd.f32 %v8909_v58, %v8908_v63  ;;  %v8911_v46 = vpop.f32.mrb[222].mxu1  ;;  %v8800_v51 = vpop.f32.mrb[223].mxu0 }
 0x4ff   :  { %v6984_v2 = vadd.f32 %v8798_v47, %v11351_v61  ;;  %v8801_v30 = vadd.f32 %v8800_v51, %v8799_v25  ;;  %v8912_v16 = vpop.f32.mrb[223].mxu1 }
 0x500   :  { %v8913_v34 = vadd.f32 %v8912_v16, %v8911_v46 }
 0x501   :  { %v7145_v0 = vadd.f32 %v8910_v41, %v6984_v2  ;;  %v6987_v15 = vadd.f32 %v8801_v30, %v11354_v36 }
 0x503   :  { %7229 = vst [vmem:[#allocation10 + $0x70] sm:$0xff] %v7145_v0  ;;  %v7148_v11 = vadd.f32 %v8913_v34, %v6987_v15  ;;  %v8802_v52 = vpop.f32.mrb[224].mxu0 }
 0x504   :  { %v8914_v62 = vpop.f32.mrb[224].mxu1  ;;  %v8803_v60 = vpop.f32.mrb[225].mxu0 }
 0x505   :  { %7230 = vst [vmem:[#allocation10 + $0x78] sm:$0xff] %v7148_v11  ;;  %v8804_v13 = vadd.f32 %v8803_v60, %v8802_v52  ;;  %v8915_v28 = vpop.f32.mrb[225].mxu1  ;;  %v8805_v24 = vpop.f32.mrb[226].mxu0 }
 0x506   :  { %v8916_v31 = vadd.f32 %v8915_v28, %v8914_v62  ;;  %v8917_v42 = vpop.f32.mrb[226].mxu1  ;;  %v8806_v5 = vpop.f32.mrb[227].mxu0 }
 0x507   :  { %v6992_v61 = vadd.f32 %v8804_v13, %v11357_v33  ;;  %v8807_v53 = vadd.f32 %v8806_v5, %v8805_v24  ;;  %v8918_v19 = vpop.f32.mrb[227].mxu1 }
 0x508   :  { %v8919_v57 = vadd.f32 %v8918_v19, %v8917_v42 }
 0x509   :  { %v7153_v59 = vadd.f32 %v8916_v31, %v6992_v61  ;;  %v6995_v36 = vadd.f32 %v8807_v53, %v11360_v6 }
 0x50b   :  { %7231 = vst [vmem:[#allocation10 + $0x80] sm:$0xff] %v7153_v59  ;;  %v7156_v7 = vadd.f32 %v8919_v57, %v6995_v36  ;;  %v8808_v17 = vpop.f32.mrb[228].mxu0 }
 0x50c   :  { %v8920_v10 = vpop.f32.mrb[228].mxu1  ;;  %v8809_v27 = vpop.f32.mrb[229].mxu0 }
 0x50d   :  { %7232 = vst [vmem:[#allocation10 + $0x88] sm:$0xff] %v7156_v7  ;;  %v8810_v23 = vadd.f32 %v8809_v27, %v8808_v17  ;;  %v8921_v22 = vpop.f32.mrb[229].mxu1  ;;  %v8811_v38 = vpop.f32.mrb[230].mxu0 }
 0x50e   :  { %v8922_v4 = vadd.f32 %v8921_v22, %v8920_v10  ;;  %v8923_v26 = vpop.f32.mrb[230].mxu1  ;;  %v8812_v49 = vpop.f32.mrb[231].mxu0 }
 0x50f   :  { %v7000_v33 = vadd.f32 %v8810_v23, %v11363_v54  ;;  %v8813_v37 = vadd.f32 %v8812_v49, %v8811_v38  ;;  %v8924_v55 = vpop.f32.mrb[231].mxu1 }
 0x510   :  { %v8925_v29 = vadd.f32 %v8924_v55, %v8923_v26 }
 0x511   :  { %v7161_v12 = vadd.f32 %v8922_v4, %v7000_v33  ;;  %v7003_v6 = vadd.f32 %v8813_v37, %v11366_v39 }
 0x513   :  { %7233 = vst [vmem:[#allocation10 + $0x90] sm:$0xff] %v7161_v12  ;;  %v7164_v40 = vadd.f32 %v8925_v29, %v7003_v6  ;;  %v8814_v56 = vpop.f32.mrb[232].mxu0 }
 0x514   :  { %v8926_v45 = vpop.f32.mrb[232].mxu1  ;;  %v8815_v48 = vpop.f32.mrb[233].mxu0 }
 0x515   :  { %7234 = vst [vmem:[#allocation10 + $0x98] sm:$0xff] %v7164_v40  ;;  %v8816_v63 = vadd.f32 %v8815_v48, %v8814_v56  ;;  %v8927_v1 = vpop.f32.mrb[233].mxu1  ;;  %v8817_v47 = vpop.f32.mrb[234].mxu0 }
 0x516   :  { %v8928_v58 = vadd.f32 %v8927_v1, %v8926_v45  ;;  %v8929_v25 = vpop.f32.mrb[234].mxu1  ;;  %v8818_v41 = vpop.f32.mrb[235].mxu0 }
 0x517   :  { %v7008_v54 = vadd.f32 %v8816_v63, %v11369_v43  ;;  %v8819_v46 = vadd.f32 %v8818_v41, %v8817_v47  ;;  %v8930_v51 = vpop.f32.mrb[235].mxu1 }
 0x518   :  { %v8931_v2 = vadd.f32 %v8930_v51, %v8929_v25 }
 0x519   :  { %v7169_v30 = vadd.f32 %v8928_v58, %v7008_v54  ;;  %v7011_v39 = vadd.f32 %v8819_v46, %v11372_v3 }
 0x51b   :  { %7235 = vst [vmem:[#allocation10 + $0xa0] sm:$0xff] %v7169_v30  ;;  %v7172_v16 = vadd.f32 %v8931_v2, %v7011_v39  ;;  %v8820_v34 = vpop.f32.mrb[236].mxu0 }
 0x51c   :  { %v8932_v0 = vpop.f32.mrb[236].mxu1  ;;  %v8821_v15 = vpop.f32.mrb[237].mxu0 }
 0x51d   :  { %7236 = vst [vmem:[#allocation10 + $0xa8] sm:$0xff] %v7172_v16  ;;  %v8822_v11 = vadd.f32 %v8821_v15, %v8820_v34  ;;  %v8933_v52 = vpop.f32.mrb[237].mxu1  ;;  %v8823_v62 = vpop.f32.mrb[238].mxu0 }
 0x51e   :  { %v8934_v60 = vadd.f32 %v8933_v52, %v8932_v0  ;;  %v8935_v13 = vpop.f32.mrb[238].mxu1  ;;  %v8824_v28 = vpop.f32.mrb[239].mxu0 }
 0x51f   :  { %v7016_v43 = vadd.f32 %v8822_v11, %v11375_v44  ;;  %v8825_v24 = vadd.f32 %v8824_v28, %v8823_v62  ;;  %v8936_v31 = vpop.f32.mrb[239].mxu1 }
 0x520   :  { %v8937_v42 = vadd.f32 %v8936_v31, %v8935_v13 }
 0x521   :  { %v7177_v5 = vadd.f32 %v8934_v60, %v7016_v43  ;;  %v7019_v3 = vadd.f32 %v8825_v24, %v11378_v8 }
 0x523   :  { %7237 = vst [vmem:[#allocation10 + $0xb0] sm:$0xff] %v7177_v5  ;;  %v7180_v61 = vadd.f32 %v8937_v42, %v7019_v3  ;;  %v8826_v53 = vpop.f32.mrb[240].mxu0 }
 0x524   :  { %v8938_v19 = vpop.f32.mrb[240].mxu1  ;;  %v8827_v57 = vpop.f32.mrb[241].mxu0 }
 0x525   :  { %7238 = vst [vmem:[#allocation10 + $0xb8] sm:$0xff] %v7180_v61  ;;  %v8828_v59 = vadd.f32 %v8827_v57, %v8826_v53  ;;  %v8939_v36 = vpop.f32.mrb[241].mxu1  ;;  %v8829_v7 = vpop.f32.mrb[242].mxu0 }
 0x526   :  { %v8940_v17 = vadd.f32 %v8939_v36, %v8938_v19  ;;  %v8941_v10 = vpop.f32.mrb[242].mxu1  ;;  %v8830_v27 = vpop.f32.mrb[243].mxu0 }
 0x527   :  { %v7024_v44 = vadd.f32 %v8828_v59, %v11381_v35  ;;  %v8831_v23 = vadd.f32 %v8830_v27, %v8829_v7  ;;  %v8942_v22 = vpop.f32.mrb[243].mxu1 }
 0x528   :  { %v8943_v38 = vadd.f32 %v8942_v22, %v8941_v10 }
 0x529   :  { %v7185_v4 = vadd.f32 %v8940_v17, %v7024_v44  ;;  %v7027_v8 = vadd.f32 %v8831_v23, %v11384_v32 }
 0x52b   :  { %7239 = vst [vmem:[#allocation10 + $0xc0] sm:$0xff] %v7185_v4  ;;  %v7188_v26 = vadd.f32 %v8943_v38, %v7027_v8  ;;  %v8832_v49 = vpop.f32.mrb[244].mxu0 }
 0x52c   :  { %v8944_v33 = vpop.f32.mrb[244].mxu1  ;;  %v8833_v37 = vpop.f32.mrb[245].mxu0 }
 0x52d   :  { %7240 = vst [vmem:[#allocation10 + $0xc8] sm:$0xff] %v7188_v26  ;;  %v8834_v55 = vadd.f32 %v8833_v37, %v8832_v49  ;;  %v8945_v29 = vpop.f32.mrb[245].mxu1  ;;  %v8835_v12 = vpop.f32.mrb[246].mxu0 }
 0x52e   :  { %v8946_v6 = vadd.f32 %v8945_v29, %v8944_v33  ;;  %v8947_v40 = vpop.f32.mrb[246].mxu1  ;;  %v8836_v56 = vpop.f32.mrb[247].mxu0 }
 0x52f   :  { %v7032_v35 = vadd.f32 %v8834_v55, %v11387_v50  ;;  %v8837_v45 = vadd.f32 %v8836_v56, %v8835_v12  ;;  %v8948_v48 = vpop.f32.mrb[247].mxu1 }
 0x530   :  { %v8949_v63 = vadd.f32 %v8948_v48, %v8947_v40 }
 0x531   :  { %v7193_v1 = vadd.f32 %v8946_v6, %v7032_v35  ;;  %v7035_v32 = vadd.f32 %v8837_v45, %v11390_v21 }
 0x533   :  { %7241 = vst [vmem:[#allocation10 + $0xd0] sm:$0xff] %v7193_v1  ;;  %v7196_v47 = vadd.f32 %v8949_v63, %v7035_v32  ;;  %v8838_v58 = vpop.f32.mrb[248].mxu0 }
 0x534   :  { %v8950_v25 = vpop.f32.mrb[248].mxu1  ;;  %v8839_v41 = vpop.f32.mrb[249].mxu0 }
 0x535   :  { %7242 = vst [vmem:[#allocation10 + $0xd8] sm:$0xff] %v7196_v47  ;;  %v8840_v54 = vadd.f32 %v8839_v41, %v8838_v58  ;;  %v8951_v46 = vpop.f32.mrb[249].mxu1  ;;  %v8841_v51 = vpop.f32.mrb[250].mxu0 }
 0x536   :  { %v8952_v2 = vadd.f32 %v8951_v46, %v8950_v25  ;;  %v8953_v30 = vpop.f32.mrb[250].mxu1  ;;  %v8842_v39 = vpop.f32.mrb[251].mxu0 }
 0x537   :  { %v7040_v50 = vadd.f32 %v8840_v54, %v11393_v20  ;;  %v8843_v16 = vadd.f32 %v8842_v39, %v8841_v51  ;;  %v8954_v34 = vpop.f32.mrb[251].mxu1 }
 0x538   :  { %v8955_v0 = vadd.f32 %v8954_v34, %v8953_v30 }
 0x539   :  { %v7201_v15 = vadd.f32 %v8952_v2, %v7040_v50  ;;  %v7043_v21 = vadd.f32 %v8843_v16, %v11396_v9 }
 0x53b   :  { %7243 = vst [vmem:[#allocation10 + $0xe0] sm:$0xff] %v7201_v15  ;;  %v7204_v11 = vadd.f32 %v8955_v0, %v7043_v21  ;;  %v8844_v52 = vpop.f32.mrb[252].mxu0 }
 0x53c   :  { %v8956_v62 = vpop.f32.mrb[252].mxu1  ;;  %v8845_v60 = vpop.f32.mrb[253].mxu0 }
 0x53d   :  { %7244 = vst [vmem:[#allocation10 + $0xe8] sm:$0xff] %v7204_v11  ;;  %v8846_v13 = vadd.f32 %v8845_v60, %v8844_v52  ;;  %v8957_v28 = vpop.f32.mrb[253].mxu1  ;;  %v8847_v43 = vpop.f32.mrb[254].mxu0 }
 0x53e   :  { %v8958_v24 = vadd.f32 %v8957_v28, %v8956_v62  ;;  %v8959_v31 = vpop.f32.mrb[254].mxu1  ;;  %v8848_v42 = vpop.f32.mrb[255].mxu0 }
 0x53f   :  { %v7048_v20 = vadd.f32 %v8846_v13, %v11399_v18  ;;  %v8849_v5 = vadd.f32 %v8848_v42, %v8847_v43  ;;  %v8960_v3 = vpop.f32.mrb[255].mxu1 }
 0x540   :  { %v8961_v61 = vadd.f32 %v8960_v3, %v8959_v31 }
 0x541   :  { %v7209_v9 = vadd.f32 %v8958_v24, %v7048_v20  ;;  %v7051_v53 = vadd.f32 %v8849_v5, %v11402_v14 }
 0x543   :  { %7245 = vst [vmem:[#allocation10 + $0xf0] sm:$0xff] %v7209_v9  ;;  %v7212_v19 = vadd.f32 %v8961_v61, %v7051_v53 }
 0x545   :  { %7246 = vst [vmem:[#allocation10 + $0xf8] sm:$0xff] %v7212_v19 }
 0x546   :  { %9273 = shalt.err (!%p9270_p2)
}
 0x547   :  { %s9274_s0 = scalar_lea.hbm %s11467_s4, 4096 }
 0x548   :  { %p9275_p3 = scmp.ne.s32.totalorder %s11467_s4, %s9274_s0  ;;  %p9278_p4 = scmp.lt.u32.totalorder %s9274_s0, %s11467_s4 }
 0x54a   :  { %p9280_p5 = pnand %p9278_p4, %p9275_p3 }
 0x54c   :  { %9283 = shalt.err (!%p9280_p5)
}
 0x54d   :  { %s9304_s11 = smov 128   ;;  %s9305_s12 = smov 8  }
 0x54e   :  { %7258 = dma.vmem_to_hbm [thread:$0]  %s7253_s28, 4096, %s11467_s4, [#allocation4], %s9304_s11, %s9304_s11, %s9305_s12  }
 0x54f   :  { %9290 = dma.done.wait [#allocation4], 4096  }
 0x550   :  { %9291 = vsyncadd [#allocation4], 4294963200 }
 0x551   :  { %9292 = dma.done.wait [#allocation12], 32768  }
 0x552   :  { %9293 = vsyncadd [#allocation12], 4294934528 }
 0x553   :  { %7277 = vsyncpa [#allocation3], 1 }
 0x554   :  { %7278 = vsyncpa [#allocation6], 1 }
 0x555   :  { %7279 = vsyncpa [#allocation9], 1 }
 0x556   :  { %7280 = vsyncpa [#allocation4], 1 }
 0x557   :  { %7281 = vsyncpa [#allocation12], 1 }

</bundles_post_ra>
